<compile_context>
chip_gen: v7x
topology: tpu7x:2x2x1
jax: 0.10.0
libtpu: 0.0.40
codegen_flags: <defaults>
</compile_context>

<pallas_src>
import numpy as np
import jax
import jax.numpy as jnp
from jax.experimental import pallas as pl
from jax.experimental.pallas import tpu as pltpu


# ----------------------------------------------------------------------------
# Constant matrices (numpy, built once; exact in bf16: entries are 1, 1/2, 1/4)
# ----------------------------------------------------------------------------
def _avgpool2x2_matrix(batch, h, w):
    """Conv-output (padded-flat) columns -> next stage 'wide' layout columns.

    Input col:  b*(h+2)*(w+2) + hp*(w+2) + wp
    Output col: margin + b*(h/2+2)*(w/2+2) + (oh+1)*(w/2+2) + (ow+1)
    Margins / borders of the output are all-zero columns, which is exactly the
    zero padding the next 3x3 conv needs.
    """
    hp, wp = h + 2, w + 2
    ho, wo = h // 2, w // 2
    hpo, wpo = ho + 2, wo + 2
    m_out = wpo + 1
    p = np.zeros((batch * hp * wp, batch * hpo * wpo + 2 * m_out), np.float32)
    for b in range(batch):
        for oh in range(ho):
            for ow in range(wo):
                q = m_out + b * hpo * wpo + (oh + 1) * wpo + (ow + 1)
                for ih in range(2):
                    for iw in range(2):
                        j = b * hp * wp + (2 * oh + ih + 1) * wp + (2 * ow + iw + 1)
                        p[j, q] = 0.25
    return p


def _adaptive_pool_matrix(batch, hin, win, hout, wout):
    """Current stage 'wide' layout -> dense (b*hout*wout) columns (torch
    AdaptiveAvgPool2d semantics)."""
    hp, wp = hin + 2, win + 2
    m_in = wp + 1
    p = np.zeros((batch * hp * wp + 2 * m_in, batch * hout * wout), np.float32)
    for b in range(batch):
        for oh in range(hout):
            h0 = (oh * hin) // hout
            h1 = -(-((oh + 1) * hin) // hout)
            for ow in range(wout):
                w0 = (ow * win) // wout
                w1 = -(-((ow + 1) * win) // wout)
                val = 1.0 / ((h1 - h0) * (w1 - w0))
                q = b * hout * wout + oh * wout + ow
                for hh in range(h0, h1):
                    for ww in range(w0, w1):
                        j = m_in + b * hp * wp + (hh + 1) * wp + (ww + 1)
                        p[j, q] = val
    return p


def _fc_center_selector(batch):
    """Pick the centre column (padded coords (2,2) of the 3x3 image) per batch."""
    hp = wp = 5
    s = np.zeros((batch * hp * wp, batch), np.float32)
    for b in range(batch):
        s[b * hp * wp + 2 * wp + 2, b] = 1.0
    return s


# ----------------------------------------------------------------------------
# The single fused Pallas kernel
# ----------------------------------------------------------------------------
def _cnn_fused_kernel(
    x_ref,
    w1_ref, s1_ref, t1_ref, p1_ref,
    w2_ref, s2_ref, t2_ref, p2_ref,
    w3_ref, s3_ref, t3_ref, p3_ref,
    wc0_ref, bc0_ref, pc0_ref,
    wc1_ref, bc1_ref, pc1_ref,
    wfc_ref, bfc_ref, sel_ref,
    out0_ref, out1_ref, logit_ref,
):
    f32 = jnp.float32
    bf16 = jnp.bfloat16

    def conv3x3(act_wide_f32, w_ref, wp):
        """3x3 conv (padding=1) as 9 accumulating shifted matmuls.

        act_wide_f32: (Cin, L + 2*(wp+1)) with zero margins/borders.
        w_ref:        (9, Cout, Cin) bf16, tap index ky*3+kx.
        Returns (Cout, L) f32; column j = padded-flat spatial index j.  Border
        columns hold garbage that no consumer ever reads.
        """
        margin = wp + 1
        xw = act_wide_f32.astype(bf16)
        length = xw.shape[1] - 2 * margin
        acc = None
        for ky in range(3):
            for kx in range(3):
                start = margin + (ky - 1) * wp + (kx - 1)
                xs = xw[:, start:start + length]
                part = jnp.dot(w_ref[ky * 3 + kx], xs, preferred_element_type=f32)
                acc = part if acc is None else acc + part
        return acc

    def bn_relu(acc, s_ref, t_ref):
        # folded BatchNorm (eval) + conv bias, then ReLU; all f32 epilogue.
        return jnp.maximum(acc * s_ref[...] + t_ref[...], 0.0)

    def mm(a_f32, b_ref):
        return jnp.dot(a_f32.astype(bf16), b_ref[...], preferred_element_type=f32)

    # ---- cnn1: conv3x3 + BN + ReLU + AvgPool(2,2) -> stage-2 wide layout ----
    a1 = bn_relu(conv3x3(x_ref[...], w1_ref, 26), s1_ref, t1_ref)      # (28, B*676)
    act2 = mm(a1, p1_ref)                                              # (28, wide2)

    # ---- classifier0: 1x1 conv + ReLU + AdaptiveAvgPool 12 -> 28 ----
    c0 = jnp.maximum(
        jnp.dot(wc0_ref[...], act2.astype(bf16), preferred_element_type=f32)
        + bc0_ref[...], 0.0)                                           # (16, wide2)
    out0_ref[...] = mm(c0, pc0_ref)                                    # (16, B*784)

    # ---- cnn2 / cnn3 blocks ----
    a2 = bn_relu(conv3x3(act2, w2_ref, 14), s2_ref, t2_ref)            # (56, B*196)
    act3 = mm(a2, p2_ref)                                              # (56, wide3)
    a3 = bn_relu(conv3x3(act3, w3_ref, 8), s3_ref, t3_ref)             # (136, B*64)
    act4 = mm(a3, p3_ref)                                              # (136, wide4)

    # ---- classifier1: 1x1 conv + ReLU + AdaptiveAvgPool 3 -> 16 ----
    c1 = jnp.maximum(
        jnp.dot(wc1_ref[...], act4.astype(bf16), preferred_element_type=f32)
        + bc1_ref[...], 0.0)                                           # (16, wide4)
    out1_ref[...] = mm(c1, pc1_ref)                                    # (16, B*256)

    # ---- fc: Linear(136*3*3, 10) == valid 3x3 conv evaluated at image centre ----
    fc_acc = conv3x3(act4, wfc_ref, 5)                                 # (10, B*25)
    logit_ref[...] = mm(fc_acc, sel_ref) + bfc_ref[...]                # (10, B)


# ----------------------------------------------------------------------------
# Wrapper: parameter prep, constant matrices, pallas_call, output layout fix-up
# ----------------------------------------------------------------------------
def _fold_bn(conv_b, gamma, beta, mean, var, eps=1e-5):
    s = gamma / jnp.sqrt(var + eps)
    return s, (conv_b - mean) * s + beta


def _conv_w9(w):
    """torch (Cout, Cin, 3, 3) -> (9, Cout, Cin), tap index ky*3+kx."""
    cout, cin = w.shape[0], w.shape[1]
    return jnp.transpose(w, (2, 3, 0, 1)).reshape(9, cout, cin)


def make_cnn_forward(batch):
    bf16 = jnp.bfloat16
    # Constant pooling / gather matrices (exact in bf16: entries are 2^-k).
    p1 = jnp.asarray(_avgpool2x2_matrix(batch, 24, 24), bf16)      # (B*676, wide2)
    p2 = jnp.asarray(_avgpool2x2_matrix(batch, 12, 12), bf16)      # (B*196, wide3)
    p3 = jnp.asarray(_avgpool2x2_matrix(batch, 6, 6), bf16)        # (B*64,  wide4)
    pc0 = jnp.asarray(_adaptive_pool_matrix(batch, 12, 12, 28, 28), bf16)
    pc1 = jnp.asarray(_adaptive_pool_matrix(batch, 3, 3, 16, 16), bf16)
    sel = jnp.asarray(_fc_center_selector(batch), bf16)            # (B*25, B)

    def forward(x_nchw, p):
        f32 = jnp.float32
        w1, b1, g1, be1, m1, v1 = p["cnn1"]
        w2, b2, g2, be2, m2, v2 = p["cnn2"]
        w3, b3, g3, be3, m3, v3 = p["cnn3"]
        wc0, bc0 = p["cls0"]
        wc1, bc1 = p["cls1"]

        s1, t1 = _fold_bn(b1, g1, be1, m1, v1)
        s2, t2 = _fold_bn(b2, g2, be2, m2, v2)
        s3, t3 = _fold_bn(b3, g3, be3, m3, v3)

        # Input layout: (Cin_pad=8, B*26*26) padded-flat plane with zero
        # margins of width 27 so every shifted conv slice is a static slice.
        xp = jnp.pad(x_nchw.astype(f32), ((0, 0), (0, 0), (1, 1), (1, 1)))
        xp = jnp.transpose(xp, (1, 0, 2, 3)).reshape(3, batch * 26 * 26)
        x_in = jnp.pad(xp, ((0, 5), (27, 27)))                     # (8, B*676+54)

        w1p = jnp.pad(w1, ((0, 0), (0, 5), (0, 0), (0, 0)))        # Cin 3 -> 8
        wfc = p["fc_w"].reshape(10, 136, 3, 3)

        args = (
            x_in,
            _conv_w9(w1p).astype(bf16), s1.reshape(-1, 1), t1.reshape(-1, 1), p1,
            _conv_w9(w2).astype(bf16), s2.reshape(-1, 1), t2.reshape(-1, 1), p2,
            _conv_w9(w3).astype(bf16), s3.reshape(-1, 1), t3.reshape(-1, 1), p3,
            wc0.reshape(16, 28).astype(bf16), bc0.reshape(-1, 1), pc0,
            wc1.reshape(16, 136).astype(bf16), bc1.reshape(-1, 1), pc1,
            _conv_w9(wfc).astype(bf16), p["fc_b"].reshape(-1, 1), sel,
        )

        out_shapes = (
            jax.ShapeDtypeStruct((16, batch * 28 * 28), f32),   # classifier0
            jax.ShapeDtypeStruct((16, batch * 16 * 16), f32),   # classifier1
            jax.ShapeDtypeStruct((10, batch), f32),             # logits^T
        )
        vmem_spec = pl.BlockSpec(memory_space=pltpu.MemorySpace.VMEM)
        out0, out1, logits_t = pl.pallas_call(
            _cnn_fused_kernel,
            out_shape=out_shapes,
            in_specs=[vmem_spec] * len(args),
            out_specs=(vmem_spec, vmem_spec, vmem_spec),
            compiler_params=pltpu.CompilerParams(
                vmem_limit_bytes=48 * 1024 * 1024),
        )(*args)

        # Tiny (<=100 KB) layout fix-ups to the torch-shaped outputs.
        x0 = out0.reshape(16, batch, 28 * 28).transpose(1, 0, 2)
        x0 = x0.reshape(batch, 256, 7, 7)
        x1 = out1.reshape(16, batch, 16 * 16).transpose(1, 0, 2)
        x1 = x1.reshape(batch, 1024, 2, 2)
        logits = logits_t.T
        return x0, x1, logits

    return jax.jit(forward)


# ----------------------------------------------------------------------------
# Deterministic parameter init (shapes from CNN.__init__)
# ----------------------------------------------------------------------------
def init_params(key):
    ks = iter(jax.random.split(key, 32))

    def conv(cout, cin, kh, kw):
        fan_in = cin * kh * kw
        w = jax.random.normal(next(ks), (cout, cin, kh, kw), jnp.float32) / np.sqrt(fan_in)
        b = 0.01 * jax.random.normal(next(ks), (cout,), jnp.float32)
        return w, b

    def bn(c):
        gamma = 1.0 + 0.1 * jax.random.normal(next(ks), (c,), jnp.float32)
        beta = 0.1 * jax.random.normal(next(ks), (c,), jnp.float32)
        mean = 0.1 * jax.random.normal(next(ks), (c,), jnp.float32)
        var = 1.0 + 0.1 * jax.random.uniform(next(ks), (c,), jnp.float32)
        return gamma, beta, mean, var

    p = {}
    p["cnn1"] = conv(28, 3, 3, 3) + bn(28)
    p["cnn2"] = conv(56, 28, 3, 3) + bn(56)
    p["cnn3"] = conv(136, 56, 3, 3) + bn(136)
    p["cls0"] = conv(16, 28, 1, 1)
    p["cls1"] = conv(16, 136, 1, 1)
    fc_in = 136 * 3 * 3
    p["fc_w"] = jax.random.normal(next(ks), (10, fc_in), jnp.float32) / np.sqrt(fc_in)
    p["fc_b"] = 0.01 * jax.random.normal(next(ks), (10,), jnp.float32)
    return p


if __name__ == "__main__":
    key = jax.random.PRNGKey(0)
    k_x, k_p = jax.random.split(key)
    B = 2
    # 24x24 input -> 12 -> 6 -> 3 spatial, so fc sees 136*3*3 features.
    x = jax.random.normal(k_x, (B, 3, 24, 24), jnp.float32)
    params = init_params(k_p)

    fwd = make_cnn_forward(B)
    x0, x1, logits = fwd(x, params)
    jax.block_until_ready((x0, x1, logits))

    assert x0.shape == (B, 256, 7, 7), x0.shape
    assert x1.shape == (B, 1024, 2, 2), x1.shape
    assert logits.shape == (B, 10), logits.shape
    print("KERNEL_OK")
</pallas_src>

<mosaic_0001>
module attributes {stable_mosaic.version = 11 : i64} {
  func.func @_cnn_fused_kernel(%arg0: memref<8x1406xf32, #tpu.memory_space<vmem>>, %arg1: memref<9x28x8xbf16, #tpu.memory_space<vmem>>, %arg2: memref<28x1xf32, #tpu.memory_space<vmem>>, %arg3: memref<28x1xf32, #tpu.memory_space<vmem>>, %arg4: memref<1352x422xbf16, #tpu.memory_space<vmem>>, %arg5: memref<9x56x28xbf16, #tpu.memory_space<vmem>>, %arg6: memref<56x1xf32, #tpu.memory_space<vmem>>, %arg7: memref<56x1xf32, #tpu.memory_space<vmem>>, %arg8: memref<392x146xbf16, #tpu.memory_space<vmem>>, %arg9: memref<9x136x56xbf16, #tpu.memory_space<vmem>>, %arg10: memref<136x1xf32, #tpu.memory_space<vmem>>, %arg11: memref<136x1xf32, #tpu.memory_space<vmem>>, %arg12: memref<128x62xbf16, #tpu.memory_space<vmem>>, %arg13: memref<16x28xbf16, #tpu.memory_space<vmem>>, %arg14: memref<16x1xf32, #tpu.memory_space<vmem>>, %arg15: memref<422x1568xbf16, #tpu.memory_space<vmem>>, %arg16: memref<16x136xbf16, #tpu.memory_space<vmem>>, %arg17: memref<16x1xf32, #tpu.memory_space<vmem>>, %arg18: memref<62x512xbf16, #tpu.memory_space<vmem>>, %arg19: memref<9x10x136xbf16, #tpu.memory_space<vmem>>, %arg20: memref<10x1xf32, #tpu.memory_space<vmem>>, %arg21: memref<50x2xbf16, #tpu.memory_space<vmem>>, %arg22: memref<16x1568xf32, #tpu.memory_space<vmem>>, %arg23: memref<16x512xf32, #tpu.memory_space<vmem>>, %arg24: memref<10x2xf32, #tpu.memory_space<vmem>>) attributes {dimension_semantics = [], scalar_prefetch = 0 : i64, scratch_operands = 0 : i64, tpu.core_type = #tpu.core_type<tc>} {
    %c0 = arith.constant 0 : index
    %c0_0 = arith.constant 0 : index
    %0 = vector.load %arg0[%c0, %c0_0] : memref<8x1406xf32, #tpu.memory_space<vmem>>, vector<8x1406xf32>
    %1 = arith.truncf %0 : vector<8x1406xf32> to vector<8x1406xbf16>
    %2 = vector.extract_strided_slice %1 {offsets = [0, 0], sizes = [8, 1352], strides = [1, 1]} : vector<8x1406xbf16> to vector<8x1352xbf16>
    %c0_1 = arith.constant 0 : index
    %c0_2 = arith.constant 0 : index
    %c0_3 = arith.constant 0 : index
    %3 = vector.load %arg1[%c0_1, %c0_2, %c0_3] : memref<9x28x8xbf16, #tpu.memory_space<vmem>>, vector<1x28x8xbf16>
    %4 = vector.shape_cast %3 : vector<1x28x8xbf16> to vector<28x8xbf16>
    %cst = arith.constant dense<0.000000e+00> : vector<28x1352xf32>
    %5 = tpu.matmul %4, %2, %cst {dimension_numbers = #tpu.dot_dimension_numbers<[1], [0], [0], [1], [0, 0, 1, 1], [], []>} : vector<28x8xbf16>, vector<8x1352xbf16>, vector<28x1352xf32> -> vector<28x1352xf32>
    %6 = vector.extract_strided_slice %1 {offsets = [0, 1], sizes = [8, 1352], strides = [1, 1]} : vector<8x1406xbf16> to vector<8x1352xbf16>
    %c1 = arith.constant 1 : index
    %c0_4 = arith.constant 0 : index
    %c0_5 = arith.constant 0 : index
    %7 = vector.load %arg1[%c1, %c0_4, %c0_5] : memref<9x28x8xbf16, #tpu.memory_space<vmem>>, vector<1x28x8xbf16>
    %8 = vector.shape_cast %7 : vector<1x28x8xbf16> to vector<28x8xbf16>
    %cst_6 = arith.constant dense<0.000000e+00> : vector<28x1352xf32>
    %9 = tpu.matmul %8, %6, %cst_6 {dimension_numbers = #tpu.dot_dimension_numbers<[1], [0], [0], [1], [0, 0, 1, 1], [], []>} : vector<28x8xbf16>, vector<8x1352xbf16>, vector<28x1352xf32> -> vector<28x1352xf32>
    %10 = arith.addf %5, %9 : vector<28x1352xf32>
    %11 = vector.extract_strided_slice %1 {offsets = [0, 2], sizes = [8, 1352], strides = [1, 1]} : vector<8x1406xbf16> to vector<8x1352xbf16>
    %c2 = arith.constant 2 : index
    %c0_7 = arith.constant 0 : index
    %c0_8 = arith.constant 0 : index
    %12 = vector.load %arg1[%c2, %c0_7, %c0_8] : memref<9x28x8xbf16, #tpu.memory_space<vmem>>, vector<1x28x8xbf16>
    %13 = vector.shape_cast %12 : vector<1x28x8xbf16> to vector<28x8xbf16>
    %cst_9 = arith.constant dense<0.000000e+00> : vector<28x1352xf32>
    %14 = tpu.matmul %13, %11, %cst_9 {dimension_numbers = #tpu.dot_dimension_numbers<[1], [0], [0], [1], [0, 0, 1, 1], [], []>} : vector<28x8xbf16>, vector<8x1352xbf16>, vector<28x1352xf32> -> vector<28x1352xf32>
    %15 = arith.addf %10, %14 : vector<28x1352xf32>
    %16 = vector.extract_strided_slice %1 {offsets = [0, 26], sizes = [8, 1352], strides = [1, 1]} : vector<8x1406xbf16> to vector<8x1352xbf16>
    %c3 = arith.constant 3 : index
    %c0_10 = arith.constant 0 : index
    %c0_11 = arith.constant 0 : index
    %17 = vector.load %arg1[%c3, %c0_10, %c0_11] : memref<9x28x8xbf16, #tpu.memory_space<vmem>>, vector<1x28x8xbf16>
    %18 = vector.shape_cast %17 : vector<1x28x8xbf16> to vector<28x8xbf16>
    %cst_12 = arith.constant dense<0.000000e+00> : vector<28x1352xf32>
    %19 = tpu.matmul %18, %16, %cst_12 {dimension_numbers = #tpu.dot_dimension_numbers<[1], [0], [0], [1], [0, 0, 1, 1], [], []>} : vector<28x8xbf16>, vector<8x1352xbf16>, vector<28x1352xf32> -> vector<28x1352xf32>
    %20 = arith.addf %15, %19 : vector<28x1352xf32>
    %21 = vector.extract_strided_slice %1 {offsets = [0, 27], sizes = [8, 1352], strides = [1, 1]} : vector<8x1406xbf16> to vector<8x1352xbf16>
    %c4 = arith.constant 4 : index
    %c0_13 = arith.constant 0 : index
    %c0_14 = arith.constant 0 : index
    %22 = vector.load %arg1[%c4, %c0_13, %c0_14] : memref<9x28x8xbf16, #tpu.memory_space<vmem>>, vector<1x28x8xbf16>
    %23 = vector.shape_cast %22 : vector<1x28x8xbf16> to vector<28x8xbf16>
    %cst_15 = arith.constant dense<0.000000e+00> : vector<28x1352xf32>
    %24 = tpu.matmul %23, %21, %cst_15 {dimension_numbers = #tpu.dot_dimension_numbers<[1], [0], [0], [1], [0, 0, 1, 1], [], []>} : vector<28x8xbf16>, vector<8x1352xbf16>, vector<28x1352xf32> -> vector<28x1352xf32>
    %25 = arith.addf %20, %24 : vector<28x1352xf32>
    %26 = vector.extract_strided_slice %1 {offsets = [0, 28], sizes = [8, 1352], strides = [1, 1]} : vector<8x1406xbf16> to vector<8x1352xbf16>
    %c5 = arith.constant 5 : index
    %c0_16 = arith.constant 0 : index
    %c0_17 = arith.constant 0 : index
    %27 = vector.load %arg1[%c5, %c0_16, %c0_17] : memref<9x28x8xbf16, #tpu.memory_space<vmem>>, vector<1x28x8xbf16>
    %28 = vector.shape_cast %27 : vector<1x28x8xbf16> to vector<28x8xbf16>
    %cst_18 = arith.constant dense<0.000000e+00> : vector<28x1352xf32>
    %29 = tpu.matmul %28, %26, %cst_18 {dimension_numbers = #tpu.dot_dimension_numbers<[1], [0], [0], [1], [0, 0, 1, 1], [], []>} : vector<28x8xbf16>, vector<8x1352xbf16>, vector<28x1352xf32> -> vector<28x1352xf32>
    %30 = arith.addf %25, %29 : vector<28x1352xf32>
    %31 = vector.extract_strided_slice %1 {offsets = [0, 52], sizes = [8, 1352], strides = [1, 1]} : vector<8x1406xbf16> to vector<8x1352xbf16>
    %c6 = arith.constant 6 : index
    %c0_19 = arith.constant 0 : index
    %c0_20 = arith.constant 0 : index
    %32 = vector.load %arg1[%c6, %c0_19, %c0_20] : memref<9x28x8xbf16, #tpu.memory_space<vmem>>, vector<1x28x8xbf16>
    %33 = vector.shape_cast %32 : vector<1x28x8xbf16> to vector<28x8xbf16>
    %cst_21 = arith.constant dense<0.000000e+00> : vector<28x1352xf32>
    %34 = tpu.matmul %33, %31, %cst_21 {dimension_numbers = #tpu.dot_dimension_numbers<[1], [0], [0], [1], [0, 0, 1, 1], [], []>} : vector<28x8xbf16>, vector<8x1352xbf16>, vector<28x1352xf32> -> vector<28x1352xf32>
    %35 = arith.addf %30, %34 : vector<28x1352xf32>
    %36 = vector.extract_strided_slice %1 {offsets = [0, 53], sizes = [8, 1352], strides = [1, 1]} : vector<8x1406xbf16> to vector<8x1352xbf16>
    %c7 = arith.constant 7 : index
    %c0_22 = arith.constant 0 : index
    %c0_23 = arith.constant 0 : index
    %37 = vector.load %arg1[%c7, %c0_22, %c0_23] : memref<9x28x8xbf16, #tpu.memory_space<vmem>>, vector<1x28x8xbf16>
    %38 = vector.shape_cast %37 : vector<1x28x8xbf16> to vector<28x8xbf16>
    %cst_24 = arith.constant dense<0.000000e+00> : vector<28x1352xf32>
    %39 = tpu.matmul %38, %36, %cst_24 {dimension_numbers = #tpu.dot_dimension_numbers<[1], [0], [0], [1], [0, 0, 1, 1], [], []>} : vector<28x8xbf16>, vector<8x1352xbf16>, vector<28x1352xf32> -> vector<28x1352xf32>
    %40 = arith.addf %35, %39 : vector<28x1352xf32>
    %41 = vector.extract_strided_slice %1 {offsets = [0, 54], sizes = [8, 1352], strides = [1, 1]} : vector<8x1406xbf16> to vector<8x1352xbf16>
    %c8 = arith.constant 8 : index
    %c0_25 = arith.constant 0 : index
    %c0_26 = arith.constant 0 : index
    %42 = vector.load %arg1[%c8, %c0_25, %c0_26] : memref<9x28x8xbf16, #tpu.memory_space<vmem>>, vector<1x28x8xbf16>
    %43 = vector.shape_cast %42 : vector<1x28x8xbf16> to vector<28x8xbf16>
    %cst_27 = arith.constant dense<0.000000e+00> : vector<28x1352xf32>
    %44 = tpu.matmul %43, %41, %cst_27 {dimension_numbers = #tpu.dot_dimension_numbers<[1], [0], [0], [1], [0, 0, 1, 1], [], []>} : vector<28x8xbf16>, vector<8x1352xbf16>, vector<28x1352xf32> -> vector<28x1352xf32>
    %45 = arith.addf %40, %44 : vector<28x1352xf32>
    %c0_28 = arith.constant 0 : index
    %c0_29 = arith.constant 0 : index
    %46 = vector.load %arg2[%c0_28, %c0_29] : memref<28x1xf32, #tpu.memory_space<vmem>>, vector<28x1xf32>
    %47 = vector.broadcast %46 : vector<28x1xf32> to vector<28x1352xf32>
    %48 = arith.mulf %45, %47 : vector<28x1352xf32>
    %c0_30 = arith.constant 0 : index
    %c0_31 = arith.constant 0 : index
    %49 = vector.load %arg3[%c0_30, %c0_31] : memref<28x1xf32, #tpu.memory_space<vmem>>, vector<28x1xf32>
    %50 = vector.broadcast %49 : vector<28x1xf32> to vector<28x1352xf32>
    %51 = arith.addf %48, %50 : vector<28x1352xf32>
    %cst_32 = arith.constant 0.000000e+00 : f32
    %52 = vector.broadcast %cst_32 : f32 to vector<28x1352xf32>
    %53 = arith.maximumf %51, %52 : vector<28x1352xf32>
    %54 = arith.truncf %53 : vector<28x1352xf32> to vector<28x1352xbf16>
    %c0_33 = arith.constant 0 : index
    %c0_34 = arith.constant 0 : index
    %55 = vector.load %arg4[%c0_33, %c0_34] : memref<1352x422xbf16, #tpu.memory_space<vmem>>, vector<1352x422xbf16>
    %cst_35 = arith.constant dense<0.000000e+00> : vector<28x422xf32>
    %56 = tpu.matmul %54, %55, %cst_35 {dimension_numbers = #tpu.dot_dimension_numbers<[1], [0], [0], [1], [0, 0, 1, 1], [], []>} : vector<28x1352xbf16>, vector<1352x422xbf16>, vector<28x422xf32> -> vector<28x422xf32>
    %c0_36 = arith.constant 0 : index
    %c0_37 = arith.constant 0 : index
    %57 = vector.load %arg13[%c0_36, %c0_37] : memref<16x28xbf16, #tpu.memory_space<vmem>>, vector<16x28xbf16>
    %58 = arith.truncf %56 : vector<28x422xf32> to vector<28x422xbf16>
    %cst_38 = arith.constant dense<0.000000e+00> : vector<16x422xf32>
    %59 = tpu.matmul %57, %58, %cst_38 {dimension_numbers = #tpu.dot_dimension_numbers<[1], [0], [0], [1], [0, 0, 1, 1], [], []>} : vector<16x28xbf16>, vector<28x422xbf16>, vector<16x422xf32> -> vector<16x422xf32>
    %c0_39 = arith.constant 0 : index
    %c0_40 = arith.constant 0 : index
    %60 = vector.load %arg14[%c0_39, %c0_40] : memref<16x1xf32, #tpu.memory_space<vmem>>, vector<16x1xf32>
    %61 = vector.broadcast %60 : vector<16x1xf32> to vector<16x422xf32>
    %62 = arith.addf %59, %61 : vector<16x422xf32>
    %cst_41 = arith.constant 0.000000e+00 : f32
    %63 = vector.broadcast %cst_41 : f32 to vector<16x422xf32>
    %64 = arith.maximumf %62, %63 : vector<16x422xf32>
    %65 = arith.truncf %64 : vector<16x422xf32> to vector<16x422xbf16>
    %c0_42 = arith.constant 0 : index
    %c0_43 = arith.constant 0 : index
    %66 = vector.load %arg15[%c0_42, %c0_43] : memref<422x1568xbf16, #tpu.memory_space<vmem>>, vector<422x1568xbf16>
    %cst_44 = arith.constant dense<0.000000e+00> : vector<16x1568xf32>
    %67 = tpu.matmul %65, %66, %cst_44 {dimension_numbers = #tpu.dot_dimension_numbers<[1], [0], [0], [1], [0, 0, 1, 1], [], []>} : vector<16x422xbf16>, vector<422x1568xbf16>, vector<16x1568xf32> -> vector<16x1568xf32>
    %c0_45 = arith.constant 0 : index
    %c0_46 = arith.constant 0 : index
    %68 = vector.load %arg22[%c0_45, %c0_46] : memref<16x1568xf32, #tpu.memory_space<vmem>>, vector<16x1568xf32>
    tpu.vector_store %arg22[%c0_45, %c0_46], %67 {strides = array<i32>} : memref<16x1568xf32, #tpu.memory_space<vmem>>, vector<16x1568xf32>,
    %69 = arith.truncf %56 : vector<28x422xf32> to vector<28x422xbf16>
    %70 = vector.extract_strided_slice %69 {offsets = [0, 0], sizes = [28, 392], strides = [1, 1]} : vector<28x422xbf16> to vector<28x392xbf16>
    %c0_47 = arith.constant 0 : index
    %c0_48 = arith.constant 0 : index
    %c0_49 = arith.constant 0 : index
    %71 = vector.load %arg5[%c0_47, %c0_48, %c0_49] : memref<9x56x28xbf16, #tpu.memory_space<vmem>>, vector<1x56x28xbf16>
    %72 = vector.shape_cast %71 : vector<1x56x28xbf16> to vector<56x28xbf16>
    %cst_50 = arith.constant dense<0.000000e+00> : vector<56x392xf32>
    %73 = tpu.matmul %72, %70, %cst_50 {dimension_numbers = #tpu.dot_dimension_numbers<[1], [0], [0], [1], [0, 0, 1, 1], [], []>} : vector<56x28xbf16>, vector<28x392xbf16>, vector<56x392xf32> -> vector<56x392xf32>
    %74 = vector.extract_strided_slice %69 {offsets = [0, 1], sizes = [28, 392], strides = [1, 1]} : vector<28x422xbf16> to vector<28x392xbf16>
    %c1_51 = arith.constant 1 : index
    %c0_52 = arith.constant 0 : index
    %c0_53 = arith.constant 0 : index
    %75 = vector.load %arg5[%c1_51, %c0_52, %c0_53] : memref<9x56x28xbf16, #tpu.memory_space<vmem>>, vector<1x56x28xbf16>
    %76 = vector.shape_cast %75 : vector<1x56x28xbf16> to vector<56x28xbf16>
    %cst_54 = arith.constant dense<0.000000e+00> : vector<56x392xf32>
    %77 = tpu.matmul %76, %74, %cst_54 {dimension_numbers = #tpu.dot_dimension_numbers<[1], [0], [0], [1], [0, 0, 1, 1], [], []>} : vector<56x28xbf16>, vector<28x392xbf16>, vector<56x392xf32> -> vector<56x392xf32>
    %78 = arith.addf %73, %77 : vector<56x392xf32>
    %79 = vector.extract_strided_slice %69 {offsets = [0, 2], sizes = [28, 392], strides = [1, 1]} : vector<28x422xbf16> to vector<28x392xbf16>
    %c2_55 = arith.constant 2 : index
    %c0_56 = arith.constant 0 : index
    %c0_57 = arith.constant 0 : index
    %80 = vector.load %arg5[%c2_55, %c0_56, %c0_57] : memref<9x56x28xbf16, #tpu.memory_space<vmem>>, vector<1x56x28xbf16>
    %81 = vector.shape_cast %80 : vector<1x56x28xbf16> to vector<56x28xbf16>
    %cst_58 = arith.constant dense<0.000000e+00> : vector<56x392xf32>
    %82 = tpu.matmul %81, %79, %cst_58 {dimension_numbers = #tpu.dot_dimension_numbers<[1], [0], [0], [1], [0, 0, 1, 1], [], []>} : vector<56x28xbf16>, vector<28x392xbf16>, vector<56x392xf32> -> vector<56x392xf32>
    %83 = arith.addf %78, %82 : vector<56x392xf32>
    %84 = vector.extract_strided_slice %69 {offsets = [0, 14], sizes = [28, 392], strides = [1, 1]} : vector<28x422xbf16> to vector<28x392xbf16>
    %c3_59 = arith.constant 3 : index
    %c0_60 = arith.constant 0 : index
    %c0_61 = arith.constant 0 : index
    %85 = vector.load %arg5[%c3_59, %c0_60, %c0_61] : memref<9x56x28xbf16, #tpu.memory_space<vmem>>, vector<1x56x28xbf16>
    %86 = vector.shape_cast %85 : vector<1x56x28xbf16> to vector<56x28xbf16>
    %cst_62 = arith.constant dense<0.000000e+00> : vector<56x392xf32>
    %87 = tpu.matmul %86, %84, %cst_62 {dimension_numbers = #tpu.dot_dimension_numbers<[1], [0], [0], [1], [0, 0, 1, 1], [], []>} : vector<56x28xbf16>, vector<28x392xbf16>, vector<56x392xf32> -> vector<56x392xf32>
    %88 = arith.addf %83, %87 : vector<56x392xf32>
    %89 = vector.extract_strided_slice %69 {offsets = [0, 15], sizes = [28, 392], strides = [1, 1]} : vector<28x422xbf16> to vector<28x392xbf16>
    %c4_63 = arith.constant 4 : index
    %c0_64 = arith.constant 0 : index
    %c0_65 = arith.constant 0 : index
    %90 = vector.load %arg5[%c4_63, %c0_64, %c0_65] : memref<9x56x28xbf16, #tpu.memory_space<vmem>>, vector<1x56x28xbf16>
    %91 = vector.shape_cast %90 : vector<1x56x28xbf16> to vector<56x28xbf16>
    %cst_66 = arith.constant dense<0.000000e+00> : vector<56x392xf32>
    %92 = tpu.matmul %91, %89, %cst_66 {dimension_numbers = #tpu.dot_dimension_numbers<[1], [0], [0], [1], [0, 0, 1, 1], [], []>} : vector<56x28xbf16>, vector<28x392xbf16>, vector<56x392xf32> -> vector<56x392xf32>
    %93 = arith.addf %88, %92 : vector<56x392xf32>
    %94 = vector.extract_strided_slice %69 {offsets = [0, 16], sizes = [28, 392], strides = [1, 1]} : vector<28x422xbf16> to vector<28x392xbf16>
    %c5_67 = arith.constant 5 : index
    %c0_68 = arith.constant 0 : index
    %c0_69 = arith.constant 0 : index
    %95 = vector.load %arg5[%c5_67, %c0_68, %c0_69] : memref<9x56x28xbf16, #tpu.memory_space<vmem>>, vector<1x56x28xbf16>
    %96 = vector.shape_cast %95 : vector<1x56x28xbf16> to vector<56x28xbf16>
    %cst_70 = arith.constant dense<0.000000e+00> : vector<56x392xf32>
    %97 = tpu.matmul %96, %94, %cst_70 {dimension_numbers = #tpu.dot_dimension_numbers<[1], [0], [0], [1], [0, 0, 1, 1], [], []>} : vector<56x28xbf16>, vector<28x392xbf16>, vector<56x392xf32> -> vector<56x392xf32>
    %98 = arith.addf %93, %97 : vector<56x392xf32>
    %99 = vector.extract_strided_slice %69 {offsets = [0, 28], sizes = [28, 392], strides = [1, 1]} : vector<28x422xbf16> to vector<28x392xbf16>
    %c6_71 = arith.constant 6 : index
    %c0_72 = arith.constant 0 : index
    %c0_73 = arith.constant 0 : index
    %100 = vector.load %arg5[%c6_71, %c0_72, %c0_73] : memref<9x56x28xbf16, #tpu.memory_space<vmem>>, vector<1x56x28xbf16>
    %101 = vector.shape_cast %100 : vector<1x56x28xbf16> to vector<56x28xbf16>
    %cst_74 = arith.constant dense<0.000000e+00> : vector<56x392xf32>
    %102 = tpu.matmul %101, %99, %cst_74 {dimension_numbers = #tpu.dot_dimension_numbers<[1], [0], [0], [1], [0, 0, 1, 1], [], []>} : vector<56x28xbf16>, vector<28x392xbf16>, vector<56x392xf32> -> vector<56x392xf32>
    %103 = arith.addf %98, %102 : vector<56x392xf32>
    %104 = vector.extract_strided_slice %69 {offsets = [0, 29], sizes = [28, 392], strides = [1, 1]} : vector<28x422xbf16> to vector<28x392xbf16>
    %c7_75 = arith.constant 7 : index
    %c0_76 = arith.constant 0 : index
    %c0_77 = arith.constant 0 : index
    %105 = vector.load %arg5[%c7_75, %c0_76, %c0_77] : memref<9x56x28xbf16, #tpu.memory_space<vmem>>, vector<1x56x28xbf16>
    %106 = vector.shape_cast %105 : vector<1x56x28xbf16> to vector<56x28xbf16>
    %cst_78 = arith.constant dense<0.000000e+00> : vector<56x392xf32>
    %107 = tpu.matmul %106, %104, %cst_78 {dimension_numbers = #tpu.dot_dimension_numbers<[1], [0], [0], [1], [0, 0, 1, 1], [], []>} : vector<56x28xbf16>, vector<28x392xbf16>, vector<56x392xf32> -> vector<56x392xf32>
    %108 = arith.addf %103, %107 : vector<56x392xf32>
    %109 = vector.extract_strided_slice %69 {offsets = [0, 30], sizes = [28, 392], strides = [1, 1]} : vector<28x422xbf16> to vector<28x392xbf16>
    %c8_79 = arith.constant 8 : index
    %c0_80 = arith.constant 0 : index
    %c0_81 = arith.constant 0 : index
    %110 = vector.load %arg5[%c8_79, %c0_80, %c0_81] : memref<9x56x28xbf16, #tpu.memory_space<vmem>>, vector<1x56x28xbf16>
    %111 = vector.shape_cast %110 : vector<1x56x28xbf16> to vector<56x28xbf16>
    %cst_82 = arith.constant dense<0.000000e+00> : vector<56x392xf32>
    %112 = tpu.matmul %111, %109, %cst_82 {dimension_numbers = #tpu.dot_dimension_numbers<[1], [0], [0], [1], [0, 0, 1, 1], [], []>} : vector<56x28xbf16>, vector<28x392xbf16>, vector<56x392xf32> -> vector<56x392xf32>
    %113 = arith.addf %108, %112 : vector<56x392xf32>
    %c0_83 = arith.constant 0 : index
    %c0_84 = arith.constant 0 : index
    %114 = vector.load %arg6[%c0_83, %c0_84] : memref<56x1xf32, #tpu.memory_space<vmem>>, vector<56x1xf32>
    %115 = vector.broadcast %114 : vector<56x1xf32> to vector<56x392xf32>
    %116 = arith.mulf %113, %115 : vector<56x392xf32>
    %c0_85 = arith.constant 0 : index
    %c0_86 = arith.constant 0 : index
    %117 = vector.load %arg7[%c0_85, %c0_86] : memref<56x1xf32, #tpu.memory_space<vmem>>, vector<56x1xf32>
    %118 = vector.broadcast %117 : vector<56x1xf32> to vector<56x392xf32>
    %119 = arith.addf %116, %118 : vector<56x392xf32>
    %cst_87 = arith.constant 0.000000e+00 : f32
    %120 = vector.broadcast %cst_87 : f32 to vector<56x392xf32>
    %121 = arith.maximumf %119, %120 : vector<56x392xf32>
    %122 = arith.truncf %121 : vector<56x392xf32> to vector<56x392xbf16>
    %c0_88 = arith.constant 0 : index
    %c0_89 = arith.constant 0 : index
    %123 = vector.load %arg8[%c0_88, %c0_89] : memref<392x146xbf16, #tpu.memory_space<vmem>>, vector<392x146xbf16>
    %cst_90 = arith.constant dense<0.000000e+00> : vector<56x146xf32>
    %124 = tpu.matmul %122, %123, %cst_90 {dimension_numbers = #tpu.dot_dimension_numbers<[1], [0], [0], [1], [0, 0, 1, 1], [], []>} : vector<56x392xbf16>, vector<392x146xbf16>, vector<56x146xf32> -> vector<56x146xf32>
    %125 = arith.truncf %124 : vector<56x146xf32> to vector<56x146xbf16>
    %126 = vector.extract_strided_slice %125 {offsets = [0, 0], sizes = [56, 128], strides = [1, 1]} : vector<56x146xbf16> to vector<56x128xbf16>
    %c0_91 = arith.constant 0 : index
    %c0_92 = arith.constant 0 : index
    %c0_93 = arith.constant 0 : index
    %127 = vector.load %arg9[%c0_91, %c0_92, %c0_93] : memref<9x136x56xbf16, #tpu.memory_space<vmem>>, vector<1x136x56xbf16>
    %128 = vector.shape_cast %127 : vector<1x136x56xbf16> to vector<136x56xbf16>
    %cst_94 = arith.constant dense<0.000000e+00> : vector<136x128xf32>
    %129 = tpu.matmul %128, %126, %cst_94 {dimension_numbers = #tpu.dot_dimension_numbers<[1], [0], [0], [1], [0, 0, 1, 1], [], []>} : vector<136x56xbf16>, vector<56x128xbf16>, vector<136x128xf32> -> vector<136x128xf32>
    %130 = vector.extract_strided_slice %125 {offsets = [0, 1], sizes = [56, 128], strides = [1, 1]} : vector<56x146xbf16> to vector<56x128xbf16>
    %c1_95 = arith.constant 1 : index
    %c0_96 = arith.constant 0 : index
    %c0_97 = arith.constant 0 : index
    %131 = vector.load %arg9[%c1_95, %c0_96, %c0_97] : memref<9x136x56xbf16, #tpu.memory_space<vmem>>, vector<1x136x56xbf16>
    %132 = vector.shape_cast %131 : vector<1x136x56xbf16> to vector<136x56xbf16>
    %cst_98 = arith.constant dense<0.000000e+00> : vector<136x128xf32>
    %133 = tpu.matmul %132, %130, %cst_98 {dimension_numbers = #tpu.dot_dimension_numbers<[1], [0], [0], [1], [0, 0, 1, 1], [], []>} : vector<136x56xbf16>, vector<56x128xbf16>, vector<136x128xf32> -> vector<136x128xf32>
    %134 = arith.addf %129, %133 : vector<136x128xf32>
    %135 = vector.extract_strided_slice %125 {offsets = [0, 2], sizes = [56, 128], strides = [1, 1]} : vector<56x146xbf16> to vector<56x128xbf16>
    %c2_99 = arith.constant 2 : index
    %c0_100 = arith.constant 0 : index
    %c0_101 = arith.constant 0 : index
    %136 = vector.load %arg9[%c2_99, %c0_100, %c0_101] : memref<9x136x56xbf16, #tpu.memory_space<vmem>>, vector<1x136x56xbf16>
    %137 = vector.shape_cast %136 : vector<1x136x56xbf16> to vector<136x56xbf16>
    %cst_102 = arith.constant dense<0.000000e+00> : vector<136x128xf32>
    %138 = tpu.matmul %137, %135, %cst_102 {dimension_numbers = #tpu.dot_dimension_numbers<[1], [0], [0], [1], [0, 0, 1, 1], [], []>} : vector<136x56xbf16>, vector<56x128xbf16>, vector<136x128xf32> -> vector<136x128xf32>
    %139 = arith.addf %134, %138 : vector<136x128xf32>
    %140 = vector.extract_strided_slice %125 {offsets = [0, 8], sizes = [56, 128], strides = [1, 1]} : vector<56x146xbf16> to vector<56x128xbf16>
    %c3_103 = arith.constant 3 : index
    %c0_104 = arith.constant 0 : index
    %c0_105 = arith.constant 0 : index
    %141 = vector.load %arg9[%c3_103, %c0_104, %c0_105] : memref<9x136x56xbf16, #tpu.memory_space<vmem>>, vector<1x136x56xbf16>
    %142 = vector.shape_cast %141 : vector<1x136x56xbf16> to vector<136x56xbf16>
    %cst_106 = arith.constant dense<0.000000e+00> : vector<136x128xf32>
    %143 = tpu.matmul %142, %140, %cst_106 {dimension_numbers = #tpu.dot_dimension_numbers<[1], [0], [0], [1], [0, 0, 1, 1], [], []>} : vector<136x56xbf16>, vector<56x128xbf16>, vector<136x128xf32> -> vector<136x128xf32>
    %144 = arith.addf %139, %143 : vector<136x128xf32>
    %145 = vector.extract_strided_slice %125 {offsets = [0, 9], sizes = [56, 128], strides = [1, 1]} : vector<56x146xbf16> to vector<56x128xbf16>
    %c4_107 = arith.constant 4 : index
    %c0_108 = arith.constant 0 : index
    %c0_109 = arith.constant 0 : index
    %146 = vector.load %arg9[%c4_107, %c0_108, %c0_109] : memref<9x136x56xbf16, #tpu.memory_space<vmem>>, vector<1x136x56xbf16>
    %147 = vector.shape_cast %146 : vector<1x136x56xbf16> to vector<136x56xbf16>
    %cst_110 = arith.constant dense<0.000000e+00> : vector<136x128xf32>
    %148 = tpu.matmul %147, %145, %cst_110 {dimension_numbers = #tpu.dot_dimension_numbers<[1], [0], [0], [1], [0, 0, 1, 1], [], []>} : vector<136x56xbf16>, vector<56x128xbf16>, vector<136x128xf32> -> vector<136x128xf32>
    %149 = arith.addf %144, %148 : vector<136x128xf32>
    %150 = vector.extract_strided_slice %125 {offsets = [0, 10], sizes = [56, 128], strides = [1, 1]} : vector<56x146xbf16> to vector<56x128xbf16>
    %c5_111 = arith.constant 5 : index
    %c0_112 = arith.constant 0 : index
    %c0_113 = arith.constant 0 : index
    %151 = vector.load %arg9[%c5_111, %c0_112, %c0_113] : memref<9x136x56xbf16, #tpu.memory_space<vmem>>, vector<1x136x56xbf16>
    %152 = vector.shape_cast %151 : vector<1x136x56xbf16> to vector<136x56xbf16>
    %cst_114 = arith.constant dense<0.000000e+00> : vector<136x128xf32>
    %153 = tpu.matmul %152, %150, %cst_114 {dimension_numbers = #tpu.dot_dimension_numbers<[1], [0], [0], [1], [0, 0, 1, 1], [], []>} : vector<136x56xbf16>, vector<56x128xbf16>, vector<136x128xf32> -> vector<136x128xf32>
    %154 = arith.addf %149, %153 : vector<136x128xf32>
    %155 = vector.extract_strided_slice %125 {offsets = [0, 16], sizes = [56, 128], strides = [1, 1]} : vector<56x146xbf16> to vector<56x128xbf16>
    %c6_115 = arith.constant 6 : index
    %c0_116 = arith.constant 0 : index
    %c0_117 = arith.constant 0 : index
    %156 = vector.load %arg9[%c6_115, %c0_116, %c0_117] : memref<9x136x56xbf16, #tpu.memory_space<vmem>>, vector<1x136x56xbf16>
    %157 = vector.shape_cast %156 : vector<1x136x56xbf16> to vector<136x56xbf16>
    %cst_118 = arith.constant dense<0.000000e+00> : vector<136x128xf32>
    %158 = tpu.matmul %157, %155, %cst_118 {dimension_numbers = #tpu.dot_dimension_numbers<[1], [0], [0], [1], [0, 0, 1, 1], [], []>} : vector<136x56xbf16>, vector<56x128xbf16>, vector<136x128xf32> -> vector<136x128xf32>
    %159 = arith.addf %154, %158 : vector<136x128xf32>
    %160 = vector.extract_strided_slice %125 {offsets = [0, 17], sizes = [56, 128], strides = [1, 1]} : vector<56x146xbf16> to vector<56x128xbf16>
    %c7_119 = arith.constant 7 : index
    %c0_120 = arith.constant 0 : index
    %c0_121 = arith.constant 0 : index
    %161 = vector.load %arg9[%c7_119, %c0_120, %c0_121] : memref<9x136x56xbf16, #tpu.memory_space<vmem>>, vector<1x136x56xbf16>
    %162 = vector.shape_cast %161 : vector<1x136x56xbf16> to vector<136x56xbf16>
    %cst_122 = arith.constant dense<0.000000e+00> : vector<136x128xf32>
    %163 = tpu.matmul %162, %160, %cst_122 {dimension_numbers = #tpu.dot_dimension_numbers<[1], [0], [0], [1], [0, 0, 1, 1], [], []>} : vector<136x56xbf16>, vector<56x128xbf16>, vector<136x128xf32> -> vector<136x128xf32>
    %164 = arith.addf %159, %163 : vector<136x128xf32>
    %165 = vector.extract_strided_slice %125 {offsets = [0, 18], sizes = [56, 128], strides = [1, 1]} : vector<56x146xbf16> to vector<56x128xbf16>
    %c8_123 = arith.constant 8 : index
    %c0_124 = arith.constant 0 : index
    %c0_125 = arith.constant 0 : index
    %166 = vector.load %arg9[%c8_123, %c0_124, %c0_125] : memref<9x136x56xbf16, #tpu.memory_space<vmem>>, vector<1x136x56xbf16>
    %167 = vector.shape_cast %166 : vector<1x136x56xbf16> to vector<136x56xbf16>
    %cst_126 = arith.constant dense<0.000000e+00> : vector<136x128xf32>
    %168 = tpu.matmul %167, %165, %cst_126 {dimension_numbers = #tpu.dot_dimension_numbers<[1], [0], [0], [1], [0, 0, 1, 1], [], []>} : vector<136x56xbf16>, vector<56x128xbf16>, vector<136x128xf32> -> vector<136x128xf32>
    %169 = arith.addf %164, %168 : vector<136x128xf32>
    %c0_127 = arith.constant 0 : index
    %c0_128 = arith.constant 0 : index
    %170 = vector.load %arg10[%c0_127, %c0_128] : memref<136x1xf32, #tpu.memory_space<vmem>>, vector<136x1xf32>
    %171 = vector.broadcast %170 : vector<136x1xf32> to vector<136x128xf32>
    %172 = arith.mulf %169, %171 : vector<136x128xf32>
    %c0_129 = arith.constant 0 : index
    %c0_130 = arith.constant 0 : index
    %173 = vector.load %arg11[%c0_129, %c0_130] : memref<136x1xf32, #tpu.memory_space<vmem>>, vector<136x1xf32>
    %174 = vector.broadcast %173 : vector<136x1xf32> to vector<136x128xf32>
    %175 = arith.addf %172, %174 : vector<136x128xf32>
    %cst_131 = arith.constant 0.000000e+00 : f32
    %176 = vector.broadcast %cst_131 : f32 to vector<136x128xf32>
    %177 = arith.maximumf %175, %176 : vector<136x128xf32>
    %178 = arith.truncf %177 : vector<136x128xf32> to vector<136x128xbf16>
    %c0_132 = arith.constant 0 : index
    %c0_133 = arith.constant 0 : index
    %179 = vector.load %arg12[%c0_132, %c0_133] : memref<128x62xbf16, #tpu.memory_space<vmem>>, vector<128x62xbf16>
    %cst_134 = arith.constant dense<0.000000e+00> : vector<136x62xf32>
    %180 = tpu.matmul %178, %179, %cst_134 {dimension_numbers = #tpu.dot_dimension_numbers<[1], [0], [0], [1], [0, 0, 1, 1], [], []>} : vector<136x128xbf16>, vector<128x62xbf16>, vector<136x62xf32> -> vector<136x62xf32>
    %c0_135 = arith.constant 0 : index
    %c0_136 = arith.constant 0 : index
    %181 = vector.load %arg16[%c0_135, %c0_136] : memref<16x136xbf16, #tpu.memory_space<vmem>>, vector<16x136xbf16>
    %182 = arith.truncf %180 : vector<136x62xf32> to vector<136x62xbf16>
    %cst_137 = arith.constant dense<0.000000e+00> : vector<16x62xf32>
    %183 = tpu.matmul %181, %182, %cst_137 {dimension_numbers = #tpu.dot_dimension_numbers<[1], [0], [0], [1], [0, 0, 1, 1], [], []>} : vector<16x136xbf16>, vector<136x62xbf16>, vector<16x62xf32> -> vector<16x62xf32>
    %c0_138 = arith.constant 0 : index
    %c0_139 = arith.constant 0 : index
    %184 = vector.load %arg17[%c0_138, %c0_139] : memref<16x1xf32, #tpu.memory_space<vmem>>, vector<16x1xf32>
    %185 = vector.broadcast %184 : vector<16x1xf32> to vector<16x62xf32>
    %186 = arith.addf %183, %185 : vector<16x62xf32>
    %cst_140 = arith.constant 0.000000e+00 : f32
    %187 = vector.broadcast %cst_140 : f32 to vector<16x62xf32>
    %188 = arith.maximumf %186, %187 : vector<16x62xf32>
    %189 = arith.truncf %188 : vector<16x62xf32> to vector<16x62xbf16>
    %c0_141 = arith.constant 0 : index
    %c0_142 = arith.constant 0 : index
    %190 = vector.load %arg18[%c0_141, %c0_142] : memref<62x512xbf16, #tpu.memory_space<vmem>>, vector<62x512xbf16>
    %cst_143 = arith.constant dense<0.000000e+00> : vector<16x512xf32>
    %191 = tpu.matmul %189, %190, %cst_143 {dimension_numbers = #tpu.dot_dimension_numbers<[1], [0], [0], [1], [0, 0, 1, 1], [], []>} : vector<16x62xbf16>, vector<62x512xbf16>, vector<16x512xf32> -> vector<16x512xf32>
    %c0_144 = arith.constant 0 : index
    %c0_145 = arith.constant 0 : index
    %192 = vector.load %arg23[%c0_144, %c0_145] : memref<16x512xf32, #tpu.memory_space<vmem>>, vector<16x512xf32>
    tpu.vector_store %arg23[%c0_144, %c0_145], %191 {strides = array<i32>} : memref<16x512xf32, #tpu.memory_space<vmem>>, vector<16x512xf32>,
    %193 = arith.truncf %180 : vector<136x62xf32> to vector<136x62xbf16>
    %194 = vector.extract_strided_slice %193 {offsets = [0, 0], sizes = [136, 50], strides = [1, 1]} : vector<136x62xbf16> to vector<136x50xbf16>
    %c0_146 = arith.constant 0 : index
    %c0_147 = arith.constant 0 : index
    %c0_148 = arith.constant 0 : index
    %195 = vector.load %arg19[%c0_146, %c0_147, %c0_148] : memref<9x10x136xbf16, #tpu.memory_space<vmem>>, vector<1x10x136xbf16>
    %196 = vector.shape_cast %195 : vector<1x10x136xbf16> to vector<10x136xbf16>
    %cst_149 = arith.constant dense<0.000000e+00> : vector<10x50xf32>
    %197 = tpu.matmul %196, %194, %cst_149 {dimension_numbers = #tpu.dot_dimension_numbers<[1], [0], [0], [1], [0, 0, 1, 1], [], []>} : vector<10x136xbf16>, vector<136x50xbf16>, vector<10x50xf32> -> vector<10x50xf32>
    %198 = vector.extract_strided_slice %193 {offsets = [0, 1], sizes = [136, 50], strides = [1, 1]} : vector<136x62xbf16> to vector<136x50xbf16>
    %c1_150 = arith.constant 1 : index
    %c0_151 = arith.constant 0 : index
    %c0_152 = arith.constant 0 : index
    %199 = vector.load %arg19[%c1_150, %c0_151, %c0_152] : memref<9x10x136xbf16, #tpu.memory_space<vmem>>, vector<1x10x136xbf16>
    %200 = vector.shape_cast %199 : vector<1x10x136xbf16> to vector<10x136xbf16>
    %cst_153 = arith.constant dense<0.000000e+00> : vector<10x50xf32>
    %201 = tpu.matmul %200, %198, %cst_153 {dimension_numbers = #tpu.dot_dimension_numbers<[1], [0], [0], [1], [0, 0, 1, 1], [], []>} : vector<10x136xbf16>, vector<136x50xbf16>, vector<10x50xf32> -> vector<10x50xf32>
    %202 = arith.addf %197, %201 : vector<10x50xf32>
    %203 = vector.extract_strided_slice %193 {offsets = [0, 2], sizes = [136, 50], strides = [1, 1]} : vector<136x62xbf16> to vector<136x50xbf16>
    %c2_154 = arith.constant 2 : index
    %c0_155 = arith.constant 0 : index
    %c0_156 = arith.constant 0 : index
    %204 = vector.load %arg19[%c2_154, %c0_155, %c0_156] : memref<9x10x136xbf16, #tpu.memory_space<vmem>>, vector<1x10x136xbf16>
    %205 = vector.shape_cast %204 : vector<1x10x136xbf16> to vector<10x136xbf16>
    %cst_157 = arith.constant dense<0.000000e+00> : vector<10x50xf32>
    %206 = tpu.matmul %205, %203, %cst_157 {dimension_numbers = #tpu.dot_dimension_numbers<[1], [0], [0], [1], [0, 0, 1, 1], [], []>} : vector<10x136xbf16>, vector<136x50xbf16>, vector<10x50xf32> -> vector<10x50xf32>
    %207 = arith.addf %202, %206 : vector<10x50xf32>
    %208 = vector.extract_strided_slice %193 {offsets = [0, 5], sizes = [136, 50], strides = [1, 1]} : vector<136x62xbf16> to vector<136x50xbf16>
    %c3_158 = arith.constant 3 : index
    %c0_159 = arith.constant 0 : index
    %c0_160 = arith.constant 0 : index
    %209 = vector.load %arg19[%c3_158, %c0_159, %c0_160] : memref<9x10x136xbf16, #tpu.memory_space<vmem>>, vector<1x10x136xbf16>
    %210 = vector.shape_cast %209 : vector<1x10x136xbf16> to vector<10x136xbf16>
    %cst_161 = arith.constant dense<0.000000e+00> : vector<10x50xf32>
    %211 = tpu.matmul %210, %208, %cst_161 {dimension_numbers = #tpu.dot_dimension_numbers<[1], [0], [0], [1], [0, 0, 1, 1], [], []>} : vector<10x136xbf16>, vector<136x50xbf16>, vector<10x50xf32> -> vector<10x50xf32>
    %212 = arith.addf %207, %211 : vector<10x50xf32>
    %213 = vector.extract_strided_slice %193 {offsets = [0, 6], sizes = [136, 50], strides = [1, 1]} : vector<136x62xbf16> to vector<136x50xbf16>
    %c4_162 = arith.constant 4 : index
    %c0_163 = arith.constant 0 : index
    %c0_164 = arith.constant 0 : index
    %214 = vector.load %arg19[%c4_162, %c0_163, %c0_164] : memref<9x10x136xbf16, #tpu.memory_space<vmem>>, vector<1x10x136xbf16>
    %215 = vector.shape_cast %214 : vector<1x10x136xbf16> to vector<10x136xbf16>
    %cst_165 = arith.constant dense<0.000000e+00> : vector<10x50xf32>
    %216 = tpu.matmul %215, %213, %cst_165 {dimension_numbers = #tpu.dot_dimension_numbers<[1], [0], [0], [1], [0, 0, 1, 1], [], []>} : vector<10x136xbf16>, vector<136x50xbf16>, vector<10x50xf32> -> vector<10x50xf32>
    %217 = arith.addf %212, %216 : vector<10x50xf32>
    %218 = vector.extract_strided_slice %193 {offsets = [0, 7], sizes = [136, 50], strides = [1, 1]} : vector<136x62xbf16> to vector<136x50xbf16>
    %c5_166 = arith.constant 5 : index
    %c0_167 = arith.constant 0 : index
    %c0_168 = arith.constant 0 : index
    %219 = vector.load %arg19[%c5_166, %c0_167, %c0_168] : memref<9x10x136xbf16, #tpu.memory_space<vmem>>, vector<1x10x136xbf16>
    %220 = vector.shape_cast %219 : vector<1x10x136xbf16> to vector<10x136xbf16>
    %cst_169 = arith.constant dense<0.000000e+00> : vector<10x50xf32>
    %221 = tpu.matmul %220, %218, %cst_169 {dimension_numbers = #tpu.dot_dimension_numbers<[1], [0], [0], [1], [0, 0, 1, 1], [], []>} : vector<10x136xbf16>, vector<136x50xbf16>, vector<10x50xf32> -> vector<10x50xf32>
    %222 = arith.addf %217, %221 : vector<10x50xf32>
    %223 = vector.extract_strided_slice %193 {offsets = [0, 10], sizes = [136, 50], strides = [1, 1]} : vector<136x62xbf16> to vector<136x50xbf16>
    %c6_170 = arith.constant 6 : index
    %c0_171 = arith.constant 0 : index
    %c0_172 = arith.constant 0 : index
    %224 = vector.load %arg19[%c6_170, %c0_171, %c0_172] : memref<9x10x136xbf16, #tpu.memory_space<vmem>>, vector<1x10x136xbf16>
    %225 = vector.shape_cast %224 : vector<1x10x136xbf16> to vector<10x136xbf16>
    %cst_173 = arith.constant dense<0.000000e+00> : vector<10x50xf32>
    %226 = tpu.matmul %225, %223, %cst_173 {dimension_numbers = #tpu.dot_dimension_numbers<[1], [0], [0], [1], [0, 0, 1, 1], [], []>} : vector<10x136xbf16>, vector<136x50xbf16>, vector<10x50xf32> -> vector<10x50xf32>
    %227 = arith.addf %222, %226 : vector<10x50xf32>
    %228 = vector.extract_strided_slice %193 {offsets = [0, 11], sizes = [136, 50], strides = [1, 1]} : vector<136x62xbf16> to vector<136x50xbf16>
    %c7_174 = arith.constant 7 : index
    %c0_175 = arith.constant 0 : index
    %c0_176 = arith.constant 0 : index
    %229 = vector.load %arg19[%c7_174, %c0_175, %c0_176] : memref<9x10x136xbf16, #tpu.memory_space<vmem>>, vector<1x10x136xbf16>
    %230 = vector.shape_cast %229 : vector<1x10x136xbf16> to vector<10x136xbf16>
    %cst_177 = arith.constant dense<0.000000e+00> : vector<10x50xf32>
    %231 = tpu.matmul %230, %228, %cst_177 {dimension_numbers = #tpu.dot_dimension_numbers<[1], [0], [0], [1], [0, 0, 1, 1], [], []>} : vector<10x136xbf16>, vector<136x50xbf16>, vector<10x50xf32> -> vector<10x50xf32>
    %232 = arith.addf %227, %231 : vector<10x50xf32>
    %233 = vector.extract_strided_slice %193 {offsets = [0, 12], sizes = [136, 50], strides = [1, 1]} : vector<136x62xbf16> to vector<136x50xbf16>
    %c8_178 = arith.constant 8 : index
    %c0_179 = arith.constant 0 : index
    %c0_180 = arith.constant 0 : index
    %234 = vector.load %arg19[%c8_178, %c0_179, %c0_180] : memref<9x10x136xbf16, #tpu.memory_space<vmem>>, vector<1x10x136xbf16>
    %235 = vector.shape_cast %234 : vector<1x10x136xbf16> to vector<10x136xbf16>
    %cst_181 = arith.constant dense<0.000000e+00> : vector<10x50xf32>
    %236 = tpu.matmul %235, %233, %cst_181 {dimension_numbers = #tpu.dot_dimension_numbers<[1], [0], [0], [1], [0, 0, 1, 1], [], []>} : vector<10x136xbf16>, vector<136x50xbf16>, vector<10x50xf32> -> vector<10x50xf32>
    %237 = arith.addf %232, %236 : vector<10x50xf32>
    %238 = arith.truncf %237 : vector<10x50xf32> to vector<10x50xbf16>
    %c0_182 = arith.constant 0 : index
    %c0_183 = arith.constant 0 : index
    %239 = vector.load %arg21[%c0_182, %c0_183] : memref<50x2xbf16, #tpu.memory_space<vmem>>, vector<50x2xbf16>
    %cst_184 = arith.constant dense<0.000000e+00> : vector<10x2xf32>
    %240 = tpu.matmul %238, %239, %cst_184 {dimension_numbers = #tpu.dot_dimension_numbers<[1], [0], [0], [1], [0, 0, 1, 1], [], []>} : vector<10x50xbf16>, vector<50x2xbf16>, vector<10x2xf32> -> vector<10x2xf32>
    %c0_185 = arith.constant 0 : index
    %c0_186 = arith.constant 0 : index
    %241 = vector.load %arg20[%c0_185, %c0_186] : memref<10x1xf32, #tpu.memory_space<vmem>>, vector<10x1xf32>
    %242 = vector.broadcast %241 : vector<10x1xf32> to vector<10x2xf32>
    %243 = arith.addf %240, %242 : vector<10x2xf32>
    %c0_187 = arith.constant 0 : index
    %c0_188 = arith.constant 0 : index
    %244 = vector.load %arg24[%c0_187, %c0_188] : memref<10x2xf32, #tpu.memory_space<vmem>>, vector<10x2xf32>
    tpu.vector_store %arg24[%c0_187, %c0_188], %243 {strides = array<i32>} : memref<10x2xf32, #tpu.memory_space<vmem>>, vector<10x2xf32>,
    return
  }
}

</mosaic_0001>

<bundles_post_ra>
// kernel: forward.1
= control target key start
LH: loop header
LB: loop body
LE: loop exit
PB: predicated region body
PF: predicated region fallthrough
CT: control target
= control target key end

     0   :  { %v20847_v3 = vmov 0   ;;  %s20848_s30 = smov 127   ;;  %s20849_s29 = smov 126   ;;  %vm149_vm0 = vcmask 1039360   ;;  %vm167_vm1 = vcmask 1043456   ;;  %vm160_vm2 = vcmask 64512   ;;  %s26537_s0 = inlined_call_operand.vmem [shape: f32[8,1406], index: 0, kind: input, shape index: {}]   ;;  %s26538_s1 = inlined_call_operand.vmem [shape: bf16[9,28,8], index: 1, kind: input, shape index: {}]   ;;  %s26539_s2 = inlined_call_operand.vmem [shape: f32[28,1], index: 2, kind: input, shape index: {}]   ;;  %s26540_s3 = inlined_call_operand.vmem [shape: f32[28,1], index: 3, kind: input, shape index: {}]   ;;  %s26541_s4 = inlined_call_operand.vmem [shape: bf16[1352,422], index: 4, kind: input, shape index: {}]   ;;  %s26542_s14 = inlined_call_operand.vmem [shape: f32[16,1], index: 14, kind: input, shape index: {}]   ;;  %s26543_s13 = inlined_call_operand.vmem [shape: bf16[16,28], index: 13, kind: input, shape index: {}]   ;;  %s26544_s15 = inlined_call_operand.vmem [shape: bf16[422,1568], index: 15, kind: input, shape index: {}]   ;;  %s26545_s6 = inlined_call_operand.vmem [shape: f32[56,1], index: 6, kind: input, shape index: {}]   ;;  %s26546_s7 = inlined_call_operand.vmem [shape: f32[56,1], index: 7, kind: input, shape index: {}]   ;;  %s26547_s5 = inlined_call_operand.vmem [shape: bf16[9,56,28], index: 5, kind: input, shape index: {}]   ;;  %s26548_s22 = inlined_call_operand.vmem [shape: f32[16,1568], index: 22, kind: output, shape index: {0}]   ;;  %s26549_s8 = inlined_call_operand.vmem [shape: bf16[392,146], index: 8, kind: input, shape index: {}]   ;;  %s26550_s9 = inlined_call_operand.vmem [shape: bf16[9,136,56], index: 9, kind: input, shape index: {}]   ;;  %s26551_s10 = inlined_call_operand.vmem [shape: f32[136,1], index: 10, kind: input, shape index: {}]   ;;  %s26552_s11 = inlined_call_operand.vmem [shape: f32[136,1], index: 11, kind: input, shape index: {}]   ;;  %s26553_s17 = inlined_call_operand.vmem [shape: f32[16,1], index: 17, kind: input, shape index: {}]   ;;  %s26554_s12 = inlined_call_operand.vmem [shape: bf16[128,62], index: 12, kind: input, shape index: {}]   ;;  %s26555_s16 = inlined_call_operand.vmem [shape: bf16[16,136], index: 16, kind: input, shape index: {}]   ;;  %s26556_s18 = inlined_call_operand.vmem [shape: bf16[62,512], index: 18, kind: input, shape index: {}]   ;;  %s26557_s20 = inlined_call_operand.vmem [shape: f32[10,1], index: 20, kind: input, shape index: {}]   ;;  %s26558_s19 = inlined_call_operand.vmem [shape: bf16[9,10,136], index: 19, kind: input, shape index: {}]   ;;  %s26559_s21 = inlined_call_operand.vmem [shape: bf16[50,2], index: 21, kind: input, shape index: {}]   ;;  %s26560_s23 = inlined_call_operand.vmem [shape: f32[16,512], index: 23, kind: output, shape index: {1}]   ;;  %s26561_s24 = inlined_call_operand.vmem [shape: f32[10,2], index: 24, kind: output, shape index: {2}]  }
   0x1   :  { %26570 = sst [smem:[#allocation2_spill]] %s26537_s0  ;;  %233 = vmatprep.mubr.bf16.mxu0 %v20847_v3  ;;  %286 = vmatprep.mubr.bf16.mxu1 %v20847_v3  ;;  %s20855_s25 = smov 74   ;;  %vm915_vm3 = vcmask 1031168   ;;  %vm1360_vm4 = vcmask 834560   ;;  %vm1805_vm5 = vcmask 826368   ;;  %vm2250_vm6 = vcmask 818176  }
   0x2   :  { %26571 = sst [smem:[#allocation3_spill]] %s26538_s1  ;;  %s26579_s27 = sld [smem:[#allocation2_spill]]  ;;  %19555 = vset.pattern.permute.xlu1 %v20847_v3  ;;  %19554 = vset.pattern.permute.xlu0 %v20847_v3  ;;  %vm2695_vm7 = vcmask 621568   ;;  %vm3140_vm8 = vcmask 613376   ;;  %vm3585_vm9 = vcmask 605184   ;;  %vm6223_vm10 = vcmask 588800  }
   0x3   :  { %26572 = sst [smem:[#allocation4_spill]] %s26539_s2  ;;  %s20853_s1 = smov 76   ;;  %vm6909_vm11 = vcmask 1045504   ;;  %vm6905_vm12 = vcmask 228352   ;;  %vm9140_vm13 = vcmask 310272   ;;  %vm9144_vm14 = vcmask 1042432  }
   0x4   :  { %26573 = sst [smem:[#allocation5_spill]] %s26540_s3  ;;  %s26580_s28 = sld [smem:[#allocation3_spill]]  ;;  %vm10502_vm15 = vcmask 932864  }
   0x5   :  { %26574 = sst [smem:[#allocation6_spill]] %s26541_s4  ;;  %s20852_s4 = smov 100  }
   0x6   :  { %26575 = sst [smem:[#allocation7_spill]] %s26542_s14  ;;  %s26582_s3 = sld [smem:[#allocation5_spill]] }
   0x7   :  { %26576 = sst [smem:[#allocation8_spill]] %s26543_s13  ;;  %s20854_s13 = smov 75  }
   0x8   :  { %26577 = sst [smem:[#allocation9_spill]] %s26544_s15  ;;  %v77_v0 = vld [vmem:[%s26579_s27 + $0x10] sm:$0xff]  ;;  %v75_v1 = vld [vmem:[%s26579_s27] sm:$0xff]  ;;  %v76_v6 = vld [vmem:[%s26579_s27 + $0x8] sm:$0xff]  ;;  %s26583_s26 = sld [smem:[#allocation7_spill]] }
   0x9   :  { %26578 = sst [smem:[#allocation10_spill]] %s26545_s6  ;;  %v79_v2 = vld [vmem:[%s26579_s27 + $0x20] sm:$0xff]  ;;  %v21009_v4 = vpack.c.bf16 %v77_v0, %v77_v0  ;;  %v21011_v5 = vpack.c.bf16 %v75_v1, %v75_v1  ;;  %v21024_v8 = vpack.c.bf16 %v76_v6, %v76_v6  ;;  %v81_v9 = vld [vmem:[%s26579_s27 + $0x30] sm:$0xff]  ;;  %v80_v10 = vld [vmem:[%s26579_s27 + $0x28] sm:$0xff]  ;;  %s20850_s6 = smov 102  }
   0xa   :  { %v21022_v7 = vpack.c.bf16 %v79_v2, %v79_v2  ;;  %v84_v11 = vld [vmem:[%s26579_s27 + $0x48] sm:$0xff]  ;;  %v83_v12 = vld [vmem:[%s26579_s27 + $0x40] sm:$0xff]  ;;  %v21042_v13 = vpack.c.bf16 %v81_v9, %v81_v9  ;;  %v21044_v14 = vpack.c.bf16 %v80_v10, %v80_v10  ;;  %v85_v15 = vld [vmem:[%s26579_s27 + $0x50] sm:$0xff]  ;;  %s26585_s2 = sld [smem:[#allocation8_spill]]  ;;  %s20857_s0 = smov 113  }
   0xb   :  { %131 = vrot.lane.b32.xlu1 %v21009_v4, %s20848_s30  ;;  %127 = vrot.lane.b32.xlu0 %v21011_v5, %s20848_s30  ;;  %v21053_v16 = vpack.c.bf16 %v84_v11, %v84_v11  ;;  %v21055_v17 = vpack.c.bf16 %v83_v12, %v83_v12  ;;  %v21061_v18 = vpack.c.bf16 %v85_v15, %v85_v15  ;;  %v78_v19 = vld [vmem:[%s26579_s27 + $0x18] sm:$0xff]  ;;  %v21162_v30 = vld [vmem:[%s26580_s28 + $0x10] sm:$0xff]   ;;  %v532_v58 = vsel %vm167_vm1, %v21011_v5, 0 }
   0xc   :  { %v21076_v20 = vpack.c.bf16 %v78_v19, %v78_v19  ;;  %v82_v21 = vld [vmem:[%s26579_s27 + $0x38] sm:$0xff]  ;;  %s20851_s27 = smov 101   ;;  %v21275_v63 = vld [vmem:[%s26580_s28] sm:$0xff]   ;;  %v544_v0 = vsel %vm167_vm1, %v21022_v7, 0  ;;  %v21299_v6 = vld [vmem:[%s26580_s28 + $0x8] sm:$0x3f]  }
   0xd   :  { %v21089_v22 = vpack.c.bf16 %v82_v21, %v82_v21  ;;  %v21182_v38 = vld [vmem:[%s26580_s28 + $0x18] sm:$0x3f]   ;;  %v538_v9 = vsel %vm167_vm1, %v21009_v4, 0  ;;  %v550_v12 = vsel %vm167_vm1, %v21042_v13, 0 }
   0xf   :  { %135 = vrot.lane.b32.xlu1 %v21022_v7, %s20848_s30  ;;  %129 = vrot.lane.b32.xlu0 %v21024_v8, %s20848_s30 }
  0x13   :  { %139 = vrot.lane.b32.xlu1 %v21042_v13, %s20848_s30  ;;  %137 = vrot.lane.b32.xlu0 %v21044_v14, %s20848_s30 }
  0x17   :  { %145 = vrot.lane.b32.xlu1 %v21053_v16, %s20848_s30  ;;  %143 = vrot.lane.b32.xlu0 %v21055_v17, %s20848_s30 }
  0x1b   :  { %893 = vrot.lane.b32.xlu1 %v21011_v5, %s20849_s29  ;;  %147 = vrot.lane.b32.xlu0 %v21061_v18, %s20848_s30 }
  0x1f   :  { %897 = vrot.lane.b32.xlu1 %v21009_v4, %s20849_s29  ;;  %895 = vrot.lane.b32.xlu0 %v21024_v8, %s20849_s29 }
  0x23   :  { %903 = vrot.lane.b32.xlu1 %v21044_v14, %s20849_s29  ;;  %901 = vrot.lane.b32.xlu0 %v21022_v7, %s20849_s29 }
  0x27   :  { %133 = vrot.lane.b32.xlu1 %v21076_v20, %s20848_s30  ;;  %905 = vrot.lane.b32.xlu0 %v21042_v13, %s20849_s29 }
  0x2b   :  { %911 = vrot.lane.b32.xlu1 %v21053_v16, %s20849_s29  ;;  %909 = vrot.lane.b32.xlu0 %v21055_v17, %s20849_s29 }
  0x2f   :  { %141 = vrot.lane.b32.xlu1 %v21089_v22, %s20848_s30  ;;  %913 = vrot.lane.b32.xlu0 %v21061_v18, %s20849_s29 }
  0x33   :  { %1338 = vrot.lane.b32.xlu0 %v21011_v5, %s20850_s6  ;;  %1340 = vrot.lane.b32.xlu1 %v21024_v8, %s20850_s6 }
  0x37   :  { %1342 = vrot.lane.b32.xlu0 %v21009_v4, %s20850_s6  ;;  %1346 = vrot.lane.b32.xlu1 %v21022_v7, %s20850_s6 }
  0x3b   :  { %1348 = vrot.lane.b32.xlu0 %v21044_v14, %s20850_s6  ;;  %1350 = vrot.lane.b32.xlu1 %v21042_v13, %s20850_s6 }
  0x3f   :  { %1354 = vrot.lane.b32.xlu0 %v21055_v17, %s20850_s6  ;;  %1356 = vrot.lane.b32.xlu1 %v21053_v16, %s20850_s6 }
  0x43   :  { %1358 = vrot.lane.b32.xlu0 %v21061_v18, %s20850_s6  ;;  %1783 = vrot.lane.b32.xlu1 %v21011_v5, %s20851_s27 }
  0x47   :  { %1785 = vrot.lane.b32.xlu0 %v21024_v8, %s20851_s27  ;;  %1787 = vrot.lane.b32.xlu1 %v21009_v4, %s20851_s27 }
  0x4b   :  { %899 = vrot.lane.b32.xlu0 %v21076_v20, %s20849_s29  ;;  %1791 = vrot.lane.b32.xlu1 %v21022_v7, %s20851_s27 }
  0x4f   :  { %1793 = vrot.lane.b32.xlu0 %v21044_v14, %s20851_s27  ;;  %1795 = vrot.lane.b32.xlu1 %v21042_v13, %s20851_s27 }
  0x53   :  { %907 = vrot.lane.b32.xlu0 %v21089_v22, %s20849_s29  ;;  %1799 = vrot.lane.b32.xlu1 %v21055_v17, %s20851_s27 }
  0x57   :  { %1803 = vrot.lane.b32.xlu1 %v21061_v18, %s20851_s27  ;;  %1801 = vrot.lane.b32.xlu0 %v21053_v16, %s20851_s27 }
  0x5b   :  { %2230 = vrot.lane.b32.xlu1 %v21024_v8, %s20852_s4  ;;  %2228 = vrot.lane.b32.xlu0 %v21011_v5, %s20852_s4 }
  0x5f   :  { %1344 = vrot.lane.b32.xlu1 %v21076_v20, %s20850_s6  ;;  %2232 = vrot.lane.b32.xlu0 %v21009_v4, %s20852_s4 }
  0x63   :  { %2238 = vrot.lane.b32.xlu1 %v21044_v14, %s20852_s4  ;;  %2236 = vrot.lane.b32.xlu0 %v21022_v7, %s20852_s4 }
  0x67   :  { %1352 = vrot.lane.b32.xlu1 %v21089_v22, %s20850_s6  ;;  %2240 = vrot.lane.b32.xlu0 %v21042_v13, %s20852_s4  ;;  %s26584_s6 = sld [smem:[#allocation6_spill]] }
  0x6b   :  { %2246 = vrot.lane.b32.xlu1 %v21053_v16, %s20852_s4  ;;  %2244 = vrot.lane.b32.xlu0 %v21055_v17, %s20852_s4 }
  0x6f   :  { %1789 = vrot.lane.b32.xlu1 %v21076_v20, %s20851_s27  ;;  %2248 = vrot.lane.b32.xlu0 %v21061_v18, %s20852_s4 }
  0x73   :  { %2675 = vrot.lane.b32.xlu1 %v21024_v8, %s20853_s1  ;;  %2673 = vrot.lane.b32.xlu0 %v21011_v5, %s20853_s1 }
  0x77   :  { %1797 = vrot.lane.b32.xlu1 %v21089_v22, %s20851_s27  ;;  %2677 = vrot.lane.b32.xlu0 %v21009_v4, %s20853_s1  ;;  %s20859_s27 = smov 99  }
  0x7b   :  { %2681 = vrot.lane.b32.xlu0 %v21022_v7, %s20853_s1  ;;  %2683 = vrot.lane.b32.xlu1 %v21044_v14, %s20853_s1 }
  0x7d   :  { %v132_v23 = vpop.permute.xlu1 %131  ;;  %v128_v24 = vpop.permute.xlu0 %127 }
  0x7f   :  { %2685 = vrot.lane.b32.xlu0 %v21042_v13, %s20853_s1  ;;  %2689 = vrot.lane.b32.xlu1 %v21055_v17, %s20853_s1 }
  0x81   :  { %v136_v25 = vpop.permute.xlu1 %135  ;;  %v130_v26 = vpop.permute.xlu0 %129 }
  0x82   :  { %v151_v27 = vsel %vm149_vm0, %v130_v26, %v132_v23  ;;  %v150_v28 = vsel %vm149_vm0, %v128_v24, %v130_v26 }
  0x83   :  { %16245 = vmatprep.subr.msk.bf16.mxu0 %vm167_vm1, %v151_v27  ;;  %v169_v29 = vsel %vm167_vm1, %v150_v28, 0  ;;  %2691 = vrot.lane.b32.xlu0 %v21053_v16, %s20853_s1  ;;  %v19560_v27 = vld [vmem:[%s26580_s28 + $0x20] sm:$0xff]  }
  0x84   :  { %202 = vmatpush1.bf16.msra.mxu0 %v169_v29  ;;  %2693 = vrot.lane.b32.xlu1 %v21061_v18, %s20853_s1 }
  0x85   :  { %v140_v31 = vpop.permute.xlu1 %139  ;;  %v138_v32 = vpop.permute.xlu0 %137 }
  0x86   :  { %v154_v33 = vsel %vm149_vm0, %v136_v25, %v138_v32  ;;  %v155_v34 = vsel %vm149_vm0, %v138_v32, %v140_v31 }
  0x87   :  { %16246 = vmatmul.mubr.msk.bf16.vlgmr.msra.gmra.mrb[0].mxu0 %vm160_vm2, %v21162_v30  ;;  %16251 = vmatprep.subr.msk.bf16.mxu0 %vm167_vm1, %v155_v34  ;;  %v181_v35 = vsel %vm167_vm1, %v154_v33, 0 }
  0x88   :  { %308 = vmatpush1.bf16.msra.mxu0 %v181_v35  ;;  %243 = vmatprep.mubr.bf16.mxu0 %v20847_v3 }
  0x89   :  { %v146_v36 = vpop.permute.xlu1 %145  ;;  %v144_v37 = vpop.permute.xlu0 %143  ;;  %2234 = vrot.lane.b32.xlu0 %v21076_v20, %s20852_s4  ;;  %3118 = vrot.lane.b32.xlu1 %v21011_v5, %s20854_s13 }
  0x8a   :  { %v158_v43 = vsel %vm149_vm0, %v144_v37, %v146_v36 }
  0x8b   :  { %v193_v46 = vsel %vm167_vm1, %v158_v43, 0 }
  0x8d   :  { %v21184_v39 = vpop.permute.xlu1 %893  ;;  %v148_v40 = vpop.permute.xlu0 %147  ;;  %3120 = vrot.lane.b32.xlu0 %v21024_v8, %s20854_s13  ;;  %3122 = vrot.lane.b32.xlu1 %v21009_v4, %s20854_s13 }
  0x8e   :  { %v159_v41 = vsel %vm149_vm0, %v146_v36, %v148_v40  ;;  %v199_v61 = vsel %vm167_vm1, %v148_v40, 0 }
  0x8f   :  { %16247 = vmatmul.mubr.msk.bf16.gmra.mrb[4].mxu0 %vm160_vm2, %v21182_v38  ;;  %16257 = vmatprep.subr.msk.bf16.mxu0 %vm167_vm1, %v159_v41 }
  0x90   :  { %339 = vmatprep.mubr.bf16.mxu0 %v20847_v3 }
  0x91   :  { %v21195_v42 = vpop.permute.xlu1 %897  ;;  %2242 = vrot.lane.b32.xlu0 %v21089_v22, %s20852_s4  ;;  %3126 = vrot.lane.b32.xlu1 %v21022_v7, %s20854_s13  ;;  %v21202_v44 = vpop.permute.xlu0 %895 }
  0x92   :  { %v917_v15 = vsel %vm915_vm3, %v21202_v44, %v21195_v42 }
  0x95   :  { %v21204_v45 = vpop.permute.xlu1 %903  ;;  %3128 = vrot.lane.b32.xlu0 %v21044_v14, %s20854_s13  ;;  %3130 = vrot.lane.b32.xlu1 %v21042_v13, %s20854_s13  ;;  %v21220_v50 = vpop.permute.xlu0 %901 }
  0x96   :  { %v920_v26 = vsel %vm915_vm3, %v21220_v50, %v21204_v45 }
  0x97   :  { %16252 = vmatmul.mubr.msk.bf16.vlgmr.msra.gmra.mrb[8].mxu0 %vm160_vm2, %v21162_v30 }
  0x98   :  { %414 = vmatpush1.bf16.msra.mxu0 %v193_v46  ;;  %349 = vmatprep.mubr.bf16.mxu0 %v20847_v3 }
  0x99   :  { %v134_v47 = vpop.permute.xlu1 %133  ;;  %16264 = vmatprep.subr.msk.bf16.mxu0 %vm167_vm1, %v21024_v8  ;;  %2679 = vrot.lane.b32.xlu0 %v21076_v20, %s20853_s1  ;;  %v21238_v53 = vpop.permute.xlu0 %905 }
  0x9a   :  { %v153_v48 = vsel %vm149_vm0, %v134_v47, %v136_v25  ;;  %v152_v49 = vsel %vm149_vm0, %v132_v23, %v134_v47  ;;  %3134 = vrot.lane.b32.xlu1 %v21055_v17, %s20854_s13  ;;  %v562_v23 = vsel %vm167_vm1, %v21061_v18, 0  ;;  %v921_v24 = vsel %vm915_vm3, %v21204_v45, %v21238_v53 }
  0x9b   :  { %16248 = vmatprep.subr.msk.bf16.mxu1 %vm167_vm1, %v153_v48  ;;  %v175_v51 = vsel %vm167_vm1, %v152_v49, 0 }
  0x9c   :  { %255 = vmatpush1.bf16.msra.mxu1 %v175_v51 }
  0x9d   :  { %v21226_v52 = vpop.permute.xlu1 %911  ;;  %3136 = vrot.lane.b32.xlu0 %v21053_v16, %s20854_s13  ;;  %v21249_v59 = vpop.permute.xlu0 %909 }
  0x9e   :  { %3138 = vrot.lane.b32.xlu1 %v21061_v18, %s20854_s13 }
  0x9f   :  { %16249 = vmatmul.mubr.msk.bf16.vlgmr.msra.gmra.mrb[0].mxu1 %vm160_vm2, %v21162_v30  ;;  %16253 = vmatmul.mubr.msk.bf16.gmra.mrb[12].mxu0 %vm160_vm2, %v21182_v38 }
  0xa0   :  { %296 = vmatprep.mubr.bf16.mxu1 %v20847_v3  ;;  %445 = vmatprep.mubr.bf16.mxu0 %v20847_v3 }
  0xa1   :  { %v142_v54 = vpop.permute.xlu1 %141  ;;  %2687 = vrot.lane.b32.xlu0 %v21089_v22, %s20853_s1  ;;  %v21259_v60 = vpop.permute.xlu0 %913  ;;  %s26581_s1 = sld [smem:[#allocation4_spill]] }
  0xa2   :  { %v156_v55 = vsel %vm149_vm0, %v140_v31, %v142_v54  ;;  %v157_v56 = vsel %vm149_vm0, %v142_v54, %v144_v37  ;;  %3563 = vrot.lane.b32.xlu1 %v21011_v5, %s20855_s25  ;;  %v945_v31 = vsel %vm167_vm1, %v920_v26, 0  ;;  %v925_v34 = vsel %vm915_vm3, %v21226_v52, %v21259_v60  ;;  %v19561_v37 = vld [vmem:[%s26580_s28 + $0x28] sm:$0x3f]  }
  0xa3   :  { %16254 = vmatprep.subr.msk.bf16.mxu1 %vm167_vm1, %v157_v56  ;;  %v187_v57 = vsel %vm167_vm1, %v156_v55, 0  ;;  %v963_v45 = vsel %vm167_vm1, %v21259_v60, 0 }
  0xa4   :  { %361 = vmatpush1.bf16.msra.mxu1 %v187_v57 }
  0xa5   :  { %19519 = vmatprep.subr.msk.bf16.mxu1 %vm167_vm1, %v148_v40  ;;  %v21270_v62 = vpop.permute.xlu0 %1338  ;;  %v21290_v2 = vpop.permute.xlu1 %1340  ;;  %3565 = vrot.lane.b32.xlu0 %v21024_v8, %s20855_s25  ;;  %v556_v8 = vsel %vm167_vm1, %v21055_v17, 0  ;;  %v924_v40 = vsel %vm915_vm3, %v21249_v59, %v21226_v52 }
  0xa6   :  { %3567 = vrot.lane.b32.xlu1 %v21009_v4, %s20855_s25  ;;  %v957_v41 = vsel %vm167_vm1, %v924_v40, 0  ;;  %v1361_v47 = vsel %vm1360_vm4, %v21270_v62, %v21290_v2 }
  0xa7   :  { %16250 = vmatmul.mubr.msk.bf16.gmra.mrb[4].mxu1 %vm160_vm2, %v21182_v38  ;;  %16258 = vmatmul.mubr.msk.bf16.vlgmr.msra.gmra.mrb[16].mxu0 %vm160_vm2, %v21162_v30  ;;  %v1378_v49 = vsel %vm167_vm1, %v1361_v47, 0 }
  0xa8   :  { %565 = vmatpush1.bf16.msra.mxu0 %v532_v58  ;;  %392 = vmatprep.mubr.bf16.mxu1 %v20847_v3 }
  0xa9   :  { %455 = vmatprep.mubr.bf16.mxu0 %v20847_v3  ;;  %16270 = vmatprep.subr.msk.bf16.mxu0 %vm167_vm1, %v21044_v14  ;;  %v21285_v1 = vpop.permute.xlu0 %1342  ;;  %v21313_v5 = vpop.permute.xlu1 %1346 }
  0xaa   :  { %3124 = vrot.lane.b32.xlu0 %v21076_v20, %s20854_s13  ;;  %3132 = vrot.lane.b32.xlu1 %v21089_v22, %s20854_s13  ;;  %v1362_v43 = vsel %vm1360_vm4, %v21290_v2, %v21285_v1  ;;  %s20865_s13 = smov 118  }
  0xad   :  { %v21303_v10 = vpop.permute.xlu0 %1348  ;;  %v21327_v11 = vpop.permute.xlu1 %1350 }
  0xae   :  { %3569 = vrot.lane.b32.xlu0 %v21076_v20, %s20855_s25  ;;  %3571 = vrot.lane.b32.xlu1 %v21022_v7, %s20855_s25  ;;  %v1366_v51 = vsel %vm1360_vm4, %v21303_v10, %v21327_v11  ;;  %v1365_v58 = vsel %vm1360_vm4, %v21313_v5, %v21303_v10 }
  0xaf   :  { %16255 = vmatmul.mubr.msk.bf16.vlgmr.msra.gmra.mrb[8].mxu1 %vm160_vm2, %v21162_v30  ;;  %16259 = vmatmul.mubr.msk.bf16.gmra.mrb[20].mxu0 %vm160_vm2, %v21182_v38 }
  0xb0   :  { %17960 = vmatpush3.bf16.msra.mxu1 %v199_v61  ;;  %402 = vmatprep.mubr.bf16.mxu1 %v20847_v3  ;;  %v1390_v61 = vsel %vm167_vm1, %v1365_v58, 0 }
  0xb1   :  { %596 = vmatprep.mubr.bf16.mxu0 %v20847_v3  ;;  %16267 = vmatprep.subr.msk.bf16.mxu1 %vm167_vm1, %v21076_v20  ;;  %v21323_v4 = vpop.permute.xlu0 %1354 }
  0xb2   :  { %3573 = vrot.lane.b32.xlu0 %v21044_v14, %s20855_s25  ;;  %v21349_v14 = vpop.permute.xlu1 %1356  ;;  %3575 = vrot.lane.b32.xlu1 %v21042_v13, %s20855_s25  ;;  %v916_v13 = vsel %vm915_vm3, %v21184_v39, %v21202_v44 }
  0xb3   :  { %v933_v21 = vsel %vm167_vm1, %v916_v13, 0 }
  0xb5   :  { %v21344_v7 = vpop.permute.xlu0 %1358 }
  0xb6   :  { %3577 = vrot.lane.b32.xlu0 %v21089_v22, %s20855_s25  ;;  %v21363_v20 = vpop.permute.xlu1 %1783  ;;  %3579 = vrot.lane.b32.xlu1 %v21055_v17, %s20855_s25 }
  0xb7   :  { %16256 = vmatmul.mubr.msk.bf16.gmra.mrb[12].mxu1 %vm160_vm2, %v21182_v38  ;;  %16265 = vmatmul.mubr.msk.bf16.vlgmr.msra.gmra.mrb[0].mxu0 %vm160_vm2, %v21275_v63 }
  0xb8   :  { %671 = vmatpush1.bf16.msra.mxu0 %v544_v0  ;;  %17961 = vmatprep.mubr.msk.bf16.mxu1 %vm160_vm2, %v21162_v30  ;;  %v1370_v0 = vsel %vm1360_vm4, %v21349_v14, %v21344_v7 }
  0xb9   :  { %606 = vmatprep.mubr.bf16.mxu0 %v20847_v3  ;;  %16276 = vmatprep.subr.msk.bf16.mxu0 %vm167_vm1, %v21053_v16  ;;  %v21360_v19 = vpop.permute.xlu0 %1785 }
  0xba   :  { %3583 = vrot.lane.b32.xlu0 %v21061_v18, %s20855_s25  ;;  %3581 = vrot.lane.b32.xlu1 %v21053_v16, %s20855_s25  ;;  %v21386_v25 = vpop.permute.xlu1 %1787  ;;  %v1806_v13 = vsel %vm1805_vm5, %v21363_v20, %v21360_v19  ;;  %s26586_s25 = sld [smem:[#allocation9_spill]] }
  0xbe   :  { %v21392_v16 = vpop.permute.xlu1 %1791 }
  0xbf   :  { %17962 = vmatmul.mubr.msk.bf16.vlgmr.msra.gmra.mrb[16].mxu1 %vm160_vm2, %v21182_v38  ;;  %16266 = vmatmul.mubr.msk.bf16.gmra.mrb[4].mxu0 %vm160_vm2, %v21299_v6 }
  0xc0   :  { %618 = vmatpush1.bf16.msra.mxu1 %v538_v9  ;;  %649 = vmatprep.mubr.bf16.mxu1 %v20847_v3  ;;  %v1369_v9 = vsel %vm1360_vm4, %v21323_v4, %v21349_v14 }
  0xc1   :  { %702 = vmatprep.mubr.bf16.mxu0 %v20847_v3  ;;  %16273 = vmatprep.subr.msk.bf16.mxu1 %vm167_vm1, %v21089_v22  ;;  %v900_v22 = vpop.permute.xlu0 %899 }
  0xc2   :  { %v919_v17 = vsel %vm915_vm3, %v900_v22, %v21220_v50  ;;  %v21409_v28 = vpop.permute.xlu1 %1795  ;;  %v918_v29 = vsel %vm915_vm3, %v21195_v42, %v900_v22 }
  0xc3   :  { %v939_v32 = vsel %vm167_vm1, %v918_v29, 0 }
  0xc6   :  { %v21425_v35 = vpop.permute.xlu1 %1799 }
  0xc7   :  { %16268 = vmatmul.mubr.msk.bf16.vlgmr.msra.gmra.mrb[0].mxu1 %vm160_vm2, %v21275_v63  ;;  %16271 = vmatmul.mubr.msk.bf16.vlgmr.msra.gmra.mrb[8].mxu0 %vm160_vm2, %v21275_v63 }
  0xc8   :  { %777 = vmatpush1.bf16.msra.mxu0 %v556_v8  ;;  %659 = vmatprep.mubr.bf16.mxu1 %v20847_v3  ;;  %v1402_v8 = vsel %vm167_vm1, %v1369_v9, 0 }
  0xc9   :  { %712 = vmatprep.mubr.bf16.mxu0 %v20847_v3  ;;  %724 = vmatpush1.bf16.msra.mxu1 %v550_v12  ;;  %v1807_v12 = vsel %vm1805_vm5, %v21360_v19, %v21386_v25 }
  0xca   :  { %16287 = vmatprep.subr.msk.bf16.mxu0 %vm167_vm1, %v917_v15  ;;  %19520 = vmatprep.subr.msk.bf16.mxu1 %vm167_vm1, %v21061_v18  ;;  %v21394_v18 = vpop.permute.xlu0 %1793  ;;  %v21437_v39 = vpop.permute.xlu1 %1803 }
  0xcb   :  { %v1811_v26 = vsel %vm1805_vm5, %v21394_v18, %v21409_v28 }
  0xce   :  { %v908_v30 = vpop.permute.xlu0 %907  ;;  %v21447_v42 = vpop.permute.xlu1 %2230 }
  0xcf   :  { %16269 = vmatmul.mubr.msk.bf16.gmra.mrb[4].mxu1 %vm160_vm2, %v21299_v6  ;;  %16272 = vmatmul.mubr.msk.bf16.gmra.mrb[12].mxu0 %vm160_vm2, %v21299_v6  ;;  %v923_v33 = vsel %vm915_vm3, %v908_v30, %v21249_v59  ;;  %v922_v36 = vsel %vm915_vm3, %v21238_v53, %v908_v30 }
  0xd0   :  { %755 = vmatprep.mubr.bf16.mxu1 %v20847_v3  ;;  %808 = vmatprep.mubr.bf16.mxu0 %v20847_v3  ;;  %v951_v38 = vsel %vm167_vm1, %v922_v36, 0 }
  0xd2   :  { %v1345_v44 = vpop.permute.xlu1 %1344  ;;  %v21469_v48 = vpop.permute.xlu0 %1801 }
  0xd3   :  { %v1364_v46 = vsel %vm1360_vm4, %v1345_v44, %v21313_v5  ;;  %v1363_v52 = vsel %vm1360_vm4, %v21285_v1, %v1345_v44  ;;  %v19563_v1 = vld [vmem:[%s26580_s28 + $0x38] sm:$0x3f]  }
  0xd4   :  { %v1384_v55 = vsel %vm167_vm1, %v1363_v52, 0  ;;  %v21672_v52 = vld [vmem:[%s26580_s28 + $0x58] sm:$0x3f]  }
  0xd6   :  { %v21472_v50 = vpop.permute.xlu1 %2238  ;;  %v21484_v53 = vpop.permute.xlu0 %2228 }
  0xd7   :  { %16274 = vmatmul.mubr.msk.bf16.vlgmr.msra.gmra.mrb[8].mxu1 %vm160_vm2, %v21275_v63  ;;  %16277 = vmatmul.mubr.msk.bf16.vlgmr.msra.gmra.mrb[16].mxu0 %vm160_vm2, %v21275_v63 }
  0xd8   :  { %966 = vmatpush1.bf16.msra.mxu0 %v933_v21  ;;  %765 = vmatprep.mubr.bf16.mxu1 %v20847_v3 }
  0xd9   :  { %818 = vmatprep.mubr.bf16.mxu0 %v20847_v3  ;;  %17966 = vmatpush3.bf16.msra.mxu1 %v562_v23 }
  0xda   :  { %16290 = vmatprep.subr.msk.bf16.mxu1 %vm167_vm1, %v919_v17  ;;  %16293 = vmatprep.subr.msk.bf16.mxu0 %vm167_vm1, %v921_v24  ;;  %v1353_v54 = vpop.permute.xlu1 %1352  ;;  %v21492_v57 = vpop.permute.xlu0 %2232  ;;  %v1823_v17 = vsel %vm167_vm1, %v1806_v13, 0 }
  0xdb   :  { %v1368_v56 = vsel %vm1360_vm4, %v1353_v54, %v21323_v4  ;;  %v1367_v59 = vsel %vm1360_vm4, %v21327_v11, %v1353_v54  ;;  %v1408_v11 = vsel %vm167_vm1, %v21344_v7, 0  ;;  %v2252_v40 = vsel %vm2250_vm6, %v21447_v42, %v21492_v57 }
  0xdc   :  { %v1396_v62 = vsel %vm167_vm1, %v1367_v59, 0  ;;  %vm10749_vm4 = vcmask 924672  }
  0xdf   :  { %16275 = vmatmul.mubr.msk.bf16.gmra.mrb[12].mxu1 %vm160_vm2, %v21299_v6  ;;  %16278 = vmatmul.mubr.msk.bf16.gmra.mrb[20].mxu0 %vm160_vm2, %v21299_v6 }
  0xe0   :  { %17967 = vmatprep.mubr.msk.bf16.mxu1 %vm160_vm2, %v21275_v63  ;;  %997 = vmatprep.mubr.bf16.mxu0 %v20847_v3  ;;  %v21506_v63 = vpop.permute.xlu0 %2236 }
  0xe4   :  { %v21521_v2 = vpop.permute.xlu0 %2240 }
  0xe7   :  { %17968 = vmatmul.mubr.msk.bf16.vlgmr.msra.gmra.mrb[16].mxu1 %vm160_vm2, %v21299_v6  ;;  %16288 = vmatmul.mubr.msk.bf16.vlgmr.msra.gmra.mrb[0].mxu0 %vm160_vm2, %v19560_v27  ;;  %v21523_v6 = vpop.permute.xlu1 %2246 }
  0xe8   :  { %1019 = vmatpush1.bf16.msra.mxu1 %v939_v32  ;;  %1072 = vmatpush1.bf16.msra.mxu0 %v945_v31  ;;  %v21532_v10 = vpop.permute.xlu0 %2244  ;;  %v1810_v31 = vsel %vm1805_vm5, %v21392_v16, %v21394_v18  ;;  %v1853_v18 = vsel %vm167_vm1, %v21437_v39, 0 }
  0xe9   :  { %1007 = vmatprep.mubr.bf16.mxu0 %v20847_v3  ;;  %1050 = vmatprep.mubr.bf16.mxu1 %v20847_v3  ;;  %v1835_v32 = vsel %vm167_vm1, %v1810_v31, 0 }
  0xea   :  { %16296 = vmatprep.subr.msk.bf16.mxu1 %vm167_vm1, %v923_v33  ;;  %16299 = vmatprep.subr.msk.bf16.mxu0 %vm167_vm1, %v925_v34  ;;  %v1815_v33 = vsel %vm1805_vm5, %v21469_v48, %v21437_v39 }
  0xeb   :  { %v1790_v5 = vpop.permute.xlu1 %1789 }
  0xec   :  { %v1809_v4 = vsel %vm1805_vm5, %v1790_v5, %v21392_v16  ;;  %v21544_v15 = vpop.permute.xlu0 %2248  ;;  %v1808_v21 = vsel %vm1805_vm5, %v21386_v25, %v1790_v5  ;;  %v19564_v25 = vld [vmem:[%s26580_s28 + $0x40] sm:$0xff]  }
  0xed   :  { %v1829_v24 = vsel %vm167_vm1, %v1808_v21, 0  ;;  %v2298_v59 = vsel %vm167_vm1, %v21544_v15, 0  ;;  %v21763_v21 = vld [vmem:[%s26580_s28 + $0x68] sm:$0x3f]  }
  0xef   :  { %16289 = vmatmul.mubr.msk.bf16.gmra.mrb[4].mxu0 %vm160_vm2, %v19561_v37  ;;  %16291 = vmatmul.mubr.msk.bf16.vlgmr.msra.gmra.mrb[0].mxu1 %vm160_vm2, %v19560_v27 }
  0xf0   :  { %1125 = vmatpush1.bf16.msra.mxu1 %v951_v38  ;;  %1060 = vmatprep.mubr.bf16.mxu1 %v20847_v3  ;;  %v21552_v14 = vpop.permute.xlu0 %2673 }
  0xf1   :  { %1103 = vmatprep.mubr.bf16.mxu0 %v20847_v3  ;;  %19521 = vmatprep.subr.msk.bf16.mxu1 %vm167_vm1, %v21259_v60  ;;  %v19562_v60 = vld [vmem:[%s26580_s28 + $0x30] sm:$0xff]  }
  0xf4   :  { %v21563_v23 = vpop.permute.xlu0 %2677 }
  0xf7   :  { %16292 = vmatmul.mubr.msk.bf16.gmra.mrb[4].mxu1 %vm160_vm2, %v19561_v37  ;;  %16294 = vmatmul.mubr.msk.bf16.vlgmr.msra.gmra.mrb[8].mxu0 %vm160_vm2, %v19560_v27 }
  0xf8   :  { %1178 = vmatpush1.bf16.msra.mxu0 %v957_v41  ;;  %1113 = vmatprep.mubr.bf16.mxu0 %v20847_v3  ;;  %v21578_v20 = vpop.permute.xlu0 %2681 }
  0xf9   :  { %1156 = vmatprep.mubr.bf16.mxu1 %v20847_v3  ;;  %16310 = vmatprep.subr.msk.bf16.mxu0 %vm167_vm1, %v1362_v43 }
  0xfc   :  { %v21590_v30 = vpop.permute.xlu0 %2685 }
  0xff   :  { %16295 = vmatmul.mubr.msk.bf16.gmra.mrb[12].mxu0 %vm160_vm2, %v19561_v37  ;;  %16297 = vmatmul.mubr.msk.bf16.vlgmr.msra.gmra.mrb[8].mxu1 %vm160_vm2, %v19560_v27 }
 0x100   :  { %17972 = vmatpush3.bf16.msra.mxu1 %v963_v45  ;;  %1166 = vmatprep.mubr.bf16.mxu1 %v20847_v3  ;;  %v21604_v34 = vpop.permute.xlu0 %2691  ;;  %v2251_v45 = vsel %vm2250_vm6, %v21484_v53, %v21447_v42  ;;  %v2256_v42 = vsel %vm2250_vm6, %v21472_v50, %v21521_v2 }
 0x101   :  { %1209 = vmatprep.mubr.bf16.mxu0 %v20847_v3  ;;  %16313 = vmatprep.subr.msk.bf16.mxu1 %vm167_vm1, %v1364_v46  ;;  %v21650_v46 = vld [vmem:[%s26580_s28 + $0x50] sm:$0xff]  }
 0x104   :  { %v2235_v16 = vpop.permute.xlu0 %2234 }
 0x105   :  { %v2254_v36 = vsel %vm2250_vm6, %v2235_v16, %v21506_v63 }
 0x107   :  { %16298 = vmatmul.mubr.msk.bf16.gmra.mrb[12].mxu1 %vm160_vm2, %v19561_v37  ;;  %16300 = vmatmul.mubr.msk.bf16.vlgmr.msra.gmra.mrb[16].mxu0 %vm160_vm2, %v19560_v27 }
 0x108   :  { %1411 = vmatpush1.bf16.msra.mxu0 %v1378_v49  ;;  %1219 = vmatprep.mubr.bf16.mxu0 %v20847_v3 }
 0x109   :  { %17973 = vmatprep.mubr.msk.bf16.mxu1 %vm160_vm2, %v19560_v27  ;;  %16316 = vmatprep.subr.msk.bf16.mxu0 %vm167_vm1, %v1366_v51 }
 0x10f   :  { %16301 = vmatmul.mubr.msk.bf16.gmra.mrb[20].mxu0 %vm160_vm2, %v19561_v37  ;;  %17974 = vmatmul.mubr.msk.bf16.vlgmr.msra.gmra.mrb[16].mxu1 %vm160_vm2, %v19561_v37  ;;  %v1814_v37 = vsel %vm1805_vm5, %v21425_v35, %v21469_v48  ;;  %v2268_v48 = vsel %vm167_vm1, %v2251_v45, 0  ;;  %v3996_v45 = vld [vmem:[%s26581_s1 + $0x18] sm:$0xf] }
 0x110   :  { %1464 = vmatpush1.bf16.msra.mxu1 %v1384_v55  ;;  %1442 = vmatprep.mubr.bf16.mxu0 %v20847_v3  ;;  %v1847_v38 = vsel %vm167_vm1, %v1814_v37, 0  ;;  %v2255_v55 = vsel %vm2250_vm6, %v21506_v63, %v21472_v50  ;;  %v21836_v37 = vld [vmem:[%s26580_s28 + $0x70] sm:$0xff]  }
 0x111   :  { %1495 = vmatprep.mubr.bf16.mxu1 %v20847_v3  ;;  %16319 = vmatprep.subr.msk.bf16.mxu1 %vm167_vm1, %v1368_v56 }
 0x117   :  { %16311 = vmatmul.mubr.msk.bf16.vlgmr.msra.gmra.mrb[0].mxu0 %vm160_vm2, %v19562_v60  ;;  %16314 = vmatmul.mubr.msk.bf16.vlgmr.msra.gmra.mrb[0].mxu1 %vm160_vm2, %v19562_v60 }
 0x118   :  { %1517 = vmatpush1.bf16.msra.mxu0 %v1390_v61  ;;  %1570 = vmatpush1.bf16.msra.mxu1 %v1396_v62 }
 0x119   :  { %1452 = vmatprep.mubr.bf16.mxu0 %v20847_v3  ;;  %1505 = vmatprep.mubr.bf16.mxu1 %v20847_v3 }
 0x11a   :  { %16322 = vmatprep.subr.msk.bf16.mxu0 %vm167_vm1, %v1370_v0  ;;  %19522 = vmatprep.subr.msk.bf16.mxu1 %vm167_vm1, %v21344_v7  ;;  %v21550_v7 = vpop.permute.xlu1 %2675  ;;  %v2259_v0 = vsel %vm2250_vm6, %v21532_v10, %v21523_v6 }
 0x11b   :  { %v2292_v9 = vsel %vm167_vm1, %v2259_v0, 0  ;;  %v2696_v13 = vsel %vm2695_vm7, %v21552_v14, %v21550_v7 }
 0x11e   :  { %v1798_v22 = vpop.permute.xlu1 %1797 }
 0x11f   :  { %16312 = vmatmul.mubr.msk.bf16.gmra.mrb[4].mxu0 %vm160_vm2, %v19563_v1  ;;  %16315 = vmatmul.mubr.msk.bf16.gmra.mrb[4].mxu1 %vm160_vm2, %v19563_v1  ;;  %v1813_v19 = vsel %vm1805_vm5, %v1798_v22, %v21425_v35  ;;  %v1812_v27 = vsel %vm1805_vm5, %v21409_v28, %v1798_v22  ;;  %v19565_v28 = vld [vmem:[%s26580_s28 + $0x48] sm:$0x3f]   ;;  %v2253_v35 = vsel %vm2250_vm6, %v21492_v57, %v2235_v16  ;;  %v2280_v57 = vsel %vm167_vm1, %v2255_v55, 0 }
 0x120   :  { %1548 = vmatprep.mubr.bf16.mxu0 %v20847_v3  ;;  %1601 = vmatprep.mubr.bf16.mxu1 %v20847_v3  ;;  %v1841_v29 = vsel %vm167_vm1, %v1812_v27, 0  ;;  %v2274_v43 = vsel %vm167_vm1, %v2253_v35, 0  ;;  %v3994_v16 = vld [vmem:[%s26581_s1 + $0x8] sm:$0xff]  ;;  %vm10996_vm5 = vcmask 916480  }
 0x121   :  { %4004 = vperm.xlu1 %19555, %v3994_v16   ;;  %v4062_v35 = vld [vmem:[%s26582_s3 + $0x8] sm:$0xff] }
 0x122   :  { %v21664_v51 = vpop.permute.xlu1 %2683  ;;  %v19589_v16 = vld [vmem:[%s26584_s6 + $0x48] ss:$16 sps:$4 sm:$0xff]  }
 0x123   :  { %v2700_v27 = vsel %vm2695_vm7, %v21578_v20, %v21664_v51 }
 0x126   :  { %v21679_v54 = vpop.permute.xlu1 %2689 }
 0x127   :  { %16317 = vmatmul.mubr.msk.bf16.vlgmr.msra.gmra.mrb[8].mxu0 %vm160_vm2, %v19562_v60  ;;  %16320 = vmatmul.mubr.msk.bf16.vlgmr.msra.gmra.mrb[8].mxu1 %vm160_vm2, %v19562_v60 }
 0x128   :  { %1623 = vmatpush1.bf16.msra.mxu0 %v1402_v8  ;;  %17978 = vmatpush3.bf16.msra.mxu1 %v1408_v11  ;;  %v2697_v8 = vsel %vm2695_vm7, %v21550_v7, %v21563_v23  ;;  %v21742_v11 = vld [vmem:[%s26580_s28 + $0x60] sm:$0xff]  }
 0x129   :  { %1558 = vmatprep.mubr.bf16.mxu0 %v20847_v3  ;;  %1611 = vmatprep.mubr.bf16.mxu1 %v20847_v3 }
 0x12a   :  { %16333 = vmatprep.subr.msk.bf16.mxu0 %vm167_vm1, %v1807_v12  ;;  %16336 = vmatprep.subr.msk.bf16.mxu1 %vm167_vm1, %v1809_v4  ;;  %v21687_v58 = vpop.permute.xlu1 %2693 }
 0x12b   :  { %v2705_v31 = vsel %vm2695_vm7, %v21604_v34, %v21687_v58 }
 0x12e   :  { %v21704_v61 = vpop.permute.xlu1 %3118 }
 0x12f   :  { %16318 = vmatmul.mubr.msk.bf16.gmra.mrb[12].mxu0 %vm160_vm2, %v19563_v1  ;;  %16321 = vmatmul.mubr.msk.bf16.gmra.mrb[12].mxu1 %vm160_vm2, %v19563_v1 }
 0x130   :  { %1654 = vmatprep.mubr.bf16.mxu0 %v20847_v3  ;;  %17979 = vmatprep.mubr.msk.bf16.mxu1 %vm160_vm2, %v19562_v60 }
 0x132   :  { %v21715_v63 = vpop.permute.xlu1 %3122 }
 0x137   :  { %16323 = vmatmul.mubr.msk.bf16.vlgmr.msra.gmra.mrb[16].mxu0 %vm160_vm2, %v19562_v60  ;;  %17980 = vmatmul.mubr.msk.bf16.vlgmr.msra.gmra.mrb[16].mxu1 %vm160_vm2, %v19563_v1  ;;  %v2260_v60 = vsel %vm2250_vm6, %v21523_v6, %v21544_v15 }
 0x138   :  { %1856 = vmatpush1.bf16.msra.mxu0 %v1823_v17  ;;  %1909 = vmatpush1.bf16.msra.mxu1 %v1829_v24  ;;  %v2701_v17 = vsel %vm2695_vm7, %v21664_v51, %v21590_v30 }
 0x139   :  { %1664 = vmatprep.mubr.bf16.mxu0 %v20847_v3  ;;  %1940 = vmatprep.mubr.bf16.mxu1 %v20847_v3 }
 0x13a   :  { %16339 = vmatprep.subr.msk.bf16.mxu0 %vm167_vm1, %v1811_v26  ;;  %16342 = vmatprep.subr.msk.bf16.mxu1 %vm167_vm1, %v1813_v19  ;;  %v2743_v26 = vsel %vm167_vm1, %v21687_v58, 0 }
 0x13f   :  { %16324 = vmatmul.mubr.msk.bf16.gmra.mrb[20].mxu0 %vm160_vm2, %v19563_v1  ;;  %16337 = vmatmul.mubr.msk.bf16.vlgmr.msra.gmra.mrb[0].mxu1 %vm160_vm2, %v19564_v25 }
 0x140   :  { %1887 = vmatprep.mubr.bf16.mxu0 %v20847_v3  ;;  %1950 = vmatprep.mubr.bf16.mxu1 %v20847_v3 }
 0x141   :  { %2015 = vmatpush1.bf16.msra.mxu1 %v1841_v29  ;;  %v2725_v29 = vsel %vm167_vm1, %v2700_v27, 0 }
 0x142   :  { %19523 = vmatprep.subr.msk.bf16.mxu1 %vm167_vm1, %v21437_v39  ;;  %v21624_v39 = vpop.permute.xlu0 %3120 }
 0x143   :  { %v3141_v51 = vsel %vm3140_vm8, %v21704_v61, %v21624_v39 }
 0x144   :  { %v3158_v55 = vsel %vm167_vm1, %v3141_v51, 0  ;;  %v19618_v51 = vld [vmem:[%s26584_s6 + $0xe4] ss:$16 sps:$4 sm:$0xff]  }
 0x146   :  { %v2243_v41 = vpop.permute.xlu0 %2242 }
 0x147   :  { %16334 = vmatmul.mubr.msk.bf16.vlgmr.msra.gmra.mrb[0].mxu0 %vm160_vm2, %v19564_v25  ;;  %16338 = vmatmul.mubr.msk.bf16.gmra.mrb[4].mxu1 %vm160_vm2, %v19565_v28  ;;  %v2258_v44 = vsel %vm2250_vm6, %v2243_v41, %v21532_v10  ;;  %v2257_v47 = vsel %vm2250_vm6, %v21521_v2, %v2243_v41  ;;  %v21733_v10 = vpop.permute.xlu1 %3126 }
 0x148   :  { %1962 = vmatpush1.bf16.msra.mxu0 %v1835_v32  ;;  %1897 = vmatprep.mubr.bf16.mxu0 %v20847_v3  ;;  %v2286_v49 = vsel %vm167_vm1, %v2257_v47, 0  ;;  %v4063_v47 = vld [vmem:[%s26582_s3 + $0x10] sm:$0xff] }
 0x149   :  { %2046 = vmatprep.mubr.bf16.mxu1 %v20847_v3  ;;  %16345 = vmatprep.subr.msk.bf16.mxu0 %vm167_vm1, %v1815_v33 }
 0x14a   :  { %v21674_v53 = vpop.permute.xlu0 %3128 }
 0x14b   :  { %v21746_v4 = vpop.permute.xlu1 %3130 }
 0x14e   :  { %v2680_v56 = vpop.permute.xlu0 %2679 }
 0x14f   :  { %16335 = vmatmul.mubr.msk.bf16.gmra.mrb[4].mxu0 %vm160_vm2, %v19565_v28  ;;  %16343 = vmatmul.mubr.msk.bf16.vlgmr.msra.gmra.mrb[8].mxu1 %vm160_vm2, %v19564_v25  ;;  %v2699_v50 = vsel %vm2695_vm7, %v2680_v56, %v21578_v20  ;;  %v2698_v1 = vsel %vm2695_vm7, %v21563_v23, %v2680_v56  ;;  %v21765_v22 = vpop.permute.xlu1 %3134  ;;  %v2713_v23 = vsel %vm167_vm1, %v2696_v13, 0 }
 0x150   :  { %1993 = vmatprep.mubr.bf16.mxu0 %v20847_v3  ;;  %2056 = vmatprep.mubr.bf16.mxu1 %v20847_v3  ;;  %v2719_v5 = vsel %vm167_vm1, %v2698_v1, 0 }
 0x151   :  { %17984 = vmatpush3.bf16.msra.mxu1 %v1853_v18  ;;  %v3993_v18 = vld [vmem:[%s26581_s1] sm:$0xff] }
 0x152   :  { %16359 = vmatprep.subr.msk.bf16.mxu1 %vm167_vm1, %v2254_v36  ;;  %v21706_v62 = vpop.permute.xlu0 %3136  ;;  %v2704_v36 = vsel %vm2695_vm7, %v21679_v54, %v21604_v34  ;;  %3999 = vperm.xlu0 %19554, %v3993_v18   ;;  %v19594_v18 = vld [vmem:[%s26584_s6 + $0x64] ss:$16 sps:$4 sm:$0xff]  }
 0x153   :  { %v21780_v7 = vpop.permute.xlu1 %3138  ;;  %v2737_v34 = vsel %vm167_vm1, %v2704_v36, 0  ;;  %v19597_v36 = vld [vmem:[%s26584_s6 + $0x6c] ss:$16 sps:$4 sm:$0xff]  }
 0x154   :  { %v3188_v56 = vsel %vm167_vm1, %v21780_v7, 0 }
 0x156   :  { %v2688_v2 = vpop.permute.xlu0 %2687  ;;  %4072 = vperm.xlu0 %19554, %v4062_v35   ;;  %v19603_v35 = vld [vmem:[%s26584_s6 + $0x8c] ss:$16 sps:$4 sm:$0xff]  }
 0x157   :  { %16340 = vmatmul.mubr.msk.bf16.vlgmr.msra.gmra.mrb[8].mxu0 %vm160_vm2, %v19564_v25  ;;  %16344 = vmatmul.mubr.msk.bf16.gmra.mrb[12].mxu1 %vm160_vm2, %v19565_v28  ;;  %v2703_v6 = vsel %vm2695_vm7, %v2688_v2, %v21679_v54  ;;  %v2702_v12 = vsel %vm2695_vm7, %v21590_v30, %v2688_v2  ;;  %vm9794_vm7 = vcmask 261120  }
 0x158   :  { %2068 = vmatpush1.bf16.msra.mxu0 %v1847_v38  ;;  %2003 = vmatprep.mubr.bf16.mxu0 %v20847_v3  ;;  %v4061_v38 = vld [vmem:[%s26582_s3] sm:$0xff] }
 0x159   :  { %17985 = vmatprep.mubr.msk.bf16.mxu1 %vm160_vm2, %v19564_v25  ;;  %16356 = vmatprep.subr.msk.bf16.mxu0 %vm167_vm1, %v2252_v40 }
 0x15a   :  { %v21771_v24 = vpop.permute.xlu0 %3565  ;;  %4067 = vperm.xlu1 %19555, %v4061_v38   ;;  %4014 = vperm.xlu0 %19554, %v3996_v45   ;;  %v19595_v38 = vld [vmem:[%s26584_s6 + $0x68] ss:$16 sps:$4 sm:$0xff]   ;;  %v19604_v45 = vld [vmem:[%s26584_s6 + $0xa0] ss:$16 sps:$4 sm:$0xff]  }
 0x15e   :  { %v3125_v14 = vpop.permute.xlu0 %3124 }
 0x15f   :  { %16341 = vmatmul.mubr.msk.bf16.gmra.mrb[12].mxu0 %vm160_vm2, %v19565_v28  ;;  %17986 = vmatmul.mubr.msk.bf16.vlgmr.msra.gmra.mrb[16].mxu1 %vm160_vm2, %v19565_v28  ;;  %v3144_v19 = vsel %vm3140_vm8, %v3125_v14, %v21733_v10  ;;  %v3143_v20 = vsel %vm3140_vm8, %v21715_v63, %v3125_v14 }
 0x160   :  { %2354 = vmatpush1.bf16.msra.mxu1 %v2274_v43  ;;  %2099 = vmatprep.mubr.bf16.mxu0 %v20847_v3  ;;  %v3164_v32 = vsel %vm167_vm1, %v3143_v20, 0  ;;  %v3142_v43 = vsel %vm3140_vm8, %v21624_v39, %v21715_v63  ;;  %v3146_v39 = vsel %vm3140_vm8, %v21674_v53, %v21746_v4  ;;  %v19577_v20 = vld [vmem:[%s26584_s6 + $0x8] ss:$16 sps:$4 sm:$0xff]  }
 0x161   :  { %2385 = vmatprep.mubr.bf16.mxu1 %v20847_v3  ;;  %16365 = vmatprep.subr.msk.bf16.mxu1 %vm167_vm1, %v2258_v44  ;;  %v3995_v44 = vld [vmem:[%s26581_s1 + $0x10] sm:$0xff]  ;;  %s20858_s1 = smov 112  }
 0x162   :  { %4009 = vperm.xlu1 %19555, %v3995_v44   ;;  %v3570_v54 = vpop.permute.xlu0 %3569  ;;  %v19609_v44 = vld [vmem:[%s26584_s6 + $0xac] ss:$16 sps:$4 sm:$0xff]  }
 0x166   :  { %4077 = vperm.xlu1 %19555, %v4063_v47   ;;  %v19612_v47 = vld [vmem:[%s26584_s6 + $0xc4] ss:$16 sps:$4 sm:$0xff]  }
 0x167   :  { %16346 = vmatmul.mubr.msk.bf16.vlgmr.msra.gmra.mrb[16].mxu0 %vm160_vm2, %v19564_v25  ;;  %16360 = vmatmul.mubr.msk.bf16.vlgmr.msra.gmra.mrb[0].mxu1 %vm160_vm2, %v21650_v46  ;;  %v21790_v25 = vpop.permute.xlu1 %3563 }
 0x168   :  { %2301 = vmatpush1.bf16.msra.mxu0 %v2268_v48  ;;  %2109 = vmatprep.mubr.bf16.mxu0 %v20847_v3  ;;  %v4064_v48 = vld [vmem:[%s26582_s3 + $0x18] sm:$0xf]  ;;  %v3586_v13 = vsel %vm3585_vm9, %v21790_v25, %v21771_v24  ;;  %s20856_s3 = smov 114  }
 0x169   :  { %2395 = vmatprep.mubr.bf16.mxu1 %v20847_v3  ;;  %2460 = vmatpush1.bf16.msra.mxu1 %v2286_v49  ;;  %v6888_v49 = vld [vmem:[%s26583_s26] sm:$0xff] }
 0x16a   :  { %16362 = vmatprep.subr.msk.bf16.mxu0 %vm167_vm1, %v2256_v42  ;;  %19524 = vmatprep.subr.msk.bf16.mxu1 %vm167_vm1, %v21544_v15  ;;  %v2731_v15 = vsel %vm167_vm1, %v2702_v12, 0  ;;  %v6889_v42 = vld [vmem:[%s26583_s26 + $0x8] sm:$0xff] }
 0x16b   :  { %v21799_v30 = vpop.permute.xlu1 %3567  ;;  %4082 = vperm.xlu0 %19554, %v4064_v48   ;;  %6892 = vperm.xlu1 %19555, %v6888_v49   ;;  %v19615_v48 = vld [vmem:[%s26584_s6 + $0xcc] ss:$16 sps:$4 sm:$0xff]   ;;  %v19610_v49 = vld [vmem:[%s26584_s6 + $0xc0] ss:$16 sps:$4 sm:$0xff]  }
 0x16f   :  { %16347 = vmatmul.mubr.msk.bf16.gmra.mrb[20].mxu0 %vm160_vm2, %v19565_v28  ;;  %16361 = vmatmul.mubr.msk.bf16.gmra.mrb[4].mxu1 %vm160_vm2, %v21672_v52  ;;  %v3133_v28 = vpop.permute.xlu1 %3132 }
 0x170   :  { %2332 = vmatprep.mubr.bf16.mxu0 %v20847_v3  ;;  %2491 = vmatprep.mubr.bf16.mxu1 %v20847_v3  ;;  %v3148_v33 = vsel %vm3140_vm8, %v3133_v28, %v21765_v22  ;;  %v3147_v40 = vsel %vm3140_vm8, %v21746_v4, %v3133_v28  ;;  %v3587_v4 = vsel %vm3585_vm9, %v21771_v24, %v21799_v30  ;;  %v19580_v24 = vld [vmem:[%s26584_s6 + $0x20] ss:$16 sps:$4 sm:$0xff]   ;;  %v19585_v28 = vld [vmem:[%s26584_s6 + $0x2c] ss:$16 sps:$4 sm:$0xff]  }
 0x171   :  { %v3176_v41 = vsel %vm167_vm1, %v3147_v40, 0  ;;  %6897 = vperm.xlu0 %19554, %v6889_v42   ;;  %v19600_v40 = vld [vmem:[%s26584_s6 + $0x84] ss:$16 sps:$4 sm:$0xff]   ;;  %v19613_v42 = vld [vmem:[%s26584_s6 + $0xc8] ss:$16 sps:$4 sm:$0xff]  }
 0x177   :  { %16357 = vmatmul.mubr.msk.bf16.vlgmr.msra.gmra.mrb[0].mxu0 %vm160_vm2, %v21650_v46  ;;  %16366 = vmatmul.mubr.msk.bf16.vlgmr.msra.gmra.mrb[8].mxu1 %vm160_vm2, %v21650_v46 }
 0x178   :  { %2407 = vmatpush1.bf16.msra.mxu0 %v2280_v57  ;;  %2342 = vmatprep.mubr.bf16.mxu0 %v20847_v3 }
 0x179   :  { %2501 = vmatprep.mubr.bf16.mxu1 %v20847_v3  ;;  %17990 = vmatpush3.bf16.msra.mxu1 %v2298_v59  ;;  %v21910_v59 = vpop.permute.xlu0 %3573 }
 0x17a   :  { %16368 = vmatprep.subr.msk.bf16.mxu0 %vm167_vm1, %v2260_v60  ;;  %16382 = vmatprep.subr.msk.bf16.mxu1 %vm167_vm1, %v2699_v50  ;;  %v3145_v60 = vsel %vm3140_vm8, %v21733_v10, %v21674_v53  ;;  %v3588_v50 = vsel %vm3585_vm9, %v21799_v30, %v3570_v54  ;;  %v3150_v53 = vsel %vm3140_vm8, %v21706_v62, %v21780_v7  ;;  %v21957_v10 = vld [vmem:[%s26580_s28 + $0x88] sm:$0x3f]  }
 0x17b   :  { %v3170_v0 = vsel %vm167_vm1, %v3145_v60, 0  ;;  %v3609_v1 = vsel %vm167_vm1, %v3588_v50, 0  ;;  %v19579_v30 = vld [vmem:[%s26584_s6 + $0xc] ss:$16 sps:$4 sm:$0xff]   ;;  %v19628_v50 = vld [vmem:[%s26584_s6 + $0x120] ss:$16 sps:$4 sm:$0xff]  }
 0x17c   :  { %v19633_v60 = vld [vmem:[%s26584_s6 + $0x12c] ss:$16 sps:$4 sm:$0xff]  }
 0x17d   :  { %v3578_v63 = vpop.permute.xlu0 %3577 }
 0x17f   :  { %16358 = vmatmul.mubr.msk.bf16.gmra.mrb[4].mxu0 %vm160_vm2, %v21672_v52  ;;  %16367 = vmatmul.mubr.msk.bf16.gmra.mrb[12].mxu1 %vm160_vm2, %v21672_v52 }
 0x180   :  { %2438 = vmatprep.mubr.bf16.mxu0 %v20847_v3  ;;  %17991 = vmatprep.mubr.msk.bf16.mxu1 %vm160_vm2, %v21650_v46 }
 0x187   :  { %16363 = vmatmul.mubr.msk.bf16.vlgmr.msra.gmra.mrb[8].mxu0 %vm160_vm2, %v21650_v46  ;;  %17992 = vmatmul.mubr.msk.bf16.vlgmr.msra.gmra.mrb[16].mxu1 %vm160_vm2, %v21672_v52 }
 0x188   :  { %2513 = vmatpush1.bf16.msra.mxu0 %v2292_v9  ;;  %2799 = vmatpush1.bf16.msra.mxu1 %v2719_v5  ;;  %v21942_v9 = vld [vmem:[%s26580_s28 + $0x80] sm:$0xff]  }
 0x189   :  { %2448 = vmatprep.mubr.bf16.mxu0 %v20847_v3  ;;  %2830 = vmatprep.mubr.bf16.mxu1 %v20847_v3 }
 0x18a   :  { %16379 = vmatprep.subr.msk.bf16.mxu0 %vm167_vm1, %v2697_v8  ;;  %16388 = vmatprep.subr.msk.bf16.mxu1 %vm167_vm1, %v2703_v6  ;;  %v3584_v6 = vpop.permute.xlu0 %3583 }
 0x18f   :  { %16364 = vmatmul.mubr.msk.bf16.gmra.mrb[12].mxu0 %vm160_vm2, %v21672_v52  ;;  %16383 = vmatmul.mubr.msk.bf16.vlgmr.msra.gmra.mrb[0].mxu1 %vm160_vm2, %v21742_v11 }
 0x190   :  { %2544 = vmatprep.mubr.bf16.mxu0 %v20847_v3  ;;  %2840 = vmatprep.mubr.bf16.mxu1 %v20847_v3 }
 0x191   :  { %2905 = vmatpush1.bf16.msra.mxu1 %v2731_v15  ;;  %v3633_v15 = vsel %vm167_vm1, %v3584_v6, 0 }
 0x192   :  { %19525 = vmatprep.subr.msk.bf16.mxu1 %vm167_vm1, %v21687_v58 }
 0x197   :  { %16369 = vmatmul.mubr.msk.bf16.vlgmr.msra.gmra.mrb[16].mxu0 %vm160_vm2, %v21650_v46  ;;  %16384 = vmatmul.mubr.msk.bf16.gmra.mrb[4].mxu1 %vm160_vm2, %v21763_v21  ;;  %v21869_v46 = vld [vmem:[%s26580_s28 + $0x78] sm:$0x3f]  }
 0x198   :  { %2746 = vmatpush1.bf16.msra.mxu0 %v2713_v23  ;;  %2554 = vmatprep.mubr.bf16.mxu0 %v20847_v3  ;;  %v19574_v23 = vld [vmem:[%s26584_s6] ss:$16 sps:$4 sm:$0xff]  }
 0x199   :  { %2936 = vmatprep.mubr.bf16.mxu1 %v20847_v3  ;;  %16385 = vmatprep.subr.msk.bf16.mxu0 %vm167_vm1, %v2701_v17  ;;  %v19582_v17 = vld [vmem:[%s26584_s6 + $0x24] ss:$16 sps:$4 sm:$0xff]  }
 0x19f   :  { %16370 = vmatmul.mubr.msk.bf16.gmra.mrb[20].mxu0 %vm160_vm2, %v21672_v52  ;;  %16389 = vmatmul.mubr.msk.bf16.vlgmr.msra.gmra.mrb[8].mxu1 %vm160_vm2, %v21742_v11  ;;  %v21892_v52 = vpop.permute.xlu1 %3571 }
 0x1a0   :  { %2777 = vmatprep.mubr.bf16.mxu0 %v20847_v3  ;;  %2946 = vmatprep.mubr.bf16.mxu1 %v20847_v3  ;;  %v3589_v57 = vsel %vm3585_vm9, %v3570_v54, %v21892_v52  ;;  %v3590_v14 = vsel %vm3585_vm9, %v21892_v52, %v21910_v59  ;;  %v19621_v52 = vld [vmem:[%s26584_s6 + $0xec] ss:$16 sps:$4 sm:$0xff]   ;;  %v19616_v54 = vld [vmem:[%s26584_s6 + $0xe0] ss:$16 sps:$4 sm:$0xff]  }
 0x1a1   :  { %17996 = vmatpush3.bf16.msra.mxu1 %v2743_v26  ;;  %v3615_v25 = vsel %vm167_vm1, %v3590_v14, 0  ;;  %v19664_v14 = vld [vmem:[%s26584_s6 + $0x1e0] ss:$16 sps:$4 sm:$0xff]  }
 0x1a2   :  { %16405 = vmatprep.subr.msk.bf16.mxu1 %vm167_vm1, %v3144_v19  ;;  %v19586_v19 = vld [vmem:[%s26584_s6 + $0x40] ss:$16 sps:$4 sm:$0xff]  }
 0x1a3   :  { %v3576_v58 = vpop.permute.xlu1 %3575 }
 0x1a4   :  { %v3592_v5 = vsel %vm3585_vm9, %v3576_v58, %v3578_v63 }
 0x1a5   :  { %v3621_v8 = vsel %vm167_vm1, %v3592_v5, 0  ;;  %v19640_v5 = vld [vmem:[%s26584_s6 + $0x160] ss:$16 sps:$4 sm:$0xff]  }
 0x1a7   :  { %16380 = vmatmul.mubr.msk.bf16.vlgmr.msra.gmra.mrb[0].mxu0 %vm160_vm2, %v21742_v11  ;;  %16390 = vmatmul.mubr.msk.bf16.gmra.mrb[12].mxu1 %vm160_vm2, %v21763_v21  ;;  %v21924_v61 = vpop.permute.xlu1 %3579 }
 0x1a8   :  { %2852 = vmatpush1.bf16.msra.mxu0 %v2725_v29  ;;  %2787 = vmatprep.mubr.bf16.mxu0 %v20847_v3  ;;  %v3593_v2 = vsel %vm3585_vm9, %v3578_v63, %v21924_v61  ;;  %v19636_v63 = vld [vmem:[%s26584_s6 + $0x144] ss:$16 sps:$4 sm:$0xff]  }
 0x1a9   :  { %17997 = vmatprep.mubr.msk.bf16.mxu1 %vm160_vm2, %v21742_v11  ;;  %16391 = vmatprep.subr.msk.bf16.mxu0 %vm167_vm1, %v2705_v31 }
 0x1ab   :  { %v3582_v26 = vpop.permute.xlu1 %3581 }
 0x1ac   :  { %v3595_v27 = vsel %vm3585_vm9, %v3582_v26, %v3584_v6  ;;  %v3594_v29 = vsel %vm3585_vm9, %v21924_v61, %v3582_v26  ;;  %v19631_v61 = vld [vmem:[%s26584_s6 + $0x128] ss:$16 sps:$4 sm:$0xff]  }
 0x1ad   :  { %v3627_v31 = vsel %vm167_vm1, %v3594_v29, 0  ;;  %v19667_v26 = vld [vmem:[%s26584_s6 + $0x1e8] ss:$16 sps:$4 sm:$0xff]  }
 0x1af   :  { %16381 = vmatmul.mubr.msk.bf16.gmra.mrb[4].mxu0 %vm160_vm2, %v21763_v21  ;;  %17998 = vmatmul.mubr.msk.bf16.vlgmr.msra.gmra.mrb[16].mxu1 %vm160_vm2, %v21763_v21 }
 0x1b0   :  { %3244 = vmatpush1.bf16.msra.mxu1 %v3164_v32  ;;  %2883 = vmatprep.mubr.bf16.mxu0 %v20847_v3  ;;  %v19583_v32 = vld [vmem:[%s26584_s6 + $0x28] ss:$16 sps:$4 sm:$0xff]  }
 0x1b1   :  { %3275 = vmatprep.mubr.bf16.mxu1 %v20847_v3  ;;  %16411 = vmatprep.subr.msk.bf16.mxu1 %vm167_vm1, %v3148_v33  ;;  %v19591_v33 = vld [vmem:[%s26584_s6 + $0x4c] ss:$16 sps:$4 sm:$0xff]  }
 0x1b7   :  { %16386 = vmatmul.mubr.msk.bf16.vlgmr.msra.gmra.mrb[8].mxu0 %vm160_vm2, %v21742_v11  ;;  %16406 = vmatmul.mubr.msk.bf16.vlgmr.msra.gmra.mrb[0].mxu1 %vm160_vm2, %v21836_v37 }
 0x1b8   :  { %2958 = vmatpush1.bf16.msra.mxu0 %v2737_v34  ;;  %2893 = vmatprep.mubr.bf16.mxu0 %v20847_v3  ;;  %v19598_v34 = vld [vmem:[%s26584_s6 + $0x80] ss:$16 sps:$4 sm:$0xff]  }
 0x1b9   :  { %3285 = vmatprep.mubr.bf16.mxu1 %v20847_v3  ;;  %3350 = vmatpush1.bf16.msra.mxu1 %v3176_v41  ;;  %v19601_v41 = vld [vmem:[%s26584_s6 + $0x88] ss:$16 sps:$4 sm:$0xff]  }
 0x1ba   :  { %16402 = vmatprep.subr.msk.bf16.mxu0 %vm167_vm1, %v3142_v43  ;;  %19526 = vmatprep.subr.msk.bf16.mxu1 %vm167_vm1, %v21780_v7  ;;  %v19588_v7 = vld [vmem:[%s26584_s6 + $0x44] ss:$16 sps:$4 sm:$0xff]  }
 0x1bb   :  { %v19606_v43 = vld [vmem:[%s26584_s6 + $0xa4] ss:$16 sps:$4 sm:$0xff]  }
 0x1bf   :  { %16387 = vmatmul.mubr.msk.bf16.gmra.mrb[12].mxu0 %vm160_vm2, %v21763_v21  ;;  %16407 = vmatmul.mubr.msk.bf16.gmra.mrb[4].mxu1 %vm160_vm2, %v21869_v46 }
 0x1c0   :  { %2989 = vmatprep.mubr.bf16.mxu0 %v20847_v3  ;;  %3381 = vmatprep.mubr.bf16.mxu1 %v20847_v3 }
 0x1c7   :  { %16392 = vmatmul.mubr.msk.bf16.vlgmr.msra.gmra.mrb[16].mxu0 %vm160_vm2, %v21742_v11  ;;  %16412 = vmatmul.mubr.msk.bf16.vlgmr.msra.gmra.mrb[8].mxu1 %vm160_vm2, %v21836_v37  ;;  %v3149_v11 = vsel %vm3140_vm8, %v21765_v22, %v21706_v62  ;;  %v19576_v62 = vld [vmem:[%s26584_s6 + $0x4] ss:$16 sps:$4 sm:$0xff]   ;;  %v3591_v22 = vsel %vm3585_vm9, %v21910_v59, %v3576_v58  ;;  %v19625_v58 = vld [vmem:[%s26584_s6 + $0x108] ss:$16 sps:$4 sm:$0xff]   ;;  %vm11489_vm8 = vcmask 809984   ;;  %vm20862_vm9 = vmmov 0  }
 0x1c8   :  { %3191 = vmatpush1.bf16.msra.mxu0 %v3158_v55  ;;  %2999 = vmatprep.mubr.bf16.mxu0 %v20847_v3  ;;  %v3182_v12 = vsel %vm167_vm1, %v3149_v11, 0  ;;  %v19619_v55 = vld [vmem:[%s26584_s6 + $0xe8] ss:$16 sps:$4 sm:$0xff]   ;;  %v19630_v59 = vld [vmem:[%s26584_s6 + $0x124] ss:$16 sps:$4 sm:$0xff]  }
 0x1c9   :  { %3391 = vmatprep.mubr.bf16.mxu1 %v20847_v3  ;;  %18002 = vmatpush3.bf16.msra.mxu1 %v3188_v56  ;;  %v19624_v56 = vld [vmem:[%s26584_s6 + $0x104] ss:$16 sps:$4 sm:$0xff]   ;;  %v19646_v11 = vld [vmem:[%s26584_s6 + $0x180] ss:$16 sps:$4 sm:$0xff]  }
 0x1ca   :  { %16408 = vmatprep.subr.msk.bf16.mxu0 %vm167_vm1, %v3146_v39  ;;  %16428 = vmatprep.subr.msk.bf16.mxu1 %vm167_vm1, %v3589_v57  ;;  %v19627_v39 = vld [vmem:[%s26584_s6 + $0x10c] ss:$16 sps:$4 sm:$0xff]   ;;  %v19622_v57 = vld [vmem:[%s26584_s6 + $0x100] ss:$16 sps:$4 sm:$0xff]  }
 0x1cf   :  { %16393 = vmatmul.mubr.msk.bf16.gmra.mrb[20].mxu0 %vm160_vm2, %v21763_v21  ;;  %16413 = vmatmul.mubr.msk.bf16.gmra.mrb[12].mxu1 %vm160_vm2, %v21869_v46  ;;  %v3603_v21 = vsel %vm167_vm1, %v3586_v13, 0  ;;  %v19655_v13 = vld [vmem:[%s26584_s6 + $0x1a8] ss:$16 sps:$4 sm:$0xff]  }
 0x1d0   :  { %3222 = vmatprep.mubr.bf16.mxu0 %v20847_v3  ;;  %18003 = vmatprep.mubr.msk.bf16.mxu1 %vm160_vm2, %v21836_v37 }
 0x1d1   :  { %v22226_v29 = vpop.permute.xlu0 %3999 }
 0x1d7   :  { %16403 = vmatmul.mubr.msk.bf16.vlgmr.msra.gmra.mrb[0].mxu0 %vm160_vm2, %v21836_v37  ;;  %18004 = vmatmul.mubr.msk.bf16.vlgmr.msra.gmra.mrb[16].mxu1 %vm160_vm2, %v21869_v46 }
 0x1d8   :  { %3297 = vmatpush1.bf16.msra.mxu0 %v3170_v0  ;;  %3689 = vmatpush1.bf16.msra.mxu1 %v3609_v1  ;;  %v19639_v0 = vld [vmem:[%s26584_s6 + $0x14c] ss:$16 sps:$4 sm:$0xff]   ;;  %v19634_v1 = vld [vmem:[%s26584_s6 + $0x140] ss:$16 sps:$4 sm:$0xff]  }
 0x1d9   :  { %3232 = vmatprep.mubr.bf16.mxu0 %v20847_v3  ;;  %3720 = vmatprep.mubr.bf16.mxu1 %v20847_v3 }
 0x1da   :  { %16414 = vmatprep.subr.msk.bf16.mxu0 %vm167_vm1, %v3150_v53  ;;  %16434 = vmatprep.subr.msk.bf16.mxu1 %vm167_vm1, %v3593_v2  ;;  %v19637_v53 = vld [vmem:[%s26584_s6 + $0x148] ss:$16 sps:$4 sm:$0xff]   ;;  %v19642_v2 = vld [vmem:[%s26584_s6 + $0x164] ss:$16 sps:$4 sm:$0xff]  }
 0x1df   :  { %16404 = vmatmul.mubr.msk.bf16.gmra.mrb[4].mxu0 %vm160_vm2, %v21869_v46  ;;  %16429 = vmatmul.mubr.msk.bf16.vlgmr.msra.gmra.mrb[0].mxu1 %vm160_vm2, %v21942_v9 }
 0x1e0   :  { %3328 = vmatprep.mubr.bf16.mxu0 %v20847_v3  ;;  %3730 = vmatprep.mubr.bf16.mxu1 %v20847_v3 }
 0x1e1   :  { %3795 = vmatpush1.bf16.msra.mxu1 %v3621_v8  ;;  %v19643_v8 = vld [vmem:[%s26584_s6 + $0x168] ss:$16 sps:$4 sm:$0xff]  }
 0x1e2   :  { %19527 = vmatprep.subr.msk.bf16.mxu1 %vm167_vm1, %v3584_v6  ;;  %v19648_v6 = vld [vmem:[%s26584_s6 + $0x184] ss:$16 sps:$4 sm:$0xff]  }
 0x1e7   :  { %16409 = vmatmul.mubr.msk.bf16.vlgmr.msra.gmra.mrb[8].mxu0 %vm160_vm2, %v21836_v37  ;;  %16430 = vmatmul.mubr.msk.bf16.gmra.mrb[4].mxu1 %vm160_vm2, %v21957_v10 }
 0x1e8   :  { %3403 = vmatpush1.bf16.msra.mxu0 %v3182_v12  ;;  %3338 = vmatprep.mubr.bf16.mxu0 %v20847_v3  ;;  %v19649_v12 = vld [vmem:[%s26584_s6 + $0x188] ss:$16 sps:$4 sm:$0xff]  }
 0x1e9   :  { %3826 = vmatprep.mubr.bf16.mxu1 %v20847_v3  ;;  %16425 = vmatprep.subr.msk.bf16.mxu0 %vm167_vm1, %v3587_v4  ;;  %v19654_v4 = vld [vmem:[%s26584_s6 + $0x1a4] ss:$16 sps:$4 sm:$0xff]  }
 0x1ef   :  { %16410 = vmatmul.mubr.msk.bf16.gmra.mrb[12].mxu0 %vm160_vm2, %v21869_v46  ;;  %16435 = vmatmul.mubr.msk.bf16.vlgmr.msra.gmra.mrb[8].mxu1 %vm160_vm2, %v21942_v9 }
 0x1f0   :  { %3434 = vmatprep.mubr.bf16.mxu0 %v20847_v3  ;;  %3836 = vmatprep.mubr.bf16.mxu1 %v20847_v3 }
 0x1f1   :  { %18008 = vmatpush3.bf16.msra.mxu1 %v3633_v15  ;;  %v19652_v15 = vld [vmem:[%s26584_s6 + $0x1a0] ss:$16 sps:$4 sm:$0xff]  }
 0x1f2   :  { %6242 = vmatprep.subr.bf16.mxu1 %v19576_v62  ;;  %v19657_v62 = vld [vmem:[%s26584_s6 + $0x1ac] ss:$16 sps:$4 sm:$0xff]  }
 0x1f7   :  { %16415 = vmatmul.mubr.msk.bf16.vlgmr.msra.gmra.mrb[16].mxu0 %vm160_vm2, %v21836_v37  ;;  %16436 = vmatmul.mubr.msk.bf16.gmra.mrb[12].mxu1 %vm160_vm2, %v21957_v10  ;;  %v19592_v37 = vld [vmem:[%s26584_s6 + $0x60] ss:$16 sps:$4 sm:$0xff]  }
 0x1f8   :  { %3636 = vmatpush1.bf16.msra.mxu0 %v3603_v21  ;;  %3444 = vmatprep.mubr.bf16.mxu0 %v20847_v3  ;;  %v19660_v21 = vld [vmem:[%s26584_s6 + $0x1c4] ss:$16 sps:$4 sm:$0xff]  }
 0x1f9   :  { %18009 = vmatprep.mubr.msk.bf16.mxu1 %vm160_vm2, %v21942_v9  ;;  %16431 = vmatprep.subr.msk.bf16.mxu0 %vm167_vm1, %v3591_v22  ;;  %v19663_v22 = vld [vmem:[%s26584_s6 + $0x1cc] ss:$16 sps:$4 sm:$0xff]  }
 0x1ff   :  { %16416 = vmatmul.mubr.msk.bf16.gmra.mrb[20].mxu0 %vm160_vm2, %v21869_v46  ;;  %18010 = vmatmul.mubr.msk.bf16.vlgmr.msra.gmra.mrb[16].mxu1 %vm160_vm2, %v21957_v10  ;;  %v19607_v46 = vld [vmem:[%s26584_s6 + $0xa8] ss:$16 sps:$4 sm:$0xff]  }
 0x200   :  { %3667 = vmatprep.mubr.bf16.mxu0 %v20847_v3  ;;  %6243 = vmatpush1.bf16.msra.mxu1 %v19574_v23  ;;  %v19658_v23 = vld [vmem:[%s26584_s6 + $0x1c0] ss:$16 sps:$4 sm:$0xff]  }
 0x201   :  { %6244 = vmatprep.subr.bf16.mxu1 %v19582_v17  ;;  %v19661_v17 = vld [vmem:[%s26584_s6 + $0x1c8] ss:$16 sps:$4 sm:$0xff]  }
 0x204   :  { %6245 = vmatpush1.bf16.msra.mxu1 %v19580_v24  ;;  %v19666_v24 = vld [vmem:[%s26584_s6 + $0x1e4] ss:$16 sps:$4 sm:$0xff]  }
 0x205   :  { %6246 = vmatprep.subr.bf16.mxu1 %v19588_v7  ;;  %v19669_v7 = vld [vmem:[%s26584_s6 + $0x1ec] ss:$16 sps:$4 sm:$0xff]  }
 0x207   :  { %16426 = vmatmul.mubr.msk.bf16.vlgmr.msra.gmra.mrb[0].mxu0 %vm160_vm2, %v21942_v9 }
 0x208   :  { %3677 = vmatprep.mubr.bf16.mxu0 %v20847_v3  ;;  %3742 = vmatpush1.bf16.msra.mxu0 %v3615_v25  ;;  %v19675_v25 = vld [vmem:[%s26584_s6 + $0x20c] ss:$16 sps:$4 sm:$0xff]  }
 0x209   :  { %16437 = vmatprep.subr.msk.bf16.mxu0 %vm167_vm1, %v3595_v27  ;;  %6247 = vmatpush1.bf16.msra.mxu1 %v19586_v19  ;;  %v19672_v19 = vld [vmem:[%s26584_s6 + $0x204] ss:$16 sps:$4 sm:$0xff]   ;;  %v22224_v27 = vpop.permute.xlu1 %4004 }
 0x20a   :  { %6248 = vmatprep.subr.bf16.mxu1 %v19594_v18 }
 0x20d   :  { %6249 = vmatpush1.bf16.msra.mxu1 %v19592_v37 }
 0x20e   :  { %6250 = vmatprep.subr.bf16.mxu1 %v19600_v40 }
 0x20f   :  { %16427 = vmatmul.mubr.msk.bf16.gmra.mrb[4].mxu0 %vm160_vm2, %v21957_v10 }
 0x210   :  { %3773 = vmatprep.mubr.bf16.mxu0 %v20847_v3 }
 0x211   :  { %6251 = vmatpush1.bf16.msra.mxu1 %v19598_v34 }
 0x212   :  { %6252 = vmatprep.subr.bf16.mxu1 %v19606_v43 }
 0x215   :  { %6253 = vmatpush1.bf16.msra.mxu1 %v19604_v45 }
 0x216   :  { %6254 = vmatprep.subr.bf16.mxu1 %v19612_v47 }
 0x217   :  { %16432 = vmatmul.mubr.msk.bf16.vlgmr.msra.gmra.mrb[8].mxu0 %vm160_vm2, %v21942_v9 }
 0x218   :  { %3783 = vmatprep.mubr.bf16.mxu0 %v20847_v3  ;;  %3848 = vmatpush1.bf16.msra.mxu0 %v3627_v31  ;;  %v22230_v31 = vpop.permute.xlu0 %4072 }
 0x219   :  { %6560 = vmatprep.subr.bf16.mxu0 %v19579_v30  ;;  %6255 = vmatpush1.bf16.msra.mxu1 %v19610_v49  ;;  %v22228_v30 = vpop.permute.xlu1 %4067 }
 0x21a   :  { %6256 = vmatprep.subr.bf16.mxu1 %v19618_v51 }
 0x21d   :  { %6257 = vmatpush1.bf16.msra.mxu1 %v19616_v54  ;;  %v22234_v18 = vpop.permute.xlu1 %4009 }
 0x21e   :  { %6258 = vmatprep.subr.bf16.mxu1 %v19624_v56 }
 0x21f   :  { %16433 = vmatmul.mubr.msk.bf16.gmra.mrb[12].mxu0 %vm160_vm2, %v21957_v10 }
 0x220   :  { %3879 = vmatprep.mubr.bf16.mxu0 %v20847_v3 }
 0x221   :  { %6259 = vmatpush1.bf16.msra.mxu1 %v19622_v57  ;;  %v22244_v47 = vpop.permute.xlu1 %4077 }
 0x222   :  { %6260 = vmatprep.subr.bf16.mxu1 %v19630_v59 }
 0x225   :  { %6261 = vmatpush1.bf16.msra.mxu1 %v19628_v50 }
 0x226   :  { %6262 = vmatprep.subr.bf16.mxu1 %v19636_v63 }
 0x227   :  { %16438 = vmatmul.mubr.msk.bf16.vlgmr.msra.gmra.mrb[16].mxu0 %vm160_vm2, %v21942_v9  ;;  %v19645_v9 = vld [vmem:[%s26584_s6 + $0x16c] ss:$16 sps:$4 sm:$0xff]  }
 0x228   :  { %3889 = vmatprep.mubr.bf16.mxu0 %v20847_v3  ;;  %6561 = vmatpush1.bf16.msra.mxu0 %v19577_v20 }
 0x229   :  { %6562 = vmatprep.subr.bf16.mxu0 %v19585_v28  ;;  %6263 = vmatpush1.bf16.msra.mxu1 %v19634_v1 }
 0x22a   :  { %6264 = vmatprep.subr.bf16.mxu1 %v19642_v2 }
 0x22c   :  { %6563 = vmatpush1.bf16.msra.mxu0 %v19583_v32 }
 0x22d   :  { %6564 = vmatprep.subr.bf16.mxu0 %v19591_v33  ;;  %6265 = vmatpush1.bf16.msra.mxu1 %v19640_v5 }
 0x22e   :  { %6266 = vmatprep.subr.bf16.mxu1 %v19648_v6 }
 0x22f   :  { %16439 = vmatmul.mubr.msk.bf16.gmra.mrb[20].mxu0 %vm160_vm2, %v21957_v10  ;;  %v19651_v10 = vld [vmem:[%s26584_s6 + $0x18c] ss:$16 sps:$4 sm:$0xff]  }
 0x230   :  { %6565 = vmatpush1.bf16.msra.mxu0 %v19589_v16 }
 0x231   :  { %6566 = vmatprep.subr.bf16.mxu0 %v19597_v36  ;;  %6267 = vmatpush1.bf16.msra.mxu1 %v19646_v11 }
 0x232   :  { %6268 = vmatprep.subr.bf16.mxu1 %v19654_v4 }
 0x234   :  { %6567 = vmatpush1.bf16.msra.mxu0 %v19595_v38 }
 0x235   :  { %6568 = vmatprep.subr.bf16.mxu0 %v19603_v35  ;;  %6269 = vmatpush1.bf16.msra.mxu1 %v19652_v15  ;;  %v22239_v35 = vpop.permute.xlu0 %4014 }
 0x236   :  { %6270 = vmatprep.subr.bf16.mxu1 %v19660_v21 }
 0x238   :  { %6569 = vmatpush1.bf16.msra.mxu0 %v19601_v41 }
 0x239   :  { %6570 = vmatprep.subr.bf16.mxu0 %v19609_v44  ;;  %6271 = vmatpush1.bf16.msra.mxu1 %v19658_v23  ;;  %v22250_v56 = vpop.permute.xlu0 %4082 }
 0x23a   :  { %6272 = vmatprep.subr.bf16.mxu1 %v19666_v24 }
 0x23c   :  { %6571 = vmatpush1.bf16.msra.mxu0 %v19607_v46 }
 0x23d   :  { %6572 = vmatprep.subr.bf16.mxu0 %v19615_v48  ;;  %6273 = vmatpush1.bf16.msra.mxu1 %v19664_v14 }
 0x23e   :  { %6295 = vmatprep.subr.bf16.mxu1 %v19672_v19 }
 0x240   :  { %6573 = vmatpush1.bf16.msra.mxu0 %v19613_v42 }
 0x241   :  { %6574 = vmatprep.subr.bf16.mxu0 %v19621_v52 }
 0x244   :  { %6575 = vmatpush1.bf16.msra.mxu0 %v19619_v55 }
 0x245   :  { %6576 = vmatprep.subr.bf16.mxu0 %v19627_v39 }
 0x248   :  { %6577 = vmatpush1.bf16.msra.mxu0 %v19625_v58 }
 0x249   :  { %6578 = vmatprep.subr.bf16.mxu0 %v19633_v60 }
 0x24c   :  { %6579 = vmatpush1.bf16.msra.mxu0 %v19631_v61 }
 0x24d   :  { %6580 = vmatprep.subr.bf16.mxu0 %v19639_v0 }
 0x250   :  { %6581 = vmatpush1.bf16.msra.mxu0 %v19637_v53 }
 0x251   :  { %6582 = vmatprep.subr.bf16.mxu0 %v19645_v9 }
 0x254   :  { %6583 = vmatpush1.bf16.msra.mxu0 %v19643_v8 }
 0x255   :  { %6584 = vmatprep.subr.bf16.mxu0 %v19651_v10 }
 0x258   :  { %6585 = vmatpush1.bf16.msra.mxu0 %v19649_v12 }
 0x259   :  { %6586 = vmatprep.subr.bf16.mxu0 %v19657_v62 }
 0x25c   :  { %6587 = vmatpush1.bf16.msra.mxu0 %v19655_v13 }
 0x25d   :  { %6588 = vmatprep.subr.bf16.mxu0 %v19663_v22 }
 0x260   :  { %6589 = vmatpush1.bf16.msra.mxu0 %v19661_v17 }
 0x261   :  { %6590 = vmatprep.subr.bf16.mxu0 %v19669_v7 }
 0x264   :  { %6591 = vmatpush1.bf16.msra.mxu0 %v19667_v26 }
 0x265   :  { %6613 = vmatprep.subr.bf16.mxu0 %v19675_v25 }
 0x2b2   :  { %v3722_v20 = vpop.f32.mrb[0].mxu1 }
 0x2b3   :  { %v3724_v28 = vpop.f32.mrb[1].mxu1  ;;  %v4019_v32 = vmul.f32 %v22226_v29, %v3722_v20 }
 0x2b4   :  { %v4020_v33 = vmul.f32 %v22226_v29, %v3724_v28  ;;  %v3726_v16 = vpop.f32.mrb[2].mxu1 }
 0x2b5   :  { %v4030_v36 = vmul.f32 %v22224_v27, %v3726_v16  ;;  %v3728_v37 = vpop.f32.mrb[3].mxu1  ;;  %v4087_v38 = vadd.f32 %v22228_v30, %v4019_v32 }
 0x2b6   :  { %v4031_v40 = vmul.f32 %v22224_v27, %v3728_v37  ;;  %v4088_v34 = vadd.f32 %v22228_v30, %v4020_v33 }
 0x2b7   :  { %v4098_v41 = vadd.f32 %v22230_v31, %v4030_v36  ;;  %v4131_v44 = vmax.f32 %v4087_v38, 0.0 }
 0x2b8   :  { %v4099_v43 = vadd.f32 %v22230_v31, %v4031_v40  ;;  %v4132_v48 = vmax.f32 %v4088_v34, 0.0 }
 0x2b9   :  { %v4142_v45 = vmax.f32 %v4098_v41, 0.0 }
 0x2ba   :  { %v3732_v46 = vpop.f32.mrb[4].mxu1  ;;  %v4143_v49 = vmax.f32 %v4099_v43, 0.0 }
 0x2bb   :  { %v4041_v42 = vmul.f32 %v22234_v18, %v3732_v46  ;;  %v3734_v51 = vpop.f32.mrb[5].mxu1  ;;  %v22247_v52 = vpack.c.bf16 %v4142_v45, %v4131_v44 }
 0x2bc   :  { %v4042_v54 = vmul.f32 %v22234_v18, %v3734_v51  ;;  %v3736_v55 = vpop.f32.mrb[6].mxu1  ;;  %v22252_v39 = vpack.c.bf16 %v4143_v49, %v4132_v48 }
 0x2bd   :  { %v4052_v57 = vmul.f32 %v22239_v35, %v3736_v55  ;;  %v3738_v58 = vpop.f32.mrb[7].mxu1  ;;  %v4109_v59 = vadd.f32 %v22244_v47, %v4041_v42 }
 0x2be   :  { %v4053_v60 = vmul.f32 %v22239_v35, %v3738_v58  ;;  %v4110_v50 = vadd.f32 %v22244_v47, %v4042_v54 }
 0x2bf   :  { %v4120_v61 = vadd.f32 %v22250_v56, %v4052_v57  ;;  %v4153_v0 = vmax.f32 %v4109_v59, 0.0 }
 0x2c0   :  { %v4121_v63 = vadd.f32 %v22250_v56, %v4053_v60  ;;  %v4154_v2 = vmax.f32 %v4110_v50, 0.0 }
 0x2c1   :  { %v4164_v1 = vmax.f32 %v4120_v61, 0.0 }
 0x2c2   :  { %v3828_v53 = vpop.f32.mrb[8].mxu1  ;;  %v4165_v9 = vmax.f32 %v4121_v63, 0.0 }
 0x2c3   :  { %v4023_v5 = vmul.f32 %v22226_v29, %v3828_v53  ;;  %v3830_v8 = vpop.f32.mrb[9].mxu1  ;;  %v22261_v6 = vpack.c.bf16 %v4164_v1, %v4153_v0 }
 0x2c4   :  { %v4024_v10 = vmul.f32 %v22226_v29, %v3830_v8  ;;  %v3832_v11 = vpop.f32.mrb[10].mxu1  ;;  %v22264_v12 = vpack.c.bf16 %v4165_v9, %v4154_v2 }
 0x2c5   :  { %v4091_v4 = vadd.f32 %v22228_v30, %v4023_v5  ;;  %v4034_v62 = vmul.f32 %v22224_v27, %v3832_v11  ;;  %v3834_v15 = vpop.f32.mrb[11].mxu1 }
 0x2c6   :  { %v4092_v13 = vadd.f32 %v22228_v30, %v4024_v10  ;;  %v4035_v21 = vmul.f32 %v22224_v27, %v3834_v15 }
 0x2c7   :  { %v4102_v22 = vadd.f32 %v22230_v31, %v4034_v62  ;;  %v4135_v17 = vmax.f32 %v4091_v4, 0.0 }
 0x2c8   :  { %v4103_v23 = vadd.f32 %v22230_v31, %v4035_v21  ;;  %v4136_v7 = vmax.f32 %v4092_v13, 0.0 }
 0x2c9   :  { %v4146_v24 = vmax.f32 %v4102_v22, 0.0 }
 0x2ca   :  { %v4147_v14 = vmax.f32 %v4103_v23, 0.0  ;;  %v3838_v26 = vpop.f32.mrb[12].mxu1 }
 0x2cb   :  { %v22272_v19 = vpack.c.bf16 %v4146_v24, %v4135_v17  ;;  %v4045_v25 = vmul.f32 %v22234_v18, %v3838_v26  ;;  %v3840_v20 = vpop.f32.mrb[13].mxu1 }
 0x2cc   :  { %v4046_v28 = vmul.f32 %v22234_v18, %v3840_v20  ;;  %v3842_v32 = vpop.f32.mrb[14].mxu1  ;;  %v22276_v33 = vpack.c.bf16 %v4147_v14, %v4136_v7 }
 0x2cd   :  { %v4113_v16 = vadd.f32 %v22244_v47, %v4045_v25  ;;  %v4056_v36 = vmul.f32 %v22239_v35, %v3842_v32  ;;  %v3844_v37 = vpop.f32.mrb[15].mxu1 }
 0x2ce   :  { %v4114_v38 = vadd.f32 %v22244_v47, %v4046_v28  ;;  %v4057_v40 = vmul.f32 %v22239_v35, %v3844_v37 }
 0x2cf   :  { %v4124_v34 = vadd.f32 %v22250_v56, %v4056_v36  ;;  %v4157_v43 = vmax.f32 %v4113_v16, 0.0 }
 0x2d0   :  { %v4125_v41 = vadd.f32 %v22250_v56, %v4057_v40  ;;  %v4158_v45 = vmax.f32 %v4114_v38, 0.0 }
 0x2d1   :  { %v4168_v44 = vmax.f32 %v4124_v34, 0.0  ;;  %v19670_v34 = vld [vmem:[%s26584_s6 + $0x200] ss:$16 sps:$4 sm:$0xff]  }
 0x2d2   :  { %v4169_v46 = vmax.f32 %v4125_v41, 0.0  ;;  %v18011_v48 = vpop.f32.mrb[16].mxu1  ;;  %v19673_v41 = vld [vmem:[%s26584_s6 + $0x208] ss:$16 sps:$4 sm:$0xff]  }
 0x2d3   :  { %v4049_v49 = vmul.f32 %v18011_v48, %v22234_v18  ;;  %v3934_v42 = vpop.f32.mrb[17].mxu1  ;;  %v22285_v51 = vpack.c.bf16 %v4168_v44, %v4157_v43  ;;  %v19681_v48 = vld [vmem:[%s26584_s6 + $0x22c] ss:$16 sps:$4 sm:$0xff]  }
 0x2d4   :  { %v4027_v54 = vmul.f32 %v22226_v29, %v3934_v42  ;;  %v18012_v55 = vpop.f32.mrb[18].mxu1  ;;  %v22288_v57 = vpack.c.bf16 %v4169_v46, %v4158_v45  ;;  %v19678_v46 = vld [vmem:[%s26584_s6 + $0x224] ss:$16 sps:$4 sm:$0xff]  }
 0x2d5   :  { %v4117_v58 = vadd.f32 %v22244_v47, %v4049_v49  ;;  %v4060_v59 = vmul.f32 %v18012_v55, %v22239_v35  ;;  %v3937_v60 = vpop.f32.mrb[19].mxu1 }
 0x2d6   :  { %v4095_v50 = vadd.f32 %v22228_v30, %v4027_v54  ;;  %v4038_v61 = vmul.f32 %v22224_v27, %v3937_v60 }
 0x2d7   :  { %v4128_v63 = vadd.f32 %v22250_v56, %v4060_v59  ;;  %v4161_v1 = vmax.f32 %v4117_v58, 0.0  ;;  %v19676_v58 = vld [vmem:[%s26584_s6 + $0x220] ss:$16 sps:$4 sm:$0xff]   ;;  %v19679_v59 = vld [vmem:[%s26584_s6 + $0x228] ss:$16 sps:$4 sm:$0xff]  }
 0x2d8   :  { %v4106_v0 = vadd.f32 %v22230_v31, %v4038_v61  ;;  %v4139_v2 = vmax.f32 %v4095_v50, 0.0  ;;  %v19684_v61 = vld [vmem:[%s26584_s6 + $0x244] ss:$16 sps:$4 sm:$0xff]  }
 0x2d9   :  { %v4172_v53 = vmax.f32 %v4128_v63, 0.0  ;;  %v19687_v63 = vld [vmem:[%s26584_s6 + $0x24c] ss:$16 sps:$4 sm:$0xff]  }
 0x2da   :  { %v4150_v9 = vmax.f32 %v4106_v0, 0.0  ;;  %v3669_v5 = vpop.f32.mrb[0].mxu0 }
 0x2db   :  { %v22296_v8 = vpack.c.bf16 %v4172_v53, %v4161_v1  ;;  %v4017_v10 = vmul.f32 %v22226_v29, %v3669_v5  ;;  %v3671_v11 = vpop.f32.mrb[1].mxu0 }
 0x2dc   :  { %v22299_v4 = vpack.c.bf16 %v4150_v9, %v4139_v2  ;;  %v4018_v62 = vmul.f32 %v22226_v29, %v3671_v11  ;;  %v3673_v15 = vpop.f32.mrb[2].mxu0 }
 0x2dd   :  { %v4085_v13 = vadd.f32 %v22228_v30, %v4017_v10  ;;  %v4028_v21 = vmul.f32 %v22224_v27, %v3673_v15  ;;  %v3675_v22 = vpop.f32.mrb[3].mxu0  ;;  %v19682_v15 = vld [vmem:[%s26584_s6 + $0x240] ss:$16 sps:$4 sm:$0xff]  }
 0x2de   :  { %v4086_v23 = vadd.f32 %v22228_v30, %v4018_v62  ;;  %v4029_v17 = vmul.f32 %v22224_v27, %v3675_v22 }
 0x2df   :  { %v4096_v24 = vadd.f32 %v22230_v31, %v4028_v21  ;;  %v4129_v14 = vmax.f32 %v4085_v13, 0.0  ;;  %v19685_v13 = vld [vmem:[%s26584_s6 + $0x248] ss:$16 sps:$4 sm:$0xff]  }
 0x2e0   :  { %v4097_v7 = vadd.f32 %v22230_v31, %v4029_v17  ;;  %v4130_v25 = vmax.f32 %v4086_v23, 0.0 }
 0x2e1   :  { %v4140_v26 = vmax.f32 %v4096_v24, 0.0 }
 0x2e2   :  { %v4141_v20 = vmax.f32 %v4097_v7, 0.0  ;;  %v3679_v28 = vpop.f32.mrb[4].mxu0  ;;  %v19690_v7 = vld [vmem:[%s26584_s6 + $0x264] ss:$16 sps:$4 sm:$0xff]  }
 0x2e3   :  { %v4173_v32 = vpack.c.bf16 %v4140_v26, %v4129_v14  ;;  %v4039_v16 = vmul.f32 %v22234_v18, %v3679_v28  ;;  %v3681_v36 = vpop.f32.mrb[5].mxu0  ;;  %v19693_v14 = vld [vmem:[%s26584_s6 + $0x26c] ss:$16 sps:$4 sm:$0xff]   ;;  %v19691_v28 = vld [vmem:[%s26584_s6 + $0x268] ss:$16 sps:$4 sm:$0xff]  }
 0x2e4   :  { %v4040_v37 = vmul.f32 %v22234_v18, %v3681_v36  ;;  %v3683_v38 = vpop.f32.mrb[6].mxu0  ;;  %v4174_v40 = vpack.c.bf16 %v4141_v20, %v4130_v25  ;;  %v19688_v20 = vld [vmem:[%s26584_s6 + $0x260] ss:$16 sps:$4 sm:$0xff]   ;;  %v19696_v36 = vld [vmem:[%s26584_s6 + $0x284] ss:$16 sps:$4 sm:$0xff]  }
 0x2e5   :  { %v4107_v43 = vadd.f32 %v22244_v47, %v4039_v16  ;;  %v4050_v44 = vmul.f32 %v22239_v35, %v3683_v38  ;;  %v3685_v45 = vpop.f32.mrb[7].mxu0 }
 0x2e6   :  { %v4108_v49 = vadd.f32 %v22244_v47, %v4040_v37  ;;  %v4051_v42 = vmul.f32 %v22239_v35, %v3685_v45  ;;  %6274 = vmatprep.mubr.bf16.mxu1 %v4174_v40  ;;  %6592 = vmatprep.mubr.bf16.mxu0 %v4174_v40  ;;  %v19699_v37 = vld [vmem:[%s26584_s6 + $0x28c] ss:$16 sps:$4 sm:$0xff]  }
 0x2e7   :  { %v4118_v54 = vadd.f32 %v22250_v56, %v4050_v44  ;;  %6275 = vmatmul.mubr.bf16.vlgmr.msra.gmra.mrb[20].mxu1 %v4173_v32  ;;  %6593 = vmatmul.mubr.bf16.vlgmr.msra.gmra.mrb[24].mxu0 %v4173_v32  ;;  %v4151_v60 = vmax.f32 %v4107_v43, 0.0 }
 0x2e8   :  { %v4119_v55 = vadd.f32 %v22250_v56, %v4051_v42  ;;  %6296 = vmatpush1.bf16.msra.mxu1 %v19670_v34  ;;  %6614 = vmatpush1.bf16.msra.mxu0 %v19673_v41  ;;  %v4152_v0 = vmax.f32 %v4108_v49, 0.0 }
 0x2e9   :  { %v4162_v50 = vmax.f32 %v4118_v54, 0.0  ;;  %6297 = vmatprep.subr.bf16.mxu1 %v19678_v46  ;;  %6615 = vmatprep.subr.bf16.mxu0 %v19681_v48  ;;  %v19694_v46 = vld [vmem:[%s26584_s6 + $0x280] ss:$16 sps:$4 sm:$0xff]   ;;  %v19697_v48 = vld [vmem:[%s26584_s6 + $0x288] ss:$16 sps:$4 sm:$0xff]  }
 0x2ea   :  { %v4163_v1 = vmax.f32 %v4119_v55, 0.0  ;;  %v3775_v53 = vpop.f32.mrb[8].mxu0 }
 0x2eb   :  { %v4021_v2 = vmul.f32 %v22226_v29, %v3775_v53  ;;  %v3777_v9 = vpop.f32.mrb[9].mxu0  ;;  %v4184_v5 = vpack.c.bf16 %v4162_v50, %v4151_v60 }
 0x2ec   :  { %v4022_v10 = vmul.f32 %v22226_v29, %v3777_v9  ;;  %6298 = vmatpush1.bf16.msra.mxu1 %v19676_v58  ;;  %6616 = vmatpush1.bf16.msra.mxu0 %v19679_v59  ;;  %v3779_v11 = vpop.f32.mrb[10].mxu0  ;;  %v4185_v62 = vpack.c.bf16 %v4163_v1, %v4152_v0  ;;  %v19702_v58 = vld [vmem:[%s26584_s6 + $0x2a4] ss:$16 sps:$4 sm:$0xff]   ;;  %v19705_v59 = vld [vmem:[%s26584_s6 + $0x2ac] ss:$16 sps:$4 sm:$0xff]  }
 0x2ed   :  { %v4089_v21 = vadd.f32 %v22228_v30, %v4021_v2  ;;  %v4032_v22 = vmul.f32 %v22224_v27, %v3779_v11  ;;  %v3781_v23 = vpop.f32.mrb[11].mxu0  ;;  %6299 = vmatprep.subr.bf16.mxu1 %v19684_v61  ;;  %6617 = vmatprep.subr.bf16.mxu0 %v19687_v63  ;;  %v19700_v0 = vld [vmem:[%s26584_s6 + $0x2a0] ss:$16 sps:$4 sm:$0xff]   ;;  %v19703_v1 = vld [vmem:[%s26584_s6 + $0x2a8] ss:$16 sps:$4 sm:$0xff]  }
 0x2ee   :  { %v4090_v17 = vadd.f32 %v22228_v30, %v4022_v10  ;;  %v4033_v24 = vmul.f32 %v22224_v27, %v3781_v23  ;;  %6284 = vmatprep.mubr.bf16.mxu1 %v4185_v62  ;;  %6602 = vmatprep.mubr.bf16.mxu0 %v4185_v62  ;;  %v19708_v9 = vld [vmem:[%s26584_s6 + $0x2c4] ss:$16 sps:$4 sm:$0xff]  }
 0x2ef   :  { %v4100_v26 = vadd.f32 %v22230_v31, %v4032_v22  ;;  %6285 = vmatmul.mubr.bf16.gmra.mrb[24].mxu1 %v4184_v5  ;;  %6603 = vmatmul.mubr.bf16.gmra.mrb[28].mxu0 %v4184_v5  ;;  %v4133_v32 = vmax.f32 %v4089_v21, 0.0  ;;  %v19711_v5 = vld [vmem:[%s26584_s6 + $0x2cc] ss:$16 sps:$4 sm:$0xff]  }
 0x2f0   :  { %v4101_v25 = vadd.f32 %v22230_v31, %v4033_v24  ;;  %6300 = vmatpush1.bf16.msra.mxu1 %v19682_v15  ;;  %6618 = vmatpush1.bf16.msra.mxu0 %v19685_v13  ;;  %v4134_v38 = vmax.f32 %v4090_v17, 0.0  ;;  %v19706_v17 = vld [vmem:[%s26584_s6 + $0x2c0] ss:$16 sps:$4 sm:$0xff]   ;;  %v19709_v24 = vld [vmem:[%s26584_s6 + $0x2c8] ss:$16 sps:$4 sm:$0xff]  }
 0x2f1   :  { %v4144_v16 = vmax.f32 %v4100_v26, 0.0  ;;  %6327 = vmatprep.mubr.bf16.mxu1 %v22252_v39  ;;  %6645 = vmatprep.mubr.bf16.mxu0 %v22252_v39 }
 0x2f2   :  { %v4145_v40 = vmax.f32 %v4101_v25, 0.0  ;;  %v3785_v34 = vpop.f32.mrb[12].mxu0  ;;  %6301 = vmatprep.subr.bf16.mxu1 %v19690_v7  ;;  %6619 = vmatprep.subr.bf16.mxu0 %v19693_v14 }
 0x2f3   :  { %v22374_v41 = vpack.c.bf16 %v4144_v16, %v4133_v32  ;;  %v4043_v43 = vmul.f32 %v22234_v18, %v3785_v34  ;;  %v3787_v44 = vpop.f32.mrb[13].mxu0 }
 0x2f4   :  { %v4044_v39 = vmul.f32 %v22234_v18, %v3787_v44  ;;  %6302 = vmatpush1.bf16.msra.mxu1 %v19688_v20  ;;  %6620 = vmatpush1.bf16.msra.mxu0 %v19691_v28  ;;  %v3789_v45 = vpop.f32.mrb[14].mxu0  ;;  %v22384_v49 = vpack.c.bf16 %v4145_v40, %v4134_v38  ;;  %v19717_v20 = vld [vmem:[%s26584_s6 + $0x2ec] ss:$16 sps:$4 sm:$0xff]   ;;  %v19715_v38 = vld [vmem:[%s26584_s6 + $0x2e8] ss:$16 sps:$4 sm:$0xff]  }
 0x2f5   :  { %v4111_v42 = vadd.f32 %v22244_v47, %v4043_v43  ;;  %v4054_v54 = vmul.f32 %v22239_v35, %v3789_v45  ;;  %v3791_v55 = vpop.f32.mrb[15].mxu0  ;;  %6303 = vmatprep.subr.bf16.mxu1 %v19696_v36  ;;  %6621 = vmatprep.subr.bf16.mxu0 %v19699_v37  ;;  %v19712_v37 = vld [vmem:[%s26584_s6 + $0x2e0] ss:$16 sps:$4 sm:$0xff]  }
 0x2f6   :  { %v4112_v60 = vadd.f32 %v22244_v47, %v4044_v39  ;;  %v4055_v50 = vmul.f32 %v22239_v35, %v3791_v55  ;;  %v19721_v55 = vld [vmem:[%s26584_s6 + $0x308] ss:$16 sps:$4 sm:$0xff]  }
 0x2f7   :  { %v4122_v61 = vadd.f32 %v22250_v56, %v4054_v54  ;;  %v4155_v53 = vmax.f32 %v4111_v42, 0.0  ;;  %v19718_v54 = vld [vmem:[%s26584_s6 + $0x300] ss:$16 sps:$4 sm:$0xff]  }
 0x2f8   :  { %v4123_v63 = vadd.f32 %v22250_v56, %v4055_v50  ;;  %6304 = vmatpush1.bf16.msra.mxu1 %v19694_v46  ;;  %6622 = vmatpush1.bf16.msra.mxu0 %v19697_v48  ;;  %v4156_v10 = vmax.f32 %v4112_v60, 0.0 }
 0x2f9   :  { %v4166_v2 = vmax.f32 %v4122_v61, 0.0  ;;  %6305 = vmatprep.subr.bf16.mxu1 %v19702_v58  ;;  %6623 = vmatprep.subr.bf16.mxu0 %v19705_v59  ;;  %v19729_v61 = vld [vmem:[%s26584_s6 + $0x32c] ss:$16 sps:$4 sm:$0xff]  }
 0x2fa   :  { %v4167_v11 = vmax.f32 %v4123_v63, 0.0  ;;  %v3881_v62 = vpop.f32.mrb[16].mxu0 }
 0x2fb   :  { %v4025_v15 = vmul.f32 %v22226_v29, %v3881_v62  ;;  %v3883_v13 = vpop.f32.mrb[17].mxu0  ;;  %v22411_v21 = vpack.c.bf16 %v4166_v2, %v4155_v53  ;;  %v19724_v2 = vld [vmem:[%s26584_s6 + $0x320] ss:$16 sps:$4 sm:$0xff]  }
 0x2fc   :  { %v4026_v22 = vmul.f32 %v22226_v29, %v3883_v13  ;;  %6306 = vmatpush1.bf16.msra.mxu1 %v19700_v0  ;;  %6624 = vmatpush1.bf16.msra.mxu0 %v19703_v1  ;;  %v3885_v23 = vpop.f32.mrb[18].mxu0  ;;  %v22420_v7 = vpack.c.bf16 %v4167_v11, %v4156_v10  ;;  %v19714_v29 = vld [vmem:[%s26584_s6 + $0x2e4] ss:$16 sps:$4 sm:$0xff]   ;;  %v19733_v13 = vld [vmem:[%s26584_s6 + $0x348] ss:$16 sps:$4 sm:$0xff]  }
 0x2fd   :  { %v4093_v14 = vadd.f32 %v22228_v30, %v4025_v15  ;;  %v4036_v26 = vmul.f32 %v22224_v27, %v3885_v23  ;;  %v3887_v25 = vpop.f32.mrb[19].mxu0  ;;  %6307 = vmatprep.subr.bf16.mxu1 %v19708_v9  ;;  %6625 = vmatprep.subr.bf16.mxu0 %v19711_v5  ;;  %v19727_v9 = vld [vmem:[%s26584_s6 + $0x328] ss:$16 sps:$4 sm:$0xff]   ;;  %v19730_v15 = vld [vmem:[%s26584_s6 + $0x340] ss:$16 sps:$4 sm:$0xff]  }
 0x2fe   :  { %v4094_v28 = vadd.f32 %v22228_v30, %v4026_v22  ;;  %v4037_v32 = vmul.f32 %v22224_v27, %v3887_v25  ;;  %v19720_v27 = vld [vmem:[%s26584_s6 + $0x304] ss:$16 sps:$4 sm:$0xff]   ;;  %v19723_v30 = vld [vmem:[%s26584_s6 + $0x30c] ss:$16 sps:$4 sm:$0xff]  }
 0x2ff   :  { %v4104_v16 = vadd.f32 %v22230_v31, %v4036_v26  ;;  %v4137_v40 = vmax.f32 %v4093_v14, 0.0  ;;  %v19738_v23 = vld [vmem:[%s26584_s6 + $0x364] ss:$16 sps:$4 sm:$0xff]   ;;  %v19739_v14 = vld [vmem:[%s26584_s6 + $0x368] ss:$16 sps:$4 sm:$0xff]  }
 0x300   :  { %v4105_v36 = vadd.f32 %v22230_v31, %v4037_v32  ;;  %6308 = vmatpush1.bf16.msra.mxu1 %v19706_v17  ;;  %6626 = vmatpush1.bf16.msra.mxu0 %v19709_v24  ;;  %v4138_v31 = vmax.f32 %v4094_v28, 0.0  ;;  %v19741_v17 = vld [vmem:[%s26584_s6 + $0x36c] ss:$16 sps:$4 sm:$0xff]   ;;  %v19736_v24 = vld [vmem:[%s26584_s6 + $0x360] ss:$16 sps:$4 sm:$0xff]  }
 0x301   :  { %v4148_v34 = vmax.f32 %v4104_v16, 0.0  ;;  %6309 = vmatprep.subr.bf16.mxu1 %v19714_v29  ;;  %6627 = vmatprep.subr.bf16.mxu0 %v19717_v20  ;;  %v19744_v26 = vld [vmem:[%s26584_s6 + $0x384] ss:$16 sps:$4 sm:$0xff]   ;;  %v19747_v25 = vld [vmem:[%s26584_s6 + $0x38c] ss:$16 sps:$4 sm:$0xff]  }
 0x302   :  { %v4149_v43 = vmax.f32 %v4105_v36, 0.0  ;;  %v3891_v44 = vpop.f32.mrb[20].mxu0  ;;  %v19742_v29 = vld [vmem:[%s26584_s6 + $0x380] ss:$16 sps:$4 sm:$0xff]   ;;  %v19745_v20 = vld [vmem:[%s26584_s6 + $0x388] ss:$16 sps:$4 sm:$0xff]  }
 0x303   :  { %v22446_v39 = vpack.c.bf16 %v4148_v34, %v4137_v40  ;;  %v4047_v45 = vmul.f32 %v22234_v18, %v3891_v44  ;;  %v3893_v46 = vpop.f32.mrb[21].mxu0  ;;  %v19750_v28 = vld [vmem:[%s26584_s6 + $0x3a4] ss:$16 sps:$4 sm:$0xff]   ;;  %v19753_v32 = vld [vmem:[%s26584_s6 + $0x3ac] ss:$16 sps:$4 sm:$0xff]  }
 0x304   :  { %v4048_v48 = vmul.f32 %v22234_v18, %v3893_v46  ;;  %6310 = vmatpush1.bf16.msra.mxu1 %v19712_v37  ;;  %6628 = vmatpush1.bf16.msra.mxu0 %v19715_v38  ;;  %v3895_v42 = vpop.f32.mrb[22].mxu0  ;;  %v22456_v58 = vpack.c.bf16 %v4149_v43, %v4138_v31  ;;  %v19726_v18 = vld [vmem:[%s26584_s6 + $0x324] ss:$16 sps:$4 sm:$0xff]   ;;  %v19748_v16 = vld [vmem:[%s26584_s6 + $0x3a0] ss:$16 sps:$4 sm:$0xff]  }
 0x305   :  { %v4115_v59 = vadd.f32 %v22244_v47, %v4047_v45  ;;  %v4058_v60 = vmul.f32 %v22239_v35, %v3895_v42  ;;  %v3897_v50 = vpop.f32.mrb[23].mxu0  ;;  %6311 = vmatprep.subr.bf16.mxu1 %v19720_v27  ;;  %6629 = vmatprep.subr.bf16.mxu0 %v19723_v30  ;;  %v19751_v36 = vld [vmem:[%s26584_s6 + $0x3a8] ss:$16 sps:$4 sm:$0xff]   ;;  %v19756_v37 = vld [vmem:[%s26584_s6 + $0x3c4] ss:$16 sps:$4 sm:$0xff]  }
 0x306   :  { %v4116_v63 = vadd.f32 %v22244_v47, %v4048_v48  ;;  %v4059_v0 = vmul.f32 %v22239_v35, %v3897_v50  ;;  %v19732_v35 = vld [vmem:[%s26584_s6 + $0x344] ss:$16 sps:$4 sm:$0xff]   ;;  %v19735_v47 = vld [vmem:[%s26584_s6 + $0x34c] ss:$16 sps:$4 sm:$0xff]   ;;  %v19754_v40 = vld [vmem:[%s26584_s6 + $0x3c0] ss:$16 sps:$4 sm:$0xff]  }
 0x307   :  { %v4126_v1 = vadd.f32 %v22250_v56, %v4058_v60  ;;  %v4159_v5 = vmax.f32 %v4115_v59, 0.0  ;;  %v19759_v38 = vld [vmem:[%s26584_s6 + $0x3cc] ss:$16 sps:$4 sm:$0xff]   ;;  %v19757_v34 = vld [vmem:[%s26584_s6 + $0x3c8] ss:$16 sps:$4 sm:$0xff]  }
 0x308   :  { %v4127_v53 = vadd.f32 %v22250_v56, %v4059_v0  ;;  %6312 = vmatpush1.bf16.msra.mxu1 %v19718_v54  ;;  %6630 = vmatpush1.bf16.msra.mxu0 %v19721_v55  ;;  %v4160_v56 = vmax.f32 %v4116_v63, 0.0  ;;  %v19762_v27 = vld [vmem:[%s26584_s6 + $0x3e4] ss:$16 sps:$4 sm:$0xff]   ;;  %v19765_v30 = vld [vmem:[%s26584_s6 + $0x3ec] ss:$16 sps:$4 sm:$0xff]  }
 0x309   :  { %v4170_v10 = vmax.f32 %v4126_v1, 0.0  ;;  %6313 = vmatprep.subr.bf16.mxu1 %v19726_v18  ;;  %6631 = vmatprep.subr.bf16.mxu0 %v19729_v61  ;;  %v19760_v31 = vld [vmem:[%s26584_s6 + $0x3e0] ss:$16 sps:$4 sm:$0xff]   ;;  %v19763_v43 = vld [vmem:[%s26584_s6 + $0x3e8] ss:$16 sps:$4 sm:$0xff]  }
 0x30a   :  { %v4171_v11 = vmax.f32 %v4127_v53, 0.0  ;;  %v19768_v44 = vld [vmem:[%s26584_s6 + $0x404] ss:$16 sps:$4 sm:$0xff]   ;;  %v19771_v45 = vld [vmem:[%s26584_s6 + $0x40c] ss:$16 sps:$4 sm:$0xff]  }
 0x30b   :  { %v22482_v62 = vpack.c.bf16 %v4170_v10, %v4159_v5  ;;  %v19766_v46 = vld [vmem:[%s26584_s6 + $0x400] ss:$16 sps:$4 sm:$0xff]   ;;  %v19769_v48 = vld [vmem:[%s26584_s6 + $0x408] ss:$16 sps:$4 sm:$0xff]   ;;  %v19774_v42 = vld [vmem:[%s26584_s6 + $0x424] ss:$16 sps:$4 sm:$0xff]  }
 0x30c   :  { %6314 = vmatpush1.bf16.msra.mxu1 %v19724_v2  ;;  %6632 = vmatpush1.bf16.msra.mxu0 %v19727_v9  ;;  %v22490_v22 = vpack.c.bf16 %v4171_v11, %v4160_v56  ;;  %v19777_v54 = vld [vmem:[%s26584_s6 + $0x42c] ss:$16 sps:$4 sm:$0xff]   ;;  %v19772_v55 = vld [vmem:[%s26584_s6 + $0x420] ss:$16 sps:$4 sm:$0xff]   ;;  %v19775_v59 = vld [vmem:[%s26584_s6 + $0x428] ss:$16 sps:$4 sm:$0xff]  }
 0x30d   :  { %6315 = vmatprep.subr.bf16.mxu1 %v19732_v35  ;;  %6633 = vmatprep.subr.bf16.mxu0 %v19735_v47  ;;  %v19780_v60 = vld [vmem:[%s26584_s6 + $0x444] ss:$16 sps:$4 sm:$0xff]   ;;  %v19781_v50 = vld [vmem:[%s26584_s6 + $0x448] ss:$16 sps:$4 sm:$0xff]   ;;  %v19789_v61 = vld [vmem:[%s26584_s6 + $0x46c] ss:$16 sps:$4 sm:$0xff]  }
 0x30e   :  { %v19786_v18 = vld [vmem:[%s26584_s6 + $0x464] ss:$16 sps:$4 sm:$0xff]   ;;  %v19784_v63 = vld [vmem:[%s26584_s6 + $0x460] ss:$16 sps:$4 sm:$0xff]   ;;  %v19787_v0 = vld [vmem:[%s26584_s6 + $0x468] ss:$16 sps:$4 sm:$0xff]  }
 0x30f   :  { %v19792_v1 = vld [vmem:[%s26584_s6 + $0x484] ss:$16 sps:$4 sm:$0xff]   ;;  %v19790_v53 = vld [vmem:[%s26584_s6 + $0x480] ss:$16 sps:$4 sm:$0xff]   ;;  %v19801_v9 = vld [vmem:[%s26584_s6 + $0x4ac] ss:$16 sps:$4 sm:$0xff]  }
 0x310   :  { %6316 = vmatpush1.bf16.msra.mxu1 %v19730_v15  ;;  %6634 = vmatpush1.bf16.msra.mxu0 %v19733_v13  ;;  %v19798_v2 = vld [vmem:[%s26584_s6 + $0x4a4] ss:$16 sps:$4 sm:$0xff]   ;;  %v19796_v5 = vld [vmem:[%s26584_s6 + $0x4a0] ss:$16 sps:$4 sm:$0xff]   ;;  %v19799_v10 = vld [vmem:[%s26584_s6 + $0x4a8] ss:$16 sps:$4 sm:$0xff]  }
 0x311   :  { %6317 = vmatprep.subr.bf16.mxu1 %v19738_v23  ;;  %6635 = vmatprep.subr.bf16.mxu0 %v19741_v17  ;;  %v19804_v35 = vld [vmem:[%s26584_s6 + $0x4c4] ss:$16 sps:$4 sm:$0xff]   ;;  %v19807_v47 = vld [vmem:[%s26584_s6 + $0x4cc] ss:$16 sps:$4 sm:$0xff]   ;;  %v19802_v56 = vld [vmem:[%s26584_s6 + $0x4c0] ss:$16 sps:$4 sm:$0xff]  }
 0x312   :  { %v19805_v11 = vld [vmem:[%s26584_s6 + $0x4c8] ss:$16 sps:$4 sm:$0xff]   ;;  %v19810_v15 = vld [vmem:[%s26584_s6 + $0x4e4] ss:$16 sps:$4 sm:$0xff]   ;;  %v19813_v13 = vld [vmem:[%s26584_s6 + $0x4ec] ss:$16 sps:$4 sm:$0xff]  }
 0x313   :  { %v19808_v23 = vld [vmem:[%s26584_s6 + $0x4e0] ss:$16 sps:$4 sm:$0xff]   ;;  %v19811_v17 = vld [vmem:[%s26584_s6 + $0x4e8] ss:$16 sps:$4 sm:$0xff]  }
 0x314   :  { %6318 = vmatpush1.bf16.msra.mxu1 %v19736_v24  ;;  %6636 = vmatpush1.bf16.msra.mxu0 %v19739_v14  ;;  %v19816_v24 = vld [vmem:[%s26584_s6 + $0x504] ss:$16 sps:$4 sm:$0xff]   ;;  %v19819_v14 = vld [vmem:[%s26584_s6 + $0x50c] ss:$16 sps:$4 sm:$0xff]  }
 0x315   :  { %6319 = vmatprep.subr.bf16.mxu1 %v19744_v26  ;;  %6637 = vmatprep.subr.bf16.mxu0 %v19747_v25  ;;  %v19814_v26 = vld [vmem:[%s26584_s6 + $0x500] ss:$16 sps:$4 sm:$0xff]   ;;  %v19817_v25 = vld [vmem:[%s26584_s6 + $0x508] ss:$16 sps:$4 sm:$0xff]  }
 0x318   :  { %6320 = vmatpush1.bf16.msra.mxu1 %v19742_v29  ;;  %6638 = vmatpush1.bf16.msra.mxu0 %v19745_v20  ;;  %v19822_v29 = vld [vmem:[%s26584_s6 + $0x524] ss:$16 sps:$4 sm:$0xff]   ;;  %v19825_v20 = vld [vmem:[%s26584_s6 + $0x52c] ss:$16 sps:$4 sm:$0xff]  }
 0x319   :  { %6321 = vmatprep.subr.bf16.mxu1 %v19750_v28  ;;  %6639 = vmatprep.subr.bf16.mxu0 %v19753_v32  ;;  %v19820_v28 = vld [vmem:[%s26584_s6 + $0x520] ss:$16 sps:$4 sm:$0xff]   ;;  %v19823_v32 = vld [vmem:[%s26584_s6 + $0x528] ss:$16 sps:$4 sm:$0xff]  }
 0x31c   :  { %6322 = vmatpush1.bf16.msra.mxu1 %v19748_v16  ;;  %6640 = vmatpush1.bf16.msra.mxu0 %v19751_v36  ;;  %v19828_v16 = vld [vmem:[%s26584_s6 + $0x544] ss:$16 sps:$4 sm:$0xff]   ;;  %v19831_v36 = vld [vmem:[%s26584_s6 + $0x54c] ss:$16 sps:$4 sm:$0xff]  }
 0x31d   :  { %6323 = vmatprep.subr.bf16.mxu1 %v19756_v37  ;;  %6641 = vmatprep.subr.bf16.mxu0 %v19759_v38  ;;  %v19826_v37 = vld [vmem:[%s26584_s6 + $0x540] ss:$16 sps:$4 sm:$0xff]   ;;  %v19829_v38 = vld [vmem:[%s26584_s6 + $0x548] ss:$16 sps:$4 sm:$0xff]  }
 0x320   :  { %6324 = vmatpush1.bf16.msra.mxu1 %v19754_v40  ;;  %6642 = vmatpush1.bf16.msra.mxu0 %v19757_v34  ;;  %v19834_v40 = vld [vmem:[%s26584_s6 + $0x564] ss:$16 sps:$4 sm:$0xff]   ;;  %v19837_v34 = vld [vmem:[%s26584_s6 + $0x56c] ss:$16 sps:$4 sm:$0xff]  }
 0x321   :  { %6325 = vmatprep.subr.bf16.mxu1 %v19762_v27  ;;  %6643 = vmatprep.subr.bf16.mxu0 %v19765_v30  ;;  %v19832_v27 = vld [vmem:[%s26584_s6 + $0x560] ss:$16 sps:$4 sm:$0xff]   ;;  %v19835_v30 = vld [vmem:[%s26584_s6 + $0x568] ss:$16 sps:$4 sm:$0xff]  }
 0x324   :  { %6326 = vmatpush1.bf16.msra.mxu1 %v19760_v31  ;;  %6644 = vmatpush1.bf16.msra.mxu0 %v19763_v43  ;;  %v19840_v31 = vld [vmem:[%s26584_s6 + $0x584] ss:$16 sps:$4 sm:$0xff]   ;;  %v19843_v43 = vld [vmem:[%s26584_s6 + $0x58c] ss:$16 sps:$4 sm:$0xff]  }
 0x325   :  { %6348 = vmatprep.subr.bf16.mxu1 %v19768_v44  ;;  %6666 = vmatprep.subr.bf16.mxu0 %v19771_v45  ;;  %v19838_v44 = vld [vmem:[%s26584_s6 + $0x580] ss:$16 sps:$4 sm:$0xff]   ;;  %v19841_v45 = vld [vmem:[%s26584_s6 + $0x588] ss:$16 sps:$4 sm:$0xff]  }
 0x327   :  { %6328 = vmatmul.mubr.bf16.vlgmr.msra.gmra.mrb[20].mxu1 %v22247_v52  ;;  %6646 = vmatmul.mubr.bf16.vlgmr.msra.gmra.mrb[24].mxu0 %v22247_v52  ;;  %v19783_v52 = vld [vmem:[%s26584_s6 + $0x44c] ss:$16 sps:$4 sm:$0xff]  }
 0x328   :  { %6337 = vmatprep.mubr.bf16.mxu1 %v22264_v12  ;;  %6349 = vmatpush1.bf16.msra.mxu1 %v19766_v46  ;;  %v19846_v46 = vld [vmem:[%s26584_s6 + $0x5a4] ss:$16 sps:$4 sm:$0xff]  }
 0x329   :  { %6655 = vmatprep.mubr.bf16.mxu0 %v22264_v12  ;;  %6667 = vmatpush1.bf16.msra.mxu0 %v19769_v48  ;;  %v19778_v12 = vld [vmem:[%s26584_s6 + $0x440] ss:$16 sps:$4 sm:$0xff]   ;;  %v19849_v48 = vld [vmem:[%s26584_s6 + $0x5ac] ss:$16 sps:$4 sm:$0xff]  }
 0x32a   :  { %6350 = vmatprep.subr.bf16.mxu1 %v19774_v42  ;;  %6668 = vmatprep.subr.bf16.mxu0 %v19777_v54  ;;  %v19844_v42 = vld [vmem:[%s26584_s6 + $0x5a0] ss:$16 sps:$4 sm:$0xff]   ;;  %v19847_v54 = vld [vmem:[%s26584_s6 + $0x5a8] ss:$16 sps:$4 sm:$0xff]  }
 0x32c   :  { %6351 = vmatpush1.bf16.msra.mxu1 %v19772_v55  ;;  %v19852_v55 = vld [vmem:[%s26584_s6 + $0x5c4] ss:$16 sps:$4 sm:$0xff]  }
 0x32d   :  { %6669 = vmatpush1.bf16.msra.mxu0 %v19775_v59  ;;  %6352 = vmatprep.subr.bf16.mxu1 %v19780_v60  ;;  %v19855_v59 = vld [vmem:[%s26584_s6 + $0x5cc] ss:$16 sps:$4 sm:$0xff]   ;;  %v19850_v60 = vld [vmem:[%s26584_s6 + $0x5c0] ss:$16 sps:$4 sm:$0xff]  }
 0x32e   :  { %6670 = vmatprep.subr.bf16.mxu0 %v19783_v52  ;;  %v19853_v52 = vld [vmem:[%s26584_s6 + $0x5c8] ss:$16 sps:$4 sm:$0xff]  }
 0x32f   :  { %6338 = vmatmul.mubr.bf16.gmra.mrb[24].mxu1 %v22261_v6  ;;  %6656 = vmatmul.mubr.bf16.gmra.mrb[28].mxu0 %v22261_v6  ;;  %v19795_v6 = vld [vmem:[%s26584_s6 + $0x48c] ss:$16 sps:$4 sm:$0xff]  }
 0x330   :  { %6353 = vmatpush1.bf16.msra.mxu1 %v19778_v12  ;;  %6380 = vmatprep.mubr.bf16.mxu1 %v22384_v49  ;;  %v19858_v12 = vld [vmem:[%s26584_s6 + $0x5e4] ss:$16 sps:$4 sm:$0xff]  }
 0x331   :  { %6671 = vmatpush1.bf16.msra.mxu0 %v19781_v50  ;;  %6698 = vmatprep.mubr.bf16.mxu0 %v22384_v49  ;;  %v19793_v49 = vld [vmem:[%s26584_s6 + $0x488] ss:$16 sps:$4 sm:$0xff]   ;;  %v19861_v50 = vld [vmem:[%s26584_s6 + $0x5ec] ss:$16 sps:$4 sm:$0xff]  }
 0x332   :  { %6354 = vmatprep.subr.bf16.mxu1 %v19786_v18  ;;  %6672 = vmatprep.subr.bf16.mxu0 %v19789_v61  ;;  %v19856_v18 = vld [vmem:[%s26584_s6 + $0x5e0] ss:$16 sps:$4 sm:$0xff]   ;;  %v19859_v61 = vld [vmem:[%s26584_s6 + $0x5e8] ss:$16 sps:$4 sm:$0xff]  }
 0x334   :  { %6355 = vmatpush1.bf16.msra.mxu1 %v19784_v63  ;;  %v19864_v63 = vld [vmem:[%s26584_s6 + $0x604] ss:$16 sps:$4 sm:$0xff]  }
 0x335   :  { %6673 = vmatpush1.bf16.msra.mxu0 %v19787_v0  ;;  %6356 = vmatprep.subr.bf16.mxu1 %v19792_v1  ;;  %v19867_v0 = vld [vmem:[%s26584_s6 + $0x60c] ss:$16 sps:$4 sm:$0xff]   ;;  %v19862_v1 = vld [vmem:[%s26584_s6 + $0x600] ss:$16 sps:$4 sm:$0xff]  }
 0x336   :  { %6674 = vmatprep.subr.bf16.mxu0 %v19795_v6  ;;  %v19865_v6 = vld [vmem:[%s26584_s6 + $0x608] ss:$16 sps:$4 sm:$0xff]  }
 0x338   :  { %6357 = vmatpush1.bf16.msra.mxu1 %v19790_v53  ;;  %v19870_v53 = vld [vmem:[%s26584_s6 + $0x624] ss:$16 sps:$4 sm:$0xff]  }
 0x339   :  { %6675 = vmatpush1.bf16.msra.mxu0 %v19793_v49  ;;  %6358 = vmatprep.subr.bf16.mxu1 %v19798_v2  ;;  %v19873_v49 = vld [vmem:[%s26584_s6 + $0x62c] ss:$16 sps:$4 sm:$0xff]   ;;  %v19868_v2 = vld [vmem:[%s26584_s6 + $0x620] ss:$16 sps:$4 sm:$0xff]  }
 0x33a   :  { %6676 = vmatprep.subr.bf16.mxu0 %v19801_v9  ;;  %v19871_v9 = vld [vmem:[%s26584_s6 + $0x628] ss:$16 sps:$4 sm:$0xff]  }
 0x33c   :  { %6359 = vmatpush1.bf16.msra.mxu1 %v19796_v5  ;;  %v19876_v5 = vld [vmem:[%s26584_s6 + $0x644] ss:$16 sps:$4 sm:$0xff]  }
 0x33d   :  { %6677 = vmatpush1.bf16.msra.mxu0 %v19799_v10  ;;  %6360 = vmatprep.subr.bf16.mxu1 %v19804_v35  ;;  %v19877_v10 = vld [vmem:[%s26584_s6 + $0x648] ss:$16 sps:$4 sm:$0xff]   ;;  %v19882_v35 = vld [vmem:[%s26584_s6 + $0x664] ss:$16 sps:$4 sm:$0xff]  }
 0x33e   :  { %6678 = vmatprep.subr.bf16.mxu0 %v19807_v47  ;;  %v19885_v47 = vld [vmem:[%s26584_s6 + $0x66c] ss:$16 sps:$4 sm:$0xff]  }
 0x340   :  { %6361 = vmatpush1.bf16.msra.mxu1 %v19802_v56  ;;  %v19880_v56 = vld [vmem:[%s26584_s6 + $0x660] ss:$16 sps:$4 sm:$0xff]  }
 0x341   :  { %6679 = vmatpush1.bf16.msra.mxu0 %v19805_v11  ;;  %6362 = vmatprep.subr.bf16.mxu1 %v19810_v15  ;;  %v19883_v11 = vld [vmem:[%s26584_s6 + $0x668] ss:$16 sps:$4 sm:$0xff]   ;;  %v19888_v15 = vld [vmem:[%s26584_s6 + $0x684] ss:$16 sps:$4 sm:$0xff]  }
 0x342   :  { %6680 = vmatprep.subr.bf16.mxu0 %v19813_v13  ;;  %v19889_v13 = vld [vmem:[%s26584_s6 + $0x688] ss:$16 sps:$4 sm:$0xff]  }
 0x344   :  { %6363 = vmatpush1.bf16.msra.mxu1 %v19808_v23  ;;  %v19894_v23 = vld [vmem:[%s26584_s6 + $0x6a4] ss:$16 sps:$4 sm:$0xff]  }
 0x345   :  { %6681 = vmatpush1.bf16.msra.mxu0 %v19811_v17  ;;  %6364 = vmatprep.subr.bf16.mxu1 %v19816_v24  ;;  %v19897_v17 = vld [vmem:[%s26584_s6 + $0x6ac] ss:$16 sps:$4 sm:$0xff]   ;;  %v19892_v24 = vld [vmem:[%s26584_s6 + $0x6a0] ss:$16 sps:$4 sm:$0xff]  }
 0x346   :  { %6682 = vmatprep.subr.bf16.mxu0 %v19819_v14  ;;  %v19895_v14 = vld [vmem:[%s26584_s6 + $0x6a8] ss:$16 sps:$4 sm:$0xff]  }
 0x348   :  { %6365 = vmatpush1.bf16.msra.mxu1 %v19814_v26  ;;  %v19900_v26 = vld [vmem:[%s26584_s6 + $0x6c4] ss:$16 sps:$4 sm:$0xff]  }
 0x349   :  { %6683 = vmatpush1.bf16.msra.mxu0 %v19817_v25  ;;  %6366 = vmatprep.subr.bf16.mxu1 %v19822_v29  ;;  %v19903_v25 = vld [vmem:[%s26584_s6 + $0x6cc] ss:$16 sps:$4 sm:$0xff]   ;;  %v19898_v29 = vld [vmem:[%s26584_s6 + $0x6c0] ss:$16 sps:$4 sm:$0xff]  }
 0x34a   :  { %6684 = vmatprep.subr.bf16.mxu0 %v19825_v20  ;;  %v19901_v20 = vld [vmem:[%s26584_s6 + $0x6c8] ss:$16 sps:$4 sm:$0xff]  }
 0x34c   :  { %6367 = vmatpush1.bf16.msra.mxu1 %v19820_v28  ;;  %v19906_v28 = vld [vmem:[%s26584_s6 + $0x6e4] ss:$16 sps:$4 sm:$0xff]  }
 0x34d   :  { %6685 = vmatpush1.bf16.msra.mxu0 %v19823_v32  ;;  %6368 = vmatprep.subr.bf16.mxu1 %v19828_v16  ;;  %v19909_v32 = vld [vmem:[%s26584_s6 + $0x6ec] ss:$16 sps:$4 sm:$0xff]   ;;  %v19904_v16 = vld [vmem:[%s26584_s6 + $0x6e0] ss:$16 sps:$4 sm:$0xff]  }
 0x34e   :  { %6686 = vmatprep.subr.bf16.mxu0 %v19831_v36  ;;  %v19907_v36 = vld [vmem:[%s26584_s6 + $0x6e8] ss:$16 sps:$4 sm:$0xff]  }
 0x350   :  { %6369 = vmatpush1.bf16.msra.mxu1 %v19826_v37  ;;  %v19912_v37 = vld [vmem:[%s26584_s6 + $0x704] ss:$16 sps:$4 sm:$0xff]  }
 0x351   :  { %6687 = vmatpush1.bf16.msra.mxu0 %v19829_v38  ;;  %6370 = vmatprep.subr.bf16.mxu1 %v19834_v40  ;;  %v19915_v38 = vld [vmem:[%s26584_s6 + $0x70c] ss:$16 sps:$4 sm:$0xff]   ;;  %v19910_v40 = vld [vmem:[%s26584_s6 + $0x700] ss:$16 sps:$4 sm:$0xff]  }
 0x352   :  { %6688 = vmatprep.subr.bf16.mxu0 %v19837_v34  ;;  %v19913_v34 = vld [vmem:[%s26584_s6 + $0x708] ss:$16 sps:$4 sm:$0xff]  }
 0x354   :  { %6371 = vmatpush1.bf16.msra.mxu1 %v19832_v27  ;;  %v19918_v27 = vld [vmem:[%s26584_s6 + $0x724] ss:$16 sps:$4 sm:$0xff]  }
 0x355   :  { %6689 = vmatpush1.bf16.msra.mxu0 %v19835_v30  ;;  %6372 = vmatprep.subr.bf16.mxu1 %v19840_v31  ;;  %v19921_v30 = vld [vmem:[%s26584_s6 + $0x72c] ss:$16 sps:$4 sm:$0xff]   ;;  %v19916_v31 = vld [vmem:[%s26584_s6 + $0x720] ss:$16 sps:$4 sm:$0xff]  }
 0x356   :  { %6690 = vmatprep.subr.bf16.mxu0 %v19843_v43  ;;  %v19919_v43 = vld [vmem:[%s26584_s6 + $0x728] ss:$16 sps:$4 sm:$0xff]  }
 0x358   :  { %6373 = vmatpush1.bf16.msra.mxu1 %v19838_v44  ;;  %v19924_v44 = vld [vmem:[%s26584_s6 + $0x744] ss:$16 sps:$4 sm:$0xff]  }
 0x359   :  { %6691 = vmatpush1.bf16.msra.mxu0 %v19841_v45  ;;  %6374 = vmatprep.subr.bf16.mxu1 %v19846_v46  ;;  %v19927_v45 = vld [vmem:[%s26584_s6 + $0x74c] ss:$16 sps:$4 sm:$0xff]   ;;  %v19922_v46 = vld [vmem:[%s26584_s6 + $0x740] ss:$16 sps:$4 sm:$0xff]  }
 0x35a   :  { %6692 = vmatprep.subr.bf16.mxu0 %v19849_v48  ;;  %v19925_v48 = vld [vmem:[%s26584_s6 + $0x748] ss:$16 sps:$4 sm:$0xff]  }
 0x35c   :  { %6375 = vmatpush1.bf16.msra.mxu1 %v19844_v42  ;;  %v19930_v42 = vld [vmem:[%s26584_s6 + $0x764] ss:$16 sps:$4 sm:$0xff]  }
 0x35d   :  { %6693 = vmatpush1.bf16.msra.mxu0 %v19847_v54  ;;  %6376 = vmatprep.subr.bf16.mxu1 %v19852_v55  ;;  %v19933_v54 = vld [vmem:[%s26584_s6 + $0x76c] ss:$16 sps:$4 sm:$0xff]   ;;  %v19928_v55 = vld [vmem:[%s26584_s6 + $0x760] ss:$16 sps:$4 sm:$0xff]  }
 0x35e   :  { %6694 = vmatprep.subr.bf16.mxu0 %v19855_v59  ;;  %v19931_v59 = vld [vmem:[%s26584_s6 + $0x768] ss:$16 sps:$4 sm:$0xff]  }
 0x360   :  { %6377 = vmatpush1.bf16.msra.mxu1 %v19850_v60  ;;  %v19936_v60 = vld [vmem:[%s26584_s6 + $0x784] ss:$16 sps:$4 sm:$0xff]  }
 0x361   :  { %6695 = vmatpush1.bf16.msra.mxu0 %v19853_v52  ;;  %6378 = vmatprep.subr.bf16.mxu1 %v19858_v12  ;;  %v19939_v52 = vld [vmem:[%s26584_s6 + $0x78c] ss:$16 sps:$4 sm:$0xff]   ;;  %v19934_v12 = vld [vmem:[%s26584_s6 + $0x780] ss:$16 sps:$4 sm:$0xff]  }
 0x362   :  { %6696 = vmatprep.subr.bf16.mxu0 %v19861_v50  ;;  %v19937_v50 = vld [vmem:[%s26584_s6 + $0x788] ss:$16 sps:$4 sm:$0xff]  }
 0x364   :  { %6379 = vmatpush1.bf16.msra.mxu1 %v19856_v18  ;;  %v19942_v18 = vld [vmem:[%s26584_s6 + $0x7a4] ss:$16 sps:$4 sm:$0xff]  }
 0x365   :  { %6697 = vmatpush1.bf16.msra.mxu0 %v19859_v61  ;;  %6401 = vmatprep.subr.bf16.mxu1 %v19864_v63  ;;  %v19945_v61 = vld [vmem:[%s26584_s6 + $0x7ac] ss:$16 sps:$4 sm:$0xff]   ;;  %v19940_v63 = vld [vmem:[%s26584_s6 + $0x7a0] ss:$16 sps:$4 sm:$0xff]  }
 0x366   :  { %6719 = vmatprep.subr.bf16.mxu0 %v19867_v0  ;;  %v19943_v0 = vld [vmem:[%s26584_s6 + $0x7a8] ss:$16 sps:$4 sm:$0xff]  }
 0x367   :  { %6381 = vmatmul.mubr.bf16.vlgmr.msra.gmra.mrb[20].mxu1 %v22374_v41 }
 0x368   :  { %6699 = vmatmul.mubr.bf16.vlgmr.msra.gmra.mrb[24].mxu0 %v22374_v41  ;;  %6390 = vmatprep.mubr.bf16.mxu1 %v22420_v7  ;;  %v19879_v41 = vld [vmem:[%s26584_s6 + $0x64c] ss:$16 sps:$4 sm:$0xff]  }
 0x369   :  { %6402 = vmatpush1.bf16.msra.mxu1 %v19862_v1  ;;  %6708 = vmatprep.mubr.bf16.mxu0 %v22420_v7  ;;  %v19874_v7 = vld [vmem:[%s26584_s6 + $0x640] ss:$16 sps:$4 sm:$0xff]   ;;  %v19948_v1 = vld [vmem:[%s26584_s6 + $0x7c4] ss:$16 sps:$4 sm:$0xff]  }
 0x36a   :  { %6720 = vmatpush1.bf16.msra.mxu0 %v19865_v6  ;;  %6403 = vmatprep.subr.bf16.mxu1 %v19870_v53  ;;  %v19951_v6 = vld [vmem:[%s26584_s6 + $0x7cc] ss:$16 sps:$4 sm:$0xff]   ;;  %v19946_v53 = vld [vmem:[%s26584_s6 + $0x7c0] ss:$16 sps:$4 sm:$0xff]  }
 0x36b   :  { %6721 = vmatprep.subr.bf16.mxu0 %v19873_v49  ;;  %v19949_v49 = vld [vmem:[%s26584_s6 + $0x7c8] ss:$16 sps:$4 sm:$0xff]  }
 0x36d   :  { %6404 = vmatpush1.bf16.msra.mxu1 %v19868_v2  ;;  %v19954_v2 = vld [vmem:[%s26584_s6 + $0x7e4] ss:$16 sps:$4 sm:$0xff]  }
 0x36e   :  { %6722 = vmatpush1.bf16.msra.mxu0 %v19871_v9  ;;  %6405 = vmatprep.subr.bf16.mxu1 %v19876_v5  ;;  %v19957_v9 = vld [vmem:[%s26584_s6 + $0x7ec] ss:$16 sps:$4 sm:$0xff]   ;;  %v19952_v5 = vld [vmem:[%s26584_s6 + $0x7e0] ss:$16 sps:$4 sm:$0xff]  }
 0x36f   :  { %6391 = vmatmul.mubr.bf16.gmra.mrb[24].mxu1 %v22411_v21  ;;  %6723 = vmatprep.subr.bf16.mxu0 %v19879_v41  ;;  %v19955_v41 = vld [vmem:[%s26584_s6 + $0x7e8] ss:$16 sps:$4 sm:$0xff]  }
 0x370   :  { %6709 = vmatmul.mubr.bf16.gmra.mrb[28].mxu0 %v22411_v21  ;;  %6433 = vmatprep.mubr.bf16.mxu1 %v22276_v33  ;;  %v19891_v21 = vld [vmem:[%s26584_s6 + $0x68c] ss:$16 sps:$4 sm:$0xff]  }
 0x371   :  { %6406 = vmatpush1.bf16.msra.mxu1 %v19874_v7  ;;  %6751 = vmatprep.mubr.bf16.mxu0 %v22276_v33  ;;  %v19886_v33 = vld [vmem:[%s26584_s6 + $0x680] ss:$16 sps:$4 sm:$0xff]   ;;  %v19960_v7 = vld [vmem:[%s26584_s6 + $0x804] ss:$16 sps:$4 sm:$0xff]  }
 0x372   :  { %6724 = vmatpush1.bf16.msra.mxu0 %v19877_v10  ;;  %6407 = vmatprep.subr.bf16.mxu1 %v19882_v35  ;;  %v19963_v10 = vld [vmem:[%s26584_s6 + $0x80c] ss:$16 sps:$4 sm:$0xff]   ;;  %v19958_v35 = vld [vmem:[%s26584_s6 + $0x800] ss:$16 sps:$4 sm:$0xff]  }
 0x373   :  { %6725 = vmatprep.subr.bf16.mxu0 %v19885_v47  ;;  %v19961_v47 = vld [vmem:[%s26584_s6 + $0x808] ss:$16 sps:$4 sm:$0xff]  }
 0x375   :  { %6408 = vmatpush1.bf16.msra.mxu1 %v19880_v56  ;;  %v19966_v56 = vld [vmem:[%s26584_s6 + $0x824] ss:$16 sps:$4 sm:$0xff]  }
 0x376   :  { %6726 = vmatpush1.bf16.msra.mxu0 %v19883_v11  ;;  %6409 = vmatprep.subr.bf16.mxu1 %v19888_v15  ;;  %v19969_v11 = vld [vmem:[%s26584_s6 + $0x82c] ss:$16 sps:$4 sm:$0xff]   ;;  %v19964_v15 = vld [vmem:[%s26584_s6 + $0x820] ss:$16 sps:$4 sm:$0xff]  }
 0x377   :  { %6727 = vmatprep.subr.bf16.mxu0 %v19891_v21  ;;  %v19967_v21 = vld [vmem:[%s26584_s6 + $0x828] ss:$16 sps:$4 sm:$0xff]  }
 0x379   :  { %6410 = vmatpush1.bf16.msra.mxu1 %v19886_v33  ;;  %v19972_v33 = vld [vmem:[%s26584_s6 + $0x844] ss:$16 sps:$4 sm:$0xff]  }
 0x37a   :  { %6728 = vmatpush1.bf16.msra.mxu0 %v19889_v13  ;;  %6411 = vmatprep.subr.bf16.mxu1 %v19894_v23  ;;  %v19973_v13 = vld [vmem:[%s26584_s6 + $0x848] ss:$16 sps:$4 sm:$0xff]   ;;  %v19978_v23 = vld [vmem:[%s26584_s6 + $0x864] ss:$16 sps:$4 sm:$0xff]  }
 0x37b   :  { %6729 = vmatprep.subr.bf16.mxu0 %v19897_v17  ;;  %v19981_v17 = vld [vmem:[%s26584_s6 + $0x86c] ss:$16 sps:$4 sm:$0xff]  }
 0x37d   :  { %6412 = vmatpush1.bf16.msra.mxu1 %v19892_v24  ;;  %v19976_v24 = vld [vmem:[%s26584_s6 + $0x860] ss:$16 sps:$4 sm:$0xff]  }
 0x37e   :  { %6730 = vmatpush1.bf16.msra.mxu0 %v19895_v14  ;;  %6413 = vmatprep.subr.bf16.mxu1 %v19900_v26  ;;  %v19979_v14 = vld [vmem:[%s26584_s6 + $0x868] ss:$16 sps:$4 sm:$0xff]   ;;  %v19984_v26 = vld [vmem:[%s26584_s6 + $0x884] ss:$16 sps:$4 sm:$0xff]  }
 0x37f   :  { %6731 = vmatprep.subr.bf16.mxu0 %v19903_v25  ;;  %v19985_v25 = vld [vmem:[%s26584_s6 + $0x888] ss:$16 sps:$4 sm:$0xff]  }
 0x381   :  { %6414 = vmatpush1.bf16.msra.mxu1 %v19898_v29  ;;  %v19990_v29 = vld [vmem:[%s26584_s6 + $0x8a4] ss:$16 sps:$4 sm:$0xff]  }
 0x382   :  { %6732 = vmatpush1.bf16.msra.mxu0 %v19901_v20  ;;  %6415 = vmatprep.subr.bf16.mxu1 %v19906_v28  ;;  %v19993_v20 = vld [vmem:[%s26584_s6 + $0x8ac] ss:$16 sps:$4 sm:$0xff]   ;;  %v19988_v28 = vld [vmem:[%s26584_s6 + $0x8a0] ss:$16 sps:$4 sm:$0xff]  }
 0x383   :  { %6733 = vmatprep.subr.bf16.mxu0 %v19909_v32  ;;  %v19991_v32 = vld [vmem:[%s26584_s6 + $0x8a8] ss:$16 sps:$4 sm:$0xff]  }
 0x385   :  { %6416 = vmatpush1.bf16.msra.mxu1 %v19904_v16  ;;  %v19996_v16 = vld [vmem:[%s26584_s6 + $0x8c4] ss:$16 sps:$4 sm:$0xff]  }
 0x386   :  { %6734 = vmatpush1.bf16.msra.mxu0 %v19907_v36  ;;  %6417 = vmatprep.subr.bf16.mxu1 %v19912_v37  ;;  %v19999_v36 = vld [vmem:[%s26584_s6 + $0x8cc] ss:$16 sps:$4 sm:$0xff]   ;;  %v19994_v37 = vld [vmem:[%s26584_s6 + $0x8c0] ss:$16 sps:$4 sm:$0xff]  }
 0x387   :  { %6735 = vmatprep.subr.bf16.mxu0 %v19915_v38  ;;  %v19997_v38 = vld [vmem:[%s26584_s6 + $0x8c8] ss:$16 sps:$4 sm:$0xff]  }
 0x389   :  { %6418 = vmatpush1.bf16.msra.mxu1 %v19910_v40  ;;  %v20002_v40 = vld [vmem:[%s26584_s6 + $0x8e4] ss:$16 sps:$4 sm:$0xff]  }
 0x38a   :  { %6736 = vmatpush1.bf16.msra.mxu0 %v19913_v34  ;;  %6419 = vmatprep.subr.bf16.mxu1 %v19918_v27  ;;  %v20005_v34 = vld [vmem:[%s26584_s6 + $0x8ec] ss:$16 sps:$4 sm:$0xff]   ;;  %v20000_v27 = vld [vmem:[%s26584_s6 + $0x8e0] ss:$16 sps:$4 sm:$0xff]  }
 0x38b   :  { %6737 = vmatprep.subr.bf16.mxu0 %v19921_v30  ;;  %v20003_v30 = vld [vmem:[%s26584_s6 + $0x8e8] ss:$16 sps:$4 sm:$0xff]  }
 0x38d   :  { %6420 = vmatpush1.bf16.msra.mxu1 %v19916_v31  ;;  %v20008_v31 = vld [vmem:[%s26584_s6 + $0x904] ss:$16 sps:$4 sm:$0xff]  }
 0x38e   :  { %6738 = vmatpush1.bf16.msra.mxu0 %v19919_v43  ;;  %6421 = vmatprep.subr.bf16.mxu1 %v19924_v44  ;;  %v20011_v43 = vld [vmem:[%s26584_s6 + $0x90c] ss:$16 sps:$4 sm:$0xff]   ;;  %v20006_v44 = vld [vmem:[%s26584_s6 + $0x900] ss:$16 sps:$4 sm:$0xff]  }
 0x38f   :  { %6739 = vmatprep.subr.bf16.mxu0 %v19927_v45  ;;  %v20009_v45 = vld [vmem:[%s26584_s6 + $0x908] ss:$16 sps:$4 sm:$0xff]  }
 0x391   :  { %6422 = vmatpush1.bf16.msra.mxu1 %v19922_v46  ;;  %v20014_v46 = vld [vmem:[%s26584_s6 + $0x924] ss:$16 sps:$4 sm:$0xff]  }
 0x392   :  { %6740 = vmatpush1.bf16.msra.mxu0 %v19925_v48  ;;  %6423 = vmatprep.subr.bf16.mxu1 %v19930_v42  ;;  %v20017_v48 = vld [vmem:[%s26584_s6 + $0x92c] ss:$16 sps:$4 sm:$0xff]   ;;  %v20012_v42 = vld [vmem:[%s26584_s6 + $0x920] ss:$16 sps:$4 sm:$0xff]  }
 0x393   :  { %6741 = vmatprep.subr.bf16.mxu0 %v19933_v54  ;;  %v20015_v54 = vld [vmem:[%s26584_s6 + $0x928] ss:$16 sps:$4 sm:$0xff]  }
 0x395   :  { %6424 = vmatpush1.bf16.msra.mxu1 %v19928_v55  ;;  %v20020_v55 = vld [vmem:[%s26584_s6 + $0x944] ss:$16 sps:$4 sm:$0xff]  }
 0x396   :  { %6742 = vmatpush1.bf16.msra.mxu0 %v19931_v59  ;;  %6425 = vmatprep.subr.bf16.mxu1 %v19936_v60  ;;  %v20023_v59 = vld [vmem:[%s26584_s6 + $0x94c] ss:$16 sps:$4 sm:$0xff]   ;;  %v20018_v60 = vld [vmem:[%s26584_s6 + $0x940] ss:$16 sps:$4 sm:$0xff]  }
 0x397   :  { %6743 = vmatprep.subr.bf16.mxu0 %v19939_v52  ;;  %v20021_v52 = vld [vmem:[%s26584_s6 + $0x948] ss:$16 sps:$4 sm:$0xff]  }
 0x399   :  { %6426 = vmatpush1.bf16.msra.mxu1 %v19934_v12  ;;  %v20026_v12 = vld [vmem:[%s26584_s6 + $0x964] ss:$16 sps:$4 sm:$0xff]  }
 0x39a   :  { %6744 = vmatpush1.bf16.msra.mxu0 %v19937_v50  ;;  %6427 = vmatprep.subr.bf16.mxu1 %v19942_v18  ;;  %v20029_v50 = vld [vmem:[%s26584_s6 + $0x96c] ss:$16 sps:$4 sm:$0xff]   ;;  %v20024_v18 = vld [vmem:[%s26584_s6 + $0x960] ss:$16 sps:$4 sm:$0xff]  }
 0x39b   :  { %6745 = vmatprep.subr.bf16.mxu0 %v19945_v61  ;;  %v20027_v61 = vld [vmem:[%s26584_s6 + $0x968] ss:$16 sps:$4 sm:$0xff]  }
 0x39d   :  { %6428 = vmatpush1.bf16.msra.mxu1 %v19940_v63  ;;  %v20032_v63 = vld [vmem:[%s26584_s6 + $0x984] ss:$16 sps:$4 sm:$0xff]  }
 0x39e   :  { %6746 = vmatpush1.bf16.msra.mxu0 %v19943_v0  ;;  %6429 = vmatprep.subr.bf16.mxu1 %v19948_v1  ;;  %v20035_v0 = vld [vmem:[%s26584_s6 + $0x98c] ss:$16 sps:$4 sm:$0xff]   ;;  %v20030_v1 = vld [vmem:[%s26584_s6 + $0x980] ss:$16 sps:$4 sm:$0xff]  }
 0x39f   :  { %6747 = vmatprep.subr.bf16.mxu0 %v19951_v6  ;;  %v20033_v6 = vld [vmem:[%s26584_s6 + $0x988] ss:$16 sps:$4 sm:$0xff]  }
 0x3a1   :  { %6430 = vmatpush1.bf16.msra.mxu1 %v19946_v53  ;;  %v20038_v53 = vld [vmem:[%s26584_s6 + $0x9a4] ss:$16 sps:$4 sm:$0xff]  }
 0x3a2   :  { %6748 = vmatpush1.bf16.msra.mxu0 %v19949_v49  ;;  %6431 = vmatprep.subr.bf16.mxu1 %v19954_v2  ;;  %v20041_v49 = vld [vmem:[%s26584_s6 + $0x9ac] ss:$16 sps:$4 sm:$0xff]   ;;  %v20036_v2 = vld [vmem:[%s26584_s6 + $0x9a0] ss:$16 sps:$4 sm:$0xff]  }
 0x3a3   :  { %6749 = vmatprep.subr.bf16.mxu0 %v19957_v9  ;;  %v20039_v9 = vld [vmem:[%s26584_s6 + $0x9a8] ss:$16 sps:$4 sm:$0xff]  }
 0x3a5   :  { %6432 = vmatpush1.bf16.msra.mxu1 %v19952_v5  ;;  %v20044_v5 = vld [vmem:[%s26584_s6 + $0x9c4] ss:$16 sps:$4 sm:$0xff]  }
 0x3a6   :  { %6750 = vmatpush1.bf16.msra.mxu0 %v19955_v41  ;;  %6454 = vmatprep.subr.bf16.mxu1 %v19960_v7  ;;  %v20047_v41 = vld [vmem:[%s26584_s6 + $0x9cc] ss:$16 sps:$4 sm:$0xff]   ;;  %v20042_v7 = vld [vmem:[%s26584_s6 + $0x9c0] ss:$16 sps:$4 sm:$0xff]  }
 0x3a7   :  { %6772 = vmatprep.subr.bf16.mxu0 %v19963_v10  ;;  %v20045_v10 = vld [vmem:[%s26584_s6 + $0x9c8] ss:$16 sps:$4 sm:$0xff]  }
 0x3a8   :  { %6434 = vmatmul.mubr.bf16.vlgmr.msra.gmra.mrb[20].mxu1 %v22272_v19 }
 0x3a9   :  { %6752 = vmatmul.mubr.bf16.vlgmr.msra.gmra.mrb[24].mxu0 %v22272_v19  ;;  %6443 = vmatprep.mubr.bf16.mxu1 %v22288_v57  ;;  %v19975_v19 = vld [vmem:[%s26584_s6 + $0x84c] ss:$16 sps:$4 sm:$0xff]  }
 0x3aa   :  { %6455 = vmatpush1.bf16.msra.mxu1 %v19958_v35  ;;  %6761 = vmatprep.mubr.bf16.mxu0 %v22288_v57  ;;  %v19970_v57 = vld [vmem:[%s26584_s6 + $0x840] ss:$16 sps:$4 sm:$0xff]   ;;  %v20050_v35 = vld [vmem:[%s26584_s6 + $0x9e4] ss:$16 sps:$4 sm:$0xff]  }
 0x3ab   :  { %6773 = vmatpush1.bf16.msra.mxu0 %v19961_v47  ;;  %6456 = vmatprep.subr.bf16.mxu1 %v19966_v56  ;;  %v20053_v47 = vld [vmem:[%s26584_s6 + $0x9ec] ss:$16 sps:$4 sm:$0xff]   ;;  %v20048_v56 = vld [vmem:[%s26584_s6 + $0x9e0] ss:$16 sps:$4 sm:$0xff]  }
 0x3ac   :  { %6774 = vmatprep.subr.bf16.mxu0 %v19969_v11  ;;  %v20051_v11 = vld [vmem:[%s26584_s6 + $0x9e8] ss:$16 sps:$4 sm:$0xff]  }
 0x3ae   :  { %6457 = vmatpush1.bf16.msra.mxu1 %v19964_v15  ;;  %v20056_v15 = vld [vmem:[%s26584_s6 + $0xa04] ss:$16 sps:$4 sm:$0xff]  }
 0x3af   :  { %6775 = vmatpush1.bf16.msra.mxu0 %v19967_v21  ;;  %6458 = vmatprep.subr.bf16.mxu1 %v19972_v33  ;;  %v20059_v21 = vld [vmem:[%s26584_s6 + $0xa0c] ss:$16 sps:$4 sm:$0xff]   ;;  %v20054_v33 = vld [vmem:[%s26584_s6 + $0xa00] ss:$16 sps:$4 sm:$0xff]  }
 0x3b0   :  { %6444 = vmatmul.mubr.bf16.gmra.mrb[24].mxu1 %v22285_v51  ;;  %6776 = vmatprep.subr.bf16.mxu0 %v19975_v19  ;;  %v20057_v19 = vld [vmem:[%s26584_s6 + $0xa08] ss:$16 sps:$4 sm:$0xff]  }
 0x3b1   :  { %6762 = vmatmul.mubr.bf16.gmra.mrb[28].mxu0 %v22285_v51  ;;  %6486 = vmatprep.mubr.bf16.mxu1 %v22456_v58  ;;  %v19987_v51 = vld [vmem:[%s26584_s6 + $0x88c] ss:$16 sps:$4 sm:$0xff]  }
 0x3b2   :  { %6459 = vmatpush1.bf16.msra.mxu1 %v19970_v57  ;;  %6804 = vmatprep.mubr.bf16.mxu0 %v22456_v58  ;;  %v19982_v58 = vld [vmem:[%s26584_s6 + $0x880] ss:$16 sps:$4 sm:$0xff]   ;;  %v20062_v57 = vld [vmem:[%s26584_s6 + $0xa24] ss:$16 sps:$4 sm:$0xff]  }
 0x3b3   :  { %6777 = vmatpush1.bf16.msra.mxu0 %v19973_v13  ;;  %6460 = vmatprep.subr.bf16.mxu1 %v19978_v23  ;;  %v20065_v13 = vld [vmem:[%s26584_s6 + $0xa2c] ss:$16 sps:$4 sm:$0xff]   ;;  %v20060_v23 = vld [vmem:[%s26584_s6 + $0xa20] ss:$16 sps:$4 sm:$0xff]  }
 0x3b4   :  { %6778 = vmatprep.subr.bf16.mxu0 %v19981_v17  ;;  %v20063_v17 = vld [vmem:[%s26584_s6 + $0xa28] ss:$16 sps:$4 sm:$0xff]  }
 0x3b6   :  { %6461 = vmatpush1.bf16.msra.mxu1 %v19976_v24  ;;  %v20068_v24 = vld [vmem:[%s26584_s6 + $0xa44] ss:$16 sps:$4 sm:$0xff]  }
 0x3b7   :  { %6779 = vmatpush1.bf16.msra.mxu0 %v19979_v14  ;;  %6462 = vmatprep.subr.bf16.mxu1 %v19984_v26  ;;  %v20069_v14 = vld [vmem:[%s26584_s6 + $0xa48] ss:$16 sps:$4 sm:$0xff]   ;;  %v20074_v26 = vld [vmem:[%s26584_s6 + $0xa64] ss:$16 sps:$4 sm:$0xff]  }
 0x3b8   :  { %6780 = vmatprep.subr.bf16.mxu0 %v19987_v51  ;;  %v20077_v51 = vld [vmem:[%s26584_s6 + $0xa6c] ss:$16 sps:$4 sm:$0xff]  }
 0x3ba   :  { %6463 = vmatpush1.bf16.msra.mxu1 %v19982_v58  ;;  %v4531_v58 = vld [vmem:[%s26584_s6 + $0xa80] sm:$0xff] }
 0x3bb   :  { %6781 = vmatpush1.bf16.msra.mxu0 %v19985_v25  ;;  %6464 = vmatprep.subr.bf16.mxu1 %v19990_v29  ;;  %v4532_v25 = vld [vmem:[%s26584_s6 + $0xa88] sm:$0xff]  ;;  %v20072_v29 = vld [vmem:[%s26584_s6 + $0xa60] ss:$16 sps:$4 sm:$0xff]  }
 0x3bc   :  { %6782 = vmatprep.subr.bf16.mxu0 %v19993_v20  ;;  %v20075_v20 = vld [vmem:[%s26584_s6 + $0xa68] ss:$16 sps:$4 sm:$0xff]  }
 0x3be   :  { %6465 = vmatpush1.bf16.msra.mxu1 %v19988_v28  ;;  %v16778_v28 = vcombine.low %v4531_v58, %v4531_v58 }
 0x3bf   :  { %6783 = vmatpush1.bf16.msra.mxu0 %v19991_v32  ;;  %6466 = vmatprep.subr.bf16.mxu1 %v19996_v16  ;;  %v16781_v32 = vcombine.high %v4532_v25, %v4532_v25  ;;  %v16780_v16 = vcombine.low %v4532_v25, %v4532_v25  ;;  %v20122_v25 = vld [vmem:[%s26586_s25 + $0x270] ss:$52 sps:$4 sm:$0xff]  }
 0x3c0   :  { %6784 = vmatprep.subr.bf16.mxu0 %v19999_v36  ;;  %v6231_v36 = vsel %vm167_vm1, %v16778_v28, 0  ;;  %v20128_v28 = vld [vmem:[%s26586_s25 + $0x2d8] ss:$52 sps:$4 sm:$0xff]  }
 0x3c2   :  { %6467 = vmatpush1.bf16.msra.mxu1 %v19994_v37  ;;  %v6237_v37 = vsel %vm167_vm1, %v16780_v16, 0  ;;  %v20133_v16 = vld [vmem:[%s26586_s25 + $0x34c] ss:$52 sps:$4 sm:$0xff]  }
 0x3c3   :  { %6785 = vmatpush1.bf16.msra.mxu0 %v19997_v38  ;;  %6468 = vmatprep.subr.bf16.mxu1 %v20002_v40 }
 0x3c4   :  { %6786 = vmatprep.subr.bf16.mxu0 %v20005_v34 }
 0x3c6   :  { %6469 = vmatpush1.bf16.msra.mxu1 %v20000_v27 }
 0x3c7   :  { %6787 = vmatpush1.bf16.msra.mxu0 %v20003_v30  ;;  %6470 = vmatprep.subr.bf16.mxu1 %v20008_v31 }
 0x3c8   :  { %6788 = vmatprep.subr.bf16.mxu0 %v20011_v43 }
 0x3ca   :  { %6471 = vmatpush1.bf16.msra.mxu1 %v20006_v44 }
 0x3cb   :  { %6789 = vmatpush1.bf16.msra.mxu0 %v20009_v45  ;;  %6472 = vmatprep.subr.bf16.mxu1 %v20014_v46 }
 0x3cc   :  { %6790 = vmatprep.subr.bf16.mxu0 %v20017_v48 }
 0x3ce   :  { %6473 = vmatpush1.bf16.msra.mxu1 %v20012_v42 }
 0x3cf   :  { %6791 = vmatpush1.bf16.msra.mxu0 %v20015_v54  ;;  %6474 = vmatprep.subr.bf16.mxu1 %v20020_v55 }
 0x3d0   :  { %6792 = vmatprep.subr.bf16.mxu0 %v20023_v59 }
 0x3d2   :  { %6475 = vmatpush1.bf16.msra.mxu1 %v20018_v60 }
 0x3d3   :  { %6793 = vmatpush1.bf16.msra.mxu0 %v20021_v52  ;;  %6476 = vmatprep.subr.bf16.mxu1 %v20026_v12 }
 0x3d4   :  { %6794 = vmatprep.subr.bf16.mxu0 %v20029_v50 }
 0x3d6   :  { %6477 = vmatpush1.bf16.msra.mxu1 %v20024_v18 }
 0x3d7   :  { %6795 = vmatpush1.bf16.msra.mxu0 %v20027_v61  ;;  %6478 = vmatprep.subr.bf16.mxu1 %v20032_v63 }
 0x3d8   :  { %6796 = vmatprep.subr.bf16.mxu0 %v20035_v0 }
 0x3da   :  { %6479 = vmatpush1.bf16.msra.mxu1 %v20030_v1  ;;  %v20082_v1 = vld [vmem:[%s26585_s2] sm:$0xff]   ;;  %s20866_s2 = smov 111  }
 0x3db   :  { %6797 = vmatpush1.bf16.msra.mxu0 %v20033_v6  ;;  %6480 = vmatprep.subr.bf16.mxu1 %v20038_v53  ;;  %v20083_v53 = vld [vmem:[%s26586_s25 + $0x8] ss:$52 sps:$4 sm:$0xff]  }
 0x3dc   :  { %6798 = vmatprep.subr.bf16.mxu0 %v20041_v49  ;;  %v20085_v49 = vld [vmem:[%s26586_s25 + $0xc] ss:$52 sps:$4 sm:$0xff]  }
 0x3de   :  { %6481 = vmatpush1.bf16.msra.mxu1 %v20036_v2  ;;  %v20086_v2 = vld [vmem:[%s26586_s25] ss:$52 sps:$4 sm:$0xff]  }
 0x3df   :  { %6799 = vmatpush1.bf16.msra.mxu0 %v20039_v9  ;;  %6482 = vmatprep.subr.bf16.mxu1 %v20044_v5  ;;  %v20088_v9 = vld [vmem:[%s26586_s25 + $0x4] ss:$52 sps:$4 sm:$0xff]  }
 0x3e0   :  { %6800 = vmatprep.subr.bf16.mxu0 %v20047_v41  ;;  %v20089_v5 = vld [vmem:[%s26586_s25 + $0x70] ss:$52 sps:$4 sm:$0xff]   ;;  %v20091_v41 = vld [vmem:[%s26586_s25 + $0x74] ss:$52 sps:$4 sm:$0xff]  }
 0x3e2   :  { %6483 = vmatpush1.bf16.msra.mxu1 %v20042_v7  ;;  %v20094_v7 = vld [vmem:[%s26586_s25 + $0x6c] ss:$52 sps:$4 sm:$0xff]  }
 0x3e3   :  { %6801 = vmatpush1.bf16.msra.mxu0 %v20045_v10  ;;  %6484 = vmatprep.subr.bf16.mxu1 %v20050_v35  ;;  %v20092_v10 = vld [vmem:[%s26586_s25 + $0x68] ss:$52 sps:$4 sm:$0xff]  }
 0x3e4   :  { %6802 = vmatprep.subr.bf16.mxu0 %v20053_v47  ;;  %v20097_v35 = vld [vmem:[%s26586_s25 + $0xdc] ss:$52 sps:$4 sm:$0xff]   ;;  %v20095_v47 = vld [vmem:[%s26586_s25 + $0xd8] ss:$52 sps:$4 sm:$0xff]  }
 0x3e6   :  { %6485 = vmatpush1.bf16.msra.mxu1 %v20048_v56  ;;  %v20100_v56 = vld [vmem:[%s26586_s25 + $0xd4] ss:$52 sps:$4 sm:$0xff]  }
 0x3e7   :  { %6803 = vmatpush1.bf16.msra.mxu0 %v20051_v11  ;;  %6507 = vmatprep.subr.bf16.mxu1 %v20056_v15  ;;  %v20098_v11 = vld [vmem:[%s26586_s25 + $0xd0] ss:$52 sps:$4 sm:$0xff]  }
 0x3e8   :  { %6825 = vmatprep.subr.bf16.mxu0 %v20059_v21  ;;  %v20103_v15 = vld [vmem:[%s26586_s25 + $0x144] ss:$52 sps:$4 sm:$0xff]   ;;  %v20101_v21 = vld [vmem:[%s26586_s25 + $0x140] ss:$52 sps:$4 sm:$0xff]  }
 0x3e9   :  { %6487 = vmatmul.mubr.bf16.vlgmr.msra.gmra.mrb[20].mxu1 %v22446_v39 }
 0x3ea   :  { %6805 = vmatmul.mubr.bf16.vlgmr.msra.gmra.mrb[24].mxu0 %v22446_v39  ;;  %6496 = vmatprep.mubr.bf16.mxu1 %v22490_v22  ;;  %v20071_v39 = vld [vmem:[%s26584_s6 + $0xa4c] ss:$16 sps:$4 sm:$0xff]  }
 0x3eb   :  { %6508 = vmatpush1.bf16.msra.mxu1 %v20054_v33  ;;  %6814 = vmatprep.mubr.bf16.mxu0 %v22490_v22  ;;  %v20066_v22 = vld [vmem:[%s26584_s6 + $0xa40] ss:$16 sps:$4 sm:$0xff]  }
 0x3ec   :  { %6826 = vmatpush1.bf16.msra.mxu0 %v20057_v19  ;;  %6509 = vmatprep.subr.bf16.mxu1 %v20062_v57  ;;  %v20106_v33 = vld [vmem:[%s26586_s25 + $0x13c] ss:$52 sps:$4 sm:$0xff]   ;;  %v20104_v19 = vld [vmem:[%s26586_s25 + $0x138] ss:$52 sps:$4 sm:$0xff]  }
 0x3ed   :  { %6827 = vmatprep.subr.bf16.mxu0 %v20065_v13  ;;  %v20107_v57 = vld [vmem:[%s26586_s25 + $0x1a8] ss:$52 sps:$4 sm:$0xff]   ;;  %v20109_v13 = vld [vmem:[%s26586_s25 + $0x1ac] ss:$52 sps:$4 sm:$0xff]  }
 0x3ef   :  { %6510 = vmatpush1.bf16.msra.mxu1 %v20060_v23  ;;  %v20112_v23 = vld [vmem:[%s26586_s25 + $0x1a4] ss:$52 sps:$4 sm:$0xff]  }
 0x3f0   :  { %6828 = vmatpush1.bf16.msra.mxu0 %v20063_v17  ;;  %6511 = vmatprep.subr.bf16.mxu1 %v20068_v24  ;;  %v20110_v17 = vld [vmem:[%s26586_s25 + $0x1a0] ss:$52 sps:$4 sm:$0xff]   ;;  %v20113_v24 = vld [vmem:[%s26586_s25 + $0x210] ss:$52 sps:$4 sm:$0xff]  }
 0x3f1   :  { %6497 = vmatmul.mubr.bf16.gmra.mrb[24].mxu1 %v22482_v62  ;;  %6829 = vmatprep.subr.bf16.mxu0 %v20071_v39  ;;  %v20115_v39 = vld [vmem:[%s26586_s25 + $0x214] ss:$52 sps:$4 sm:$0xff]  }
 0x3f2   :  { %6815 = vmatmul.mubr.bf16.gmra.mrb[28].mxu0 %v22482_v62  ;;  %6539 = vmatprep.mubr.bf16.mxu1 %v20847_v3  ;;  %v16779_v62 = vcombine.high %v4531_v58, %v4531_v58  ;;  %v20124_v58 = vld [vmem:[%s26586_s25 + $0x274] ss:$52 sps:$4 sm:$0xff]  }
 0x3f3   :  { %6512 = vmatpush1.bf16.msra.mxu1 %v20066_v22  ;;  %6857 = vmatprep.mubr.bf16.mxu0 %v20847_v3  ;;  %v20118_v22 = vld [vmem:[%s26586_s25 + $0x20c] ss:$52 sps:$4 sm:$0xff]  }
 0x3f4   :  { %6830 = vmatpush1.bf16.msra.mxu0 %v20069_v14  ;;  %6513 = vmatprep.subr.bf16.mxu1 %v20074_v26  ;;  %v20116_v14 = vld [vmem:[%s26586_s25 + $0x208] ss:$52 sps:$4 sm:$0xff]  }
 0x3f5   :  { %6831 = vmatprep.subr.bf16.mxu0 %v20077_v51  ;;  %v20121_v26 = vld [vmem:[%s26586_s25 + $0x27c] ss:$52 sps:$4 sm:$0xff]   ;;  %v20119_v51 = vld [vmem:[%s26586_s25 + $0x278] ss:$52 sps:$4 sm:$0xff]  }
 0x3f7   :  { %6514 = vmatpush1.bf16.msra.mxu1 %v20072_v29  ;;  %v20127_v29 = vld [vmem:[%s26586_s25 + $0x2e4] ss:$52 sps:$4 sm:$0xff]  }
 0x3f8   :  { %6832 = vmatpush1.bf16.msra.mxu0 %v20075_v20  ;;  %16782 = vmatprep.subr.msk.bf16.mxu1 %vm167_vm1, %v16779_v62  ;;  %v20125_v20 = vld [vmem:[%s26586_s25 + $0x2e0] ss:$52 sps:$4 sm:$0xff]   ;;  %v20130_v62 = vld [vmem:[%s26586_s25 + $0x2dc] ss:$52 sps:$4 sm:$0xff]  }
 0x3f9   :  { %16785 = vmatprep.subr.msk.bf16.mxu0 %vm167_vm1, %v16781_v32  ;;  %v20131_v32 = vld [vmem:[%s26586_s25 + $0x348] ss:$52 sps:$4 sm:$0xff]  }
 0x3fb   :  { %6516 = vmatpush1.bf16.msra.mxu1 %v6231_v36  ;;  %v20136_v36 = vld [vmem:[%s26586_s25 + $0x344] ss:$52 sps:$4 sm:$0xff]  }
 0x3fc   :  { %6834 = vmatpush1.bf16.msra.mxu0 %v6237_v37  ;;  %v20134_v37 = vld [vmem:[%s26586_s25 + $0x340] ss:$52 sps:$4 sm:$0xff]  }
 0x3fd   :  { %9270 = vmatprep.subr.bf16.mxu0 %v20085_v49  ;;  %v20166_v49 = vld [vmem:[%s26586_s25 + $0x54c] ss:$52 sps:$4 sm:$0xff]  }
 0x3fe   :  { %16783 = vmatmul.mubr.msk.bf16.vlgmr.msra.gmra.mrb[20].mxu1 %vm6223_vm10, %v22299_v4 }
 0x3ff   :  { %16786 = vmatmul.mubr.msk.bf16.vlgmr.msra.gmra.mrb[24].mxu0 %vm6223_vm10, %v22299_v4  ;;  %6549 = vmatprep.mubr.bf16.mxu1 %v20847_v3 }
 0x400   :  { %6867 = vmatprep.mubr.bf16.mxu0 %v20847_v3  ;;  %9271 = vmatpush1.bf16.msra.mxu0 %v20083_v53  ;;  %v20163_v53 = vld [vmem:[%s26586_s25 + $0x554] ss:$52 sps:$4 sm:$0xff]  }
 0x401   :  { %9272 = vmatprep.subr.bf16.mxu0 %v20091_v41  ;;  %v20167_v41 = vld [vmem:[%s26586_s25 + $0x5b8] ss:$52 sps:$4 sm:$0xff]  }
 0x404   :  { %9273 = vmatpush1.bf16.msra.mxu0 %v20089_v5  ;;  %v20172_v5 = vld [vmem:[%s26586_s25 + $0x5b4] ss:$52 sps:$4 sm:$0xff]  }
 0x405   :  { %9274 = vmatprep.subr.bf16.mxu0 %v20097_v35  ;;  %v20178_v35 = vld [vmem:[%s26586_s25 + $0x61c] ss:$52 sps:$4 sm:$0xff]  }
 0x406   :  { %16784 = vmatmul.mubr.msk.bf16.gmra.mrb[24].mxu1 %vm6223_vm10, %v22296_v8 }
 0x407   :  { %16787 = vmatmul.mubr.msk.bf16.gmra.mrb[28].mxu0 %vm6223_vm10, %v22296_v8  ;;  %6954 = vmatprep.mubr.bf16.mxu1 %v20847_v3  ;;  %vm12696_vm10 = vcmask 457728  }
 0x408   :  { %9275 = vmatpush1.bf16.msra.mxu0 %v20095_v47  ;;  %v20173_v47 = vld [vmem:[%s26586_s25 + $0x620] ss:$52 sps:$4 sm:$0xff]  }
 0x409   :  { %9276 = vmatprep.subr.bf16.mxu0 %v20103_v15  ;;  %v20184_v15 = vld [vmem:[%s26586_s25 + $0x684] ss:$52 sps:$4 sm:$0xff]  }
 0x40c   :  { %9277 = vmatpush1.bf16.msra.mxu0 %v20101_v21 }
 0x40d   :  { %9278 = vmatprep.subr.bf16.mxu0 %v20109_v13  ;;  %v12013_v13 = vld [vmem:[%s26546_s7 + $0x10] sm:$0xff] }
 0x410   :  { %9279 = vmatpush1.bf16.msra.mxu0 %v20107_v57 }
 0x411   :  { %9280 = vmatprep.subr.bf16.mxu0 %v20115_v39  ;;  %v12015_v39 = vld [vmem:[%s26546_s7 + $0x20] sm:$0xff] }
 0x414   :  { %9281 = vmatpush1.bf16.msra.mxu0 %v20113_v24 }
 0x415   :  { %9282 = vmatprep.subr.bf16.mxu0 %v20121_v26  ;;  %v12017_v26 = vld [vmem:[%s26546_s7 + $0x30] sm:$0xff] }
 0x418   :  { %9283 = vmatpush1.bf16.msra.mxu0 %v20119_v51  ;;  %v6893_v51 = vpop.permute.xlu1 %6892 }
 0x419   :  { %9284 = vmatprep.subr.bf16.mxu0 %v20127_v29 }
 0x41c   :  { %9285 = vmatpush1.bf16.msra.mxu0 %v20125_v20  ;;  %v6898_v20 = vpop.permute.xlu0 %6897 }
 0x41d   :  { %9286 = vmatprep.subr.bf16.mxu0 %v20133_v16 }
 0x420   :  { %9287 = vmatpush1.bf16.msra.mxu0 %v20131_v32 }
 0x4d1   :  { %v6541_v38 = vpop.f32.mrb[20].mxu1 }
 0x4d2   :  { %v6859_v40 = vpop.f32.mrb[24].mxu0  ;;  %v6543_v34 = vpop.f32.mrb[21].mxu1 }
 0x4d3   :  { %v6861_v27 = vpop.f32.mrb[25].mxu0  ;;  %v6545_v30 = vpop.f32.mrb[22].mxu1 }
 0x4d4   :  { %v23225_v31 = vpack.c.bf16 %v6545_v30, %v6541_v38  ;;  %v6863_v43 = vpop.f32.mrb[26].mxu0  ;;  %v6547_v44 = vpop.f32.mrb[23].mxu1  ;;  %v20137_v38 = vld [vmem:[%s26586_s25 + $0x3b0] ss:$52 sps:$4 sm:$0xff]  }
 0x4d5   :  { %v23227_v4 = vpack.c.bf16 %v6863_v43, %v6859_v40  ;;  %v23229_v45 = vpack.c.bf16 %v6547_v44, %v6543_v34  ;;  %v6865_v46 = vpop.f32.mrb[27].mxu0  ;;  %v20139_v40 = vld [vmem:[%s26586_s25 + $0x3b4] ss:$52 sps:$4 sm:$0xff]   ;;  %v20142_v34 = vld [vmem:[%s26586_s25 + $0x3ac] ss:$52 sps:$4 sm:$0xff]  }
 0x4d6   :  { %v23231_v48 = vpack.c.bf16 %v6865_v46, %v6861_v27  ;;  %9850 = vrot.lane.b32.xlu1 %v23225_v31, %s20848_s30  ;;  %v20140_v27 = vld [vmem:[%s26586_s25 + $0x3a8] ss:$52 sps:$4 sm:$0xff]   ;;  %9288 = vmatprep.subr.bf16.mxu0 %v20139_v40  ;;  %v20143_v43 = vld [vmem:[%s26586_s25 + $0x418] ss:$52 sps:$4 sm:$0xff]   ;;  %v20146_v46 = vld [vmem:[%s26586_s25 + $0x410] ss:$52 sps:$4 sm:$0xff]  }
 0x4d7   :  { %9854 = vrot.lane.b32.xlu0 %v23227_v4, %s20848_s30  ;;  %6922 = vmatprep.subr.bf16.mxu1 %v23229_v45  ;;  %v20145_v30 = vld [vmem:[%s26586_s25 + $0x41c] ss:$52 sps:$4 sm:$0xff]   ;;  %v20148_v44 = vld [vmem:[%s26586_s25 + $0x414] ss:$52 sps:$4 sm:$0xff]  }
 0x4d8   :  { %6923 = vmatpush1.bf16.msra.mxu1 %v23225_v31  ;;  %9289 = vmatpush1.bf16.msra.mxu0 %v20137_v38 }
 0x4d9   :  { %v6551_v8 = vpop.f32.mrb[24].mxu1  ;;  %9290 = vmatprep.subr.bf16.mxu0 %v20145_v30 }
 0x4da   :  { %v6869_v42 = vpop.f32.mrb[28].mxu0  ;;  %9852 = vrot.lane.b32.xlu1 %v23229_v45, %s20848_s30  ;;  %v6553_v54 = vpop.f32.mrb[25].mxu1 }
 0x4db   :  { %v6871_v55 = vpop.f32.mrb[29].mxu0  ;;  %v6555_v59 = vpop.f32.mrb[26].mxu1 }
 0x4dc   :  { %v23241_v60 = vpack.c.bf16 %v6555_v59, %v6551_v8  ;;  %v6873_v52 = vpop.f32.mrb[30].mxu0  ;;  %v6557_v12 = vpop.f32.mrb[27].mxu1  ;;  %v20151_v8 = vld [vmem:[%s26586_s25 + $0x484] ss:$52 sps:$4 sm:$0xff]   ;;  %9291 = vmatpush1.bf16.msra.mxu0 %v20143_v43  ;;  %v20155_v59 = vld [vmem:[%s26586_s25 + $0x4e8] ss:$52 sps:$4 sm:$0xff]  }
 0x4dd   :  { %v23243_v50 = vpack.c.bf16 %v6873_v52, %v6869_v42  ;;  %v23245_v18 = vpack.c.bf16 %v6557_v12, %v6553_v54  ;;  %v6875_v61 = vpop.f32.mrb[31].mxu0  ;;  %v20149_v42 = vld [vmem:[%s26586_s25 + $0x480] ss:$52 sps:$4 sm:$0xff]   ;;  %v20154_v54 = vld [vmem:[%s26586_s25 + $0x47c] ss:$52 sps:$4 sm:$0xff]   ;;  %9292 = vmatprep.subr.bf16.mxu0 %v20151_v8 }
 0x4de   :  { %v23247_v63 = vpack.c.bf16 %v6875_v61, %v6871_v55  ;;  %9858 = vrot.lane.b32.xlu0 %v23241_v60, %s20848_s30  ;;  %v23253_v0 = vsel %vm6909_vm11, %v23241_v60, 0  ;;  %v20152_v55 = vld [vmem:[%s26586_s25 + $0x478] ss:$52 sps:$4 sm:$0xff]   ;;  %v20158_v61 = vld [vmem:[%s26586_s25 + $0x4e0] ss:$52 sps:$4 sm:$0xff]  }
 0x4df   :  { %9860 = vrot.lane.b32.xlu1 %v23245_v18, %s20848_s30  ;;  %16789 = vmatprep.subr.msk.bf16.mxu1 %vm6909_vm11, %v23245_v18  ;;  %v23279_v6 = vsel %vm6909_vm11, %v23243_v50, 0  ;;  %v20157_v52 = vld [vmem:[%s26586_s25 + $0x4ec] ss:$52 sps:$4 sm:$0xff]   ;;  %v20160_v12 = vld [vmem:[%s26586_s25 + $0x4e4] ss:$52 sps:$4 sm:$0xff]  }
 0x4e0   :  { %6925 = vmatpush1.bf16.msra.mxu1 %v23253_v0  ;;  %9293 = vmatpush1.bf16.msra.mxu0 %v20149_v42 }
 0x4e1   :  { %6965 = vmatprep.subr.bf16.mxu1 %v23231_v48  ;;  %9294 = vmatprep.subr.bf16.mxu0 %v20157_v52 }
 0x4e2   :  { %9862 = vrot.lane.b32.xlu0 %v23243_v50, %s20848_s30 }
 0x4e3   :  { %9856 = vrot.lane.b32.xlu1 %v23231_v48, %s20848_s30  ;;  %16790 = vmatmul.mubr.msk.bf16.vlgmr.msra.gmra.mrb[28].mxu1 %vm6905_vm12, %v20082_v1 }
 0x4e4   :  { %6966 = vmatpush1.bf16.msra.mxu1 %v23227_v4  ;;  %6997 = vmatprep.mubr.bf16.mxu1 %v20847_v3 }
 0x4e5   :  { %16791 = vmatprep.subr.msk.bf16.mxu1 %vm6909_vm11, %v23247_v63  ;;  %9295 = vmatpush1.bf16.msra.mxu0 %v20155_v59 }
 0x4e6   :  { %9864 = vrot.lane.b32.xlu0 %v23247_v63, %s20848_s30  ;;  %9296 = vmatprep.subr.bf16.mxu0 %v20163_v53  ;;  %v20185_v53 = vld [vmem:[%s26586_s25 + $0x6e8] ss:$52 sps:$4 sm:$0xff]  }
 0x4e7   :  { %10242 = vrot.lane.b32.xlu1 %v23229_v45, %s20849_s29 }
 0x4e8   :  { %6968 = vmatpush1.bf16.msra.mxu1 %v23279_v6 }
 0x4e9   :  { %9184 = vmatprep.subr.bf16.mxu1 %v20088_v9  ;;  %v20169_v9 = vld [vmem:[%s26586_s25 + $0x5bc] ss:$52 sps:$4 sm:$0xff]  }
 0x4ea   :  { %10244 = vrot.lane.b32.xlu0 %v23227_v4, %s20849_s29 }
 0x4eb   :  { %10240 = vrot.lane.b32.xlu1 %v23225_v31, %s20849_s29  ;;  %16792 = vmatmul.mubr.msk.bf16.vlgmr.msra.gmra.mrb[32].mxu1 %vm6905_vm12, %v20082_v1  ;;  %v20161_v1 = vld [vmem:[%s26586_s25 + $0x550] ss:$52 sps:$4 sm:$0xff]  }
 0x4ec   :  { %9185 = vmatpush1.bf16.msra.mxu1 %v20086_v2  ;;  %v20164_v2 = vld [vmem:[%s26586_s25 + $0x548] ss:$52 sps:$4 sm:$0xff]   ;;  %9297 = vmatpush1.bf16.msra.mxu0 %v20161_v1 }
 0x4ed   :  { %9186 = vmatprep.subr.bf16.mxu1 %v20094_v7  ;;  %v20170_v7 = vld [vmem:[%s26586_s25 + $0x5b0] ss:$52 sps:$4 sm:$0xff]   ;;  %9298 = vmatprep.subr.bf16.mxu0 %v20169_v9 }
 0x4ee   :  { %10248 = vrot.lane.b32.xlu0 %v23241_v60, %s20849_s29 }
 0x4ef   :  { %10250 = vrot.lane.b32.xlu1 %v23245_v18, %s20849_s29 }
 0x4f0   :  { %9187 = vmatpush1.bf16.msra.mxu1 %v20092_v10  ;;  %v20175_v10 = vld [vmem:[%s26586_s25 + $0x624] ss:$52 sps:$4 sm:$0xff]   ;;  %9299 = vmatpush1.bf16.msra.mxu0 %v20167_v41  ;;  %v20196_v41 = vld [vmem:[%s26586_s25 + $0x75c] ss:$52 sps:$4 sm:$0xff]  }
 0x4f1   :  { %9188 = vmatprep.subr.bf16.mxu1 %v20100_v56  ;;  %v20176_v56 = vld [vmem:[%s26586_s25 + $0x618] ss:$52 sps:$4 sm:$0xff]   ;;  %9300 = vmatprep.subr.bf16.mxu0 %v20175_v10 }
 0x4f2   :  { %10252 = vrot.lane.b32.xlu0 %v23243_v50, %s20849_s29 }
 0x4f3   :  { %10246 = vrot.lane.b32.xlu1 %v23231_v48, %s20849_s29 }
 0x4f4   :  { %9189 = vmatpush1.bf16.msra.mxu1 %v20098_v11  ;;  %v20181_v11 = vld [vmem:[%s26586_s25 + $0x68c] ss:$52 sps:$4 sm:$0xff]   ;;  %9301 = vmatpush1.bf16.msra.mxu0 %v20173_v47 }
 0x4f5   :  { %9190 = vmatprep.subr.bf16.mxu1 %v20106_v33  ;;  %9313 = vmatprep.subr.bf16.mxu0 %v20181_v11  ;;  %v20194_v11 = vld [vmem:[%s26586_s25 + $0x758] ss:$52 sps:$4 sm:$0xff]  }
 0x4f6   :  { %10254 = vrot.lane.b32.xlu0 %v23247_v63, %s20849_s29 }
 0x4f7   :  { %10488 = vrot.lane.b32.xlu1 %v23229_v45, %s20856_s3 }
 0x4f8   :  { %9191 = vmatpush1.bf16.msra.mxu1 %v20104_v19 }
 0x4f9   :  { %9192 = vmatprep.subr.bf16.mxu1 %v20112_v23  ;;  %v12014_v23 = vld [vmem:[%s26546_s7 + $0x18] sm:$0xff] }
 0x4fa   :  { %10490 = vrot.lane.b32.xlu0 %v23227_v4, %s20856_s3 }
 0x4fb   :  { %10486 = vrot.lane.b32.xlu1 %v23225_v31, %s20856_s3 }
 0x4fc   :  { %9193 = vmatpush1.bf16.msra.mxu1 %v20110_v17 }
 0x4fd   :  { %9194 = vmatprep.subr.bf16.mxu1 %v20118_v22  ;;  %v12016_v22 = vld [vmem:[%s26546_s7 + $0x28] sm:$0xff] }
 0x4fe   :  { %10494 = vrot.lane.b32.xlu0 %v23241_v60, %s20856_s3 }
 0x4ff   :  { %10496 = vrot.lane.b32.xlu1 %v23245_v18, %s20856_s3 }
 0x500   :  { %9195 = vmatpush1.bf16.msra.mxu1 %v20116_v14 }
 0x501   :  { %9196 = vmatprep.subr.bf16.mxu1 %v20124_v58 }
 0x502   :  { %10498 = vrot.lane.b32.xlu0 %v23243_v50, %s20856_s3 }
 0x503   :  { %10492 = vrot.lane.b32.xlu1 %v23231_v48, %s20856_s3 }
 0x504   :  { %9197 = vmatpush1.bf16.msra.mxu1 %v20122_v25 }
 0x505   :  { %9198 = vmatprep.subr.bf16.mxu1 %v20130_v62 }
 0x506   :  { %10500 = vrot.lane.b32.xlu0 %v23247_v63, %s20856_s3  ;;  %s20860_s3 = smov 98  }
 0x507   :  { %10735 = vrot.lane.b32.xlu1 %v23229_v45, %s20857_s0 }
 0x508   :  { %9199 = vmatpush1.bf16.msra.mxu1 %v20128_v28 }
 0x509   :  { %9200 = vmatprep.subr.bf16.mxu1 %v20136_v36 }
 0x50a   :  { %10737 = vrot.lane.b32.xlu0 %v23227_v4, %s20857_s0 }
 0x50b   :  { %10733 = vrot.lane.b32.xlu1 %v23225_v31, %s20857_s0 }
 0x50c   :  { %9201 = vmatpush1.bf16.msra.mxu1 %v20134_v37 }
 0x50d   :  { %9202 = vmatprep.subr.bf16.mxu1 %v20142_v34 }
 0x50e   :  { %10741 = vrot.lane.b32.xlu0 %v23241_v60, %s20857_s0 }
 0x50f   :  { %10743 = vrot.lane.b32.xlu1 %v23245_v18, %s20857_s0 }
 0x510   :  { %9203 = vmatpush1.bf16.msra.mxu1 %v20140_v27 }
 0x511   :  { %9204 = vmatprep.subr.bf16.mxu1 %v20148_v44  ;;  %v20179_v44 = vld [vmem:[%s26586_s25 + $0x688] ss:$52 sps:$4 sm:$0xff]  }
 0x512   :  { %10745 = vrot.lane.b32.xlu0 %v23243_v50, %s20857_s0 }
 0x513   :  { %10739 = vrot.lane.b32.xlu1 %v23231_v48, %s20857_s0 }
 0x514   :  { %9205 = vmatpush1.bf16.msra.mxu1 %v20146_v46  ;;  %v20182_v46 = vld [vmem:[%s26586_s25 + $0x680] ss:$52 sps:$4 sm:$0xff]  }
 0x515   :  { %9206 = vmatprep.subr.bf16.mxu1 %v20154_v54  ;;  %v20187_v54 = vld [vmem:[%s26586_s25 + $0x6ec] ss:$52 sps:$4 sm:$0xff]  }
 0x516   :  { %10747 = vrot.lane.b32.xlu0 %v23247_v63, %s20857_s0  ;;  %s26587_s0 = sld [smem:[#allocation10_spill]] }
 0x517   :  { %10982 = vrot.lane.b32.xlu1 %v23229_v45, %s20858_s1 }
 0x518   :  { %9207 = vmatpush1.bf16.msra.mxu1 %v20152_v55  ;;  %v20190_v55 = vld [vmem:[%s26586_s25 + $0x6f4] ss:$52 sps:$4 sm:$0xff]  }
 0x519   :  { %9208 = vmatprep.subr.bf16.mxu1 %v20160_v12 }
 0x51a   :  { %10984 = vrot.lane.b32.xlu0 %v23227_v4, %s20858_s1 }
 0x51b   :  { %10980 = vrot.lane.b32.xlu1 %v23225_v31, %s20858_s1 }
 0x51c   :  { %9209 = vmatpush1.bf16.msra.mxu1 %v20158_v61  ;;  %v11941_v21 = vld [vmem:[%s26587_s0] sm:$0xff]  ;;  %v11942_v33 = vld [vmem:[%s26587_s0 + $0x8] sm:$0xff]  ;;  %v11943_v19 = vld [vmem:[%s26587_s0 + $0x10] sm:$0xff] }
 0x51d   :  { %9210 = vmatprep.subr.bf16.mxu1 %v20166_v49  ;;  %v11944_v57 = vld [vmem:[%s26587_s0 + $0x18] sm:$0xff]  ;;  %v11945_v17 = vld [vmem:[%s26587_s0 + $0x20] sm:$0xff]  ;;  %v11946_v24 = vld [vmem:[%s26587_s0 + $0x28] sm:$0xff] }
 0x51e   :  { %10988 = vrot.lane.b32.xlu0 %v23241_v60, %s20858_s1  ;;  %v11947_v14 = vld [vmem:[%s26587_s0 + $0x30] sm:$0xff] }
 0x51f   :  { %10990 = vrot.lane.b32.xlu1 %v23245_v18, %s20858_s1  ;;  %v20188_v49 = vld [vmem:[%s26586_s25 + $0x6f0] ss:$52 sps:$4 sm:$0xff]  }
 0x520   :  { %9211 = vmatpush1.bf16.msra.mxu1 %v20164_v2 }
 0x521   :  { %9212 = vmatprep.subr.bf16.mxu1 %v20172_v5  ;;  %v20193_v5 = vld [vmem:[%s26586_s25 + $0x754] ss:$52 sps:$4 sm:$0xff]  }
 0x522   :  { %10992 = vrot.lane.b32.xlu0 %v23243_v50, %s20858_s1 }
 0x523   :  { %10986 = vrot.lane.b32.xlu1 %v23231_v48, %s20858_s1 }
 0x524   :  { %9213 = vmatpush1.bf16.msra.mxu1 %v20170_v7 }
 0x525   :  { %9214 = vmatprep.subr.bf16.mxu1 %v20178_v35 }
 0x526   :  { %10994 = vrot.lane.b32.xlu0 %v23247_v63, %s20858_s1 }
 0x527   :  { %11229 = vrot.lane.b32.xlu1 %v23229_v45, %s20852_s4 }
 0x528   :  { %9215 = vmatpush1.bf16.msra.mxu1 %v20176_v56  ;;  %v20191_v56 = vld [vmem:[%s26586_s25 + $0x750] ss:$52 sps:$4 sm:$0xff]  }
 0x529   :  { %9227 = vmatprep.subr.bf16.mxu1 %v20184_v15  ;;  %v20199_v15 = vld [vmem:[%s26586_s25 + $0x7bc] ss:$52 sps:$4 sm:$0xff]  }
 0x52a   :  { %11231 = vrot.lane.b32.xlu0 %v23227_v4, %s20852_s4 }
 0x52b   :  { %11227 = vrot.lane.b32.xlu1 %v23225_v31, %s20852_s4 }
 0x52e   :  { %11235 = vrot.lane.b32.xlu0 %v23241_v60, %s20852_s4 }
 0x52f   :  { %11237 = vrot.lane.b32.xlu1 %v23245_v18, %s20852_s4 }
 0x532   :  { %11239 = vrot.lane.b32.xlu0 %v23243_v50, %s20852_s4 }
 0x533   :  { %11233 = vrot.lane.b32.xlu1 %v23231_v48, %s20852_s4 }
 0x536   :  { %11241 = vrot.lane.b32.xlu0 %v23247_v63, %s20852_s4 }
 0x537   :  { %11475 = vrot.lane.b32.xlu1 %v23229_v45, %s20859_s27 }
 0x53a   :  { %11477 = vrot.lane.b32.xlu0 %v23227_v4, %s20859_s27 }
 0x53b   :  { %11473 = vrot.lane.b32.xlu1 %v23225_v31, %s20859_s27 }
 0x53e   :  { %11481 = vrot.lane.b32.xlu0 %v23241_v60, %s20859_s27 }
 0x53f   :  { %11483 = vrot.lane.b32.xlu1 %v23245_v18, %s20859_s27 }
 0x542   :  { %11485 = vrot.lane.b32.xlu0 %v23243_v50, %s20859_s27 }
 0x543   :  { %11479 = vrot.lane.b32.xlu1 %v23231_v48, %s20859_s27 }
 0x546   :  { %11487 = vrot.lane.b32.xlu0 %v23247_v63, %s20859_s27 }
 0x547   :  { %11722 = vrot.lane.b32.xlu1 %v23229_v45, %s20860_s3 }
 0x54a   :  { %11724 = vrot.lane.b32.xlu0 %v23227_v4, %s20860_s3 }
 0x54b   :  { %11720 = vrot.lane.b32.xlu1 %v23225_v31, %s20860_s3 }
 0x54e   :  { %11728 = vrot.lane.b32.xlu0 %v23241_v60, %s20860_s3  ;;  %v12011_v60 = vld [vmem:[%s26546_s7] sm:$0xff] }
 0x54f   :  { %11730 = vrot.lane.b32.xlu1 %v23245_v18, %s20860_s3 }
 0x552   :  { %11732 = vrot.lane.b32.xlu0 %v23243_v50, %s20860_s3  ;;  %v12012_v50 = vld [vmem:[%s26546_s7 + $0x8] sm:$0xff]  ;;  %s20871_s7 = smov 117  }
 0x553   :  { %11726 = vrot.lane.b32.xlu1 %v23231_v48, %s20860_s3 }
 0x556   :  { %11734 = vrot.lane.b32.xlu0 %v23247_v63, %s20860_s3 }
 0x557   :  { %11950 = vperm.xlu1 %19555, %v11941_v21   ;;  %v20202_v21 = vld [vmem:[%s26586_s25 + $0x7c4] ss:$52 sps:$4 sm:$0xff]  }
 0x55a   :  { %11955 = vperm.xlu0 %19554, %v11942_v33   ;;  %v20197_v33 = vld [vmem:[%s26586_s25 + $0x7b8] ss:$52 sps:$4 sm:$0xff]  }
 0x55b   :  { %12020 = vperm.xlu1 %19555, %v12011_v60   ;;  %v20200_v60 = vld [vmem:[%s26586_s25 + $0x7c0] ss:$52 sps:$4 sm:$0xff]  }
 0x55e   :  { %12025 = vperm.xlu0 %19554, %v12012_v50   ;;  %v20205_v50 = vld [vmem:[%s26586_s25 + $0x824] ss:$52 sps:$4 sm:$0xff]  }
 0x55f   :  { %11960 = vperm.xlu1 %19555, %v11943_v19   ;;  %v20208_v19 = vld [vmem:[%s26586_s25 + $0x82c] ss:$52 sps:$4 sm:$0xff]  }
 0x562   :  { %11965 = vperm.xlu0 %19554, %v11944_v57   ;;  %v20203_v57 = vld [vmem:[%s26586_s25 + $0x820] ss:$52 sps:$4 sm:$0xff]  }
 0x563   :  { %12030 = vperm.xlu1 %19555, %v12013_v13   ;;  %v20206_v13 = vld [vmem:[%s26586_s25 + $0x828] ss:$52 sps:$4 sm:$0xff]  }
 0x566   :  { %12035 = vperm.xlu0 %19554, %v12014_v23   ;;  %v20211_v23 = vld [vmem:[%s26586_s25 + $0x88c] ss:$52 sps:$4 sm:$0xff]  }
 0x567   :  { %11970 = vperm.xlu1 %19555, %v11945_v17   ;;  %v20214_v17 = vld [vmem:[%s26586_s25 + $0x894] ss:$52 sps:$4 sm:$0xff]  }
 0x56a   :  { %11975 = vperm.xlu0 %19554, %v11946_v24   ;;  %v20209_v24 = vld [vmem:[%s26586_s25 + $0x888] ss:$52 sps:$4 sm:$0xff]  }
 0x56b   :  { %12040 = vperm.xlu1 %19555, %v12015_v39   ;;  %v20212_v39 = vld [vmem:[%s26586_s25 + $0x890] ss:$52 sps:$4 sm:$0xff]  }
 0x56e   :  { %12045 = vperm.xlu0 %19554, %v12016_v22   ;;  %v20217_v22 = vld [vmem:[%s26586_s25 + $0x8f4] ss:$52 sps:$4 sm:$0xff]  }
 0x56f   :  { %11980 = vperm.xlu1 %19555, %v11947_v14   ;;  %v20220_v14 = vld [vmem:[%s26586_s25 + $0x8fc] ss:$52 sps:$4 sm:$0xff]  }
 0x572   :  { %12050 = vperm.xlu0 %19554, %v12017_v26   ;;  %v20215_v26 = vld [vmem:[%s26586_s25 + $0x8f0] ss:$52 sps:$4 sm:$0xff]  }
 0x5b6   :  { %v6956_v58 = vpop.f32.mrb[28].mxu1 }
 0x5b7   :  { %v6957_v25 = vadd.f32 %v6956_v58, %v6893_v51  ;;  %v6958_v29 = vpop.f32.mrb[29].mxu1  ;;  %v20223_v58 = vld [vmem:[%s26586_s25 + $0x95c] ss:$52 sps:$4 sm:$0xff]  }
 0x5b8   :  { %v6959_v62 = vadd.f32 %v6958_v29, %v6893_v51  ;;  %v6960_v28 = vpop.f32.mrb[30].mxu1  ;;  %v20221_v29 = vld [vmem:[%s26586_s25 + $0x958] ss:$52 sps:$4 sm:$0xff]  }
 0x5b9   :  { %v6961_v32 = vadd.f32 %v6960_v28, %v6898_v20  ;;  %v6962_v16 = vpop.f32.mrb[31].mxu1  ;;  %v7008_v37 = vmax.f32 %v6957_v25, 0.0  ;;  %v20226_v25 = vld [vmem:[%s26586_s25 + $0x964] ss:$52 sps:$4 sm:$0xff]   ;;  %v20232_v28 = vld [vmem:[%s26586_s25 + $0x9cc] ss:$52 sps:$4 sm:$0xff]  }
 0x5ba   :  { %v6963_v36 = vadd.f32 %v6962_v16, %v6898_v20  ;;  %v7009_v40 = vmax.f32 %v6959_v62, 0.0  ;;  %v20229_v62 = vld [vmem:[%s26586_s25 + $0x9c4] ss:$52 sps:$4 sm:$0xff]   ;;  %v20230_v16 = vld [vmem:[%s26586_s25 + $0x9c8] ss:$52 sps:$4 sm:$0xff]  }
 0x5bb   :  { %v7012_v38 = vmax.f32 %v6961_v32, 0.0  ;;  %v20227_v32 = vld [vmem:[%s26586_s25 + $0x9c0] ss:$52 sps:$4 sm:$0xff]  }
 0x5bc   :  { %v7013_v34 = vmax.f32 %v6963_v36, 0.0  ;;  %v20235_v36 = vld [vmem:[%s26586_s25 + $0xa2c] ss:$52 sps:$4 sm:$0xff]  }
 0x5bd   :  { %v23609_v27 = vpack.c.bf16 %v7012_v38, %v7008_v37  ;;  %v20238_v37 = vld [vmem:[%s26586_s25 + $0xa34] ss:$52 sps:$4 sm:$0xff]  }
 0x5be   :  { %v23611_v30 = vpack.c.bf16 %v7013_v34, %v7009_v40  ;;  %v6999_v43 = vpop.f32.mrb[32].mxu1  ;;  %v7384_v38 = vld [vmem:[%s26586_s25 + $0xa90] sm:$0x77]  ;;  %v7385_v40 = vld [vmem:[%s26586_s25 + $0xa98] sm:$0x77] }
 0x5bf   :  { %v7000_v8 = vadd.f32 %v6999_v43, %v6893_v51  ;;  %v7001_v42 = vpop.f32.mrb[33].mxu1  ;;  %v20233_v34 = vld [vmem:[%s26586_s25 + $0xa28] ss:$52 sps:$4 sm:$0xff]   ;;  %v20236_v43 = vld [vmem:[%s26586_s25 + $0xa30] ss:$52 sps:$4 sm:$0xff]  }
 0x5c0   :  { %v7002_v59 = vadd.f32 %v7001_v42, %v6893_v51  ;;  %v7003_v52 = vpop.f32.mrb[34].mxu1  ;;  %9216 = vmatprep.mubr.bf16.mxu1 %v23611_v30  ;;  %9302 = vmatprep.mubr.bf16.mxu0 %v23611_v30  ;;  %v20218_v51 = vld [vmem:[%s26586_s25 + $0x8f8] ss:$52 sps:$4 sm:$0xff]   ;;  %v17133_v42 = vcombine.low %v7385_v40, %v7385_v40 }
 0x5c1   :  { %v7004_v12 = vadd.f32 %v7003_v52, %v6898_v20  ;;  %v7005_v61 = vpop.f32.mrb[35].mxu1  ;;  %9217 = vmatmul.mubr.bf16.vlgmr.msra.gmra.mrb[36].mxu1 %v23609_v27  ;;  %9303 = vmatmul.mubr.bf16.vlgmr.msra.gmra.mrb[32].mxu0 %v23609_v27  ;;  %v7010_v2 = vmax.f32 %v7000_v8, 0.0  ;;  %v17131_v8 = vcombine.low %v7384_v38, %v7384_v38  ;;  %v20248_v52 = vld [vmem:[%s26586_s25 + $0x1c] ss:$52 sps:$4 sm:$0xff]  }
 0x5c2   :  { %v7006_v1 = vadd.f32 %v7005_v61, %v6898_v20  ;;  %9228 = vmatpush1.bf16.msra.mxu1 %v20182_v46  ;;  %9314 = vmatpush1.bf16.msra.mxu0 %v20179_v44  ;;  %v7011_v7 = vmax.f32 %v7002_v59, 0.0  ;;  %v20224_v20 = vld [vmem:[%s26586_s25 + $0x960] ss:$52 sps:$4 sm:$0xff]   ;;  %v17132_v44 = vcombine.high %v7384_v38, %v7384_v38  ;;  %v17134_v46 = vcombine.high %v7385_v40, %v7385_v40  ;;  %v20246_v61 = vld [vmem:[%s26586_s25 + $0x18] ss:$52 sps:$4 sm:$0xff]  }
 0x5c3   :  { %v7014_v9 = vmax.f32 %v7004_v12, 0.0  ;;  %9229 = vmatprep.subr.bf16.mxu1 %v20187_v54  ;;  %9315 = vmatprep.subr.bf16.mxu0 %v20190_v55  ;;  %v9146_v54 = vsel %vm9144_vm14, %v17131_v8, 0  ;;  %v9152_v55 = vsel %vm9144_vm14, %v17133_v42, 0  ;;  %v20245_v59 = vld [vmem:[%s26586_s25 + $0x14] ss:$52 sps:$4 sm:$0xff]  }
 0x5c4   :  { %v7015_v10 = vmax.f32 %v7006_v1, 0.0  ;;  %v20243_v12 = vld [vmem:[%s26586_s25 + $0x10] ss:$52 sps:$4 sm:$0xff]   ;;  %v20308_v38 = vld [vmem:[%s26586_s25 + $0x42c] ss:$52 sps:$4 sm:$0xff]  }
 0x5c5   :  { %v23641_v35 = vpack.c.bf16 %v7014_v9, %v7010_v2  ;;  %v20251_v1 = vld [vmem:[%s26586_s25 + $0x7c] ss:$52 sps:$4 sm:$0xff]   ;;  %v20252_v2 = vld [vmem:[%s26586_s25 + $0x80] ss:$52 sps:$4 sm:$0xff]   ;;  %v20257_v9 = vld [vmem:[%s26586_s25 + $0xe4] ss:$52 sps:$4 sm:$0xff]  }
 0x5c6   :  { %v23643_v47 = vpack.c.bf16 %v7015_v10, %v7011_v7  ;;  %9230 = vmatpush1.bf16.msra.mxu1 %v20185_v53  ;;  %9316 = vmatpush1.bf16.msra.mxu0 %v20188_v49  ;;  %v20254_v53 = vld [vmem:[%s26586_s25 + $0x84] ss:$52 sps:$4 sm:$0xff]   ;;  %v20258_v7 = vld [vmem:[%s26586_s25 + $0xe8] ss:$52 sps:$4 sm:$0xff]   ;;  %v20263_v10 = vld [vmem:[%s26586_s25 + $0x14c] ss:$52 sps:$4 sm:$0xff]  }
 0x5c7   :  { %9231 = vmatprep.subr.bf16.mxu1 %v20193_v5  ;;  %9317 = vmatprep.subr.bf16.mxu0 %v20196_v41  ;;  %v20249_v49 = vld [vmem:[%s26586_s25 + $0x78] ss:$52 sps:$4 sm:$0xff]   ;;  %v20255_v41 = vld [vmem:[%s26586_s25 + $0xe0] ss:$52 sps:$4 sm:$0xff]   ;;  %v20312_v8 = vld [vmem:[%s26586_s25 + $0x490] ss:$52 sps:$4 sm:$0xff]  }
 0x5c8   :  { %17145 = vmatprep.mubr.msk.bf16.mxu1 %vm9140_vm13, %v23643_v47  ;;  %17147 = vmatprep.mubr.msk.bf16.mxu0 %vm9140_vm13, %v23643_v47  ;;  %v20260_v5 = vld [vmem:[%s26586_s25 + $0xec] ss:$52 sps:$4 sm:$0xff]   ;;  %v20317_v42 = vld [vmem:[%s26586_s25 + $0x4f4] ss:$52 sps:$4 sm:$0xff]  }
 0x5c9   :  { %v20303_v40 = vld [vmem:[%s26586_s25 + $0x420] ss:$52 sps:$4 sm:$0xff]  }
 0x5ca   :  { %9232 = vmatpush1.bf16.msra.mxu1 %v20191_v56  ;;  %9318 = vmatpush1.bf16.msra.mxu0 %v20194_v11  ;;  %v20266_v56 = vld [vmem:[%s26586_s25 + $0x154] ss:$52 sps:$4 sm:$0xff]  }
 0x5cb   :  { %9233 = vmatprep.subr.bf16.mxu1 %v20199_v15  ;;  %9319 = vmatprep.subr.bf16.mxu0 %v20202_v21  ;;  %v20261_v11 = vld [vmem:[%s26586_s25 + $0x148] ss:$52 sps:$4 sm:$0xff]   ;;  %v20264_v15 = vld [vmem:[%s26586_s25 + $0x150] ss:$52 sps:$4 sm:$0xff]  }
 0x5cc   :  { %v20269_v21 = vld [vmem:[%s26586_s25 + $0x1b4] ss:$52 sps:$4 sm:$0xff]  }
 0x5ce   :  { %9234 = vmatpush1.bf16.msra.mxu1 %v20197_v33  ;;  %9320 = vmatpush1.bf16.msra.mxu0 %v20200_v60  ;;  %v20272_v33 = vld [vmem:[%s26586_s25 + $0x1bc] ss:$52 sps:$4 sm:$0xff]  }
 0x5cf   :  { %9235 = vmatprep.subr.bf16.mxu1 %v20205_v50  ;;  %9321 = vmatprep.subr.bf16.mxu0 %v20208_v19  ;;  %v20267_v60 = vld [vmem:[%s26586_s25 + $0x1b0] ss:$52 sps:$4 sm:$0xff]   ;;  %v20270_v50 = vld [vmem:[%s26586_s25 + $0x1b8] ss:$52 sps:$4 sm:$0xff]  }
 0x5d0   :  { %v20275_v19 = vld [vmem:[%s26586_s25 + $0x21c] ss:$52 sps:$4 sm:$0xff]  }
 0x5d2   :  { %9236 = vmatpush1.bf16.msra.mxu1 %v20203_v57  ;;  %9322 = vmatpush1.bf16.msra.mxu0 %v20206_v13  ;;  %v20278_v57 = vld [vmem:[%s26586_s25 + $0x224] ss:$52 sps:$4 sm:$0xff]  }
 0x5d3   :  { %9237 = vmatprep.subr.bf16.mxu1 %v20211_v23  ;;  %9323 = vmatprep.subr.bf16.mxu0 %v20214_v17  ;;  %v20273_v13 = vld [vmem:[%s26586_s25 + $0x218] ss:$52 sps:$4 sm:$0xff]   ;;  %v20276_v23 = vld [vmem:[%s26586_s25 + $0x220] ss:$52 sps:$4 sm:$0xff]  }
 0x5d4   :  { %v20281_v17 = vld [vmem:[%s26586_s25 + $0x284] ss:$52 sps:$4 sm:$0xff]  }
 0x5d6   :  { %9238 = vmatpush1.bf16.msra.mxu1 %v20209_v24  ;;  %9324 = vmatpush1.bf16.msra.mxu0 %v20212_v39  ;;  %v20284_v24 = vld [vmem:[%s26586_s25 + $0x28c] ss:$52 sps:$4 sm:$0xff]  }
 0x5d7   :  { %9239 = vmatprep.subr.bf16.mxu1 %v20217_v22  ;;  %9325 = vmatprep.subr.bf16.mxu0 %v20220_v14  ;;  %v20279_v39 = vld [vmem:[%s26586_s25 + $0x280] ss:$52 sps:$4 sm:$0xff]   ;;  %v20282_v22 = vld [vmem:[%s26586_s25 + $0x288] ss:$52 sps:$4 sm:$0xff]  }
 0x5d8   :  { %v20287_v14 = vld [vmem:[%s26586_s25 + $0x2ec] ss:$52 sps:$4 sm:$0xff]  }
 0x5da   :  { %9240 = vmatpush1.bf16.msra.mxu1 %v20215_v26  ;;  %9326 = vmatpush1.bf16.msra.mxu0 %v20218_v51  ;;  %v20290_v26 = vld [vmem:[%s26586_s25 + $0x2f4] ss:$52 sps:$4 sm:$0xff]  }
 0x5db   :  { %9241 = vmatprep.subr.bf16.mxu1 %v20223_v58  ;;  %9327 = vmatprep.subr.bf16.mxu0 %v20226_v25  ;;  %v20285_v51 = vld [vmem:[%s26586_s25 + $0x2e8] ss:$52 sps:$4 sm:$0xff]   ;;  %v20288_v58 = vld [vmem:[%s26586_s25 + $0x2f0] ss:$52 sps:$4 sm:$0xff]  }
 0x5dc   :  { %v20293_v25 = vld [vmem:[%s26586_s25 + $0x354] ss:$52 sps:$4 sm:$0xff]  }
 0x5de   :  { %9242 = vmatpush1.bf16.msra.mxu1 %v20221_v29  ;;  %9328 = vmatpush1.bf16.msra.mxu0 %v20224_v20  ;;  %v20296_v29 = vld [vmem:[%s26586_s25 + $0x35c] ss:$52 sps:$4 sm:$0xff]  }
 0x5df   :  { %9243 = vmatprep.subr.bf16.mxu1 %v20229_v62  ;;  %9329 = vmatprep.subr.bf16.mxu0 %v20232_v28  ;;  %v20291_v20 = vld [vmem:[%s26586_s25 + $0x350] ss:$52 sps:$4 sm:$0xff]   ;;  %v20294_v62 = vld [vmem:[%s26586_s25 + $0x358] ss:$52 sps:$4 sm:$0xff]  }
 0x5e0   :  { %v20299_v28 = vld [vmem:[%s26586_s25 + $0x3bc] ss:$52 sps:$4 sm:$0xff]  }
 0x5e2   :  { %9244 = vmatpush1.bf16.msra.mxu1 %v20227_v32  ;;  %9330 = vmatpush1.bf16.msra.mxu0 %v20230_v16  ;;  %v20302_v32 = vld [vmem:[%s26586_s25 + $0x3c4] ss:$52 sps:$4 sm:$0xff]  }
 0x5e3   :  { %9245 = vmatprep.subr.bf16.mxu1 %v20235_v36  ;;  %9331 = vmatprep.subr.bf16.mxu0 %v20238_v37  ;;  %v20297_v16 = vld [vmem:[%s26586_s25 + $0x3b8] ss:$52 sps:$4 sm:$0xff]   ;;  %v20300_v36 = vld [vmem:[%s26586_s25 + $0x3c0] ss:$52 sps:$4 sm:$0xff]  }
 0x5e4   :  { %v20305_v37 = vld [vmem:[%s26586_s25 + $0x424] ss:$52 sps:$4 sm:$0xff]  }
 0x5e6   :  { %9246 = vmatpush1.bf16.msra.mxu1 %v20233_v34  ;;  %9332 = vmatpush1.bf16.msra.mxu0 %v20236_v43  ;;  %v20306_v34 = vld [vmem:[%s26586_s25 + $0x428] ss:$52 sps:$4 sm:$0xff]   ;;  %v20311_v43 = vld [vmem:[%s26586_s25 + $0x48c] ss:$52 sps:$4 sm:$0xff]  }
 0x5e7   :  { %17144 = vmatprep.subr.msk.bf16.mxu1 %vm9144_vm14, %v17132_v44  ;;  %17146 = vmatprep.subr.msk.bf16.mxu0 %vm9144_vm14, %v17134_v46  ;;  %v20314_v44 = vld [vmem:[%s26586_s25 + $0x494] ss:$52 sps:$4 sm:$0xff]  }
 0x5e8   :  { %v20309_v46 = vld [vmem:[%s26586_s25 + $0x488] ss:$52 sps:$4 sm:$0xff]  }
 0x5ea   :  { %9248 = vmatpush1.bf16.msra.mxu1 %v9146_v54  ;;  %9334 = vmatpush1.bf16.msra.mxu0 %v9152_v55  ;;  %v20320_v54 = vld [vmem:[%s26586_s25 + $0x4fc] ss:$52 sps:$4 sm:$0xff]  }
 0x5eb   :  { %9356 = vmatprep.subr.bf16.mxu1 %v20245_v59  ;;  %9442 = vmatprep.subr.bf16.mxu0 %v20248_v52  ;;  %v20315_v55 = vld [vmem:[%s26586_s25 + $0x4f0] ss:$52 sps:$4 sm:$0xff]   ;;  %v20318_v59 = vld [vmem:[%s26586_s25 + $0x4f8] ss:$52 sps:$4 sm:$0xff]  }
 0x5ec   :  { %v20323_v52 = vld [vmem:[%s26586_s25 + $0x55c] ss:$52 sps:$4 sm:$0xff]  }
 0x5ed   :  { %9260 = vmatmul.mubr.bf16.vlgmr.msra.gmra.mrb[36].mxu1 %v23641_v35  ;;  %9346 = vmatmul.mubr.bf16.vlgmr.msra.gmra.mrb[32].mxu0 %v23641_v35 }
 0x5ee   :  { %9357 = vmatpush1.bf16.msra.mxu1 %v20243_v12  ;;  %9388 = vmatprep.mubr.bf16.mxu1 %v23611_v30  ;;  %v20326_v12 = vld [vmem:[%s26586_s25 + $0x564] ss:$52 sps:$4 sm:$0xff]  }
 0x5ef   :  { %9443 = vmatpush1.bf16.msra.mxu0 %v20246_v61  ;;  %9474 = vmatprep.mubr.bf16.mxu0 %v23611_v30  ;;  %v20321_v61 = vld [vmem:[%s26586_s25 + $0x558] ss:$52 sps:$4 sm:$0xff]  }
 0x5f0   :  { %9358 = vmatprep.subr.bf16.mxu1 %v20251_v1  ;;  %9444 = vmatprep.subr.bf16.mxu0 %v20254_v53  ;;  %v20324_v1 = vld [vmem:[%s26586_s25 + $0x560] ss:$52 sps:$4 sm:$0xff]   ;;  %v20329_v53 = vld [vmem:[%s26586_s25 + $0x5c4] ss:$52 sps:$4 sm:$0xff]  }
 0x5f2   :  { %9359 = vmatpush1.bf16.msra.mxu1 %v20249_v49  ;;  %v20332_v49 = vld [vmem:[%s26586_s25 + $0x5cc] ss:$52 sps:$4 sm:$0xff]  }
 0x5f3   :  { %9445 = vmatpush1.bf16.msra.mxu0 %v20252_v2  ;;  %9360 = vmatprep.subr.bf16.mxu1 %v20257_v9  ;;  %v20327_v2 = vld [vmem:[%s26586_s25 + $0x5c0] ss:$52 sps:$4 sm:$0xff]   ;;  %v20330_v9 = vld [vmem:[%s26586_s25 + $0x5c8] ss:$52 sps:$4 sm:$0xff]  }
 0x5f4   :  { %9446 = vmatprep.subr.bf16.mxu0 %v20260_v5  ;;  %v20335_v5 = vld [vmem:[%s26586_s25 + $0x62c] ss:$52 sps:$4 sm:$0xff]  }
 0x5f6   :  { %9361 = vmatpush1.bf16.msra.mxu1 %v20255_v41  ;;  %v20338_v41 = vld [vmem:[%s26586_s25 + $0x634] ss:$52 sps:$4 sm:$0xff]  }
 0x5f7   :  { %9447 = vmatpush1.bf16.msra.mxu0 %v20258_v7  ;;  %9362 = vmatprep.subr.bf16.mxu1 %v20263_v10  ;;  %v20333_v7 = vld [vmem:[%s26586_s25 + $0x628] ss:$52 sps:$4 sm:$0xff]   ;;  %v20336_v10 = vld [vmem:[%s26586_s25 + $0x630] ss:$52 sps:$4 sm:$0xff]  }
 0x5f8   :  { %9448 = vmatprep.subr.bf16.mxu0 %v20266_v56  ;;  %v20341_v56 = vld [vmem:[%s26586_s25 + $0x694] ss:$52 sps:$4 sm:$0xff]  }
 0x5fa   :  { %9363 = vmatpush1.bf16.msra.mxu1 %v20261_v11  ;;  %v20344_v11 = vld [vmem:[%s26586_s25 + $0x69c] ss:$52 sps:$4 sm:$0xff]  }
 0x5fb   :  { %9449 = vmatpush1.bf16.msra.mxu0 %v20264_v15  ;;  %9364 = vmatprep.subr.bf16.mxu1 %v20269_v21  ;;  %v20339_v15 = vld [vmem:[%s26586_s25 + $0x690] ss:$52 sps:$4 sm:$0xff]   ;;  %v20342_v21 = vld [vmem:[%s26586_s25 + $0x698] ss:$52 sps:$4 sm:$0xff]  }
 0x5fc   :  { %9450 = vmatprep.subr.bf16.mxu0 %v20272_v33  ;;  %v20347_v33 = vld [vmem:[%s26586_s25 + $0x6fc] ss:$52 sps:$4 sm:$0xff]  }
 0x5fe   :  { %9365 = vmatpush1.bf16.msra.mxu1 %v20267_v60  ;;  %v20350_v60 = vld [vmem:[%s26586_s25 + $0x704] ss:$52 sps:$4 sm:$0xff]  }
 0x5ff   :  { %9451 = vmatpush1.bf16.msra.mxu0 %v20270_v50  ;;  %9366 = vmatprep.subr.bf16.mxu1 %v20275_v19  ;;  %v20345_v50 = vld [vmem:[%s26586_s25 + $0x6f8] ss:$52 sps:$4 sm:$0xff]   ;;  %v20348_v19 = vld [vmem:[%s26586_s25 + $0x700] ss:$52 sps:$4 sm:$0xff]  }
 0x600   :  { %9452 = vmatprep.subr.bf16.mxu0 %v20278_v57  ;;  %v20353_v57 = vld [vmem:[%s26586_s25 + $0x764] ss:$52 sps:$4 sm:$0xff]  }
 0x602   :  { %9367 = vmatpush1.bf16.msra.mxu1 %v20273_v13  ;;  %v20356_v13 = vld [vmem:[%s26586_s25 + $0x76c] ss:$52 sps:$4 sm:$0xff]  }
 0x603   :  { %9453 = vmatpush1.bf16.msra.mxu0 %v20276_v23  ;;  %9368 = vmatprep.subr.bf16.mxu1 %v20281_v17  ;;  %v20351_v23 = vld [vmem:[%s26586_s25 + $0x760] ss:$52 sps:$4 sm:$0xff]   ;;  %v20354_v17 = vld [vmem:[%s26586_s25 + $0x768] ss:$52 sps:$4 sm:$0xff]  }
 0x604   :  { %9454 = vmatprep.subr.bf16.mxu0 %v20284_v24  ;;  %v20359_v24 = vld [vmem:[%s26586_s25 + $0x7cc] ss:$52 sps:$4 sm:$0xff]  }
 0x606   :  { %9369 = vmatpush1.bf16.msra.mxu1 %v20279_v39  ;;  %v20362_v39 = vld [vmem:[%s26586_s25 + $0x7d4] ss:$52 sps:$4 sm:$0xff]  }
 0x607   :  { %9455 = vmatpush1.bf16.msra.mxu0 %v20282_v22  ;;  %9370 = vmatprep.subr.bf16.mxu1 %v20287_v14  ;;  %v20357_v22 = vld [vmem:[%s26586_s25 + $0x7c8] ss:$52 sps:$4 sm:$0xff]   ;;  %v20360_v14 = vld [vmem:[%s26586_s25 + $0x7d0] ss:$52 sps:$4 sm:$0xff]  }
 0x608   :  { %9456 = vmatprep.subr.bf16.mxu0 %v20290_v26  ;;  %v20365_v26 = vld [vmem:[%s26586_s25 + $0x834] ss:$52 sps:$4 sm:$0xff]  }
 0x60a   :  { %9371 = vmatpush1.bf16.msra.mxu1 %v20285_v51  ;;  %v20368_v51 = vld [vmem:[%s26586_s25 + $0x83c] ss:$52 sps:$4 sm:$0xff]  }
 0x60b   :  { %9457 = vmatpush1.bf16.msra.mxu0 %v20288_v58  ;;  %9372 = vmatprep.subr.bf16.mxu1 %v20293_v25  ;;  %v20363_v58 = vld [vmem:[%s26586_s25 + $0x830] ss:$52 sps:$4 sm:$0xff]   ;;  %v20366_v25 = vld [vmem:[%s26586_s25 + $0x838] ss:$52 sps:$4 sm:$0xff]  }
 0x60c   :  { %9458 = vmatprep.subr.bf16.mxu0 %v20296_v29  ;;  %v20371_v29 = vld [vmem:[%s26586_s25 + $0x89c] ss:$52 sps:$4 sm:$0xff]  }
 0x60e   :  { %9373 = vmatpush1.bf16.msra.mxu1 %v20291_v20  ;;  %v20374_v20 = vld [vmem:[%s26586_s25 + $0x8a4] ss:$52 sps:$4 sm:$0xff]  }
 0x60f   :  { %9459 = vmatpush1.bf16.msra.mxu0 %v20294_v62  ;;  %9374 = vmatprep.subr.bf16.mxu1 %v20299_v28  ;;  %v20369_v62 = vld [vmem:[%s26586_s25 + $0x898] ss:$52 sps:$4 sm:$0xff]   ;;  %v20372_v28 = vld [vmem:[%s26586_s25 + $0x8a0] ss:$52 sps:$4 sm:$0xff]  }
 0x610   :  { %9460 = vmatprep.subr.bf16.mxu0 %v20302_v32  ;;  %v20377_v32 = vld [vmem:[%s26586_s25 + $0x904] ss:$52 sps:$4 sm:$0xff]  }
 0x612   :  { %9375 = vmatpush1.bf16.msra.mxu1 %v20297_v16  ;;  %v20380_v16 = vld [vmem:[%s26586_s25 + $0x90c] ss:$52 sps:$4 sm:$0xff]  }
 0x613   :  { %9461 = vmatpush1.bf16.msra.mxu0 %v20300_v36  ;;  %9376 = vmatprep.subr.bf16.mxu1 %v20305_v37  ;;  %v20375_v36 = vld [vmem:[%s26586_s25 + $0x900] ss:$52 sps:$4 sm:$0xff]   ;;  %v20378_v37 = vld [vmem:[%s26586_s25 + $0x908] ss:$52 sps:$4 sm:$0xff]  }
 0x614   :  { %9462 = vmatprep.subr.bf16.mxu0 %v20308_v38  ;;  %v20383_v38 = vld [vmem:[%s26586_s25 + $0x96c] ss:$52 sps:$4 sm:$0xff]  }
 0x616   :  { %9377 = vmatpush1.bf16.msra.mxu1 %v20303_v40  ;;  %v20386_v40 = vld [vmem:[%s26586_s25 + $0x974] ss:$52 sps:$4 sm:$0xff]  }
 0x617   :  { %9463 = vmatpush1.bf16.msra.mxu0 %v20306_v34  ;;  %9378 = vmatprep.subr.bf16.mxu1 %v20311_v43  ;;  %v20381_v34 = vld [vmem:[%s26586_s25 + $0x968] ss:$52 sps:$4 sm:$0xff]   ;;  %v20384_v43 = vld [vmem:[%s26586_s25 + $0x970] ss:$52 sps:$4 sm:$0xff]  }
 0x618   :  { %9464 = vmatprep.subr.bf16.mxu0 %v20314_v44  ;;  %v20389_v44 = vld [vmem:[%s26586_s25 + $0x9d4] ss:$52 sps:$4 sm:$0xff]  }
 0x61a   :  { %9379 = vmatpush1.bf16.msra.mxu1 %v20309_v46  ;;  %v20392_v46 = vld [vmem:[%s26586_s25 + $0x9dc] ss:$52 sps:$4 sm:$0xff]  }
 0x61b   :  { %9465 = vmatpush1.bf16.msra.mxu0 %v20312_v8  ;;  %9380 = vmatprep.subr.bf16.mxu1 %v20317_v42  ;;  %v7386_v8 = vld [vmem:[%s26586_s25 + $0xaa0] sm:$0x77]  ;;  %v7387_v42 = vld [vmem:[%s26586_s25 + $0xaa8] sm:$0x77] }
 0x61c   :  { %9466 = vmatprep.subr.bf16.mxu0 %v20320_v54  ;;  %v20387_v54 = vld [vmem:[%s26586_s25 + $0x9d0] ss:$52 sps:$4 sm:$0xff]  }
 0x61e   :  { %9381 = vmatpush1.bf16.msra.mxu1 %v20315_v55  ;;  %v20390_v55 = vld [vmem:[%s26586_s25 + $0x9d8] ss:$52 sps:$4 sm:$0xff]  }
 0x61f   :  { %9467 = vmatpush1.bf16.msra.mxu0 %v20318_v59  ;;  %9382 = vmatprep.subr.bf16.mxu1 %v20323_v52  ;;  %v20395_v59 = vld [vmem:[%s26586_s25 + $0xa3c] ss:$52 sps:$4 sm:$0xff]   ;;  %v20398_v52 = vld [vmem:[%s26586_s25 + $0xa44] ss:$52 sps:$4 sm:$0xff]  }
 0x620   :  { %9468 = vmatprep.subr.bf16.mxu0 %v20326_v12  ;;  %v17135_v12 = vcombine.low %v7386_v8, %v7386_v8 }
 0x622   :  { %9383 = vmatpush1.bf16.msra.mxu1 %v20321_v61  ;;  %v17137_v61 = vcombine.low %v7387_v42, %v7387_v42 }
 0x623   :  { %9469 = vmatpush1.bf16.msra.mxu0 %v20324_v1  ;;  %9384 = vmatprep.subr.bf16.mxu1 %v20329_v53  ;;  %v20393_v1 = vld [vmem:[%s26586_s25 + $0xa38] ss:$52 sps:$4 sm:$0xff]   ;;  %v20396_v53 = vld [vmem:[%s26586_s25 + $0xa40] ss:$52 sps:$4 sm:$0xff]  }
 0x624   :  { %9470 = vmatprep.subr.bf16.mxu0 %v20332_v49  ;;  %v17136_v49 = vcombine.high %v7386_v8, %v7386_v8  ;;  %v20462_v8 = vld [vmem:[%s26586_s25 + $0x3d4] ss:$52 sps:$4 sm:$0xff]  }
 0x626   :  { %9385 = vmatpush1.bf16.msra.mxu1 %v20327_v2  ;;  %v17138_v2 = vcombine.high %v7387_v42, %v7387_v42  ;;  %v20457_v42 = vld [vmem:[%s26586_s25 + $0x3c8] ss:$52 sps:$4 sm:$0xff]  }
 0x627   :  { %9471 = vmatpush1.bf16.msra.mxu0 %v20330_v9  ;;  %9386 = vmatprep.subr.bf16.mxu1 %v20335_v5  ;;  %v9158_v9 = vsel %vm9144_vm14, %v17135_v12, 0  ;;  %v9164_v5 = vsel %vm9144_vm14, %v17137_v61, 0  ;;  %v20466_v12 = vld [vmem:[%s26586_s25 + $0x438] ss:$52 sps:$4 sm:$0xff]   ;;  %v20471_v61 = vld [vmem:[%s26586_s25 + $0x49c] ss:$52 sps:$4 sm:$0xff]  }
 0x628   :  { %9472 = vmatprep.subr.bf16.mxu0 %v20338_v41  ;;  %v20405_v41 = vld [vmem:[%s26586_s25 + $0x24] ss:$52 sps:$4 sm:$0xff]  }
 0x62a   :  { %9387 = vmatpush1.bf16.msra.mxu1 %v20333_v7  ;;  %v20403_v7 = vld [vmem:[%s26586_s25 + $0x20] ss:$52 sps:$4 sm:$0xff]  }
 0x62b   :  { %9473 = vmatpush1.bf16.msra.mxu0 %v20336_v10  ;;  %9399 = vmatprep.subr.bf16.mxu1 %v20341_v56  ;;  %v20408_v10 = vld [vmem:[%s26586_s25 + $0x2c] ss:$52 sps:$4 sm:$0xff]   ;;  %v20406_v56 = vld [vmem:[%s26586_s25 + $0x28] ss:$52 sps:$4 sm:$0xff]  }
 0x62c   :  { %9485 = vmatprep.subr.bf16.mxu0 %v20344_v11  ;;  %v20411_v11 = vld [vmem:[%s26586_s25 + $0x8c] ss:$52 sps:$4 sm:$0xff]  }
 0x62d   :  { %9389 = vmatmul.mubr.bf16.vlgmr.msra.gmra.mrb[40].mxu1 %v23609_v27 }
 0x62e   :  { %9475 = vmatmul.mubr.bf16.vlgmr.msra.gmra.mrb[36].mxu0 %v23609_v27  ;;  %9400 = vmatpush1.bf16.msra.mxu1 %v20339_v15  ;;  %v20414_v15 = vld [vmem:[%s26586_s25 + $0x94] ss:$52 sps:$4 sm:$0xff]  }
 0x62f   :  { %17149 = vmatprep.mubr.msk.bf16.mxu1 %vm9140_vm13, %v23643_v47  ;;  %9486 = vmatpush1.bf16.msra.mxu0 %v20342_v21  ;;  %v20409_v21 = vld [vmem:[%s26586_s25 + $0x88] ss:$52 sps:$4 sm:$0xff]  }
 0x630   :  { %17151 = vmatprep.mubr.msk.bf16.mxu0 %vm9140_vm13, %v23643_v47  ;;  %9401 = vmatprep.subr.bf16.mxu1 %v20347_v33  ;;  %v20412_v33 = vld [vmem:[%s26586_s25 + $0x90] ss:$52 sps:$4 sm:$0xff]  }
 0x631   :  { %9487 = vmatprep.subr.bf16.mxu0 %v20350_v60  ;;  %v20417_v60 = vld [vmem:[%s26586_s25 + $0xf4] ss:$52 sps:$4 sm:$0xff]  }
 0x632   :  { %9402 = vmatpush1.bf16.msra.mxu1 %v20345_v50  ;;  %v20420_v50 = vld [vmem:[%s26586_s25 + $0xfc] ss:$52 sps:$4 sm:$0xff]  }
 0x633   :  { %9488 = vmatpush1.bf16.msra.mxu0 %v20348_v19  ;;  %9403 = vmatprep.subr.bf16.mxu1 %v20353_v57  ;;  %v20415_v19 = vld [vmem:[%s26586_s25 + $0xf0] ss:$52 sps:$4 sm:$0xff]   ;;  %v20418_v57 = vld [vmem:[%s26586_s25 + $0xf8] ss:$52 sps:$4 sm:$0xff]  }
 0x634   :  { %9489 = vmatprep.subr.bf16.mxu0 %v20356_v13  ;;  %v20423_v13 = vld [vmem:[%s26586_s25 + $0x15c] ss:$52 sps:$4 sm:$0xff]  }
 0x636   :  { %9404 = vmatpush1.bf16.msra.mxu1 %v20351_v23  ;;  %v20426_v23 = vld [vmem:[%s26586_s25 + $0x164] ss:$52 sps:$4 sm:$0xff]  }
 0x637   :  { %9490 = vmatpush1.bf16.msra.mxu0 %v20354_v17  ;;  %9405 = vmatprep.subr.bf16.mxu1 %v20359_v24  ;;  %v20421_v17 = vld [vmem:[%s26586_s25 + $0x158] ss:$52 sps:$4 sm:$0xff]   ;;  %v20424_v24 = vld [vmem:[%s26586_s25 + $0x160] ss:$52 sps:$4 sm:$0xff]  }
 0x638   :  { %9491 = vmatprep.subr.bf16.mxu0 %v20362_v39  ;;  %v20429_v39 = vld [vmem:[%s26586_s25 + $0x1c4] ss:$52 sps:$4 sm:$0xff]  }
 0x63a   :  { %9406 = vmatpush1.bf16.msra.mxu1 %v20357_v22  ;;  %v20432_v22 = vld [vmem:[%s26586_s25 + $0x1cc] ss:$52 sps:$4 sm:$0xff]  }
 0x63b   :  { %9492 = vmatpush1.bf16.msra.mxu0 %v20360_v14  ;;  %9407 = vmatprep.subr.bf16.mxu1 %v20365_v26  ;;  %v20427_v14 = vld [vmem:[%s26586_s25 + $0x1c0] ss:$52 sps:$4 sm:$0xff]   ;;  %v20430_v26 = vld [vmem:[%s26586_s25 + $0x1c8] ss:$52 sps:$4 sm:$0xff]  }
 0x63c   :  { %9493 = vmatprep.subr.bf16.mxu0 %v20368_v51  ;;  %v20435_v51 = vld [vmem:[%s26586_s25 + $0x22c] ss:$52 sps:$4 sm:$0xff]  }
 0x63e   :  { %9408 = vmatpush1.bf16.msra.mxu1 %v20363_v58  ;;  %v20438_v58 = vld [vmem:[%s26586_s25 + $0x234] ss:$52 sps:$4 sm:$0xff]  }
 0x63f   :  { %9494 = vmatpush1.bf16.msra.mxu0 %v20366_v25  ;;  %9409 = vmatprep.subr.bf16.mxu1 %v20371_v29  ;;  %v20433_v25 = vld [vmem:[%s26586_s25 + $0x228] ss:$52 sps:$4 sm:$0xff]   ;;  %v20436_v29 = vld [vmem:[%s26586_s25 + $0x230] ss:$52 sps:$4 sm:$0xff]  }
 0x640   :  { %9495 = vmatprep.subr.bf16.mxu0 %v20374_v20  ;;  %v20441_v20 = vld [vmem:[%s26586_s25 + $0x294] ss:$52 sps:$4 sm:$0xff]  }
 0x642   :  { %9410 = vmatpush1.bf16.msra.mxu1 %v20369_v62  ;;  %v20444_v62 = vld [vmem:[%s26586_s25 + $0x29c] ss:$52 sps:$4 sm:$0xff]  }
 0x643   :  { %9496 = vmatpush1.bf16.msra.mxu0 %v20372_v28  ;;  %9411 = vmatprep.subr.bf16.mxu1 %v20377_v32  ;;  %v20439_v28 = vld [vmem:[%s26586_s25 + $0x290] ss:$52 sps:$4 sm:$0xff]   ;;  %v20442_v32 = vld [vmem:[%s26586_s25 + $0x298] ss:$52 sps:$4 sm:$0xff]  }
 0x644   :  { %9497 = vmatprep.subr.bf16.mxu0 %v20380_v16  ;;  %v20447_v16 = vld [vmem:[%s26586_s25 + $0x2fc] ss:$52 sps:$4 sm:$0xff]  }
 0x646   :  { %9412 = vmatpush1.bf16.msra.mxu1 %v20375_v36  ;;  %v20450_v36 = vld [vmem:[%s26586_s25 + $0x304] ss:$52 sps:$4 sm:$0xff]  }
 0x647   :  { %9498 = vmatpush1.bf16.msra.mxu0 %v20378_v37  ;;  %9413 = vmatprep.subr.bf16.mxu1 %v20383_v38  ;;  %v20445_v37 = vld [vmem:[%s26586_s25 + $0x2f8] ss:$52 sps:$4 sm:$0xff]   ;;  %v20448_v38 = vld [vmem:[%s26586_s25 + $0x300] ss:$52 sps:$4 sm:$0xff]  }
 0x648   :  { %9499 = vmatprep.subr.bf16.mxu0 %v20386_v40  ;;  %v20453_v40 = vld [vmem:[%s26586_s25 + $0x364] ss:$52 sps:$4 sm:$0xff]  }
 0x64a   :  { %9414 = vmatpush1.bf16.msra.mxu1 %v20381_v34  ;;  %v20456_v34 = vld [vmem:[%s26586_s25 + $0x36c] ss:$52 sps:$4 sm:$0xff]  }
 0x64b   :  { %9500 = vmatpush1.bf16.msra.mxu0 %v20384_v43  ;;  %9415 = vmatprep.subr.bf16.mxu1 %v20389_v44  ;;  %v20451_v43 = vld [vmem:[%s26586_s25 + $0x360] ss:$52 sps:$4 sm:$0xff]   ;;  %v20454_v44 = vld [vmem:[%s26586_s25 + $0x368] ss:$52 sps:$4 sm:$0xff]  }
 0x64c   :  { %9501 = vmatprep.subr.bf16.mxu0 %v20392_v46  ;;  %v20459_v46 = vld [vmem:[%s26586_s25 + $0x3cc] ss:$52 sps:$4 sm:$0xff]  }
 0x64e   :  { %9416 = vmatpush1.bf16.msra.mxu1 %v20387_v54  ;;  %v20460_v54 = vld [vmem:[%s26586_s25 + $0x3d0] ss:$52 sps:$4 sm:$0xff]  }
 0x64f   :  { %9502 = vmatpush1.bf16.msra.mxu0 %v20390_v55  ;;  %9417 = vmatprep.subr.bf16.mxu1 %v20395_v59  ;;  %v20465_v55 = vld [vmem:[%s26586_s25 + $0x434] ss:$52 sps:$4 sm:$0xff]   ;;  %v20468_v59 = vld [vmem:[%s26586_s25 + $0x43c] ss:$52 sps:$4 sm:$0xff]  }
 0x650   :  { %9503 = vmatprep.subr.bf16.mxu0 %v20398_v52  ;;  %v20463_v52 = vld [vmem:[%s26586_s25 + $0x430] ss:$52 sps:$4 sm:$0xff]  }
 0x652   :  { %9418 = vmatpush1.bf16.msra.mxu1 %v20393_v1  ;;  %v20474_v1 = vld [vmem:[%s26586_s25 + $0x4a4] ss:$52 sps:$4 sm:$0xff]  }
 0x653   :  { %9504 = vmatpush1.bf16.msra.mxu0 %v20396_v53  ;;  %17148 = vmatprep.subr.msk.bf16.mxu1 %vm9144_vm14, %v17136_v49  ;;  %v20469_v53 = vld [vmem:[%s26586_s25 + $0x498] ss:$52 sps:$4 sm:$0xff]   ;;  %v20472_v49 = vld [vmem:[%s26586_s25 + $0x4a0] ss:$52 sps:$4 sm:$0xff]  }
 0x654   :  { %17150 = vmatprep.subr.msk.bf16.mxu0 %vm9144_vm14, %v17138_v2  ;;  %v20477_v2 = vld [vmem:[%s26586_s25 + $0x504] ss:$52 sps:$4 sm:$0xff]  }
 0x656   :  { %9420 = vmatpush1.bf16.msra.mxu1 %v9158_v9  ;;  %v20480_v9 = vld [vmem:[%s26586_s25 + $0x50c] ss:$52 sps:$4 sm:$0xff]  }
 0x657   :  { %9506 = vmatpush1.bf16.msra.mxu0 %v9164_v5  ;;  %9528 = vmatprep.subr.bf16.mxu1 %v20405_v41  ;;  %v20475_v5 = vld [vmem:[%s26586_s25 + $0x500] ss:$52 sps:$4 sm:$0xff]   ;;  %v20478_v41 = vld [vmem:[%s26586_s25 + $0x508] ss:$52 sps:$4 sm:$0xff]  }
 0x658   :  { %9614 = vmatprep.subr.bf16.mxu0 %v20408_v10  ;;  %v20486_v10 = vld [vmem:[%s26586_s25 + $0x574] ss:$52 sps:$4 sm:$0xff]  }
 0x659   :  { %9432 = vmatmul.mubr.bf16.vlgmr.msra.gmra.mrb[40].mxu1 %v23641_v35 }
 0x65a   :  { %9518 = vmatmul.mubr.bf16.vlgmr.msra.gmra.mrb[36].mxu0 %v23641_v35  ;;  %9529 = vmatpush1.bf16.msra.mxu1 %v20403_v7  ;;  %v20483_v7 = vld [vmem:[%s26586_s25 + $0x56c] ss:$52 sps:$4 sm:$0xff]  }
 0x65b   :  { %9560 = vmatprep.mubr.bf16.mxu1 %v23611_v30  ;;  %9615 = vmatpush1.bf16.msra.mxu0 %v20406_v56  ;;  %v20481_v56 = vld [vmem:[%s26586_s25 + $0x568] ss:$52 sps:$4 sm:$0xff]  }
 0x65c   :  { %9646 = vmatprep.mubr.bf16.mxu0 %v23611_v30  ;;  %9530 = vmatprep.subr.bf16.mxu1 %v20411_v11  ;;  %v20484_v11 = vld [vmem:[%s26586_s25 + $0x570] ss:$52 sps:$4 sm:$0xff]  }
 0x65d   :  { %9616 = vmatprep.subr.bf16.mxu0 %v20414_v15  ;;  %v20489_v15 = vld [vmem:[%s26586_s25 + $0x5d4] ss:$52 sps:$4 sm:$0xff]  }
 0x65e   :  { %9531 = vmatpush1.bf16.msra.mxu1 %v20409_v21  ;;  %v20492_v21 = vld [vmem:[%s26586_s25 + $0x5dc] ss:$52 sps:$4 sm:$0xff]  }
 0x65f   :  { %9617 = vmatpush1.bf16.msra.mxu0 %v20412_v33  ;;  %9532 = vmatprep.subr.bf16.mxu1 %v20417_v60  ;;  %v20487_v33 = vld [vmem:[%s26586_s25 + $0x5d0] ss:$52 sps:$4 sm:$0xff]   ;;  %v20490_v60 = vld [vmem:[%s26586_s25 + $0x5d8] ss:$52 sps:$4 sm:$0xff]  }
 0x660   :  { %9618 = vmatprep.subr.bf16.mxu0 %v20420_v50  ;;  %v20495_v50 = vld [vmem:[%s26586_s25 + $0x63c] ss:$52 sps:$4 sm:$0xff]  }
 0x662   :  { %9533 = vmatpush1.bf16.msra.mxu1 %v20415_v19  ;;  %v20498_v19 = vld [vmem:[%s26586_s25 + $0x644] ss:$52 sps:$4 sm:$0xff]  }
 0x663   :  { %9619 = vmatpush1.bf16.msra.mxu0 %v20418_v57  ;;  %9534 = vmatprep.subr.bf16.mxu1 %v20423_v13  ;;  %v20493_v57 = vld [vmem:[%s26586_s25 + $0x638] ss:$52 sps:$4 sm:$0xff]   ;;  %v20496_v13 = vld [vmem:[%s26586_s25 + $0x640] ss:$52 sps:$4 sm:$0xff]  }
 0x664   :  { %9620 = vmatprep.subr.bf16.mxu0 %v20426_v23  ;;  %v20501_v23 = vld [vmem:[%s26586_s25 + $0x6a4] ss:$52 sps:$4 sm:$0xff]  }
 0x666   :  { %9535 = vmatpush1.bf16.msra.mxu1 %v20421_v17  ;;  %v20504_v17 = vld [vmem:[%s26586_s25 + $0x6ac] ss:$52 sps:$4 sm:$0xff]  }
 0x667   :  { %9621 = vmatpush1.bf16.msra.mxu0 %v20424_v24  ;;  %9536 = vmatprep.subr.bf16.mxu1 %v20429_v39  ;;  %v20499_v24 = vld [vmem:[%s26586_s25 + $0x6a0] ss:$52 sps:$4 sm:$0xff]   ;;  %v20502_v39 = vld [vmem:[%s26586_s25 + $0x6a8] ss:$52 sps:$4 sm:$0xff]  }
 0x668   :  { %9622 = vmatprep.subr.bf16.mxu0 %v20432_v22  ;;  %v20507_v22 = vld [vmem:[%s26586_s25 + $0x70c] ss:$52 sps:$4 sm:$0xff]  }
 0x66a   :  { %9537 = vmatpush1.bf16.msra.mxu1 %v20427_v14  ;;  %v20510_v14 = vld [vmem:[%s26586_s25 + $0x714] ss:$52 sps:$4 sm:$0xff]  }
 0x66b   :  { %9623 = vmatpush1.bf16.msra.mxu0 %v20430_v26  ;;  %9538 = vmatprep.subr.bf16.mxu1 %v20435_v51  ;;  %v20505_v26 = vld [vmem:[%s26586_s25 + $0x708] ss:$52 sps:$4 sm:$0xff]   ;;  %v20508_v51 = vld [vmem:[%s26586_s25 + $0x710] ss:$52 sps:$4 sm:$0xff]  }
 0x66c   :  { %9624 = vmatprep.subr.bf16.mxu0 %v20438_v58  ;;  %v20513_v58 = vld [vmem:[%s26586_s25 + $0x774] ss:$52 sps:$4 sm:$0xff]  }
 0x66e   :  { %9539 = vmatpush1.bf16.msra.mxu1 %v20433_v25  ;;  %v20516_v25 = vld [vmem:[%s26586_s25 + $0x77c] ss:$52 sps:$4 sm:$0xff]  }
 0x66f   :  { %9625 = vmatpush1.bf16.msra.mxu0 %v20436_v29  ;;  %9540 = vmatprep.subr.bf16.mxu1 %v20441_v20  ;;  %v20511_v29 = vld [vmem:[%s26586_s25 + $0x770] ss:$52 sps:$4 sm:$0xff]   ;;  %v20514_v20 = vld [vmem:[%s26586_s25 + $0x778] ss:$52 sps:$4 sm:$0xff]  }
 0x670   :  { %9626 = vmatprep.subr.bf16.mxu0 %v20444_v62  ;;  %v20519_v62 = vld [vmem:[%s26586_s25 + $0x7dc] ss:$52 sps:$4 sm:$0xff]  }
 0x672   :  { %9541 = vmatpush1.bf16.msra.mxu1 %v20439_v28  ;;  %v20522_v28 = vld [vmem:[%s26586_s25 + $0x7e4] ss:$52 sps:$4 sm:$0xff]  }
 0x673   :  { %9627 = vmatpush1.bf16.msra.mxu0 %v20442_v32  ;;  %9542 = vmatprep.subr.bf16.mxu1 %v20447_v16  ;;  %v20517_v32 = vld [vmem:[%s26586_s25 + $0x7d8] ss:$52 sps:$4 sm:$0xff]   ;;  %v20520_v16 = vld [vmem:[%s26586_s25 + $0x7e0] ss:$52 sps:$4 sm:$0xff]  }
 0x674   :  { %9628 = vmatprep.subr.bf16.mxu0 %v20450_v36  ;;  %v20525_v36 = vld [vmem:[%s26586_s25 + $0x844] ss:$52 sps:$4 sm:$0xff]  }
 0x676   :  { %9543 = vmatpush1.bf16.msra.mxu1 %v20445_v37  ;;  %v20528_v37 = vld [vmem:[%s26586_s25 + $0x84c] ss:$52 sps:$4 sm:$0xff]  }
 0x677   :  { %9629 = vmatpush1.bf16.msra.mxu0 %v20448_v38  ;;  %9544 = vmatprep.subr.bf16.mxu1 %v20453_v40  ;;  %v20523_v38 = vld [vmem:[%s26586_s25 + $0x840] ss:$52 sps:$4 sm:$0xff]   ;;  %v20526_v40 = vld [vmem:[%s26586_s25 + $0x848] ss:$52 sps:$4 sm:$0xff]  }
 0x678   :  { %9630 = vmatprep.subr.bf16.mxu0 %v20456_v34  ;;  %v20531_v34 = vld [vmem:[%s26586_s25 + $0x8ac] ss:$52 sps:$4 sm:$0xff]  }
 0x67a   :  { %9545 = vmatpush1.bf16.msra.mxu1 %v20451_v43  ;;  %v20534_v43 = vld [vmem:[%s26586_s25 + $0x8b4] ss:$52 sps:$4 sm:$0xff]  }
 0x67b   :  { %9631 = vmatpush1.bf16.msra.mxu0 %v20454_v44  ;;  %9546 = vmatprep.subr.bf16.mxu1 %v20459_v46  ;;  %v20529_v44 = vld [vmem:[%s26586_s25 + $0x8a8] ss:$52 sps:$4 sm:$0xff]   ;;  %v20532_v46 = vld [vmem:[%s26586_s25 + $0x8b0] ss:$52 sps:$4 sm:$0xff]  }
 0x67c   :  { %9632 = vmatprep.subr.bf16.mxu0 %v20462_v8  ;;  %v20537_v8 = vld [vmem:[%s26586_s25 + $0x914] ss:$52 sps:$4 sm:$0xff]  }
 0x67e   :  { %9547 = vmatpush1.bf16.msra.mxu1 %v20457_v42  ;;  %v20540_v42 = vld [vmem:[%s26586_s25 + $0x91c] ss:$52 sps:$4 sm:$0xff]  }
 0x67f   :  { %9633 = vmatpush1.bf16.msra.mxu0 %v20460_v54  ;;  %9548 = vmatprep.subr.bf16.mxu1 %v20465_v55  ;;  %v20535_v54 = vld [vmem:[%s26586_s25 + $0x910] ss:$52 sps:$4 sm:$0xff]   ;;  %v20538_v55 = vld [vmem:[%s26586_s25 + $0x918] ss:$52 sps:$4 sm:$0xff]  }
 0x680   :  { %9634 = vmatprep.subr.bf16.mxu0 %v20468_v59  ;;  %v20543_v59 = vld [vmem:[%s26586_s25 + $0x97c] ss:$52 sps:$4 sm:$0xff]  }
 0x682   :  { %9549 = vmatpush1.bf16.msra.mxu1 %v20463_v52  ;;  %v20546_v52 = vld [vmem:[%s26586_s25 + $0x984] ss:$52 sps:$4 sm:$0xff]  }
 0x683   :  { %9635 = vmatpush1.bf16.msra.mxu0 %v20466_v12  ;;  %9550 = vmatprep.subr.bf16.mxu1 %v20471_v61  ;;  %v20541_v12 = vld [vmem:[%s26586_s25 + $0x978] ss:$52 sps:$4 sm:$0xff]   ;;  %v20544_v61 = vld [vmem:[%s26586_s25 + $0x980] ss:$52 sps:$4 sm:$0xff]  }
 0x684   :  { %9636 = vmatprep.subr.bf16.mxu0 %v20474_v1  ;;  %v20549_v1 = vld [vmem:[%s26586_s25 + $0x9e4] ss:$52 sps:$4 sm:$0xff]  }
 0x686   :  { %9551 = vmatpush1.bf16.msra.mxu1 %v20469_v53  ;;  %v20552_v53 = vld [vmem:[%s26586_s25 + $0x9ec] ss:$52 sps:$4 sm:$0xff]  }
 0x687   :  { %9637 = vmatpush1.bf16.msra.mxu0 %v20472_v49  ;;  %9552 = vmatprep.subr.bf16.mxu1 %v20477_v2  ;;  %v20547_v49 = vld [vmem:[%s26586_s25 + $0x9e0] ss:$52 sps:$4 sm:$0xff]   ;;  %v20550_v2 = vld [vmem:[%s26586_s25 + $0x9e8] ss:$52 sps:$4 sm:$0xff]  }
 0x688   :  { %9638 = vmatprep.subr.bf16.mxu0 %v20480_v9  ;;  %v20555_v9 = vld [vmem:[%s26586_s25 + $0xa4c] ss:$52 sps:$4 sm:$0xff]  }
 0x68a   :  { %9553 = vmatpush1.bf16.msra.mxu1 %v20475_v5  ;;  %v9851_v5 = vpop.permute.xlu1 %9850 }
 0x68b   :  { %9639 = vmatpush1.bf16.msra.mxu0 %v20478_v41  ;;  %9554 = vmatprep.subr.bf16.mxu1 %v20483_v7  ;;  %v20558_v41 = vld [vmem:[%s26586_s25 + $0xa54] ss:$52 sps:$4 sm:$0xff]  }
 0x68c   :  { %9640 = vmatprep.subr.bf16.mxu0 %v20486_v10  ;;  %v7388_v7 = vld [vmem:[%s26586_s25 + $0xab0] sm:$0x77]  ;;  %v7389_v10 = vld [vmem:[%s26586_s25 + $0xab8] sm:$0x77] }
 0x68e   :  { %9555 = vmatpush1.bf16.msra.mxu1 %v20481_v56  ;;  %v24403_v56 = vpop.permute.xlu0 %9854 }
 0x68f   :  { %9641 = vmatpush1.bf16.msra.mxu0 %v20484_v11  ;;  %9556 = vmatprep.subr.bf16.mxu1 %v20489_v15  ;;  %v20553_v11 = vld [vmem:[%s26586_s25 + $0xa48] ss:$52 sps:$4 sm:$0xff]   ;;  %v20556_v15 = vld [vmem:[%s26586_s25 + $0xa50] ss:$52 sps:$4 sm:$0xff]  }
 0x690   :  { %9642 = vmatprep.subr.bf16.mxu0 %v20492_v21  ;;  %v17140_v21 = vcombine.high %v7388_v7, %v7388_v7 }
 0x692   :  { %9557 = vmatpush1.bf16.msra.mxu1 %v20487_v33  ;;  %v17139_v33 = vcombine.low %v7388_v7, %v7388_v7  ;;  %v20583_v7 = vld [vmem:[%s26586_s25 + $0x6b0] ss:$52 sps:$4 sm:$0xff]  }
 0x693   :  { %9643 = vmatpush1.bf16.msra.mxu0 %v20490_v60  ;;  %9558 = vmatprep.subr.bf16.mxu1 %v20495_v50  ;;  %v17142_v60 = vcombine.high %v7389_v10, %v7389_v10  ;;  %v17141_v50 = vcombine.low %v7389_v10, %v7389_v10  ;;  %v20584_v10 = vld [vmem:[%s26586_s25 + $0x718] ss:$52 sps:$4 sm:$0xff]  }
 0x694   :  { %9644 = vmatprep.subr.bf16.mxu0 %v20498_v19  ;;  %v9853_v19 = vpop.permute.xlu1 %9852 }
 0x696   :  { %9559 = vmatpush1.bf16.msra.mxu1 %v20493_v57  ;;  %v9859_v57 = vpop.permute.xlu0 %9858 }
 0x697   :  { %9645 = vmatpush1.bf16.msra.mxu0 %v20496_v13  ;;  %9571 = vmatprep.subr.bf16.mxu1 %v20501_v23  ;;  %v9170_v13 = vsel %vm9144_vm14, %v17139_v33, 0  ;;  %v20563_v23 = vld [vmem:[%s26586_s25 + $0x370] ss:$52 sps:$4 sm:$0xff]  }
 0x698   :  { %9657 = vmatprep.subr.bf16.mxu0 %v20504_v17 }
 0x699   :  { %9561 = vmatmul.mubr.bf16.vlgmr.msra.gmra.mrb[44].mxu1 %v23609_v27 }
 0x69a   :  { %9647 = vmatmul.mubr.bf16.vlgmr.msra.gmra.mrb[40].mxu0 %v23609_v27  ;;  %9572 = vmatpush1.bf16.msra.mxu1 %v20499_v24 }
 0x69b   :  { %17153 = vmatprep.mubr.msk.bf16.mxu1 %vm9140_vm13, %v23643_v47  ;;  %9658 = vmatpush1.bf16.msra.mxu0 %v20502_v39  ;;  %v9176_v39 = vsel %vm9144_vm14, %v17141_v50, 0 }
 0x69c   :  { %17155 = vmatprep.mubr.msk.bf16.mxu0 %vm9140_vm13, %v23643_v47  ;;  %9573 = vmatprep.subr.bf16.mxu1 %v20507_v22 }
 0x69d   :  { %9659 = vmatprep.subr.bf16.mxu0 %v20510_v14 }
 0x69e   :  { %9574 = vmatpush1.bf16.msra.mxu1 %v20505_v26 }
 0x69f   :  { %9660 = vmatpush1.bf16.msra.mxu0 %v20508_v51  ;;  %9575 = vmatprep.subr.bf16.mxu1 %v20513_v58  ;;  %v20564_v58 = vld [vmem:[%s26586_s25 + $0x30] ss:$52 sps:$4 sm:$0xff]  }
 0x6a0   :  { %9661 = vmatprep.subr.bf16.mxu0 %v20516_v25 }
 0x6a2   :  { %9576 = vmatpush1.bf16.msra.mxu1 %v20511_v29 }
 0x6a3   :  { %9662 = vmatpush1.bf16.msra.mxu0 %v20514_v20  ;;  %9577 = vmatprep.subr.bf16.mxu1 %v20519_v62  ;;  %v9867_v20 = vsel %vm149_vm0, %v9853_v19, %v24403_v56  ;;  %v9861_v62 = vpop.permute.xlu1 %9860 }
 0x6a4   :  { %9663 = vmatprep.subr.bf16.mxu0 %v20522_v28  ;;  %v9863_v28 = vpop.permute.xlu0 %9862 }
 0x6a6   :  { %9578 = vmatpush1.bf16.msra.mxu1 %v20517_v32  ;;  %v20565_v32 = vld [vmem:[%s26586_s25 + $0x3d8] ss:$52 sps:$4 sm:$0xff]  }
 0x6a7   :  { %9664 = vmatpush1.bf16.msra.mxu0 %v20520_v16  ;;  %9579 = vmatprep.subr.bf16.mxu1 %v20525_v36  ;;  %v9866_v16 = vsel %vm149_vm0, %v9851_v5, %v9853_v19  ;;  %v20566_v36 = vld [vmem:[%s26586_s25 + $0x98] ss:$52 sps:$4 sm:$0xff]   ;;  %v20581_v5 = vld [vmem:[%s26586_s25 + $0x308] ss:$52 sps:$4 sm:$0xff]  }
 0x6a8   :  { %9665 = vmatprep.subr.bf16.mxu0 %v20528_v37  ;;  %v9869_v37 = vsel %vm149_vm0, %v9859_v57, %v9861_v62  ;;  %v20595_v19 = vld [vmem:[%s26547_s5 + $0x8] sm:$0xff]  }
 0x6aa   :  { %9580 = vmatpush1.bf16.msra.mxu1 %v20523_v38  ;;  %v9870_v38 = vsel %vm149_vm0, %v9861_v62, %v9863_v28 }
 0x6ab   :  { %9666 = vmatpush1.bf16.msra.mxu0 %v20526_v40  ;;  %9581 = vmatprep.subr.bf16.mxu1 %v20531_v34  ;;  %v20567_v40 = vld [vmem:[%s26586_s25 + $0x440] ss:$52 sps:$4 sm:$0xff]   ;;  %v9889_v34 = vsel %vm6909_vm11, %v9869_v37, 0 }
 0x6ac   :  { %9667 = vmatprep.subr.bf16.mxu0 %v20534_v43  ;;  %v20568_v43 = vld [vmem:[%s26547_s5 + $0x1c] sm:$0xff]  }
 0x6ae   :  { %9582 = vmatpush1.bf16.msra.mxu1 %v20529_v44  ;;  %v9857_v44 = vpop.permute.xlu1 %9856 }
 0x6af   :  { %9668 = vmatpush1.bf16.msra.mxu0 %v20532_v46  ;;  %9583 = vmatprep.subr.bf16.mxu1 %v20537_v8  ;;  %v20570_v46 = vld [vmem:[%s26586_s25 + $0x4a8] ss:$52 sps:$4 sm:$0xff]   ;;  %v9865_v8 = vpop.permute.xlu0 %9864 }
 0x6b0   :  { %9669 = vmatprep.subr.bf16.mxu0 %v20540_v42  ;;  %v9868_v42 = vsel %vm149_vm0, %v24403_v56, %v9857_v44  ;;  %v20585_v56 = vld [vmem:[%s26586_s25 + $0x780] ss:$52 sps:$4 sm:$0xff]  }
 0x6b2   :  { %9584 = vmatpush1.bf16.msra.mxu1 %v20535_v54  ;;  %v20571_v54 = vld [vmem:[%s26586_s25 + $0x168] ss:$52 sps:$4 sm:$0xff]   ;;  %v10243_v50 = vpop.permute.xlu1 %10242 }
 0x6b3   :  { %9670 = vmatpush1.bf16.msra.mxu0 %v20538_v55  ;;  %9585 = vmatprep.subr.bf16.mxu1 %v20543_v59  ;;  %v9871_v55 = vsel %vm149_vm0, %v9863_v28, %v9865_v8  ;;  %v20572_v59 = vld [vmem:[%s26586_s25 + $0x510] ss:$52 sps:$4 sm:$0xff]  }
 0x6b4   :  { %9671 = vmatprep.subr.bf16.mxu0 %v20546_v52  ;;  %v9895_v52 = vsel %vm6909_vm11, %v9871_v55, 0 }
 0x6b6   :  { %9586 = vmatpush1.bf16.msra.mxu1 %v20541_v12  ;;  %v20573_v12 = vld [vmem:[%s26547_s5 + $0x24] sm:$0xff]  }
 0x6b7   :  { %9672 = vmatpush1.bf16.msra.mxu0 %v20544_v61  ;;  %9587 = vmatprep.subr.bf16.mxu1 %v20549_v1  ;;  %v20574_v61 = vld [vmem:[%s26586_s25 + $0x1d0] ss:$52 sps:$4 sm:$0xff]   ;;  %v20575_v1 = vld [vmem:[%s26586_s25 + $0x578] ss:$52 sps:$4 sm:$0xff]  }
 0x6b8   :  { %9673 = vmatprep.subr.bf16.mxu0 %v20552_v53  ;;  %v20576_v53 = vld [vmem:[%s26586_s25 + $0x238] ss:$52 sps:$4 sm:$0xff]  }
 0x6ba   :  { %9588 = vmatpush1.bf16.msra.mxu1 %v20547_v49  ;;  %v20577_v49 = vld [vmem:[%s26586_s25 + $0x5e0] ss:$52 sps:$4 sm:$0xff]  }
 0x6bb   :  { %9674 = vmatpush1.bf16.msra.mxu0 %v20550_v2  ;;  %9589 = vmatprep.subr.bf16.mxu1 %v20555_v9  ;;  %v20578_v2 = vld [vmem:[%s26547_s5 + $0x2c] sm:$0xff]   ;;  %v20580_v9 = vld [vmem:[%s26586_s25 + $0x648] ss:$52 sps:$4 sm:$0xff]  }
 0x6bc   :  { %9675 = vmatprep.subr.bf16.mxu0 %v20558_v41  ;;  %v20582_v41 = vld [vmem:[%s26547_s5 + $0x34] ss:$0 sps:$4 sm:$0xff]  }
 0x6be   :  { %9590 = vmatpush1.bf16.msra.mxu1 %v20553_v11  ;;  %v20592_v11 = vld [vmem:[%s26586_s25 + $0xa58] ss:$52 sps:$4 sm:$0xff]  }
 0x6bf   :  { %9676 = vmatpush1.bf16.msra.mxu0 %v20556_v15  ;;  %17152 = vmatprep.subr.msk.bf16.mxu1 %vm9144_vm14, %v17140_v21  ;;  %v20594_v15 = vld [vmem:[%s26586_s25 + $0xac0] ss:$0 sps:$4 sm:$0x77]  }
 0x6c0   :  { %v9261_v17 = vpop.f32.mrb[36].mxu1  ;;  %v9347_v24 = vpop.f32.mrb[32].mxu0  ;;  %17154 = vmatprep.subr.msk.bf16.mxu0 %vm9144_vm14, %v17142_v60  ;;  %v20593_v21 = vld [vmem:[%s26547_s5] sm:$0xff]   ;;  %v9182_v33 = vsel %vm9144_vm14, %v20594_v15, 0  ;;  %vm15268_vm14 = vcmask 1046528  }
 0x6c1   :  { %9782 = vst [vmem:[%s26548_s22] sm:$0xff] %v9261_v17  ;;  %9784 = vst [vmem:[%s26548_s22 + $0x10] sm:$0xff] %v9347_v24  ;;  %v9263_v22 = vpop.f32.mrb[37].mxu1  ;;  %v9349_v14 = vpop.f32.mrb[33].mxu0 }
 0x6c2   :  { %9783 = vst [vmem:[%s26548_s22 + $0x8] sm:$0xff] %v9263_v22  ;;  %9785 = vst [vmem:[%s26548_s22 + $0x18] sm:$0xff] %v9349_v14  ;;  %v9265_v26 = vpop.f32.mrb[38].mxu1  ;;  %v9351_v51 = vpop.f32.mrb[34].mxu0  ;;  %9592 = vmatpush1.bf16.msra.mxu1 %v9170_v13 }
 0x6c3   :  { %9796 = vst [vmem:[%s26548_s22 + $0x68] sm:$0xff] %v9265_v26  ;;  %9798 = vst [vmem:[%s26548_s22 + $0x78] sm:$0xff] %v9351_v51  ;;  %9678 = vmatpush1.bf16.msra.mxu0 %v9176_v39  ;;  %v9267_v25 = vpop.f32.mrb[39].mxu1  ;;  %v9353_v29 = vpop.f32.mrb[35].mxu0  ;;  %17798 = vmatprep.subr.bf16.mxu1 %v20563_v23 }
 0x6c4   :  { %9797 = vst [vmem:[%s26548_s22 + $0x70] sm:$0xff] %v9267_v25  ;;  %9799 = vst [vmem:[%s26548_s22 + $0x80] sm:$0xff] %v9353_v29  ;;  %9900 = vmatprep.subr.bf16.mxu0 %v9867_v20  ;;  %v10245_v60 = vpop.permute.xlu0 %10244 }
 0x6c5   :  { %9604 = vmatmul.mubr.bf16.vlgmr.msra.gmra.mrb[44].mxu1 %v23641_v35  ;;  %v10257_v57 = vsel %vm915_vm3, %v10243_v50, %v10245_v60 }
 0x6c6   :  { %9690 = vmatmul.mubr.bf16.vlgmr.msra.gmra.mrb[40].mxu0 %v23641_v35  ;;  %17799 = vmatpush3.bf16.msra.mxu1 %v20564_v58 }
 0x6c7   :  { %9732 = vmatprep.mubr.bf16.mxu1 %v23611_v30  ;;  %9901 = vmatpush1.bf16.msra.mxu0 %v9866_v16  ;;  %v20569_v30 = vld [vmem:[%s26586_s25 + $0x100] ss:$52 sps:$4 sm:$0xff]   ;;  %v20598_v16 = vld [vmem:[%s26547_s5 + $0x38] sm:$0xff]  }
 0x6c8   :  { %17168 = vmatprep.subr.msk.bf16.mxu0 %vm6909_vm11, %v9870_v38  ;;  %17800 = vmatprep.subr.bf16.mxu1 %v20565_v32 }
 0x6c9   :  { %9932 = vmatprep.mubr.bf16.mxu0 %v20847_v3 }
 0x6ca   :  { %17801 = vmatpush3.bf16.msra.mxu1 %v20566_v36 }
 0x6cb   :  { %9903 = vmatpush1.bf16.msra.mxu0 %v9889_v34  ;;  %17802 = vmatprep.subr.bf16.mxu1 %v20567_v40 }
 0x6cc   :  { %9971 = vmatprep.subr.bf16.mxu0 %v9857_v44  ;;  %v20600_v44 = vld [vmem:[%s26547_s5 + $0x48] sm:$0xff]  }
 0x6ce   :  { %17169 = vmatmul.mubr.msk.bf16.vlgmr.msra.gmra.mrb[44].mxu0 %vm6905_vm12, %v20568_v43  ;;  %17803 = vmatpush3.bf16.msra.mxu1 %v20569_v30 }
 0x6cf   :  { %9972 = vmatpush1.bf16.msra.mxu0 %v9868_v42  ;;  %17804 = vmatprep.subr.bf16.mxu1 %v20570_v46  ;;  %v20601_v46 = vld [vmem:[%s26547_s5 + $0x50] ss:$0 sps:$4 sm:$0xff]  }
 0x6d0   :  { %17173 = vmatprep.subr.msk.bf16.mxu0 %vm6909_vm11, %v9865_v8  ;;  %9942 = vmatprep.mubr.bf16.mxu0 %v20847_v3 }
 0x6d2   :  { %17805 = vmatpush3.bf16.msra.mxu1 %v20571_v54 }
 0x6d3   :  { %9974 = vmatpush1.bf16.msra.mxu0 %v9895_v52  ;;  %17806 = vmatprep.subr.bf16.mxu1 %v20572_v59 }
 0x6d4   :  { %10072 = vmatprep.subr.bf16.mxu0 %v23229_v45  ;;  %v20579_v45 = vld [vmem:[%s26586_s25 + $0x2a0] ss:$52 sps:$4 sm:$0xff]  }
 0x6d6   :  { %17170 = vmatmul.mubr.msk.bf16.gmra.mrb[48].mxu0 %vm6905_vm12, %v20573_v12  ;;  %17807 = vmatpush3.bf16.msra.mxu1 %v20574_v61 }
 0x6d7   :  { %17808 = vmatprep.subr.bf16.mxu1 %v20575_v1  ;;  %9952 = vmatprep.mubr.bf16.mxu0 %v20847_v3 }
 0x6da   :  { %17809 = vmatpush3.bf16.msra.mxu1 %v20576_v53 }
 0x6db   :  { %17810 = vmatprep.subr.bf16.mxu1 %v20577_v49  ;;  %v20602_v49 = vld [vmem:[%s26547_s5 + $0x54] sm:$0xff]  }
 0x6de   :  { %17171 = vmatmul.mubr.msk.bf16.gmra.mrb[52].mxu0 %vm6905_vm12, %v20578_v2  ;;  %17811 = vmatpush3.bf16.msra.mxu1 %v20579_v45 }
 0x6df   :  { %17812 = vmatprep.subr.bf16.mxu1 %v20580_v9  ;;  %9962 = vmatprep.mubr.bf16.mxu0 %v20847_v3 }
 0x6e2   :  { %17813 = vmatpush3.bf16.msra.mxu1 %v20581_v5 }
 0x6e3   :  { %9741 = vmatprep.subr.bf16.mxu1 %v20847_v3 }
 0x6e5   :  { %9733 = vmatmul.mubr.bf16.vlgmr.msra.gmra.mrb[48].mxu1 %v23609_v27  ;;  %v20586_v27 = vld [vmem:[%s26586_s25 + $0x7e8] ss:$52 sps:$4 sm:$0xff]  }
 0x6e6   :  { %17172 = vmatmul.mubr.msk.bf16.gmra.mrb[56].mxu0 %vm6905_vm12, %v20582_v41  ;;  %9742 = vmatpush1.bf16.msra.mxu1 %v20583_v7  ;;  %v20603_v7 = vld [vmem:[%s26547_s5 + $0x5c] sm:$0xff]  }
 0x6e7   :  { %17156 = vmatprep.mubr.msk.bf16.mxu1 %vm9140_vm13, %v23643_v47  ;;  %9743 = vmatprep.subr.bf16.mxu1 %v20847_v3  ;;  %v20587_v47 = vld [vmem:[%s26586_s25 + $0x850] ss:$52 sps:$4 sm:$0xff]   ;;  %vm14499_vm13 = vcmask 900096  }
 0x6e8   :  { %10003 = vmatprep.mubr.bf16.mxu0 %v20847_v3 }
 0x6ea   :  { %9744 = vmatpush1.bf16.msra.mxu1 %v20584_v10 }
 0x6eb   :  { %9745 = vmatprep.subr.bf16.mxu1 %v20847_v3 }
 0x6ee   :  { %17174 = vmatmul.mubr.msk.bf16.vlgmr.msra.gmra.mrb[60].mxu0 %vm6905_vm12, %v20568_v43  ;;  %9746 = vmatpush1.bf16.msra.mxu1 %v20585_v56  ;;  %v20599_v43 = vld [vmem:[%s26547_s5 + $0x40] sm:$0xff]  }
 0x6ef   :  { %10073 = vmatpush1.bf16.msra.mxu0 %v23225_v31  ;;  %9747 = vmatprep.subr.bf16.mxu1 %v20847_v3  ;;  %v20588_v31 = vld [vmem:[%s26586_s25 + $0x8b8] ss:$52 sps:$4 sm:$0xff]  }
 0x6f0   :  { %17182 = vmatprep.subr.msk.bf16.mxu0 %vm6909_vm11, %v23245_v18  ;;  %10013 = vmatprep.mubr.bf16.mxu0 %v20847_v3  ;;  %v20589_v18 = vld [vmem:[%s26586_s25 + $0x920] ss:$52 sps:$4 sm:$0xff]  }
 0x6f2   :  { %9748 = vmatpush1.bf16.msra.mxu1 %v20586_v27 }
 0x6f3   :  { %10075 = vmatpush1.bf16.msra.mxu0 %v23253_v0  ;;  %9749 = vmatprep.subr.bf16.mxu1 %v20847_v3  ;;  %v20591_v0 = vld [vmem:[%s26586_s25 + $0x9f0] ss:$52 sps:$4 sm:$0xff]  }
 0x6f4   :  { %10143 = vmatprep.subr.bf16.mxu0 %v23231_v48  ;;  %v20590_v48 = vld [vmem:[%s26586_s25 + $0x988] ss:$52 sps:$4 sm:$0xff]  }
 0x6f6   :  { %17175 = vmatmul.mubr.msk.bf16.gmra.mrb[64].mxu0 %vm6905_vm12, %v20573_v12  ;;  %9750 = vmatpush1.bf16.msra.mxu1 %v20587_v47 }
 0x6f7   :  { %9751 = vmatprep.subr.bf16.mxu1 %v20847_v3  ;;  %10023 = vmatprep.mubr.bf16.mxu0 %v20847_v3 }
 0x6fa   :  { %9752 = vmatpush1.bf16.msra.mxu1 %v20588_v31 }
 0x6fb   :  { %9753 = vmatprep.subr.bf16.mxu1 %v20847_v3 }
 0x6fe   :  { %17176 = vmatmul.mubr.msk.bf16.gmra.mrb[68].mxu0 %vm6905_vm12, %v20578_v2  ;;  %9754 = vmatpush1.bf16.msra.mxu1 %v20589_v18 }
 0x6ff   :  { %9755 = vmatprep.subr.bf16.mxu1 %v20847_v3  ;;  %10033 = vmatprep.mubr.bf16.mxu0 %v20847_v3 }
 0x702   :  { %9756 = vmatpush1.bf16.msra.mxu1 %v20590_v48  ;;  %v20604_v48 = vld [vmem:[%s26547_s5 + $0x64] sm:$0xff]  }
 0x703   :  { %9757 = vmatprep.subr.bf16.mxu1 %v20847_v3 }
 0x706   :  { %17177 = vmatmul.mubr.msk.bf16.gmra.mrb[72].mxu0 %vm6905_vm12, %v20582_v41  ;;  %9758 = vmatpush1.bf16.msra.mxu1 %v20591_v0 }
 0x707   :  { %9759 = vmatprep.subr.bf16.mxu1 %v20847_v3  ;;  %10104 = vmatprep.mubr.bf16.mxu0 %v20847_v3 }
 0x70a   :  { %9760 = vmatpush1.bf16.msra.mxu1 %v20592_v11 }
 0x70b   :  { %9761 = vmatprep.subr.bf16.mxu1 %v20847_v3 }
 0x70e   :  { %17183 = vmatmul.mubr.msk.bf16.vlgmr.msra.gmra.mrb[44].mxu0 %vm6905_vm12, %v20593_v21  ;;  %9762 = vmatpush1.bf16.msra.mxu1 %v9182_v33 }
 0x70f   :  { %10144 = vmatpush1.bf16.msra.mxu0 %v23227_v4  ;;  %10114 = vmatprep.mubr.bf16.mxu0 %v20847_v3  ;;  %v20596_v4 = vld [vmem:[%s26547_s5 + $0x10] sm:$0xff]  }
 0x710   :  { %17187 = vmatprep.subr.msk.bf16.mxu0 %vm6909_vm11, %v23247_v63  ;;  %v20597_v63 = vld [vmem:[%s26547_s5 + $0x18] ss:$0 sps:$4 sm:$0xff]  }
 0x711   :  { %9774 = vmatmul.mubr.bf16.vlgmr.msra.gmra.mrb[52].mxu1 %v23641_v35  ;;  %v10249_v35 = vpop.permute.xlu0 %10248 }
 0x713   :  { %10146 = vmatpush1.bf16.msra.mxu0 %v23279_v6  ;;  %v10241_v6 = vpop.permute.xlu1 %10240 }
 0x714   :  { %10290 = vmatprep.subr.bf16.mxu0 %v10257_v57  ;;  %v10256_v22 = vsel %vm915_vm3, %v10241_v6, %v10243_v50 }
 0x715   :  { %v10253_v23 = vpop.permute.xlu0 %10252 }
 0x716   :  { %17184 = vmatmul.mubr.msk.bf16.gmra.mrb[48].mxu0 %vm6905_vm12, %v20595_v19 }
 0x717   :  { %10124 = vmatprep.mubr.bf16.mxu0 %v20847_v3  ;;  %v10251_v13 = vpop.permute.xlu1 %10250 }
 0x718   :  { %v10259_v51 = vsel %vm915_vm3, %v10249_v35, %v10251_v13  ;;  %v10260_v25 = vsel %vm915_vm3, %v10251_v13, %v10253_v23 }
 0x719   :  { %v10279_v62 = vsel %vm6909_vm11, %v10259_v51, 0  ;;  %v10255_v32 = vpop.permute.xlu0 %10254 }
 0x71a   :  { %v10261_v37 = vsel %vm915_vm3, %v10253_v23, %v10255_v32 }
 0x71b   :  { %v10247_v28 = vpop.permute.xlu1 %10246  ;;  %v10285_v34 = vsel %vm6909_vm11, %v10261_v37, 0 }
 0x71c   :  { %v10258_v36 = vsel %vm915_vm3, %v10245_v60, %v10247_v28 }
 0x71d   :  { %v10491_v38 = vpop.permute.xlu0 %10490 }
 0x71e   :  { %17185 = vmatmul.mubr.msk.bf16.gmra.mrb[52].mxu0 %vm6905_vm12, %v20596_v4 }
 0x71f   :  { %10134 = vmatprep.mubr.bf16.mxu0 %v20847_v3  ;;  %v10489_v40 = vpop.permute.xlu1 %10488 }
 0x720   :  { %v10504_v30 = vsel %vm10502_vm15, %v10489_v40, %v10491_v38 }
 0x721   :  { %v10495_v42 = vpop.permute.xlu0 %10494 }
 0x723   :  { %v10487_v8 = vpop.permute.xlu1 %10486 }
 0x724   :  { %v10503_v59 = vsel %vm10502_vm15, %v10487_v8, %v10489_v40 }
 0x725   :  { %v10499_v55 = vpop.permute.xlu0 %10498 }
 0x726   :  { %17186 = vmatmul.mubr.msk.bf16.gmra.mrb[56].mxu0 %vm6905_vm12, %v20597_v63 }
 0x727   :  { %10175 = vmatprep.mubr.bf16.mxu0 %v20847_v3  ;;  %v10497_v54 = vpop.permute.xlu1 %10496 }
 0x728   :  { %v10506_v52 = vsel %vm10502_vm15, %v10495_v42, %v10497_v54  ;;  %v10507_v12 = vsel %vm10502_vm15, %v10497_v54, %v10499_v55 }
 0x729   :  { %v10526_v61 = vsel %vm6909_vm11, %v10506_v52, 0  ;;  %v10501_v53 = vpop.permute.xlu0 %10500 }
 0x72a   :  { %v10508_v45 = vsel %vm10502_vm15, %v10499_v55, %v10501_v53 }
 0x72b   :  { %v10493_v1 = vpop.permute.xlu1 %10492  ;;  %v10532_v41 = vsel %vm6909_vm11, %v10508_v45, 0 }
 0x72c   :  { %v9433_v17 = vpop.f32.mrb[40].mxu1  ;;  %v10505_v2 = vsel %vm10502_vm15, %v10491_v38, %v10493_v1  ;;  %vm15264_vm15 = vcmask 506880  }
 0x72d   :  { %9786 = vst [vmem:[%s26548_s22 + $0x20] sm:$0xff] %v9433_v17  ;;  %v9519_v24 = vpop.f32.mrb[36].mxu0  ;;  %v9435_v39 = vpop.f32.mrb[41].mxu1 }
 0x72e   :  { %9788 = vst [vmem:[%s26548_s22 + $0x30] sm:$0xff] %v9519_v24  ;;  %9787 = vst [vmem:[%s26548_s22 + $0x28] sm:$0xff] %v9435_v39  ;;  %v9521_v14 = vpop.f32.mrb[37].mxu0  ;;  %17188 = vmatmul.mubr.msk.bf16.vlgmr.msra.gmra.mrb[60].mxu0 %vm6905_vm12, %v20593_v21  ;;  %v9437_v26 = vpop.f32.mrb[42].mxu1  ;;  %v20605_v21 = vld [vmem:[%s26547_s5 + $0x6c] ss:$0 sps:$4 sm:$0xff]  }
 0x72f   :  { %9789 = vst [vmem:[%s26548_s22 + $0x38] sm:$0xff] %v9521_v14  ;;  %10291 = vmatpush1.bf16.msra.mxu0 %v10256_v22  ;;  %9800 = vst [vmem:[%s26548_s22 + $0x88] sm:$0xff] %v9437_v26  ;;  %v9523_v58 = vpop.f32.mrb[38].mxu0  ;;  %v9439_v29 = vpop.f32.mrb[43].mxu1  ;;  %10185 = vmatprep.mubr.bf16.mxu0 %v20847_v3  ;;  %v20606_v26 = vld [vmem:[%s26547_s5 + $0x70] sm:$0xff]  }
 0x730   :  { %9802 = vst [vmem:[%s26548_s22 + $0x98] sm:$0xff] %v9523_v58  ;;  %17203 = vmatprep.subr.msk.bf16.mxu0 %vm6909_vm11, %v10260_v25  ;;  %9801 = vst [vmem:[%s26548_s22 + $0x90] sm:$0xff] %v9439_v29  ;;  %v9525_v20 = vpop.f32.mrb[39].mxu0  ;;  %v24693_v9 = vpop.permute.xlu0 %10737 }
 0x731   :  { %9803 = vst [vmem:[%s26548_s22 + $0xa0] sm:$0xff] %v9525_v20  ;;  %v10736_v5 = vpop.permute.xlu1 %10735 }
 0x732   :  { %v10751_v10 = vsel %vm10749_vm4, %v10736_v5, %v24693_v9 }
 0x733   :  { %10293 = vmatpush1.bf16.msra.mxu0 %v10279_v62  ;;  %v20607_v62 = vld [vmem:[%s26547_s5 + $0x78] sm:$0xff]  }
 0x734   :  { %10361 = vmatprep.subr.bf16.mxu0 %v10247_v28  ;;  %v10742_v60 = vpop.permute.xlu0 %10741 }
 0x735   :  { %v10734_v33 = vpop.permute.xlu1 %10733 }
 0x736   :  { %17189 = vmatmul.mubr.msk.bf16.gmra.mrb[64].mxu0 %vm6905_vm12, %v20595_v19  ;;  %v10750_v57 = vsel %vm10749_vm4, %v10734_v33, %v10736_v5 }
 0x737   :  { %10195 = vmatprep.mubr.bf16.mxu0 %v20847_v3 }
 0x738   :  { %v10746_v19 = vpop.permute.xlu0 %10745 }
 0x739   :  { %v10744_v50 = vpop.permute.xlu1 %10743 }
 0x73c   :  { %v10748_v14 = vpop.permute.xlu0 %10747 }
 0x73d   :  { %v10740_v35 = vpop.permute.xlu1 %10739  ;;  %v10755_v58 = vsel %vm10749_vm4, %v10746_v19, %v10748_v14 }
 0x73e   :  { %17190 = vmatmul.mubr.msk.bf16.gmra.mrb[68].mxu0 %vm6905_vm12, %v20596_v4  ;;  %v10753_v4 = vsel %vm10749_vm4, %v10742_v60, %v10744_v50  ;;  %v10752_v51 = vsel %vm10749_vm4, %v24693_v9, %v10740_v35  ;;  %v10779_v20 = vsel %vm6909_vm11, %v10755_v58, 0  ;;  %v20611_v9 = vld [vmem:[%s26547_s5 + $0x94] sm:$0xff]   ;;  %v20626_v58 = vld [vmem:[%s26549_s8] ss:$8 sps:$4 sm:$0xff]  }
 0x73f   :  { %10205 = vmatprep.mubr.bf16.mxu0 %v20847_v3  ;;  %v10773_v6 = vsel %vm6909_vm11, %v10753_v4, 0  ;;  %v20615_v4 = vld [vmem:[%s26547_s5 + $0xb0] sm:$0xff]  }
 0x740   :  { %v10985_v25 = vpop.permute.xlu0 %10984 }
 0x741   :  { %v10983_v29 = vpop.permute.xlu1 %10982 }
 0x742   :  { %v10998_v28 = vsel %vm10996_vm5, %v10983_v29, %v10985_v25 }
 0x745   :  { %v10981_v37 = vpop.permute.xlu1 %10980 }
 0x746   :  { %17191 = vmatmul.mubr.msk.bf16.gmra.mrb[72].mxu0 %vm6905_vm12, %v20597_v63  ;;  %v10754_v63 = vsel %vm10749_vm4, %v10744_v50, %v10746_v19  ;;  %v10997_v42 = vsel %vm10996_vm5, %v10981_v37, %v10983_v29  ;;  %v20631_v29 = vld [vmem:[%s26549_s8 + $0x14] ss:$8 sps:$4 sm:$0xff]   ;;  %vm16223_vm4 = vcmask 15360  }
 0x747   :  { %10322 = vmatprep.mubr.bf16.mxu0 %v20847_v3 }
 0x74e   :  { %17204 = vmatmul.mubr.msk.bf16.vlgmr.msra.gmra.mrb[44].mxu0 %vm6905_vm12, %v20598_v16 }
 0x74f   :  { %10362 = vmatpush1.bf16.msra.mxu0 %v10258_v36  ;;  %10332 = vmatprep.mubr.bf16.mxu0 %v20847_v3 }
 0x750   :  { %17208 = vmatprep.subr.msk.bf16.mxu0 %vm6909_vm11, %v10255_v32  ;;  %v20608_v32 = vld [vmem:[%s26547_s5 + $0x80] sm:$0xff]  }
 0x753   :  { %10364 = vmatpush1.bf16.msra.mxu0 %v10285_v34  ;;  %v10989_v34 = vpop.permute.xlu0 %10988 }
 0x754   :  { %10537 = vmatprep.subr.bf16.mxu0 %v10504_v30 }
 0x756   :  { %17205 = vmatmul.mubr.msk.bf16.gmra.mrb[48].mxu0 %vm6905_vm12, %v20599_v43 }
 0x757   :  { %10342 = vmatprep.mubr.bf16.mxu0 %v20847_v3  ;;  %v10993_v8 = vpop.permute.xlu0 %10992 }
 0x75e   :  { %17206 = vmatmul.mubr.msk.bf16.gmra.mrb[52].mxu0 %vm6905_vm12, %v20600_v44 }
 0x75f   :  { %10352 = vmatprep.mubr.bf16.mxu0 %v20847_v3 }
 0x766   :  { %17207 = vmatmul.mubr.msk.bf16.gmra.mrb[56].mxu0 %vm6905_vm12, %v20601_v46 }
 0x767   :  { %10393 = vmatprep.mubr.bf16.mxu0 %v20847_v3 }
 0x76e   :  { %17209 = vmatmul.mubr.msk.bf16.vlgmr.msra.gmra.mrb[60].mxu0 %vm6905_vm12, %v20598_v16  ;;  %v20609_v16 = vld [vmem:[%s26547_s5 + $0x88] ss:$0 sps:$4 sm:$0xff]  }
 0x76f   :  { %10538 = vmatpush1.bf16.msra.mxu0 %v10503_v59  ;;  %10403 = vmatprep.mubr.bf16.mxu0 %v20847_v3 }
 0x770   :  { %17224 = vmatprep.subr.msk.bf16.mxu0 %vm6909_vm11, %v10507_v12  ;;  %v10995_v12 = vpop.permute.xlu0 %10994 }
 0x773   :  { %10540 = vmatpush1.bf16.msra.mxu0 %v10526_v61  ;;  %v20610_v61 = vld [vmem:[%s26547_s5 + $0x8c] sm:$0xff]  }
 0x774   :  { %10608 = vmatprep.subr.bf16.mxu0 %v10493_v1 }
 0x776   :  { %17210 = vmatmul.mubr.msk.bf16.gmra.mrb[64].mxu0 %vm6905_vm12, %v20599_v43 }
 0x777   :  { %10413 = vmatprep.mubr.bf16.mxu0 %v20847_v3 }
 0x77e   :  { %17211 = vmatmul.mubr.msk.bf16.gmra.mrb[68].mxu0 %vm6905_vm12, %v20600_v44 }
 0x77f   :  { %10423 = vmatprep.mubr.bf16.mxu0 %v20847_v3 }
 0x786   :  { %17212 = vmatmul.mubr.msk.bf16.gmra.mrb[72].mxu0 %vm6905_vm12, %v20601_v46  ;;  %v10991_v46 = vpop.permute.xlu1 %10990 }
 0x787   :  { %10569 = vmatprep.mubr.bf16.mxu0 %v20847_v3  ;;  %v11000_v54 = vsel %vm10996_vm5, %v10989_v34, %v10991_v46  ;;  %v11001_v55 = vsel %vm10996_vm5, %v10991_v46, %v10993_v8  ;;  %v20635_v46 = vld [vmem:[%s26549_s8 + $0x30] ss:$8 sps:$4 sm:$0xff]  }
 0x788   :  { %v11020_v59 = vsel %vm6909_vm11, %v11000_v54, 0  ;;  %v20620_v54 = vld [vmem:[%s26547_s5 + $0xd4] sm:$0xff]  }
 0x78a   :  { %v10987_v52 = vpop.permute.xlu1 %10986 }
 0x78b   :  { %v10999_v1 = vsel %vm10996_vm5, %v10985_v25, %v10987_v52  ;;  %v20628_v25 = vld [vmem:[%s26549_s8 + $0x4] ss:$8 sps:$4 sm:$0xff]  }
 0x78c   :  { %12437 = vmatprep.subr.bf16.mxu1 %v20628_v25 }
 0x78d   :  { %12438 = vmatpush1.bf16.msra.mxu1 %v20626_v58 }
 0x78e   :  { %17225 = vmatmul.mubr.msk.bf16.vlgmr.msra.gmra.mrb[44].mxu0 %vm6905_vm12, %v20602_v49  ;;  %12439 = vmatprep.subr.bf16.mxu1 %v20631_v29 }
 0x78f   :  { %10609 = vmatpush1.bf16.msra.mxu0 %v10505_v2  ;;  %10579 = vmatprep.mubr.bf16.mxu0 %v20847_v3  ;;  %v11230_v2 = vpop.permute.xlu1 %11229 }
 0x790   :  { %17229 = vmatprep.subr.msk.bf16.mxu0 %vm6909_vm11, %v10501_v53  ;;  %v11002_v53 = vsel %vm10996_vm5, %v10993_v8, %v10995_v12  ;;  %v20640_v8 = vld [vmem:[%s26549_s8 + $0x44] ss:$8 sps:$4 sm:$0xff]  }
 0x791   :  { %v11026_v45 = vsel %vm6909_vm11, %v11002_v53, 0  ;;  %v20647_v53 = vld [vmem:[%s26549_s8 + $0x70] ss:$8 sps:$4 sm:$0xff]  }
 0x793   :  { %10611 = vmatpush1.bf16.msra.mxu0 %v10532_v41  ;;  %v20612_v41 = vld [vmem:[%s26547_s5 + $0x9c] sm:$0xff]  }
 0x794   :  { %10784 = vmatprep.subr.bf16.mxu0 %v10751_v10  ;;  %v11228_v10 = vpop.permute.xlu1 %11227 }
 0x796   :  { %17226 = vmatmul.mubr.msk.bf16.gmra.mrb[48].mxu0 %vm6905_vm12, %v20603_v7 }
 0x797   :  { %10589 = vmatprep.mubr.bf16.mxu0 %v20847_v3 }
 0x798   :  { %v9605_v56 = vpop.f32.mrb[44].mxu1 }
 0x799   :  { %9790 = vst [vmem:[%s26548_s22 + $0x40] sm:$0xff] %v9605_v56  ;;  %v9691_v27 = vpop.f32.mrb[40].mxu0  ;;  %v9607_v47 = vpop.f32.mrb[45].mxu1 }
 0x79a   :  { %9792 = vst [vmem:[%s26548_s22 + $0x50] sm:$0xff] %v9691_v27  ;;  %9791 = vst [vmem:[%s26548_s22 + $0x48] sm:$0xff] %v9607_v47  ;;  %v9693_v31 = vpop.f32.mrb[41].mxu0  ;;  %v9609_v18 = vpop.f32.mrb[46].mxu1 }
 0x79b   :  { %9793 = vst [vmem:[%s26548_s22 + $0x58] sm:$0xff] %v9693_v31  ;;  %9804 = vst [vmem:[%s26548_s22 + $0xa8] sm:$0xff] %v9609_v18  ;;  %v9695_v0 = vpop.f32.mrb[42].mxu0  ;;  %v9611_v11 = vpop.f32.mrb[47].mxu1  ;;  %v11243_v31 = vsel %vm2250_vm6, %v11228_v10, %v11230_v2  ;;  %v20653_v10 = vld [vmem:[%s26549_s8 + $0x90] ss:$8 sps:$4 sm:$0xff]  }
 0x79c   :  { %9806 = vst [vmem:[%s26548_s22 + $0xb8] sm:$0xff] %v9695_v0  ;;  %9805 = vst [vmem:[%s26548_s22 + $0xb0] sm:$0xff] %v9611_v11  ;;  %v9697_v15 = vpop.f32.mrb[43].mxu0  ;;  %v11238_v27 = vpop.permute.xlu1 %11237 }
 0x79d   :  { %9807 = vst [vmem:[%s26548_s22 + $0xc0] sm:$0xff] %v9697_v15 }
 0x79e   :  { %17227 = vmatmul.mubr.msk.bf16.gmra.mrb[52].mxu0 %vm6905_vm12, %v20604_v48 }
 0x79f   :  { %10599 = vmatprep.mubr.bf16.mxu0 %v20847_v3 }
 0x7a0   :  { %v11234_v11 = vpop.permute.xlu1 %11233 }
 0x7a4   :  { %v11476_v19 = vpop.permute.xlu1 %11475 }
 0x7a6   :  { %17228 = vmatmul.mubr.msk.bf16.gmra.mrb[56].mxu0 %vm6905_vm12, %v20605_v21 }
 0x7a7   :  { %10640 = vmatprep.mubr.bf16.mxu0 %v20847_v3 }
 0x7ae   :  { %17230 = vmatmul.mubr.msk.bf16.vlgmr.msra.gmra.mrb[60].mxu0 %vm6905_vm12, %v20602_v49  ;;  %v11232_v49 = vpop.permute.xlu0 %11231 }
 0x7af   :  { %10785 = vmatpush1.bf16.msra.mxu0 %v10750_v57  ;;  %10650 = vmatprep.mubr.bf16.mxu0 %v20847_v3  ;;  %v11244_v5 = vsel %vm2250_vm6, %v11230_v2, %v11232_v49  ;;  %v11245_v33 = vsel %vm2250_vm6, %v11232_v49, %v11234_v11  ;;  %v20652_v49 = vld [vmem:[%s26549_s8 + $0x84] ss:$8 sps:$4 sm:$0xff]  }
 0x7b0   :  { %17245 = vmatprep.subr.msk.bf16.mxu0 %vm6909_vm11, %v10754_v63 }
 0x7b2   :  { %v11236_v56 = vpop.permute.xlu0 %11235 }
 0x7b3   :  { %10787 = vmatpush1.bf16.msra.mxu0 %v10773_v6  ;;  %v11246_v18 = vsel %vm2250_vm6, %v11236_v56, %v11238_v27  ;;  %v20616_v6 = vld [vmem:[%s26547_s5 + $0xb8] sm:$0xff]   ;;  %v20658_v56 = vld [vmem:[%s26549_s8 + $0xa4] ss:$8 sps:$4 sm:$0xff]  }
 0x7b4   :  { %10855 = vmatprep.subr.bf16.mxu0 %v10740_v35  ;;  %v11266_v0 = vsel %vm6909_vm11, %v11246_v18, 0  ;;  %v20617_v35 = vld [vmem:[%s26547_s5 + $0xc0] ss:$0 sps:$4 sm:$0xff]  }
 0x7b5   :  { %v20656_v18 = vld [vmem:[%s26549_s8 + $0xa0] ss:$8 sps:$4 sm:$0xff]  }
 0x7b6   :  { %17231 = vmatmul.mubr.msk.bf16.gmra.mrb[64].mxu0 %vm6905_vm12, %v20603_v7  ;;  %v20613_v7 = vld [vmem:[%s26547_s5 + $0xa4] ss:$0 sps:$4 sm:$0xff]   ;;  %v11240_v47 = vpop.permute.xlu0 %11239 }
 0x7b7   :  { %10660 = vmatprep.mubr.bf16.mxu0 %v20847_v3 }
 0x7b8   :  { %v17814_v13 = vpop.f32.mrb[48].mxu1 }
 0x7b9   :  { %v17815_v23 = vpop.f32.mrb[49].mxu1 }
 0x7ba   :  { %v17816_v17 = vadd.f32 %v17815_v23, %v17814_v13  ;;  %v17817_v24 = vpop.f32.mrb[50].mxu1  ;;  %v11242_v15 = vpop.permute.xlu0 %11241 }
 0x7bb   :  { %v17818_v39 = vpop.f32.mrb[51].mxu1  ;;  %v11248_v60 = vsel %vm2250_vm6, %v11240_v47, %v11242_v15  ;;  %v11474_v13 = vpop.permute.xlu1 %11473 }
 0x7bc   :  { %v17819_v22 = vadd.f32 %v17818_v39, %v17817_v24  ;;  %v11272_v57 = vsel %vm6909_vm11, %v11248_v60, 0  ;;  %v11490_v39 = vsel %vm11489_vm8, %v11474_v13, %v11476_v19  ;;  %v20622_v60 = vld [vmem:[%s26547_s5 + $0xe0] sm:$0xff]   ;;  %v20665_v13 = vld [vmem:[%s26549_s8 + $0xd0] ss:$8 sps:$4 sm:$0xff]  }
 0x7be   :  { %17232 = vmatmul.mubr.msk.bf16.gmra.mrb[68].mxu0 %vm6905_vm12, %v20604_v48  ;;  %v11247_v48 = vsel %vm2250_vm6, %v11238_v27, %v11240_v47  ;;  %v11478_v50 = vpop.permute.xlu0 %11477  ;;  %vm11736_vm6 = vcmask 801792  }
 0x7bf   :  { %10670 = vmatprep.mubr.bf16.mxu0 %v20847_v3  ;;  %v11491_v63 = vsel %vm11489_vm8, %v11476_v19, %v11478_v50 }
 0x7c2   :  { %v11482_v23 = vpop.permute.xlu0 %11481 }
 0x7c6   :  { %17233 = vmatmul.mubr.msk.bf16.gmra.mrb[72].mxu0 %vm6905_vm12, %v20605_v21  ;;  %v20614_v21 = vld [vmem:[%s26547_s5 + $0xa8] sm:$0xff]   ;;  %v11486_v24 = vpop.permute.xlu0 %11485 }
 0x7c7   :  { %10816 = vmatprep.mubr.bf16.mxu0 %v20847_v3 }
 0x7ce   :  { %17246 = vmatmul.mubr.msk.bf16.vlgmr.msra.gmra.mrb[44].mxu0 %vm6905_vm12, %v20606_v26 }
 0x7cf   :  { %10856 = vmatpush1.bf16.msra.mxu0 %v10752_v51  ;;  %10826 = vmatprep.mubr.bf16.mxu0 %v20847_v3 }
 0x7d0   :  { %17250 = vmatprep.subr.msk.bf16.mxu0 %vm6909_vm11, %v10748_v14 }
 0x7d3   :  { %10858 = vmatpush1.bf16.msra.mxu0 %v10779_v20  ;;  %v11488_v20 = vpop.permute.xlu0 %11487 }
 0x7d4   :  { %11031 = vmatprep.subr.bf16.mxu0 %v10998_v28  ;;  %v20629_v28 = vld [vmem:[%s26549_s8 + $0x10] ss:$8 sps:$4 sm:$0xff]  }
 0x7d5   :  { %12440 = vmatpush1.bf16.msra.mxu1 %v20629_v28 }
 0x7d6   :  { %17247 = vmatmul.mubr.msk.bf16.gmra.mrb[48].mxu0 %vm6905_vm12, %v20607_v62 }
 0x7d7   :  { %10836 = vmatprep.mubr.bf16.mxu0 %v20847_v3  ;;  %v24897_v37 = vpop.permute.xlu0 %11724 }
 0x7de   :  { %17248 = vmatmul.mubr.msk.bf16.gmra.mrb[52].mxu0 %vm6905_vm12, %v20608_v32 }
 0x7df   :  { %10846 = vmatprep.mubr.bf16.mxu0 %v20847_v3 }
 0x7e4   :  { %v9775_v36 = vpop.f32.mrb[52].mxu1 }
 0x7e5   :  { %v9776_v38 = vadd.f32 %v17816_v17, %v9775_v36  ;;  %v9777_v40 = vpop.f32.mrb[53].mxu1  ;;  %v11484_v17 = vpop.permute.xlu1 %11483  ;;  %v11495_v36 = vsel %vm11489_vm8, %v11486_v24, %v11488_v20 }
 0x7e6   :  { %17249 = vmatmul.mubr.msk.bf16.gmra.mrb[56].mxu0 %vm6905_vm12, %v20609_v16  ;;  %v9778_v43 = vpop.f32.mrb[54].mxu1  ;;  %v11494_v14 = vsel %vm11489_vm8, %v11484_v17, %v11486_v24  ;;  %v20637_v40 = vld [vmem:[%s26549_s8 + $0x34] ss:$8 sps:$4 sm:$0xff]   ;;  %v20670_v24 = vld [vmem:[%s26549_s8 + $0xe4] ss:$8 sps:$4 sm:$0xff]  }
 0x7e7   :  { %9795 = vst.msk [vmem:[%s26548_s22 + $0x60] sm:$0xff] %vm9794_vm7, %v9776_v38  ;;  %v9779_v30 = vadd.f32 %v17819_v22, %v9778_v43  ;;  %v9780_v44 = vpop.f32.mrb[55].mxu1  ;;  %10887 = vmatprep.mubr.bf16.mxu0 %v20847_v3  ;;  %v11493_v22 = vsel %vm11489_vm8, %v11482_v23, %v11484_v17  ;;  %v20632_v38 = vld [vmem:[%s26549_s8 + $0x20] ss:$8 sps:$4 sm:$0xff]   ;;  %v11519_v43 = vsel %vm6909_vm11, %v11495_v36, 0 }
 0x7e8   :  { %v20667_v23 = vld [vmem:[%s26549_s8 + $0xd4] ss:$8 sps:$4 sm:$0xff]   ;;  %v20668_v17 = vld [vmem:[%s26549_s8 + $0xe0] ss:$8 sps:$4 sm:$0xff]  }
 0x7e9   :  { %9808 = vst.msk [vmem:[%s26548_s22 + $0xc8] sm:$0xff] %vm9794_vm7, %v9779_v30  ;;  %v11480_v51 = vpop.permute.xlu1 %11479  ;;  %v24910_v30 = vld [vmem:[%s26547_s5 + $0xcc] sm:$0xff]  }
 0x7ed   :  { %v11723_v34 = vpop.permute.xlu1 %11722 }
 0x7ee   :  { %17251 = vmatmul.mubr.msk.bf16.vlgmr.msra.gmra.mrb[60].mxu0 %vm6905_vm12, %v20606_v26  ;;  %v11513_v26 = vsel %vm6909_vm11, %v11493_v22, 0  ;;  %v11738_v44 = vsel %vm11736_vm6, %v11723_v34, %v24897_v37  ;;  %v20673_v22 = vld [vmem:[%s26549_s8 + $0xf4] ss:$8 sps:$4 sm:$0xff]  }
 0x7ef   :  { %11032 = vmatpush1.bf16.msra.mxu0 %v10997_v42  ;;  %10897 = vmatprep.mubr.bf16.mxu0 %v20847_v3  ;;  %v20638_v42 = vld [vmem:[%s26549_s8 + $0x40] ss:$8 sps:$4 sm:$0xff]  }
 0x7f0   :  { %17266 = vmatprep.subr.msk.bf16.mxu0 %vm6909_vm11, %v11001_v55  ;;  %v20643_v55 = vld [vmem:[%s26549_s8 + $0x54] ss:$8 sps:$4 sm:$0xff]  }
 0x7f1   :  { %v11721_v2 = vpop.permute.xlu1 %11720 }
 0x7f2   :  { %v11737_v27 = vsel %vm11736_vm6, %v11721_v2, %v11723_v34 }
 0x7f3   :  { %11034 = vmatpush1.bf16.msra.mxu0 %v11020_v59  ;;  %v20641_v59 = vld [vmem:[%s26549_s8 + $0x50] ss:$8 sps:$4 sm:$0xff]  }
 0x7f4   :  { %11102 = vmatprep.subr.bf16.mxu0 %v10987_v52  ;;  %v20646_v52 = vld [vmem:[%s26549_s8 + $0x64] ss:$8 sps:$4 sm:$0xff]  }
 0x7f6   :  { %17252 = vmatmul.mubr.msk.bf16.gmra.mrb[64].mxu0 %vm6905_vm12, %v20607_v62  ;;  %v24884_v62 = vld [vmem:[%s26547_s5 + $0xc4] sm:$0xff]  }
 0x7f7   :  { %10907 = vmatprep.mubr.bf16.mxu0 %v20847_v3 }
 0x7fe   :  { %17253 = vmatmul.mubr.msk.bf16.gmra.mrb[68].mxu0 %vm6905_vm12, %v20608_v32  ;;  %v20634_v32 = vld [vmem:[%s26549_s8 + $0x24] ss:$8 sps:$4 sm:$0xff]  }
 0x7ff   :  { %10917 = vmatprep.mubr.bf16.mxu0 %v20847_v3  ;;  %12441 = vmatprep.subr.bf16.mxu1 %v20634_v32 }
 0x800   :  { %12442 = vmatpush1.bf16.msra.mxu1 %v20632_v38 }
 0x801   :  { %12443 = vmatprep.subr.bf16.mxu1 %v20637_v40 }
 0x804   :  { %12444 = vmatpush1.bf16.msra.mxu1 %v20635_v46 }
 0x805   :  { %12445 = vmatprep.subr.bf16.mxu1 %v20640_v8 }
 0x806   :  { %17254 = vmatmul.mubr.msk.bf16.gmra.mrb[72].mxu0 %vm6905_vm12, %v20609_v16  ;;  %v11492_v16 = vsel %vm11489_vm8, %v11478_v50, %v11480_v51 }
 0x807   :  { %11063 = vmatprep.mubr.bf16.mxu0 %v20847_v3 }
 0x808   :  { %12446 = vmatpush1.bf16.msra.mxu1 %v20638_v42 }
 0x809   :  { %12447 = vmatprep.subr.bf16.mxu1 %v20643_v55 }
 0x80c   :  { %12448 = vmatpush1.bf16.msra.mxu1 %v20641_v59 }
 0x80d   :  { %12449 = vmatprep.subr.bf16.mxu1 %v20646_v52 }
 0x80e   :  { %17267 = vmatmul.mubr.msk.bf16.vlgmr.msra.gmra.mrb[44].mxu0 %vm6905_vm12, %v20610_v61 }
 0x80f   :  { %11103 = vmatpush1.bf16.msra.mxu0 %v10999_v1  ;;  %11073 = vmatprep.mubr.bf16.mxu0 %v20847_v3  ;;  %v20621_v1 = vld [vmem:[%s26547_s5 + $0xdc] ss:$0 sps:$4 sm:$0xff]  }
 0x810   :  { %17271 = vmatprep.subr.msk.bf16.mxu0 %vm6909_vm11, %v10995_v12  ;;  %v20644_v12 = vld [vmem:[%s26549_s8 + $0x60] ss:$8 sps:$4 sm:$0xff]  }
 0x811   :  { %12450 = vmatpush1.bf16.msra.mxu1 %v20644_v12 }
 0x813   :  { %11105 = vmatpush1.bf16.msra.mxu0 %v11026_v45  ;;  %v11729_v45 = vpop.permute.xlu0 %11728 }
 0x814   :  { %11277 = vmatprep.subr.bf16.mxu0 %v11244_v5  ;;  %v20655_v5 = vld [vmem:[%s26549_s8 + $0x94] ss:$8 sps:$4 sm:$0xff]  }
 0x816   :  { %17268 = vmatmul.mubr.msk.bf16.gmra.mrb[48].mxu0 %vm6905_vm12, %v20611_v9 }
 0x817   :  { %11083 = vmatprep.mubr.bf16.mxu0 %v20847_v3 }
 0x81e   :  { %17269 = vmatmul.mubr.msk.bf16.gmra.mrb[52].mxu0 %vm6905_vm12, %v20612_v41 }
 0x81f   :  { %11093 = vmatprep.mubr.bf16.mxu0 %v20847_v3 }
 0x826   :  { %17270 = vmatmul.mubr.msk.bf16.gmra.mrb[56].mxu0 %vm6905_vm12, %v20613_v7 }
 0x827   :  { %11134 = vmatprep.mubr.bf16.mxu0 %v20847_v3 }
 0x82e   :  { %17272 = vmatmul.mubr.msk.bf16.vlgmr.msra.gmra.mrb[60].mxu0 %vm6905_vm12, %v20610_v61  ;;  %v20649_v61 = vld [vmem:[%s26549_s8 + $0x74] ss:$8 sps:$4 sm:$0xff]  }
 0x82f   :  { %11278 = vmatpush1.bf16.msra.mxu0 %v11243_v31  ;;  %11144 = vmatprep.mubr.bf16.mxu0 %v20847_v3 }
 0x830   :  { %17287 = vmatprep.subr.msk.bf16.mxu0 %vm6909_vm11, %v11247_v48  ;;  %12451 = vmatprep.subr.bf16.mxu1 %v20649_v61  ;;  %v20661_v48 = vld [vmem:[%s26549_s8 + $0xb4] ss:$8 sps:$4 sm:$0xff]  }
 0x831   :  { %12452 = vmatpush1.bf16.msra.mxu1 %v20647_v53 }
 0x832   :  { %12453 = vmatprep.subr.bf16.mxu1 %v20652_v49 }
 0x833   :  { %11280 = vmatpush1.bf16.msra.mxu0 %v11266_v0 }
 0x834   :  { %11348 = vmatprep.subr.bf16.mxu0 %v11234_v11 }
 0x836   :  { %17273 = vmatmul.mubr.msk.bf16.gmra.mrb[64].mxu0 %vm6905_vm12, %v20611_v9  ;;  %v20650_v9 = vld [vmem:[%s26549_s8 + $0x80] ss:$8 sps:$4 sm:$0xff]  }
 0x837   :  { %11154 = vmatprep.mubr.bf16.mxu0 %v20847_v3  ;;  %12454 = vmatpush1.bf16.msra.mxu1 %v20650_v9 }
 0x838   :  { %12455 = vmatprep.subr.bf16.mxu1 %v20655_v5 }
 0x83b   :  { %12456 = vmatpush1.bf16.msra.mxu1 %v20653_v10 }
 0x83c   :  { %12457 = vmatprep.subr.bf16.mxu1 %v20658_v56 }
 0x83e   :  { %17274 = vmatmul.mubr.msk.bf16.gmra.mrb[68].mxu0 %vm6905_vm12, %v20612_v41  ;;  %v11731_v41 = vpop.permute.xlu1 %11730 }
 0x83f   :  { %11164 = vmatprep.mubr.bf16.mxu0 %v20847_v3  ;;  %v11740_v47 = vsel %vm11736_vm6, %v11729_v45, %v11731_v41  ;;  %12458 = vmatpush1.bf16.msra.mxu1 %v20656_v18  ;;  %v20674_v45 = vld [vmem:[%s26549_s8 + $0x100] ss:$8 sps:$4 sm:$0xff]  }
 0x840   :  { %v11760_v0 = vsel %vm6909_vm11, %v11740_v47, 0  ;;  %12459 = vmatprep.subr.bf16.mxu1 %v20661_v48  ;;  %v20677_v48 = vld [vmem:[%s26549_s8 + $0x110] ss:$8 sps:$4 sm:$0xff]  }
 0x842   :  { %v11727_v11 = vpop.permute.xlu1 %11726 }
 0x843   :  { %v11739_v19 = vsel %vm11736_vm6, %v24897_v37, %v11727_v11 }
 0x846   :  { %17275 = vmatmul.mubr.msk.bf16.gmra.mrb[72].mxu0 %vm6905_vm12, %v20613_v7  ;;  %v11733_v7 = vpop.permute.xlu0 %11732 }
 0x847   :  { %11309 = vmatprep.mubr.bf16.mxu0 %v20847_v3  ;;  %v11741_v31 = vsel %vm11736_vm6, %v11731_v41, %v11733_v7 }
 0x84a   :  { %v11735_v50 = vpop.permute.xlu0 %11734 }
 0x84e   :  { %17288 = vmatmul.mubr.msk.bf16.vlgmr.msra.gmra.mrb[44].mxu0 %vm6905_vm12, %v20614_v21 }
 0x84f   :  { %11349 = vmatpush1.bf16.msra.mxu0 %v11245_v33  ;;  %11319 = vmatprep.mubr.bf16.mxu0 %v20847_v3  ;;  %v20662_v33 = vld [vmem:[%s26549_s8 + $0xc0] ss:$8 sps:$4 sm:$0xff]  }
 0x850   :  { %17292 = vmatprep.subr.msk.bf16.mxu0 %vm6909_vm11, %v11242_v15  ;;  %v20659_v15 = vld [vmem:[%s26549_s8 + $0xb0] ss:$8 sps:$4 sm:$0xff]  }
 0x851   :  { %12460 = vmatpush1.bf16.msra.mxu1 %v20659_v15  ;;  %v20682_v15 = vld [vmem:[%s26549_s8 + $0x124] ss:$8 sps:$4 sm:$0xff]  }
 0x853   :  { %11351 = vmatpush1.bf16.msra.mxu0 %v11272_v57  ;;  %v11742_v57 = vsel %vm11736_vm6, %v11733_v7, %v11735_v50  ;;  %v20679_v7 = vld [vmem:[%s26549_s8 + $0x114] ss:$8 sps:$4 sm:$0xff]  }
 0x854   :  { %11524 = vmatprep.subr.bf16.mxu0 %v11491_v63  ;;  %v20623_v63 = vld [vmem:[%s26547_s5 + $0xe8] sm:$0xff]  }
 0x856   :  { %17289 = vmatmul.mubr.msk.bf16.gmra.mrb[48].mxu0 %vm6905_vm12, %v20615_v4 }
 0x857   :  { %11329 = vmatprep.mubr.bf16.mxu0 %v20847_v3 }
 0x85e   :  { %17290 = vmatmul.mubr.msk.bf16.gmra.mrb[52].mxu0 %vm6905_vm12, %v20616_v6 }
 0x85f   :  { %11339 = vmatprep.mubr.bf16.mxu0 %v20847_v3 }
 0x866   :  { %17291 = vmatmul.mubr.msk.bf16.gmra.mrb[56].mxu0 %vm6905_vm12, %v20617_v35 }
 0x867   :  { %11380 = vmatprep.mubr.bf16.mxu0 %v20847_v3 }
 0x86e   :  { %17293 = vmatmul.mubr.msk.bf16.vlgmr.msra.gmra.mrb[60].mxu0 %vm6905_vm12, %v20614_v21  ;;  %v20664_v21 = vld [vmem:[%s26549_s8 + $0xc4] ss:$8 sps:$4 sm:$0xff]  }
 0x86f   :  { %11525 = vmatpush1.bf16.msra.mxu0 %v11490_v39  ;;  %11390 = vmatprep.mubr.bf16.mxu0 %v20847_v3  ;;  %v20671_v39 = vld [vmem:[%s26549_s8 + $0xf0] ss:$8 sps:$4 sm:$0xff]  }
 0x870   :  { %17308 = vmatprep.subr.msk.bf16.mxu0 %vm6909_vm11, %v11494_v14  ;;  %12461 = vmatprep.subr.bf16.mxu1 %v20664_v21  ;;  %v20676_v14 = vld [vmem:[%s26549_s8 + $0x104] ss:$8 sps:$4 sm:$0xff]  }
 0x871   :  { %12462 = vmatpush1.bf16.msra.mxu1 %v20662_v33 }
 0x872   :  { %12463 = vmatprep.subr.bf16.mxu1 %v20667_v23 }
 0x873   :  { %11527 = vmatpush1.bf16.msra.mxu0 %v11513_v26  ;;  %v25053_v26 = vpop.permute.xlu1 %11950 }
 0x874   :  { %11595 = vmatprep.subr.bf16.mxu0 %v11480_v51  ;;  %v25055_v51 = vpop.permute.xlu0 %11955 }
 0x875   :  { %12464 = vmatpush1.bf16.msra.mxu1 %v20665_v13  ;;  %v20680_v13 = vld [vmem:[%s26549_s8 + $0x120] ss:$8 sps:$4 sm:$0xff]  }
 0x876   :  { %17294 = vmatmul.mubr.msk.bf16.gmra.mrb[64].mxu0 %vm6905_vm12, %v20615_v4  ;;  %v11766_v4 = vsel %vm6909_vm11, %v11742_v57, 0  ;;  %12465 = vmatprep.subr.bf16.mxu1 %v20670_v24 }
 0x877   :  { %11400 = vmatprep.mubr.bf16.mxu0 %v20847_v3  ;;  %v25057_v58 = vpop.permute.xlu1 %12020 }
 0x878   :  { %v25059_v25 = vpop.permute.xlu0 %12025 }
 0x879   :  { %12466 = vmatpush1.bf16.msra.mxu1 %v20668_v17 }
 0x87a   :  { %12467 = vmatprep.subr.bf16.mxu1 %v20673_v22 }
 0x87b   :  { %v25061_v29 = vpop.permute.xlu1 %11960 }
 0x87c   :  { %v25064_v32 = vpop.permute.xlu0 %11965 }
 0x87d   :  { %12468 = vmatpush1.bf16.msra.mxu1 %v20671_v39  ;;  %v20685_v39 = vld [vmem:[%s26549_s8 + $0x134] ss:$8 sps:$4 sm:$0xff]  }
 0x87e   :  { %17295 = vmatmul.mubr.msk.bf16.gmra.mrb[68].mxu0 %vm6905_vm12, %v20616_v6  ;;  %v20624_v6 = vld [vmem:[%s26547_s5 + $0xf0] sm:$0xff]   ;;  %12508 = vmatprep.subr.bf16.mxu1 %v20676_v14 }
 0x87f   :  { %11410 = vmatprep.mubr.bf16.mxu0 %v20847_v3 }
 0x886   :  { %17296 = vmatmul.mubr.msk.bf16.gmra.mrb[72].mxu0 %vm6905_vm12, %v20617_v35  ;;  %v20625_v35 = vld [vmem:[%s26547_s5 + $0xf8] ss:$0 sps:$4 sm:$0xff]   ;;  %s20864_s5 = smov 119  }
 0x887   :  { %11556 = vmatprep.mubr.bf16.mxu0 %v20847_v3 }
 0x88e   :  { %17309 = vmatmul.mubr.msk.bf16.vlgmr.msra.gmra.mrb[44].mxu0 %vm6905_vm12, %v24884_v62 }
 0x88f   :  { %11596 = vmatpush1.bf16.msra.mxu0 %v11492_v16  ;;  %11566 = vmatprep.mubr.bf16.mxu0 %v20847_v3 }
 0x890   :  { %17313 = vmatprep.subr.msk.bf16.mxu0 %vm6909_vm11, %v11488_v20 }
 0x893   :  { %11598 = vmatpush1.bf16.msra.mxu0 %v11519_v43 }
 0x894   :  { %11771 = vmatprep.subr.bf16.mxu0 %v11738_v44  ;;  %v25072_v44 = vpop.permute.xlu1 %12030 }
 0x896   :  { %17310 = vmatmul.mubr.msk.bf16.gmra.mrb[48].mxu0 %vm6905_vm12, %v24910_v30 }
 0x897   :  { %11576 = vmatprep.mubr.bf16.mxu0 %v20847_v3 }
 0x898   :  { %v25087_v10 = vpop.permute.xlu1 %11970 }
 0x89e   :  { %17311 = vmatmul.mubr.msk.bf16.gmra.mrb[52].mxu0 %vm6905_vm12, %v20620_v54 }
 0x89f   :  { %11586 = vmatprep.mubr.bf16.mxu0 %v20847_v3 }
 0x8a6   :  { %17312 = vmatmul.mubr.msk.bf16.gmra.mrb[56].mxu0 %vm6905_vm12, %v20621_v1 }
 0x8a7   :  { %11627 = vmatprep.mubr.bf16.mxu0 %v20847_v3 }
 0x8ae   :  { %17314 = vmatmul.mubr.msk.bf16.vlgmr.msra.gmra.mrb[60].mxu0 %vm6905_vm12, %v24884_v62 }
 0x8af   :  { %11772 = vmatpush1.bf16.msra.mxu0 %v11737_v27  ;;  %11637 = vmatprep.mubr.bf16.mxu0 %v20847_v3 }
 0x8b0   :  { %17329 = vmatprep.subr.msk.bf16.mxu0 %vm6909_vm11, %v11741_v31 }
 0x8b3   :  { %11774 = vmatpush1.bf16.msra.mxu0 %v11760_v0 }
 0x8b4   :  { %11842 = vmatprep.subr.bf16.mxu0 %v11727_v11 }
 0x8b6   :  { %17315 = vmatmul.mubr.msk.bf16.gmra.mrb[64].mxu0 %vm6905_vm12, %v24910_v30 }
 0x8b7   :  { %11647 = vmatprep.mubr.bf16.mxu0 %v20847_v3 }
 0x8be   :  { %17316 = vmatmul.mubr.msk.bf16.gmra.mrb[68].mxu0 %vm6905_vm12, %v20620_v54  ;;  %v25075_v54 = vpop.permute.xlu0 %12035 }
 0x8bf   :  { %11657 = vmatprep.mubr.bf16.mxu0 %v20847_v3 }
 0x8c2   :  { %v25092_v31 = vpop.permute.xlu0 %11975 }
 0x8c6   :  { %17317 = vmatmul.mubr.msk.bf16.gmra.mrb[72].mxu0 %vm6905_vm12, %v20621_v1  ;;  %v25113_v22 = vpop.permute.xlu0 %12045 }
 0x8c7   :  { %11803 = vmatprep.mubr.bf16.mxu0 %v20847_v3 }
 0x8ce   :  { %17330 = vmatmul.mubr.msk.bf16.vlgmr.msra.gmra.mrb[44].mxu0 %vm6905_vm12, %v20622_v60 }
 0x8cf   :  { %11843 = vmatpush1.bf16.msra.mxu0 %v11739_v19  ;;  %11813 = vmatprep.mubr.bf16.mxu0 %v20847_v3 }
 0x8d0   :  { %17334 = vmatprep.subr.msk.bf16.mxu0 %vm6909_vm11, %v11735_v50  ;;  %vm13792_vm11 = vcmask 965632  }
 0x8d3   :  { %11845 = vmatpush1.bf16.msra.mxu0 %v11766_v4  ;;  %v25102_v4 = vpop.permute.xlu1 %12040 }
 0x8d4   :  { %15128 = vmatprep.subr.bf16.mxu0 %v20847_v3 }
 0x8d6   :  { %17331 = vmatmul.mubr.msk.bf16.gmra.mrb[48].mxu0 %vm6905_vm12, %v20623_v63 }
 0x8d7   :  { %11823 = vmatprep.mubr.bf16.mxu0 %v20847_v3 }
 0x8de   :  { %17332 = vmatmul.mubr.msk.bf16.gmra.mrb[52].mxu0 %vm6905_vm12, %v20624_v6 }
 0x8df   :  { %11833 = vmatprep.mubr.bf16.mxu0 %v20847_v3 }
 0x8e6   :  { %17333 = vmatmul.mubr.msk.bf16.gmra.mrb[56].mxu0 %vm6905_vm12, %v20625_v35 }
 0x8e7   :  { %11874 = vmatprep.mubr.bf16.mxu0 %v20847_v3 }
 0x8ee   :  { %17335 = vmatmul.mubr.msk.bf16.vlgmr.msra.gmra.mrb[60].mxu0 %vm6905_vm12, %v20622_v60 }
 0x8ef   :  { %11884 = vmatprep.mubr.bf16.mxu0 %v20847_v3 }
 0x8f6   :  { %17336 = vmatmul.mubr.msk.bf16.gmra.mrb[64].mxu0 %vm6905_vm12, %v20623_v63 }
 0x8f7   :  { %11894 = vmatprep.mubr.bf16.mxu0 %v20847_v3 }
 0x8fe   :  { %17337 = vmatmul.mubr.msk.bf16.gmra.mrb[68].mxu0 %vm6905_vm12, %v20624_v6 }
 0x8ff   :  { %11904 = vmatprep.mubr.bf16.mxu0 %v20847_v3 }
 0x906   :  { %17338 = vmatmul.mubr.msk.bf16.gmra.mrb[72].mxu0 %vm6905_vm12, %v20625_v35  ;;  %vm14263_vm12 = vcmask 908288  }
 0x9a1   :  { %v11805_v20 = vpop.f32.mrb[44].mxu0 }
 0x9a2   :  { %v11983_v62 = vmul.f32 %v25053_v26, %v11805_v20  ;;  %v11807_v28 = vpop.f32.mrb[45].mxu0 }
 0x9a3   :  { %v11984_v16 = vmul.f32 %v25053_v26, %v11807_v28  ;;  %v11809_v36 = vpop.f32.mrb[46].mxu0 }
 0x9a4   :  { %v12053_v37 = vadd.f32 %v25057_v58, %v11983_v62  ;;  %v11987_v38 = vmul.f32 %v25055_v51, %v11809_v36  ;;  %v11811_v40 = vpop.f32.mrb[47].mxu0 }
 0x9a5   :  { %v12054_v34 = vadd.f32 %v25057_v58, %v11984_v16  ;;  %v11988_v43 = vmul.f32 %v25055_v51, %v11811_v40  ;;  %v20683_v16 = vld [vmem:[%s26549_s8 + $0x130] ss:$8 sps:$4 sm:$0xff]   ;;  %v25125_v40 = vpop.permute.xlu1 %11980 }
 0x9a6   :  { %v12057_v30 = vadd.f32 %v25059_v25, %v11987_v38  ;;  %v12081_v8 = vmax.f32 %v12053_v37, 0.0  ;;  %v20688_v38 = vld [vmem:[%s26549_s8 + $0x144] ss:$8 sps:$4 sm:$0xff]  }
 0x9a7   :  { %v12058_v46 = vadd.f32 %v25059_v25, %v11988_v43  ;;  %v12082_v55 = vmax.f32 %v12054_v34, 0.0 }
 0x9a8   :  { %v12085_v42 = vmax.f32 %v12057_v30, 0.0 }
 0x9a9   :  { %v12086_v59 = vmax.f32 %v12058_v46, 0.0  ;;  %v11815_v52 = vpop.f32.mrb[48].mxu0 }
 0x9aa   :  { %v12109_v12 = vpack.c.bf16 %v12085_v42, %v12081_v8  ;;  %v11991_v61 = vmul.f32 %v25061_v29, %v11815_v52  ;;  %v11817_v1 = vpop.f32.mrb[49].mxu0 }
 0x9ab   :  { %v11992_v53 = vmul.f32 %v25061_v29, %v11817_v1  ;;  %v11819_v49 = vpop.f32.mrb[50].mxu0  ;;  %v12110_v2 = vpack.c.bf16 %v12086_v59, %v12082_v55  ;;  %v25128_v55 = vpop.permute.xlu0 %12050 }
 0x9ac   :  { %v12061_v9 = vadd.f32 %v25072_v44, %v11991_v61  ;;  %v11995_v5 = vmul.f32 %v25064_v32, %v11819_v49  ;;  %v11821_v41 = vpop.f32.mrb[51].mxu0  ;;  %v20686_v61 = vld [vmem:[%s26549_s8 + $0x140] ss:$8 sps:$4 sm:$0xff]   ;;  %v20691_v49 = vld [vmem:[%s26549_s8 + $0x154] ss:$8 sps:$4 sm:$0xff]  }
 0x9ad   :  { %v12062_v56 = vadd.f32 %v25072_v44, %v11992_v53  ;;  %v11996_v27 = vmul.f32 %v25064_v32, %v11821_v41  ;;  %12469 = vmatprep.mubr.bf16.mxu1 %v12110_v2  ;;  %v20694_v41 = vld [vmem:[%s26549_s8 + $0x164] ss:$8 sps:$4 sm:$0xff]  }
 0x9ae   :  { %v12065_v47 = vadd.f32 %v25075_v54, %v11995_v5  ;;  %12470 = vmatmul.mubr.bf16.vlgmr.msra.gmra.mrb[56].mxu1 %v12109_v12  ;;  %v12089_v0 = vmax.f32 %v12061_v9, 0.0  ;;  %v20689_v9 = vld [vmem:[%s26549_s8 + $0x150] ss:$8 sps:$4 sm:$0xff]  }
 0x9af   :  { %v12066_v18 = vadd.f32 %v25075_v54, %v11996_v27  ;;  %12509 = vmatpush1.bf16.msra.mxu1 %v20674_v45  ;;  %v12090_v21 = vmax.f32 %v12062_v56, 0.0 }
 0x9b0   :  { %v12093_v11 = vmax.f32 %v12065_v47, 0.0  ;;  %12510 = vmatprep.subr.bf16.mxu1 %v20679_v7 }
 0x9b1   :  { %v12094_v33 = vmax.f32 %v12066_v18, 0.0  ;;  %v11825_v60 = vpop.f32.mrb[52].mxu0 }
 0x9b2   :  { %v11999_v50 = vmul.f32 %v25087_v10, %v11825_v60  ;;  %v11827_v19 = vpop.f32.mrb[53].mxu0  ;;  %v12113_v57 = vpack.c.bf16 %v12093_v11, %v12089_v0  ;;  %v20692_v0 = vld [vmem:[%s26549_s8 + $0x160] ss:$8 sps:$4 sm:$0xff]   ;;  %v20697_v60 = vld [vmem:[%s26549_s8 + $0x174] ss:$8 sps:$4 sm:$0xff]  }
 0x9b3   :  { %v12000_v63 = vmul.f32 %v25087_v10, %v11827_v19  ;;  %12511 = vmatpush1.bf16.msra.mxu1 %v20677_v48  ;;  %v11829_v6 = vpop.f32.mrb[54].mxu0  ;;  %v12114_v35 = vpack.c.bf16 %v12094_v33, %v12090_v21  ;;  %v12173_v19 = vld [vmem:[%s26549_s8 + $0x180] sm:$0xff] }
 0x9b4   :  { %v12069_v23 = vadd.f32 %v25102_v4, %v11999_v50  ;;  %v12003_v17 = vmul.f32 %v25092_v31, %v11829_v6  ;;  %v11831_v24 = vpop.f32.mrb[55].mxu0  ;;  %12512 = vmatprep.subr.bf16.mxu1 %v20682_v15  ;;  %v20695_v6 = vld [vmem:[%s26549_s8 + $0x170] ss:$8 sps:$4 sm:$0xff]   ;;  %s20863_s8 = smov 120  }
 0x9b5   :  { %v12070_v14 = vadd.f32 %v25102_v4, %v12000_v63  ;;  %v12004_v20 = vmul.f32 %v25092_v31, %v11831_v24  ;;  %12479 = vmatprep.mubr.bf16.mxu1 %v12114_v35 }
 0x9b6   :  { %v12073_v62 = vadd.f32 %v25113_v22, %v12003_v17  ;;  %12480 = vmatmul.mubr.bf16.gmra.mrb[60].mxu1 %v12113_v57  ;;  %v12097_v36 = vmax.f32 %v12069_v23, 0.0  ;;  %v17387_v23 = vcombine.low %v12173_v19, %v12173_v19 }
 0x9b7   :  { %v12074_v28 = vadd.f32 %v25113_v22, %v12004_v20  ;;  %12513 = vmatpush1.bf16.msra.mxu1 %v20680_v13  ;;  %v12098_v34 = vmax.f32 %v12070_v14, 0.0 }
 0x9b8   :  { %v12101_v37 = vmax.f32 %v12073_v62, 0.0  ;;  %12514 = vmatprep.subr.bf16.mxu1 %v20685_v39 }
 0x9b9   :  { %v12102_v43 = vmax.f32 %v12074_v28, 0.0  ;;  %v11835_v30 = vpop.f32.mrb[56].mxu0 }
 0x9ba   :  { %v12007_v46 = vmul.f32 %v25125_v40, %v11835_v30  ;;  %v11837_v8 = vpop.f32.mrb[57].mxu0  ;;  %v12117_v42 = vpack.c.bf16 %v12101_v37, %v12097_v36 }
 0x9bb   :  { %v12008_v59 = vmul.f32 %v25125_v40, %v11837_v8  ;;  %12515 = vmatpush1.bf16.msra.mxu1 %v20683_v16  ;;  %v11839_v52 = vpop.f32.mrb[58].mxu0  ;;  %v12118_v12 = vpack.c.bf16 %v12102_v43, %v12098_v34 }
 0x9bc   :  { %v12077_v1 = vadd.f32 %v25128_v55, %v12007_v46  ;;  %v11840_v53 = vpop.f32.mrb[59].mxu0  ;;  %12516 = vmatprep.subr.bf16.mxu1 %v20688_v38  ;;  %v12432_v38 = vsel %vm167_vm1, %v17387_v23, 0 }
 0x9bd   :  { %v12078_v2 = vadd.f32 %v25128_v55, %v12008_v59  ;;  %12489 = vmatprep.mubr.bf16.mxu1 %v12118_v12 }
 0x9be   :  { %12490 = vmatmul.mubr.bf16.gmra.mrb[64].mxu1 %v12117_v42  ;;  %v12105_v5 = vmax.f32 %v12077_v1, 0.0 }
 0x9bf   :  { %v12106_v45 = vmax.f32 %v12078_v2, 0.0  ;;  %12517 = vmatpush1.bf16.msra.mxu1 %v20686_v61 }
 0x9c0   :  { %12518 = vmatprep.subr.bf16.mxu1 %v20691_v49  ;;  %v12121_v11 = vpack.c.bf16 %v12105_v5, %v12105_v5 }
 0x9c1   :  { %v12122_v7 = vpack.c.bf16 %v12106_v45, %v12106_v45  ;;  %v11876_v56 = vpop.f32.mrb[60].mxu0 }
 0x9c2   :  { %v11985_v27 = vmul.f32 %v25053_v26, %v11876_v56  ;;  %v11878_v47 = vpop.f32.mrb[61].mxu0 }
 0x9c3   :  { %v11986_v18 = vmul.f32 %v25053_v26, %v11878_v47  ;;  %12519 = vmatpush1.bf16.msra.mxu1 %v20689_v9  ;;  %v11880_v48 = vpop.f32.mrb[62].mxu0  ;;  %12499 = vmatprep.mubr.bf16.mxu1 %v12122_v7 }
 0x9c4   :  { %v12055_v15 = vadd.f32 %v25057_v58, %v11985_v27  ;;  %v11989_v21 = vmul.f32 %v25055_v51, %v11880_v48  ;;  %v11882_v33 = vpop.f32.mrb[63].mxu0  ;;  %12520 = vmatprep.subr.bf16.mxu1 %v20694_v41 }
 0x9c5   :  { %v12056_v26 = vadd.f32 %v25057_v58, %v11986_v18  ;;  %v11990_v50 = vmul.f32 %v25055_v51, %v11882_v33  ;;  %v17388_v58 = vcombine.high %v12173_v19, %v12173_v19  ;;  %v20861_v19 = vmov 0.0  }
 0x9c6   :  { %v12059_v57 = vadd.f32 %v25059_v25, %v11989_v21  ;;  %12500 = vmatmul.mubr.bf16.gmra.mrb[68].mxu1 %v12121_v11  ;;  %v12083_v35 = vmax.f32 %v12055_v15, 0.0 }
 0x9c7   :  { %v12060_v63 = vadd.f32 %v25059_v25, %v11990_v50  ;;  %12521 = vmatpush1.bf16.msra.mxu1 %v20692_v0  ;;  %v12084_v51 = vmax.f32 %v12056_v26, 0.0 }
 0x9c8   :  { %v12087_v13 = vmax.f32 %v12059_v57, 0.0  ;;  %12522 = vmatprep.subr.bf16.mxu1 %v20697_v60 }
 0x9c9   :  { %v12088_v17 = vmax.f32 %v12060_v63, 0.0  ;;  %v11886_v24 = vpop.f32.mrb[64].mxu0 }
 0x9ca   :  { %v12111_v39 = vpack.c.bf16 %v12087_v13, %v12083_v35  ;;  %v11993_v14 = vmul.f32 %v25061_v29, %v11886_v24  ;;  %v11888_v20 = vpop.f32.mrb[65].mxu0 }
 0x9cb   :  { %v12112_v62 = vpack.c.bf16 %v12088_v17, %v12084_v51  ;;  %v11994_v25 = vmul.f32 %v25061_v29, %v11888_v20  ;;  %12523 = vmatpush1.bf16.msra.mxu1 %v20695_v6  ;;  %v11890_v28 = vpop.f32.mrb[66].mxu0 }
 0x9cc   :  { %v12063_v16 = vadd.f32 %v25072_v44, %v11993_v14  ;;  %v11997_v36 = vmul.f32 %v25064_v32, %v11890_v28  ;;  %v11892_v37 = vpop.f32.mrb[67].mxu0  ;;  %17389 = vmatprep.subr.msk.bf16.mxu1 %vm167_vm1, %v17388_v58 }
 0x9cd   :  { %v12064_v34 = vadd.f32 %v25072_v44, %v11994_v25  ;;  %v11998_v43 = vmul.f32 %v25064_v32, %v11892_v37  ;;  %17390 = vmatprep.mubr.msk.bf16.mxu1 %vm160_vm2, %v12112_v62 }
 0x9ce   :  { %v12067_v30 = vadd.f32 %v25075_v54, %v11997_v36  ;;  %v12091_v46 = vmax.f32 %v12063_v16, 0.0 }
 0x9cf   :  { %v12068_v29 = vadd.f32 %v25075_v54, %v11998_v43  ;;  %12525 = vmatpush1.bf16.msra.mxu1 %v12432_v38  ;;  %v12092_v42 = vmax.f32 %v12064_v34, 0.0 }
 0x9d0   :  { %v12095_v8 = vmax.f32 %v12067_v30, 0.0  ;;  %18013 = vmatprep.subr.bf16.mxu1 %v20861_v19 }
 0x9d1   :  { %v12096_v59 = vmax.f32 %v12068_v29, 0.0  ;;  %v11896_v52 = vpop.f32.mrb[68].mxu0 }
 0x9d2   :  { %v12001_v12 = vmul.f32 %v25087_v10, %v11896_v52  ;;  %12541 = vmatmul.mubr.bf16.vlgmr.msra.gmra.mrb[56].mxu1 %v12111_v39  ;;  %v11898_v61 = vpop.f32.mrb[69].mxu0  ;;  %v12115_v1 = vpack.c.bf16 %v12095_v8, %v12091_v46 }
 0x9d3   :  { %v12116_v44 = vpack.c.bf16 %v12096_v59, %v12092_v42  ;;  %v12002_v32 = vmul.f32 %v25087_v10, %v11898_v61  ;;  %v11900_v53 = vpop.f32.mrb[70].mxu0 }
 0x9d4   :  { %v12071_v49 = vadd.f32 %v25102_v4, %v12001_v12  ;;  %v12005_v2 = vmul.f32 %v25092_v31, %v11900_v53  ;;  %v11902_v54 = vpop.f32.mrb[71].mxu0 }
 0x9d5   :  { %v12072_v45 = vadd.f32 %v25102_v4, %v12002_v32  ;;  %v12006_v9 = vmul.f32 %v25092_v31, %v11902_v54  ;;  %17391 = vmatprep.mubr.msk.bf16.mxu1 %vm160_vm2, %v12116_v44  ;;  %v14659_v32 = vld [vmem:[%s26551_s10 + $0x8] sm:$0xff]  ;;  %v14777_v54 = vld [vmem:[%s26552_s11] sm:$0xff] }
 0x9d6   :  { %v12075_v5 = vadd.f32 %v25113_v22, %v12005_v2  ;;  %v12099_v7 = vmax.f32 %v12071_v49, 0.0 }
 0x9d7   :  { %v12076_v41 = vadd.f32 %v25113_v22, %v12006_v9  ;;  %v12100_v27 = vmax.f32 %v12072_v45, 0.0  ;;  %v20700_v45 = vld [vmem:[%s26550_s9 + $0x44] sm:$0xff]  }
 0x9d8   :  { %v12103_v56 = vmax.f32 %v12075_v5, 0.0  ;;  %v14778_v9 = vld [vmem:[%s26552_s11 + $0x8] sm:$0xff]  ;;  %v14660_v5 = vld [vmem:[%s26551_s10 + $0x10] sm:$0xff] }
 0x9d9   :  { %v12104_v10 = vmax.f32 %v12076_v41, 0.0  ;;  %v11906_v47 = vpop.f32.mrb[72].mxu0  ;;  %v14661_v41 = vld [vmem:[%s26551_s10 + $0x18] sm:$0xff] }
 0x9da   :  { %12551 = vmatmul.mubr.bf16.gmra.mrb[60].mxu1 %v12115_v1  ;;  %v11908_v18 = vpop.f32.mrb[73].mxu0  ;;  %v12119_v48 = vpack.c.bf16 %v12103_v56, %v12099_v7  ;;  %v12009_v31 = vmul.f32 %v25125_v40, %v11906_v47  ;;  %v14658_v1 = vld [vmem:[%s26551_s10] sm:$0xff]  ;;  %v14779_v7 = vld [vmem:[%s26552_s11 + $0x10] sm:$0xff]  ;;  %v14663_v47 = vld [vmem:[%s26551_s10 + $0x28] sm:$0xff] }
 0x9db   :  { %v12120_v0 = vpack.c.bf16 %v12104_v10, %v12100_v27  ;;  %v12010_v11 = vmul.f32 %v25125_v40, %v11908_v18  ;;  %v11910_v4 = vpop.f32.mrb[74].mxu0  ;;  %v20701_v56 = vld [vmem:[%s26550_s9 + $0x4c] sm:$0xff]   ;;  %v14780_v27 = vld [vmem:[%s26552_s11 + $0x18] sm:$0xff]  ;;  %v14662_v10 = vld [vmem:[%s26551_s10 + $0x20] sm:$0xff] }
 0x9dc   :  { %v11911_v15 = vpop.f32.mrb[75].mxu0  ;;  %v12079_v33 = vadd.f32 %v25128_v55, %v12009_v31  ;;  %v14664_v4 = vld [vmem:[%s26551_s10 + $0x30] sm:$0xff]  ;;  %v14665_v31 = vld [vmem:[%s26551_s10 + $0x38] sm:$0xff] }
 0x9dd   :  { %v12080_v21 = vadd.f32 %v25128_v55, %v12010_v11  ;;  %17392 = vmatprep.mubr.msk.bf16.mxu1 %vm160_vm2, %v12120_v0  ;;  %v20702_v0 = vld [vmem:[%s26550_s9 + $0x54] sm:$0xff]   ;;  %v14782_v11 = vld [vmem:[%s26552_s11 + $0x28] sm:$0xff] }
 0x9de   :  { %v12107_v26 = vmax.f32 %v12079_v33, 0.0  ;;  %v14783_v15 = vld [vmem:[%s26552_s11 + $0x30] sm:$0xff]  ;;  %v14666_v33 = vld [vmem:[%s26551_s10 + $0x40] sm:$0xff] }
 0x9df   :  { %v12108_v22 = vmax.f32 %v12080_v21, 0.0  ;;  %v20703_v21 = vld [vmem:[%s26550_s9 + $0x5c] sm:$0xff]  }
 0x9e0   :  { %v12123_v50 = vpack.c.bf16 %v12107_v26, %v12107_v26  ;;  %v14785_v26 = vld [vmem:[%s26552_s11 + $0x40] sm:$0xff] }
 0x9e1   :  { %v12124_v60 = vpack.c.bf16 %v12108_v22, %v12108_v22  ;;  %v14784_v22 = vld [vmem:[%s26552_s11 + $0x38] sm:$0xff] }
 0x9e2   :  { %12561 = vmatmul.mubr.bf16.gmra.mrb[64].mxu1 %v12119_v48  ;;  %v14781_v48 = vld [vmem:[%s26552_s11 + $0x20] sm:$0xff] }
 0x9e3   :  { %17393 = vmatprep.mubr.msk.bf16.mxu1 %vm160_vm2, %v12124_v60  ;;  %v14667_v60 = vld [vmem:[%s26551_s10 + $0x48] sm:$0xff] }
 0x9ea   :  { %12571 = vmatmul.mubr.bf16.gmra.mrb[68].mxu1 %v12123_v50  ;;  %v20704_v50 = vld [vmem:[%s26550_s9 + $0x64] sm:$0xff]  }
 0x9eb   :  { %18021 = vmatprep.mubr.msk.bf16.mxu1 %vm20862_vm9, %v20861_v19 }
 0xaa5   :  { %v12542_v57 = vpop.f32.mrb[56].mxu1 }
 0xaa6   :  { %v12544_v40 = vpop.f32.mrb[57].mxu1 }
 0xaa7   :  { %v12546_v63 = vpop.f32.mrb[58].mxu1 }
 0xaa8   :  { %v25192_v6 = vpack.c.bf16 %v12546_v63, %v12542_v57  ;;  %v12548_v35 = vpop.f32.mrb[59].mxu1  ;;  %v14786_v57 = vld [vmem:[%s26552_s11 + $0x48] sm:$0xff]  ;;  %v14669_v63 = vld [vmem:[%s26551_s10 + $0x58] sm:$0xff] }
 0xaa9   :  { %v25194_v13 = vpack.c.bf16 %v12548_v35, %v12544_v40  ;;  %v14668_v40 = vld [vmem:[%s26551_s10 + $0x50] sm:$0xff] }
 0xaaa   :  { %12673 = vrot.lane.b32.xlu1 %v25192_v6, %s20848_s30  ;;  %v20705_v35 = vld [vmem:[%s26550_s9 + $0x6c] sm:$0xff]  }
 0xaab   :  { %12675 = vrot.lane.b32.xlu0 %v25194_v13, %s20848_s30 }
 0xaad   :  { %v12552_v55 = vpop.f32.mrb[60].mxu1 }
 0xaae   :  { %v12554_v58 = vpop.f32.mrb[61].mxu1 }
 0xaaf   :  { %v12556_v23 = vpop.f32.mrb[62].mxu1 }
 0xab0   :  { %v25200_v51 = vpack.c.bf16 %v12556_v23, %v12552_v55  ;;  %v12558_v17 = vpop.f32.mrb[63].mxu1  ;;  %v14670_v55 = vld [vmem:[%s26551_s10 + $0x60] sm:$0xff] }
 0xab1   :  { %v25202_v24 = vpack.c.bf16 %v12558_v17, %v12554_v58  ;;  %v14671_v58 = vld [vmem:[%s26551_s10 + $0x68] sm:$0xff]  ;;  %v14789_v23 = vld [vmem:[%s26552_s11 + $0x60] sm:$0xff] }
 0xab2   :  { %12677 = vrot.lane.b32.xlu1 %v25200_v51, %s20848_s30  ;;  %v14790_v17 = vld [vmem:[%s26552_s11 + $0x68] sm:$0xff] }
 0xab3   :  { %12679 = vrot.lane.b32.xlu0 %v25202_v24, %s20848_s30 }
 0xab5   :  { %v12562_v39 = vpop.f32.mrb[64].mxu1 }
 0xab6   :  { %v12564_v14 = vpop.f32.mrb[65].mxu1 }
 0xab7   :  { %v12566_v20 = vpop.f32.mrb[66].mxu1 }
 0xab8   :  { %v25208_v62 = vpack.c.bf16 %v12566_v20, %v12562_v39  ;;  %v12568_v25 = vpop.f32.mrb[67].mxu1  ;;  %v14673_v39 = vld [vmem:[%s26551_s10 + $0x78] sm:$0xff] }
 0xab9   :  { %v25210_v28 = vpack.c.bf16 %v12568_v25, %v12564_v14  ;;  %v14791_v14 = vld [vmem:[%s26552_s11 + $0x70] sm:$0xff]  ;;  %v20707_v20 = vld [vmem:[%s26550_s9 + $0x7c] sm:$0xff]  }
 0xaba   :  { %12681 = vrot.lane.b32.xlu1 %v25208_v62, %s20848_s30  ;;  %v14674_v25 = vld [vmem:[%s26551_s10 + $0x80] sm:$0xff] }
 0xabb   :  { %12683 = vrot.lane.b32.xlu0 %v25210_v28, %s20848_s30 }
 0xabd   :  { %v12572_v16 = vpop.f32.mrb[68].mxu1 }
 0xabe   :  { %v25218_v36 = vpack.c.bf16 %v12572_v16, %v12572_v16  ;;  %v12574_v37 = vpop.f32.mrb[69].mxu1 }
 0xabf   :  { %v25220_v38 = vpack.c.bf16 %v12574_v37, %v12574_v37  ;;  %v12576_v34 = vpop.f32.mrb[70].mxu1  ;;  %v15101_v37 = vld [vmem:[%s26553_s17] sm:$0xff] }
 0xac0   :  { %12685 = vrot.lane.b32.xlu1 %v25218_v36, %s20848_s30  ;;  %v12577_v43 = vpop.f32.mrb[71].mxu1  ;;  %v12902_v18 = vsel %vm167_vm1, %v25218_v36, 0  ;;  %v15102_v34 = vld [vmem:[%s26553_s17 + $0x8] sm:$0xff] }
 0xac1   :  { %12687 = vrot.lane.b32.xlu0 %v25220_v38, %s20848_s30 }
 0xac4   :  { %13069 = vrot.lane.b32.xlu1 %v25192_v6, %s20849_s29 }
 0xac5   :  { %13071 = vrot.lane.b32.xlu0 %v25194_v13, %s20849_s29 }
 0xac8   :  { %13073 = vrot.lane.b32.xlu1 %v25200_v51, %s20849_s29 }
 0xac9   :  { %13075 = vrot.lane.b32.xlu0 %v25202_v24, %s20849_s29 }
 0xacc   :  { %13077 = vrot.lane.b32.xlu1 %v25208_v62, %s20849_s29 }
 0xacd   :  { %13079 = vrot.lane.b32.xlu0 %v25210_v28, %s20849_s29 }
 0xad0   :  { %13081 = vrot.lane.b32.xlu1 %v25218_v36, %s20849_s29 }
 0xad1   :  { %13083 = vrot.lane.b32.xlu0 %v25220_v38, %s20849_s29 }
 0xad4   :  { %13304 = vrot.lane.b32.xlu1 %v25192_v6, %s20863_s8 }
 0xad5   :  { %13306 = vrot.lane.b32.xlu0 %v25194_v13, %s20863_s8 }
 0xad8   :  { %13308 = vrot.lane.b32.xlu1 %v25200_v51, %s20863_s8 }
 0xad9   :  { %13310 = vrot.lane.b32.xlu0 %v25202_v24, %s20863_s8 }
 0xadc   :  { %13312 = vrot.lane.b32.xlu1 %v25208_v62, %s20863_s8 }
 0xadd   :  { %13314 = vrot.lane.b32.xlu0 %v25210_v28, %s20863_s8 }
 0xae0   :  { %13316 = vrot.lane.b32.xlu1 %v25218_v36, %s20863_s8 }
 0xae1   :  { %13318 = vrot.lane.b32.xlu0 %v25220_v38, %s20863_s8 }
 0xae4   :  { %13540 = vrot.lane.b32.xlu1 %v25192_v6, %s20864_s5 }
 0xae5   :  { %13542 = vrot.lane.b32.xlu0 %v25194_v13, %s20864_s5 }
 0xae8   :  { %13544 = vrot.lane.b32.xlu1 %v25200_v51, %s20864_s5 }
 0xae9   :  { %13546 = vrot.lane.b32.xlu0 %v25202_v24, %s20864_s5 }
 0xaec   :  { %13548 = vrot.lane.b32.xlu1 %v25208_v62, %s20864_s5 }
 0xaed   :  { %13550 = vrot.lane.b32.xlu0 %v25210_v28, %s20864_s5 }
 0xaf0   :  { %13552 = vrot.lane.b32.xlu1 %v25218_v36, %s20864_s5 }
 0xaf1   :  { %13554 = vrot.lane.b32.xlu0 %v25220_v38, %s20864_s5 }
 0xaf4   :  { %13776 = vrot.lane.b32.xlu1 %v25192_v6, %s20865_s13 }
 0xaf5   :  { %13778 = vrot.lane.b32.xlu0 %v25194_v13, %s20865_s13 }
 0xaf8   :  { %13780 = vrot.lane.b32.xlu1 %v25200_v51, %s20865_s13 }
 0xaf9   :  { %13782 = vrot.lane.b32.xlu0 %v25202_v24, %s20865_s13 }
 0xafc   :  { %13784 = vrot.lane.b32.xlu1 %v25208_v62, %s20865_s13 }
 0xafd   :  { %13786 = vrot.lane.b32.xlu0 %v25210_v28, %s20865_s13 }
 0xb00   :  { %13788 = vrot.lane.b32.xlu1 %v25218_v36, %s20865_s13 }
 0xb01   :  { %13790 = vrot.lane.b32.xlu0 %v25220_v38, %s20865_s13 }
 0xb04   :  { %14012 = vrot.lane.b32.xlu1 %v25192_v6, %s20858_s1 }
 0xb05   :  { %14014 = vrot.lane.b32.xlu0 %v25194_v13, %s20858_s1 }
 0xb08   :  { %14016 = vrot.lane.b32.xlu1 %v25200_v51, %s20858_s1 }
 0xb09   :  { %14018 = vrot.lane.b32.xlu0 %v25202_v24, %s20858_s1 }
 0xb0c   :  { %14020 = vrot.lane.b32.xlu1 %v25208_v62, %s20858_s1 }
 0xb0d   :  { %14022 = vrot.lane.b32.xlu0 %v25210_v28, %s20858_s1 }
 0xb10   :  { %14024 = vrot.lane.b32.xlu1 %v25218_v36, %s20858_s1 }
 0xb11   :  { %14026 = vrot.lane.b32.xlu0 %v25220_v38, %s20858_s1  ;;  %s20867_s1 = smov 110  }
 0xb14   :  { %14247 = vrot.lane.b32.xlu1 %v25192_v6, %s20866_s2 }
 0xb15   :  { %14249 = vrot.lane.b32.xlu0 %v25194_v13, %s20866_s2 }
 0xb18   :  { %14251 = vrot.lane.b32.xlu1 %v25200_v51, %s20866_s2 }
 0xb19   :  { %14253 = vrot.lane.b32.xlu0 %v25202_v24, %s20866_s2 }
 0xb1c   :  { %v12674_v30 = vpop.permute.xlu1 %12673  ;;  %14255 = vrot.lane.b32.xlu1 %v25208_v62, %s20866_s2 }
 0xb1d   :  { %v12676_v29 = vpop.permute.xlu0 %12675  ;;  %14257 = vrot.lane.b32.xlu0 %v25210_v28, %s20866_s2 }
 0xb1e   :  { %v12689_v46 = vsel %vm149_vm0, %v12674_v30, %v12676_v29  ;;  %v20709_v29 = vld [vmem:[%s26550_s9] sm:$0xff]  }
 0xb1f   :  { %18014 = vmatpush3.bf16.msra.mxu1 %v12689_v46 }
 0xb20   :  { %14259 = vrot.lane.b32.xlu1 %v25218_v36, %s20866_s2  ;;  %18015 = vmatprep.subr.bf16.mxu1 %v20861_v19 }
 0xb21   :  { %14261 = vrot.lane.b32.xlu0 %v25220_v38, %s20866_s2 }
 0xb24   :  { %v12678_v8 = vpop.permute.xlu1 %12677  ;;  %14483 = vrot.lane.b32.xlu1 %v25192_v6, %s20867_s1 }
 0xb25   :  { %v12680_v42 = vpop.permute.xlu0 %12679  ;;  %14485 = vrot.lane.b32.xlu0 %v25194_v13, %s20867_s1  ;;  %v14788_v13 = vld [vmem:[%s26552_s11 + $0x58] sm:$0xff] }
 0xb26   :  { %v12690_v59 = vsel %vm149_vm0, %v12678_v8, %v12680_v42 }
 0xb27   :  { %18016 = vmatpush3.bf16.msra.mxu1 %v12690_v59 }
 0xb28   :  { %14487 = vrot.lane.b32.xlu1 %v25200_v51, %s20867_s1  ;;  %18017 = vmatprep.subr.bf16.mxu1 %v20861_v19 }
 0xb29   :  { %14489 = vrot.lane.b32.xlu0 %v25202_v24, %s20867_s1  ;;  %v14672_v24 = vld [vmem:[%s26551_s10 + $0x70] sm:$0xff] }
 0xb2c   :  { %v12682_v52 = vpop.permute.xlu1 %12681  ;;  %14491 = vrot.lane.b32.xlu1 %v25208_v62, %s20867_s1 }
 0xb2d   :  { %v12684_v12 = vpop.permute.xlu0 %12683  ;;  %14493 = vrot.lane.b32.xlu0 %v25210_v28, %s20867_s1  ;;  %v14793_v28 = vld [vmem:[%s26552_s11 + $0x80] sm:$0xff] }
 0xb2e   :  { %v12691_v61 = vsel %vm149_vm0, %v12682_v52, %v12684_v12  ;;  %v20710_v52 = vld [vmem:[%s26550_s9 + $0x8] sm:$0xff]  }
 0xb2f   :  { %18018 = vmatpush3.bf16.msra.mxu1 %v12691_v61 }
 0xb30   :  { %14495 = vrot.lane.b32.xlu1 %v25218_v36, %s20867_s1  ;;  %18019 = vmatprep.subr.bf16.mxu1 %v20861_v19 }
 0xb31   :  { %14497 = vrot.lane.b32.xlu0 %v25220_v38, %s20867_s1  ;;  %v20708_v38 = vld [vmem:[%s26550_s9 + $0x84] ss:$0 sps:$4 sm:$0xff]   ;;  %s20868_s1 = smov 123  }
 0xb32   :  { %v12686_v44 = vpop.permute.xlu1 %12685 }
 0xb33   :  { %v12688_v53 = vpop.permute.xlu0 %12687 }
 0xb34   :  { %v12692_v49 = vsel %vm149_vm0, %v12686_v44, %v12688_v53  ;;  %14677 = vperm.xlu1 %19555, %v14658_v1   ;;  %v20711_v53 = vld [vmem:[%s26550_s9 + $0x10] sm:$0xff]   ;;  %vm13320_vm0 = vcmask 982016  }
 0xb35   :  { %v12725_v2 = vsel %vm167_vm1, %v12692_v49, 0  ;;  %14682 = vperm.xlu0 %19554, %v14659_v32   ;;  %v20712_v49 = vld [vmem:[%s26550_s9 + $0x18] sm:$0xff]  }
 0xb36   :  { %18020 = vmatpush3.bf16.msra.mxu1 %v12725_v2  ;;  %v13070_v16 = vpop.permute.xlu1 %13069  ;;  %v20713_v2 = vld [vmem:[%s26550_s9 + $0x20] sm:$0xff]  }
 0xb37   :  { %18057 = vmatprep.subr.bf16.mxu1 %v20861_v19  ;;  %v13072_v36 = vpop.permute.xlu0 %13071 }
 0xb38   :  { %14796 = vperm.xlu1 %19555, %v14777_v54   ;;  %v13085_v46 = vsel %vm915_vm3, %v13070_v16, %v13072_v36  ;;  %v20714_v54 = vld [vmem:[%s26550_s9 + $0x28] sm:$0xff]   ;;  %v20729_v16 = vld [vmem:[%s26550_s9 + $0xdc] sm:$0xff]  }
 0xb39   :  { %14801 = vperm.xlu0 %19554, %v14778_v9   ;;  %18022 = vmatmul.mubr.msk.bf16.vlgmr.msra.gmra.mrb[72].mxu1 %vm12696_vm10, %v20700_v45  ;;  %v20715_v45 = vld [vmem:[%s26550_s9 + $0x30] sm:$0xff]   ;;  %v20716_v9 = vld [vmem:[%s26550_s9 + $0x38] sm:$0xff]   ;;  %v20730_v36 = vld [vmem:[%s26550_s9 + $0xe4] sm:$0xff]  }
 0xb3a   :  { %18058 = vmatpush3.bf16.msra.mxu1 %v25192_v6  ;;  %18025 = vmatprep.mubr.msk.bf16.mxu1 %vm20862_vm9, %v20861_v19  ;;  %v14787_v6 = vld [vmem:[%s26552_s11 + $0x50] sm:$0xff]  ;;  %v13074_v43 = vpop.permute.xlu1 %13073 }
 0xb3b   :  { %18059 = vmatprep.subr.bf16.mxu1 %v20861_v19  ;;  %v13076_v30 = vpop.permute.xlu0 %13075 }
 0xb3c   :  { %14687 = vperm.xlu1 %19555, %v14660_v5   ;;  %v13086_v59 = vsel %vm915_vm3, %v13074_v43, %v13076_v30  ;;  %v20734_v43 = vld [vmem:[%s26550_s9 + $0x104] sm:$0xff]  }
 0xb3d   :  { %14692 = vperm.xlu0 %19554, %v14661_v41  }
 0xb3e   :  { %18060 = vmatpush3.bf16.msra.mxu1 %v25200_v51  ;;  %v20706_v51 = vld [vmem:[%s26550_s9 + $0x74] sm:$0xff]   ;;  %v13078_v8 = vpop.permute.xlu1 %13077 }
 0xb3f   :  { %18061 = vmatprep.subr.bf16.mxu1 %v20861_v19  ;;  %v13080_v42 = vpop.permute.xlu0 %13079 }
 0xb40   :  { %14806 = vperm.xlu1 %19555, %v14779_v7   ;;  %v13087_v1 = vsel %vm915_vm3, %v13078_v8, %v13080_v42  ;;  %v20717_v7 = vld [vmem:[%s26550_s9 + $0x40] ss:$0 sps:$4 sm:$0xff]  }
 0xb41   :  { %14811 = vperm.xlu0 %19554, %v14780_v27   ;;  %18026 = vmatmul.mubr.msk.bf16.gmra.mrb[76].mxu1 %vm12696_vm10, %v20701_v56 }
 0xb42   :  { %18062 = vmatpush3.bf16.msra.mxu1 %v25208_v62  ;;  %18029 = vmatprep.mubr.msk.bf16.mxu1 %vm20862_vm9, %v20861_v19  ;;  %v14792_v62 = vld [vmem:[%s26552_s11 + $0x78] sm:$0xff]  ;;  %v13082_v12 = vpop.permute.xlu1 %13081  ;;  %s20872_s11 = smov 116  }
 0xb43   :  { %18063 = vmatprep.subr.bf16.mxu1 %v20861_v19  ;;  %v13084_v61 = vpop.permute.xlu0 %13083 }
 0xb44   :  { %14697 = vperm.xlu1 %19555, %v14662_v10   ;;  %v13088_v44 = vsel %vm915_vm3, %v13082_v12, %v13084_v61  ;;  %v20718_v10 = vld [vmem:[%s26550_s9 + $0x88] sm:$0xff]   ;;  %vm13556_vm3 = vcmask 973824  }
 0xb45   :  { %14702 = vperm.xlu0 %19554, %v14663_v47   ;;  %v13120_v32 = vsel %vm167_vm1, %v13088_v44, 0  ;;  %v20737_v44 = vld [vmem:[%s26550_s9 + $0x118] sm:$0xff]  }
 0xb46   :  { %18064 = vmatpush3.bf16.msra.mxu1 %v12902_v18  ;;  %v13305_v5 = vpop.permute.xlu1 %13304 }
 0xb47   :  { %18101 = vmatprep.subr.bf16.mxu1 %v20861_v19  ;;  %v13307_v41 = vpop.permute.xlu0 %13306 }
 0xb48   :  { %14816 = vperm.xlu1 %19555, %v14781_v48   ;;  %v13321_v47 = vsel %vm13320_vm0, %v13305_v5, %v13307_v41  ;;  %v20740_v5 = vld [vmem:[%s26550_s9 + $0x130] sm:$0xff]   ;;  %v20741_v41 = vld [vmem:[%s26550_s9 + $0x138] sm:$0xff]  }
 0xb49   :  { %14821 = vperm.xlu0 %19554, %v14782_v11   ;;  %18030 = vmatmul.mubr.msk.bf16.gmra.mrb[80].mxu1 %vm12696_vm10, %v20702_v0  ;;  %v20719_v11 = vld [vmem:[%s26550_s9 + $0x90] sm:$0xff]  }
 0xb4a   :  { %18033 = vmatprep.mubr.msk.bf16.mxu1 %vm20862_vm9, %v20861_v19  ;;  %v13309_v56 = vpop.permute.xlu1 %13308 }
 0xb4b   :  { %v13311_v27 = vpop.permute.xlu0 %13310 }
 0xb4c   :  { %14707 = vperm.xlu1 %19555, %v14664_v4   ;;  %v13322_v0 = vsel %vm13320_vm0, %v13309_v56, %v13311_v27  ;;  %v20743_v56 = vld [vmem:[%s26550_s9 + $0x148] sm:$0xff]  }
 0xb4d   :  { %14712 = vperm.xlu0 %19554, %v14665_v31  }
 0xb4e   :  { %v13313_v18 = vpop.permute.xlu1 %13312 }
 0xb4f   :  { %v13315_v48 = vpop.permute.xlu0 %13314 }
 0xb50   :  { %14826 = vperm.xlu1 %19555, %v14783_v15   ;;  %v13323_v15 = vsel %vm13320_vm0, %v13313_v18, %v13315_v48 }
 0xb51   :  { %14831 = vperm.xlu0 %19554, %v14784_v22   ;;  %18034 = vmatmul.mubr.msk.bf16.gmra.mrb[84].mxu1 %vm12696_vm10, %v20703_v21 }
 0xb52   :  { %18037 = vmatprep.mubr.msk.bf16.mxu1 %vm20862_vm9, %v20861_v19  ;;  %v13317_v4 = vpop.permute.xlu1 %13316 }
 0xb53   :  { %v13319_v31 = vpop.permute.xlu0 %13318 }
 0xb54   :  { %14717 = vperm.xlu1 %19555, %v14666_v33   ;;  %v13324_v21 = vsel %vm13320_vm0, %v13317_v4, %v13319_v31  ;;  %v20720_v33 = vld [vmem:[%s26550_s9 + $0x98] sm:$0xff]  }
 0xb55   :  { %14722 = vperm.xlu0 %19554, %v14667_v60   ;;  %v13356_v22 = vsel %vm167_vm1, %v13324_v21, 0  ;;  %v20721_v60 = vld [vmem:[%s26550_s9 + $0xa0] sm:$0xff]  }
 0xb56   :  { %v20746_v21 = vld [vmem:[%s26550_s9 + $0x15c] sm:$0xff]  }
 0xb58   :  { %14836 = vperm.xlu1 %19555, %v14785_v26   ;;  %v20722_v26 = vld [vmem:[%s26550_s9 + $0xa8] sm:$0xff]  }
 0xb59   :  { %14841 = vperm.xlu0 %19554, %v14786_v57   ;;  %18038 = vmatmul.mubr.msk.bf16.gmra.mrb[88].mxu1 %vm12696_vm10, %v20704_v50  ;;  %v20723_v50 = vld [vmem:[%s26550_s9 + $0xb0] sm:$0xff]   ;;  %v20724_v57 = vld [vmem:[%s26550_s9 + $0xb8] sm:$0xff]  }
 0xb5a   :  { %18041 = vmatprep.mubr.msk.bf16.mxu1 %vm20862_vm9, %v20861_v19 }
 0xb5c   :  { %14727 = vperm.xlu1 %19555, %v14668_v40   ;;  %v20725_v40 = vld [vmem:[%s26550_s9 + $0xc0] sm:$0xff]  }
 0xb5d   :  { %14732 = vperm.xlu0 %19554, %v14669_v63   ;;  %v13541_v63 = vpop.permute.xlu1 %13540 }
 0xb60   :  { %14846 = vperm.xlu1 %19555, %v14787_v6   ;;  %v13543_v6 = vpop.permute.xlu0 %13542 }
 0xb61   :  { %14851 = vperm.xlu0 %19554, %v14788_v13   ;;  %18042 = vmatmul.mubr.msk.bf16.gmra.mrb[92].mxu1 %vm12696_vm10, %v20705_v35  ;;  %v20726_v35 = vld [vmem:[%s26550_s9 + $0xc8] ss:$0 sps:$4 sm:$0xff]   ;;  %v13545_v13 = vpop.permute.xlu1 %13544 }
 0xb62   :  { %18045 = vmatprep.mubr.msk.bf16.mxu1 %vm20862_vm9, %v20861_v19 }
 0xb64   :  { %14737 = vperm.xlu1 %19555, %v14670_v55   ;;  %v13547_v55 = vpop.permute.xlu0 %13546 }
 0xb65   :  { %14742 = vperm.xlu0 %19554, %v14671_v58   ;;  %v20727_v58 = vld [vmem:[%s26550_s9 + $0xcc] sm:$0xff]  }
 0xb68   :  { %14856 = vperm.xlu1 %19555, %v14789_v23   ;;  %v13557_v23 = vsel %vm13556_vm3, %v13541_v63, %v13543_v6  ;;  %v20749_v63 = vld [vmem:[%s26550_s9 + $0x174] sm:$0xff]   ;;  %v20750_v6 = vld [vmem:[%s26550_s9 + $0x17c] sm:$0xff]  }
 0xb69   :  { %14861 = vperm.xlu0 %19554, %v14790_v17   ;;  %18046 = vmatmul.mubr.msk.bf16.gmra.mrb[96].mxu1 %vm12696_vm10, %v20706_v51  ;;  %v13549_v51 = vpop.permute.xlu1 %13548  ;;  %v13551_v17 = vpop.permute.xlu0 %13550 }
 0xb6a   :  { %18049 = vmatprep.mubr.msk.bf16.mxu1 %vm20862_vm9, %v20861_v19 }
 0xb6c   :  { %14747 = vperm.xlu1 %19555, %v14672_v24   ;;  %v13558_v24 = vsel %vm13556_vm3, %v13545_v13, %v13547_v55  ;;  %v20752_v13 = vld [vmem:[%s26550_s9 + $0x18c] sm:$0xff]  }
 0xb6d   :  { %14752 = vperm.xlu0 %19554, %v14673_v39   ;;  %v20728_v39 = vld [vmem:[%s26550_s9 + $0xd4] sm:$0xff]  }
 0xb70   :  { %14866 = vperm.xlu1 %19555, %v14791_v14   ;;  %v13553_v14 = vpop.permute.xlu1 %13552 }
 0xb71   :  { %14871 = vperm.xlu0 %19554, %v14792_v62   ;;  %18050 = vmatmul.mubr.msk.bf16.gmra.mrb[100].mxu1 %vm12696_vm10, %v20707_v20  ;;  %v13555_v20 = vpop.permute.xlu0 %13554  ;;  %v13559_v62 = vsel %vm13556_vm3, %v13549_v51, %v13551_v17 }
 0xb72   :  { %18053 = vmatprep.mubr.msk.bf16.mxu1 %vm20862_vm9, %v20861_v19 }
 0xb74   :  { %14757 = vperm.xlu1 %19555, %v14674_v25   ;;  %v13560_v25 = vsel %vm13556_vm3, %v13553_v14, %v13555_v20  ;;  %v13777_v30 = vpop.permute.xlu1 %13776 }
 0xb75   :  { %14876 = vperm.xlu0 %19554, %v14793_v28   ;;  %v13592_v28 = vsel %vm167_vm1, %v13560_v25, 0  ;;  %v20755_v25 = vld [vmem:[%s26550_s9 + $0x1a0] sm:$0xff]  }
 0xb78   :  { %15105 = vperm.xlu1 %19555, %v15101_v37   ;;  %v20731_v37 = vld [vmem:[%s26550_s9 + $0xec] sm:$0xff]   ;;  %v13781_v8 = vpop.permute.xlu1 %13780 }
 0xb79   :  { %15110 = vperm.xlu0 %19554, %v15102_v34   ;;  %18054 = vmatmul.mubr.msk.bf16.gmra.mrb[104].mxu1 %vm12696_vm10, %v20708_v38  ;;  %v20732_v38 = vld [vmem:[%s26550_s9 + $0xf4] sm:$0xff]   ;;  %v20733_v34 = vld [vmem:[%s26550_s9 + $0xfc] sm:$0xff]  }
 0xb7a   :  { %18065 = vmatprep.mubr.msk.bf16.mxu1 %vm20862_vm9, %v20861_v19 }
 0xb7c   :  { %v13785_v12 = vpop.permute.xlu1 %13784 }
 0xb81   :  { %18066 = vmatmul.mubr.msk.bf16.vlgmr.msra.gmra.mrb[72].mxu1 %vm12696_vm10, %v20709_v29  ;;  %v13779_v29 = vpop.permute.xlu0 %13778 }
 0xb82   :  { %18102 = vmatpush3.bf16.msra.mxu1 %v13085_v46  ;;  %18069 = vmatprep.mubr.msk.bf16.mxu1 %vm20862_vm9, %v20861_v19  ;;  %v20735_v46 = vld [vmem:[%s26550_s9 + $0x10c] ss:$0 sps:$4 sm:$0xff]  }
 0xb83   :  { %18103 = vmatprep.subr.bf16.mxu1 %v20861_v19 }
 0xb85   :  { %v13783_v42 = vpop.permute.xlu0 %13782 }
 0xb86   :  { %18104 = vmatpush3.bf16.msra.mxu1 %v13086_v59  ;;  %v20736_v59 = vld [vmem:[%s26550_s9 + $0x110] sm:$0xff]  }
 0xb87   :  { %18105 = vmatprep.subr.bf16.mxu1 %v20861_v19 }
 0xb89   :  { %18070 = vmatmul.mubr.msk.bf16.gmra.mrb[76].mxu1 %vm12696_vm10, %v20710_v52  ;;  %v13793_v52 = vsel %vm13792_vm11, %v13777_v30, %v13779_v29  ;;  %v13787_v61 = vpop.permute.xlu0 %13786  ;;  %v20758_v30 = vld [vmem:[%s26550_s9 + $0x1b8] sm:$0xff]   ;;  %v20759_v29 = vld [vmem:[%s26550_s9 + $0x1c0] sm:$0xff]  }
 0xb8a   :  { %18106 = vmatpush3.bf16.msra.mxu1 %v13087_v1  ;;  %18073 = vmatprep.mubr.msk.bf16.mxu1 %vm20862_vm9, %v20861_v19  ;;  %v13794_v1 = vsel %vm13792_vm11, %v13781_v8, %v13783_v42  ;;  %v20761_v8 = vld [vmem:[%s26550_s9 + $0x1d0] sm:$0xff]  }
 0xb8b   :  { %18107 = vmatprep.subr.bf16.mxu1 %v20861_v19 }
 0xb8e   :  { %18108 = vmatpush3.bf16.msra.mxu1 %v13120_v32  ;;  %v13789_v32 = vpop.permute.xlu1 %13788 }
 0xb8f   :  { %18145 = vmatprep.subr.bf16.mxu1 %v20861_v19 }
 0xb91   :  { %18074 = vmatmul.mubr.msk.bf16.gmra.mrb[80].mxu1 %vm12696_vm10, %v20711_v53  ;;  %v13791_v53 = vpop.permute.xlu0 %13790 }
 0xb92   :  { %18077 = vmatprep.mubr.msk.bf16.mxu1 %vm20862_vm9, %v20861_v19  ;;  %v14013_v27 = vpop.permute.xlu1 %14012 }
 0xb96   :  { %v14017_v18 = vpop.permute.xlu1 %14016 }
 0xb99   :  { %18078 = vmatmul.mubr.msk.bf16.gmra.mrb[84].mxu1 %vm12696_vm10, %v20712_v49  ;;  %v13795_v49 = vsel %vm13792_vm11, %v13785_v12, %v13787_v61 }
 0xb9a   :  { %18081 = vmatprep.mubr.msk.bf16.mxu1 %vm20862_vm9, %v20861_v19  ;;  %v14021_v4 = vpop.permute.xlu1 %14020 }
 0xba1   :  { %18082 = vmatmul.mubr.msk.bf16.gmra.mrb[88].mxu1 %vm12696_vm10, %v20713_v2  ;;  %v13796_v2 = vsel %vm13792_vm11, %v13789_v32, %v13791_v53 }
 0xba2   :  { %18085 = vmatprep.mubr.msk.bf16.mxu1 %vm20862_vm9, %v20861_v19 }
 0xba9   :  { %18086 = vmatmul.mubr.msk.bf16.gmra.mrb[92].mxu1 %vm12696_vm10, %v20714_v54  ;;  %v13828_v54 = vsel %vm167_vm1, %v13796_v2, 0  ;;  %v20764_v2 = vld [vmem:[%s26550_s9 + $0x1e4] sm:$0xff]  }
 0xbaa   :  { %18089 = vmatprep.mubr.msk.bf16.mxu1 %vm20862_vm9, %v20861_v19 }
 0xbb1   :  { %18090 = vmatmul.mubr.msk.bf16.gmra.mrb[96].mxu1 %vm12696_vm10, %v20715_v45  ;;  %v20738_v45 = vld [vmem:[%s26550_s9 + $0x120] sm:$0xff]  }
 0xbb2   :  { %18093 = vmatprep.mubr.msk.bf16.mxu1 %vm20862_vm9, %v20861_v19 }
 0xbb9   :  { %18094 = vmatmul.mubr.msk.bf16.gmra.mrb[100].mxu1 %vm12696_vm10, %v20716_v9  ;;  %v20739_v9 = vld [vmem:[%s26550_s9 + $0x128] sm:$0xff]  }
 0xbba   :  { %18097 = vmatprep.mubr.msk.bf16.mxu1 %vm20862_vm9, %v20861_v19 }
 0xbc1   :  { %18098 = vmatmul.mubr.msk.bf16.gmra.mrb[104].mxu1 %vm12696_vm10, %v20717_v7  ;;  %v20742_v7 = vld [vmem:[%s26550_s9 + $0x140] sm:$0xff]  }
 0xbc2   :  { %18109 = vmatprep.mubr.msk.bf16.mxu1 %vm20862_vm9, %v20861_v19 }
 0xbc9   :  { %18110 = vmatmul.mubr.msk.bf16.vlgmr.msra.gmra.mrb[72].mxu1 %vm12696_vm10, %v20718_v10  ;;  %v14015_v10 = vpop.permute.xlu0 %14014 }
 0xbca   :  { %18146 = vmatpush3.bf16.msra.mxu1 %v13321_v47  ;;  %18113 = vmatprep.mubr.msk.bf16.mxu1 %vm20862_vm9, %v20861_v19  ;;  %v20744_v47 = vld [vmem:[%s26550_s9 + $0x150] ss:$0 sps:$4 sm:$0xff]  }
 0xbcb   :  { %18147 = vmatprep.subr.bf16.mxu1 %v20861_v19 }
 0xbcd   :  { %v14019_v48 = vpop.permute.xlu0 %14018 }
 0xbce   :  { %18148 = vmatpush3.bf16.msra.mxu1 %v13322_v0  ;;  %v20745_v0 = vld [vmem:[%s26550_s9 + $0x154] sm:$0xff]  }
 0xbcf   :  { %18149 = vmatprep.subr.bf16.mxu1 %v20861_v19 }
 0xbd1   :  { %18114 = vmatmul.mubr.msk.bf16.gmra.mrb[76].mxu1 %vm12696_vm10, %v20719_v11  ;;  %v14028_v11 = vsel %vm10996_vm5, %v14013_v27, %v14015_v10  ;;  %v14023_v31 = vpop.permute.xlu0 %14022  ;;  %v20767_v27 = vld [vmem:[%s26550_s9 + $0x1fc] sm:$0xff]   ;;  %v20768_v10 = vld [vmem:[%s26550_s9 + $0x204] sm:$0xff]  }
 0xbd2   :  { %18150 = vmatpush3.bf16.msra.mxu1 %v13323_v15  ;;  %18117 = vmatprep.mubr.msk.bf16.mxu1 %vm20862_vm9, %v20861_v19  ;;  %v14029_v15 = vsel %vm10996_vm5, %v14017_v18, %v14019_v48  ;;  %v20770_v18 = vld [vmem:[%s26550_s9 + $0x214] sm:$0xff]   ;;  %v20771_v48 = vld [vmem:[%s26550_s9 + $0x21c] ss:$0 sps:$4 sm:$0xff]  }
 0xbd3   :  { %18151 = vmatprep.subr.bf16.mxu1 %v20861_v19 }
 0xbd6   :  { %18152 = vmatpush3.bf16.msra.mxu1 %v13356_v22  ;;  %v14025_v22 = vpop.permute.xlu1 %14024 }
 0xbd7   :  { %18189 = vmatprep.subr.bf16.mxu1 %v20861_v19 }
 0xbd9   :  { %18118 = vmatmul.mubr.msk.bf16.gmra.mrb[80].mxu1 %vm12696_vm10, %v20720_v33  ;;  %v14027_v33 = vpop.permute.xlu0 %14026 }
 0xbda   :  { %18121 = vmatprep.mubr.msk.bf16.mxu1 %vm20862_vm9, %v20861_v19  ;;  %v14248_v55 = vpop.permute.xlu1 %14247 }
 0xbde   :  { %v14252_v51 = vpop.permute.xlu1 %14251 }
 0xbe1   :  { %18122 = vmatmul.mubr.msk.bf16.gmra.mrb[84].mxu1 %vm12696_vm10, %v20721_v60  ;;  %v14030_v60 = vsel %vm10996_vm5, %v14021_v4, %v14023_v31  ;;  %v20782_v4 = vld [vmem:[%s26554_s12 + $0x8] sm:$0xff]  }
 0xbe2   :  { %18125 = vmatprep.mubr.msk.bf16.mxu1 %vm20862_vm9, %v20861_v19  ;;  %v14256_v14 = vpop.permute.xlu1 %14255  ;;  %v20773_v31 = vld [vmem:[%s26550_s9 + $0x228] sm:$0xff]  }
 0xbe9   :  { %18126 = vmatmul.mubr.msk.bf16.gmra.mrb[88].mxu1 %vm12696_vm10, %v20722_v26  ;;  %v14031_v26 = vsel %vm10996_vm5, %v14025_v22, %v14027_v33  ;;  %v20774_v22 = vld [vmem:[%s26550_s9 + $0x230] sm:$0xff]   ;;  %v20785_v33 = vld [vmem:[%s26554_s12 + $0x20] sm:$0xff]   ;;  %vm16225_vm5 = vcmask 9216  }
 0xbea   :  { %18129 = vmatprep.mubr.msk.bf16.mxu1 %vm20862_vm9, %v20861_v19 }
 0xbf1   :  { %18130 = vmatmul.mubr.msk.bf16.gmra.mrb[92].mxu1 %vm12696_vm10, %v20723_v50  ;;  %v14063_v50 = vsel %vm167_vm1, %v14031_v26, 0  ;;  %v20775_v26 = vld [vmem:[%s26550_s9 + $0x238] sm:$0xff]  }
 0xbf2   :  { %18133 = vmatprep.mubr.msk.bf16.mxu1 %vm20862_vm9, %v20861_v19 }
 0xbf9   :  { %18134 = vmatmul.mubr.msk.bf16.gmra.mrb[96].mxu1 %vm12696_vm10, %v20724_v57  ;;  %v20747_v57 = vld [vmem:[%s26550_s9 + $0x164] sm:$0xff]  }
 0xbfa   :  { %18137 = vmatprep.mubr.msk.bf16.mxu1 %vm20862_vm9, %v20861_v19 }
 0xc01   :  { %18138 = vmatmul.mubr.msk.bf16.gmra.mrb[100].mxu1 %vm12696_vm10, %v20725_v40  ;;  %v20748_v40 = vld [vmem:[%s26550_s9 + $0x16c] sm:$0xff]  }
 0xc02   :  { %18141 = vmatprep.mubr.msk.bf16.mxu1 %vm20862_vm9, %v20861_v19 }
 0xc09   :  { %18142 = vmatmul.mubr.msk.bf16.gmra.mrb[104].mxu1 %vm12696_vm10, %v20726_v35  ;;  %v20751_v35 = vld [vmem:[%s26550_s9 + $0x184] sm:$0xff]  }
 0xc0a   :  { %18153 = vmatprep.mubr.msk.bf16.mxu1 %vm20862_vm9, %v20861_v19 }
 0xc11   :  { %18154 = vmatmul.mubr.msk.bf16.vlgmr.msra.gmra.mrb[72].mxu1 %vm12696_vm10, %v20727_v58  ;;  %v14250_v58 = vpop.permute.xlu0 %14249 }
 0xc12   :  { %18190 = vmatpush3.bf16.msra.mxu1 %v13557_v23  ;;  %18157 = vmatprep.mubr.msk.bf16.mxu1 %vm20862_vm9, %v20861_v19  ;;  %v20753_v23 = vld [vmem:[%s26550_s9 + $0x194] ss:$0 sps:$4 sm:$0xff]  }
 0xc13   :  { %18191 = vmatprep.subr.bf16.mxu1 %v20861_v19 }
 0xc15   :  { %v14254_v17 = vpop.permute.xlu0 %14253 }
 0xc16   :  { %18192 = vmatpush3.bf16.msra.mxu1 %v13558_v24  ;;  %v20754_v24 = vld [vmem:[%s26550_s9 + $0x198] sm:$0xff]  }
 0xc17   :  { %18193 = vmatprep.subr.bf16.mxu1 %v20861_v19 }
 0xc19   :  { %18158 = vmatmul.mubr.msk.bf16.gmra.mrb[76].mxu1 %vm12696_vm10, %v20728_v39  ;;  %v14264_v39 = vsel %vm14263_vm12, %v14248_v55, %v14250_v58  ;;  %v14258_v20 = vpop.permute.xlu0 %14257 }
 0xc1a   :  { %18194 = vmatpush3.bf16.msra.mxu1 %v13559_v62  ;;  %18161 = vmatprep.mubr.msk.bf16.mxu1 %vm20862_vm9, %v20861_v19  ;;  %v14265_v62 = vsel %vm14263_vm12, %v14252_v51, %v14254_v17 }
 0xc1b   :  { %18195 = vmatprep.subr.bf16.mxu1 %v20861_v19 }
 0xc1e   :  { %18196 = vmatpush3.bf16.msra.mxu1 %v13592_v28  ;;  %v14260_v28 = vpop.permute.xlu1 %14259 }
 0xc1f   :  { %18233 = vmatprep.subr.bf16.mxu1 %v20861_v19 }
 0xc21   :  { %18162 = vmatmul.mubr.msk.bf16.gmra.mrb[80].mxu1 %vm12696_vm10, %v20729_v16  ;;  %v14262_v16 = vpop.permute.xlu0 %14261 }
 0xc22   :  { %18165 = vmatprep.mubr.msk.bf16.mxu1 %vm20862_vm9, %v20861_v19  ;;  %v14484_v42 = vpop.permute.xlu1 %14483 }
 0xc26   :  { %v14488_v12 = vpop.permute.xlu1 %14487 }
 0xc29   :  { %18166 = vmatmul.mubr.msk.bf16.gmra.mrb[84].mxu1 %vm12696_vm10, %v20730_v36  ;;  %v14266_v36 = vsel %vm14263_vm12, %v14256_v14, %v14258_v20 }
 0xc2a   :  { %18169 = vmatprep.mubr.msk.bf16.mxu1 %vm20862_vm9, %v20861_v19  ;;  %v14492_v32 = vpop.permute.xlu1 %14491 }
 0xc31   :  { %18170 = vmatmul.mubr.msk.bf16.gmra.mrb[88].mxu1 %vm12696_vm10, %v20731_v37  ;;  %v14267_v37 = vsel %vm14263_vm12, %v14260_v28, %v14262_v16 }
 0xc32   :  { %18173 = vmatprep.mubr.msk.bf16.mxu1 %vm20862_vm9, %v20861_v19 }
 0xc39   :  { %18174 = vmatmul.mubr.msk.bf16.gmra.mrb[92].mxu1 %vm12696_vm10, %v20732_v38  ;;  %v14299_v38 = vsel %vm167_vm1, %v14267_v37, 0 }
 0xc3a   :  { %18177 = vmatprep.mubr.msk.bf16.mxu1 %vm20862_vm9, %v20861_v19 }
 0xc41   :  { %18178 = vmatmul.mubr.msk.bf16.gmra.mrb[96].mxu1 %vm12696_vm10, %v20733_v34  ;;  %v20756_v34 = vld [vmem:[%s26550_s9 + $0x1a8] sm:$0xff]  }
 0xc42   :  { %18181 = vmatprep.mubr.msk.bf16.mxu1 %vm20862_vm9, %v20861_v19 }
 0xc49   :  { %18182 = vmatmul.mubr.msk.bf16.gmra.mrb[100].mxu1 %vm12696_vm10, %v20734_v43  ;;  %v20757_v43 = vld [vmem:[%s26550_s9 + $0x1b0] sm:$0xff]  }
 0xc4a   :  { %18185 = vmatprep.mubr.msk.bf16.mxu1 %vm20862_vm9, %v20861_v19 }
 0xc51   :  { %18186 = vmatmul.mubr.msk.bf16.gmra.mrb[104].mxu1 %vm12696_vm10, %v20735_v46  ;;  %v20760_v46 = vld [vmem:[%s26550_s9 + $0x1c8] sm:$0xff]  }
 0xc52   :  { %18197 = vmatprep.mubr.msk.bf16.mxu1 %vm20862_vm9, %v20861_v19 }
 0xc59   :  { %18198 = vmatmul.mubr.msk.bf16.vlgmr.msra.gmra.mrb[72].mxu1 %vm12696_vm10, %v20736_v59  ;;  %v14486_v59 = vpop.permute.xlu0 %14485 }
 0xc5a   :  { %18234 = vmatpush3.bf16.msra.mxu1 %v13793_v52  ;;  %18201 = vmatprep.mubr.msk.bf16.mxu1 %vm20862_vm9, %v20861_v19  ;;  %v20762_v52 = vld [vmem:[%s26550_s9 + $0x1d8] ss:$0 sps:$4 sm:$0xff]  }
 0xc5b   :  { %18235 = vmatprep.subr.bf16.mxu1 %v20861_v19 }
 0xc5d   :  { %v14490_v61 = vpop.permute.xlu0 %14489 }
 0xc5e   :  { %18236 = vmatpush3.bf16.msra.mxu1 %v13794_v1  ;;  %v20763_v1 = vld [vmem:[%s26550_s9 + $0x1dc] sm:$0xff]  }
 0xc5f   :  { %18237 = vmatprep.subr.bf16.mxu1 %v20861_v19 }
 0xc61   :  { %18202 = vmatmul.mubr.msk.bf16.gmra.mrb[76].mxu1 %vm12696_vm10, %v20737_v44  ;;  %v14500_v44 = vsel %vm14499_vm13, %v14484_v42, %v14486_v59  ;;  %v14494_v53 = vpop.permute.xlu0 %14493 }
 0xc62   :  { %18238 = vmatpush3.bf16.msra.mxu1 %v13795_v49  ;;  %18205 = vmatprep.mubr.msk.bf16.mxu1 %vm20862_vm9, %v20861_v19  ;;  %v14501_v49 = vsel %vm14499_vm13, %v14488_v12, %v14490_v61 }
 0xc63   :  { %18239 = vmatprep.subr.bf16.mxu1 %v20861_v19 }
 0xc66   :  { %18240 = vmatpush3.bf16.msra.mxu1 %v13828_v54  ;;  %v14496_v54 = vpop.permute.xlu1 %14495 }
 0xc67   :  { %18277 = vmatprep.subr.bf16.mxu1 %v20861_v19 }
 0xc69   :  { %18206 = vmatmul.mubr.msk.bf16.gmra.mrb[80].mxu1 %vm12696_vm10, %v20738_v45  ;;  %v14498_v45 = vpop.permute.xlu0 %14497 }
 0xc6a   :  { %18209 = vmatprep.mubr.msk.bf16.mxu1 %vm20862_vm9, %v20861_v19  ;;  %v14678_v55 = vpop.permute.xlu1 %14677 }
 0xc6d   :  { %v14683_v58 = vpop.permute.xlu0 %14682 }
 0xc71   :  { %18210 = vmatmul.mubr.msk.bf16.gmra.mrb[84].mxu1 %vm12696_vm10, %v20739_v9  ;;  %v14502_v9 = vsel %vm14499_vm13, %v14492_v32, %v14494_v53  ;;  %v14802_v51 = vpop.permute.xlu0 %14801 }
 0xc72   :  { %18213 = vmatprep.mubr.msk.bf16.mxu1 %vm20862_vm9, %v20861_v19 }
 0xc79   :  { %18214 = vmatmul.mubr.msk.bf16.gmra.mrb[88].mxu1 %vm12696_vm10, %v20740_v5  ;;  %v14503_v5 = vsel %vm14499_vm13, %v14496_v54, %v14498_v45 }
 0xc7a   :  { %18217 = vmatprep.mubr.msk.bf16.mxu1 %vm20862_vm9, %v20861_v19 }
 0xc81   :  { %18218 = vmatmul.mubr.msk.bf16.gmra.mrb[92].mxu1 %vm12696_vm10, %v20741_v41  ;;  %v14535_v41 = vsel %vm167_vm1, %v14503_v5, 0 }
 0xc82   :  { %18221 = vmatprep.mubr.msk.bf16.mxu1 %vm20862_vm9, %v20861_v19 }
 0xc89   :  { %18222 = vmatmul.mubr.msk.bf16.gmra.mrb[96].mxu1 %vm12696_vm10, %v20742_v7  ;;  %v20765_v7 = vld [vmem:[%s26550_s9 + $0x1ec] sm:$0xff]  }
 0xc8a   :  { %18225 = vmatprep.mubr.msk.bf16.mxu1 %vm20862_vm9, %v20861_v19 }
 0xc91   :  { %18226 = vmatmul.mubr.msk.bf16.gmra.mrb[100].mxu1 %vm12696_vm10, %v20743_v56  ;;  %v20766_v56 = vld [vmem:[%s26550_s9 + $0x1f4] sm:$0xff]  }
 0xc92   :  { %18229 = vmatprep.mubr.msk.bf16.mxu1 %vm20862_vm9, %v20861_v19 }
 0xc99   :  { %18230 = vmatmul.mubr.msk.bf16.gmra.mrb[104].mxu1 %vm12696_vm10, %v20744_v47  ;;  %v20769_v47 = vld [vmem:[%s26550_s9 + $0x20c] sm:$0xff]  }
 0xc9a   :  { %18241 = vmatprep.mubr.msk.bf16.mxu1 %vm20862_vm9, %v20861_v19 }
 0xca1   :  { %18242 = vmatmul.mubr.msk.bf16.vlgmr.msra.gmra.mrb[72].mxu1 %vm12696_vm10, %v20745_v0  ;;  %v20772_v0 = vld [vmem:[%s26550_s9 + $0x220] sm:$0xff]  }
 0xca2   :  { %18278 = vmatpush3.bf16.msra.mxu1 %v14028_v11  ;;  %18245 = vmatprep.mubr.msk.bf16.mxu1 %vm20862_vm9, %v20861_v19  ;;  %v20781_v11 = vld [vmem:[%s26554_s12] sm:$0xff]  }
 0xca3   :  { %18279 = vmatprep.subr.bf16.mxu1 %v20861_v19 }
 0xca6   :  { %18280 = vmatpush3.bf16.msra.mxu1 %v14029_v15  ;;  %v20783_v15 = vld [vmem:[%s26554_s12 + $0x10] sm:$0xff]  }
 0xca7   :  { %18281 = vmatprep.subr.bf16.mxu1 %v20861_v19 }
 0xca9   :  { %18246 = vmatmul.mubr.msk.bf16.gmra.mrb[76].mxu1 %vm12696_vm10, %v20746_v21  ;;  %v20784_v21 = vld [vmem:[%s26554_s12 + $0x18] sm:$0xff]  }
 0xcaa   :  { %18282 = vmatpush3.bf16.msra.mxu1 %v14030_v60  ;;  %18249 = vmatprep.mubr.msk.bf16.mxu1 %vm20862_vm9, %v20861_v19  ;;  %v20786_v60 = vld [vmem:[%s26554_s12 + $0x28] sm:$0xff]  }
 0xcab   :  { %18283 = vmatprep.subr.bf16.mxu1 %v20861_v19 }
 0xcae   :  { %18284 = vmatpush3.bf16.msra.mxu1 %v14063_v50  ;;  %v20787_v50 = vld [vmem:[%s26554_s12 + $0x30] sm:$0xff]  }
 0xcaf   :  { %18321 = vmatprep.subr.bf16.mxu1 %v20861_v19 }
 0xcb1   :  { %18250 = vmatmul.mubr.msk.bf16.gmra.mrb[80].mxu1 %vm12696_vm10, %v20747_v57  ;;  %v20776_v57 = vld [vmem:[%s26550_s9 + $0x240] sm:$0xff]  }
 0xcb2   :  { %18253 = vmatprep.mubr.msk.bf16.mxu1 %vm20862_vm9, %v20861_v19 }
 0xcb9   :  { %18254 = vmatmul.mubr.msk.bf16.gmra.mrb[84].mxu1 %vm12696_vm10, %v20748_v40  ;;  %v20777_v40 = vld [vmem:[%s26550_s9 + $0x248] sm:$0xff]  }
 0xcba   :  { %18257 = vmatprep.mubr.msk.bf16.mxu1 %vm20862_vm9, %v20861_v19 }
 0xcc1   :  { %18258 = vmatmul.mubr.msk.bf16.gmra.mrb[88].mxu1 %vm12696_vm10, %v20749_v63  ;;  %v20778_v63 = vld [vmem:[%s26550_s9 + $0x250] sm:$0xff]  }
 0xcc2   :  { %18261 = vmatprep.mubr.msk.bf16.mxu1 %vm20862_vm9, %v20861_v19 }
 0xcc9   :  { %18262 = vmatmul.mubr.msk.bf16.gmra.mrb[92].mxu1 %vm12696_vm10, %v20750_v6  ;;  %v20779_v6 = vld [vmem:[%s26550_s9 + $0x258] sm:$0xff]  }
 0xcca   :  { %18265 = vmatprep.mubr.msk.bf16.mxu1 %vm20862_vm9, %v20861_v19 }
 0xcd1   :  { %18266 = vmatmul.mubr.msk.bf16.gmra.mrb[96].mxu1 %vm12696_vm10, %v20751_v35  ;;  %v20780_v35 = vld [vmem:[%s26550_s9 + $0x260] ss:$0 sps:$4 sm:$0xff]  }
 0xcd2   :  { %18269 = vmatprep.mubr.msk.bf16.mxu1 %vm20862_vm9, %v20861_v19 }
 0xcd9   :  { %18270 = vmatmul.mubr.msk.bf16.gmra.mrb[100].mxu1 %vm12696_vm10, %v20752_v13  ;;  %v20788_v13 = vld [vmem:[%s26554_s12 + $0x38] sm:$0xff]  }
 0xcda   :  { %18273 = vmatprep.mubr.msk.bf16.mxu1 %vm20862_vm9, %v20861_v19 }
 0xce1   :  { %18274 = vmatmul.mubr.msk.bf16.gmra.mrb[104].mxu1 %vm12696_vm10, %v20753_v23  ;;  %v14797_v23 = vpop.permute.xlu1 %14796 }
 0xce2   :  { %18285 = vmatprep.mubr.msk.bf16.mxu1 %vm20862_vm9, %v20861_v19 }
 0xce5   :  { %v14688_v17 = vpop.permute.xlu1 %14687 }
 0xce9   :  { %18286 = vmatmul.mubr.msk.bf16.vlgmr.msra.gmra.mrb[72].mxu1 %vm12696_vm10, %v20754_v24  ;;  %v14693_v24 = vpop.permute.xlu0 %14692 }
 0xcea   :  { %18322 = vmatpush3.bf16.msra.mxu1 %v14264_v39  ;;  %18289 = vmatprep.mubr.msk.bf16.mxu1 %vm20862_vm9, %v20861_v19  ;;  %v14807_v39 = vpop.permute.xlu1 %14806 }
 0xceb   :  { %18323 = vmatprep.subr.bf16.mxu1 %v20861_v19 }
 0xced   :  { %v14812_v14 = vpop.permute.xlu0 %14811 }
 0xcee   :  { %18324 = vmatpush3.bf16.msra.mxu1 %v14265_v62  ;;  %v14698_v20 = vpop.permute.xlu1 %14697 }
 0xcef   :  { %18325 = vmatprep.subr.bf16.mxu1 %v20861_v19 }
 0xcf1   :  { %18290 = vmatmul.mubr.msk.bf16.gmra.mrb[76].mxu1 %vm12696_vm10, %v20755_v25  ;;  %v14703_v62 = vpop.permute.xlu0 %14702 }
 0xcf2   :  { %18326 = vmatpush3.bf16.msra.mxu1 %v14266_v36  ;;  %18293 = vmatprep.mubr.msk.bf16.mxu1 %vm20862_vm9, %v20861_v19  ;;  %v14817_v25 = vpop.permute.xlu1 %14816 }
 0xcf3   :  { %18327 = vmatprep.subr.bf16.mxu1 %v20861_v19 }
 0xcf5   :  { %v14822_v28 = vpop.permute.xlu0 %14821 }
 0xcf6   :  { %18328 = vmatpush3.bf16.msra.mxu1 %v14299_v38 }
 0xcf7   :  { %18365 = vmatprep.subr.bf16.mxu1 %v20861_v19 }
 0xcf9   :  { %18294 = vmatmul.mubr.msk.bf16.gmra.mrb[80].mxu1 %vm12696_vm10, %v20756_v34 }
 0xcfa   :  { %18297 = vmatprep.mubr.msk.bf16.mxu1 %vm20862_vm9, %v20861_v19 }
 0xd01   :  { %18298 = vmatmul.mubr.msk.bf16.gmra.mrb[84].mxu1 %vm12696_vm10, %v20757_v43 }
 0xd02   :  { %18301 = vmatprep.mubr.msk.bf16.mxu1 %vm20862_vm9, %v20861_v19 }
 0xd09   :  { %18302 = vmatmul.mubr.msk.bf16.gmra.mrb[88].mxu1 %vm12696_vm10, %v20758_v30 }
 0xd0a   :  { %18305 = vmatprep.mubr.msk.bf16.mxu1 %vm20862_vm9, %v20861_v19 }
 0xd11   :  { %18306 = vmatmul.mubr.msk.bf16.gmra.mrb[92].mxu1 %vm12696_vm10, %v20759_v29  ;;  %v14708_v29 = vpop.permute.xlu1 %14707 }
 0xd12   :  { %18309 = vmatprep.mubr.msk.bf16.mxu1 %vm20862_vm9, %v20861_v19 }
 0xd19   :  { %18310 = vmatmul.mubr.msk.bf16.gmra.mrb[96].mxu1 %vm12696_vm10, %v20760_v46 }
 0xd1a   :  { %18313 = vmatprep.mubr.msk.bf16.mxu1 %vm20862_vm9, %v20861_v19 }
 0xd21   :  { %18314 = vmatmul.mubr.msk.bf16.gmra.mrb[100].mxu1 %vm12696_vm10, %v20761_v8  ;;  %v14713_v8 = vpop.permute.xlu0 %14712 }
 0xd22   :  { %18317 = vmatprep.mubr.msk.bf16.mxu1 %vm20862_vm9, %v20861_v19 }
 0xd25   :  { %v14832_v54 = vpop.permute.xlu0 %14831 }
 0xd29   :  { %18318 = vmatmul.mubr.msk.bf16.gmra.mrb[104].mxu1 %vm12696_vm10, %v20762_v52 }
 0xd2a   :  { %18329 = vmatprep.mubr.msk.bf16.mxu1 %vm20862_vm9, %v20861_v19 }
 0xd31   :  { %18330 = vmatmul.mubr.msk.bf16.vlgmr.msra.gmra.mrb[72].mxu1 %vm12696_vm10, %v20763_v1 }
 0xd32   :  { %18366 = vmatpush3.bf16.msra.mxu1 %v14500_v44  ;;  %18333 = vmatprep.mubr.msk.bf16.mxu1 %vm20862_vm9, %v20861_v19  ;;  %v14827_v44 = vpop.permute.xlu1 %14826 }
 0xd33   :  { %18367 = vmatprep.subr.bf16.mxu1 %v20861_v19 }
 0xd36   :  { %18368 = vmatpush3.bf16.msra.mxu1 %v14501_v49 }
 0xd37   :  { %18369 = vmatprep.subr.bf16.mxu1 %v20861_v19 }
 0xd39   :  { %18334 = vmatmul.mubr.msk.bf16.gmra.mrb[76].mxu1 %vm12696_vm10, %v20764_v2 }
 0xd3a   :  { %18370 = vmatpush3.bf16.msra.mxu1 %v14502_v9  ;;  %18337 = vmatprep.mubr.msk.bf16.mxu1 %vm20862_vm9, %v20861_v19 }
 0xd3b   :  { %18371 = vmatprep.subr.bf16.mxu1 %v20861_v19 }
 0xd3e   :  { %18372 = vmatpush3.bf16.msra.mxu1 %v14535_v41  ;;  %v14718_v41 = vpop.permute.xlu1 %14717 }
 0xd3f   :  { %18409 = vmatprep.subr.bf16.mxu1 %v20861_v19 }
 0xd41   :  { %18338 = vmatmul.mubr.msk.bf16.gmra.mrb[80].mxu1 %vm12696_vm10, %v20765_v7 }
 0xd42   :  { %18341 = vmatprep.mubr.msk.bf16.mxu1 %vm20862_vm9, %v20861_v19 }
 0xd49   :  { %18342 = vmatmul.mubr.msk.bf16.gmra.mrb[84].mxu1 %vm12696_vm10, %v20766_v56 }
 0xd4a   :  { %18345 = vmatprep.mubr.msk.bf16.mxu1 %vm20862_vm9, %v20861_v19 }
 0xd51   :  { %18346 = vmatmul.mubr.msk.bf16.gmra.mrb[88].mxu1 %vm12696_vm10, %v20767_v27 }
 0xd52   :  { %18349 = vmatprep.mubr.msk.bf16.mxu1 %vm20862_vm9, %v20861_v19 }
 0xd59   :  { %18350 = vmatmul.mubr.msk.bf16.gmra.mrb[92].mxu1 %vm12696_vm10, %v20768_v10 }
 0xd5a   :  { %18353 = vmatprep.mubr.msk.bf16.mxu1 %vm20862_vm9, %v20861_v19 }
 0xd61   :  { %18354 = vmatmul.mubr.msk.bf16.gmra.mrb[96].mxu1 %vm12696_vm10, %v20769_v47  ;;  %v14723_v47 = vpop.permute.xlu0 %14722 }
 0xd62   :  { %18357 = vmatprep.mubr.msk.bf16.mxu1 %vm20862_vm9, %v20861_v19 }
 0xd69   :  { %18358 = vmatmul.mubr.msk.bf16.gmra.mrb[100].mxu1 %vm12696_vm10, %v20770_v18 }
 0xd6a   :  { %18361 = vmatprep.mubr.msk.bf16.mxu1 %vm20862_vm9, %v20861_v19 }
 0xd71   :  { %18362 = vmatmul.mubr.msk.bf16.gmra.mrb[104].mxu1 %vm12696_vm10, %v20771_v48 }
 0xd72   :  { %18373 = vmatprep.mubr.msk.bf16.mxu1 %vm20862_vm9, %v20861_v19 }
 0xd79   :  { %18374 = vmatmul.mubr.msk.bf16.vlgmr.msra.gmra.mrb[72].mxu1 %vm12696_vm10, %v20772_v0 }
 0xd7a   :  { %18377 = vmatprep.mubr.msk.bf16.mxu1 %vm20862_vm9, %v20861_v19  ;;  %18410 = vmatpush3.bf16.msra.mxu1 %v20781_v11 }
 0xd7b   :  { %18411 = vmatprep.subr.bf16.mxu1 %v20861_v19 }
 0xd7e   :  { %18412 = vmatpush3.bf16.msra.mxu1 %v20782_v4 }
 0xd7f   :  { %18413 = vmatprep.subr.bf16.mxu1 %v20861_v19 }
 0xd81   :  { %18378 = vmatmul.mubr.msk.bf16.gmra.mrb[76].mxu1 %vm12696_vm10, %v20773_v31  ;;  %v14837_v31 = vpop.permute.xlu1 %14836 }
 0xd82   :  { %18381 = vmatprep.mubr.msk.bf16.mxu1 %vm20862_vm9, %v20861_v19  ;;  %18414 = vmatpush3.bf16.msra.mxu1 %v20783_v15 }
 0xd83   :  { %18415 = vmatprep.subr.bf16.mxu1 %v20861_v19 }
 0xd86   :  { %18416 = vmatpush3.bf16.msra.mxu1 %v20784_v21 }
 0xd87   :  { %18417 = vmatprep.subr.bf16.mxu1 %v20861_v19 }
 0xd89   :  { %18382 = vmatmul.mubr.msk.bf16.gmra.mrb[80].mxu1 %vm12696_vm10, %v20774_v22  ;;  %v14842_v22 = vpop.permute.xlu0 %14841 }
 0xd8a   :  { %18385 = vmatprep.mubr.msk.bf16.mxu1 %vm20862_vm9, %v20861_v19  ;;  %18418 = vmatpush3.bf16.msra.mxu1 %v20785_v33 }
 0xd8b   :  { %18419 = vmatprep.subr.bf16.mxu1 %v20861_v19 }
 0xd8e   :  { %18420 = vmatpush3.bf16.msra.mxu1 %v20786_v60 }
 0xd8f   :  { %18421 = vmatprep.subr.bf16.mxu1 %v20861_v19 }
 0xd91   :  { %18386 = vmatmul.mubr.msk.bf16.gmra.mrb[84].mxu1 %vm12696_vm10, %v20775_v26 }
 0xd92   :  { %18389 = vmatprep.mubr.msk.bf16.mxu1 %vm20862_vm9, %v20861_v19  ;;  %18422 = vmatpush3.bf16.msra.mxu1 %v20787_v50 }
 0xd93   :  { %18423 = vmatprep.subr.bf16.mxu1 %v20861_v19 }
 0xd96   :  { %18424 = vmatpush3.bf16.msra.mxu1 %v20788_v13 }
 0xd97   :  { %15430 = vmatprep.subr.bf16.mxu1 %v20847_v3 }
 0xd99   :  { %18390 = vmatmul.mubr.msk.bf16.gmra.mrb[88].mxu1 %vm12696_vm10, %v20776_v57 }
 0xd9a   :  { %18393 = vmatprep.mubr.msk.bf16.mxu1 %vm20862_vm9, %v20861_v19 }
 0xda1   :  { %18394 = vmatmul.mubr.msk.bf16.gmra.mrb[92].mxu1 %vm12696_vm10, %v20777_v40 }
 0xda2   :  { %18397 = vmatprep.mubr.msk.bf16.mxu1 %vm20862_vm9, %v20861_v19 }
 0xda9   :  { %18398 = vmatmul.mubr.msk.bf16.gmra.mrb[96].mxu1 %vm12696_vm10, %v20778_v63 }
 0xdaa   :  { %18401 = vmatprep.mubr.msk.bf16.mxu1 %vm20862_vm9, %v20861_v19 }
 0xdb1   :  { %18402 = vmatmul.mubr.msk.bf16.gmra.mrb[100].mxu1 %vm12696_vm10, %v20779_v6 }
 0xdb2   :  { %18405 = vmatprep.mubr.msk.bf16.mxu1 %vm20862_vm9, %v20861_v19 }
 0xdb9   :  { %18406 = vmatmul.mubr.msk.bf16.gmra.mrb[104].mxu1 %vm12696_vm10, %v20780_v35  ;;  %v14728_v35 = vpop.permute.xlu1 %14727 }
 0xdba   :  { %18425 = vmatprep.mubr.msk.bf16.mxu1 %vm20862_vm9, %v20861_v19 }
 0xe4c   :  { %v14571_v16 = vpop.f32.mrb[72].mxu1 }
 0xe4d   :  { %v14760_v36 = vmul.f32 %v14678_v55, %v14571_v16  ;;  %v18375_v37 = vpop.f32.mrb[73].mxu1  ;;  %v14733_v55 = vpop.permute.xlu0 %14732 }
 0xe4e   :  { %v14574_v38 = vpop.f32.mrb[74].mxu1 }
 0xe4f   :  { %v14879_v34 = vadd.f32 %v14797_v23, %v14760_v36  ;;  %v14761_v43 = vmul.f32 %v14683_v58, %v14574_v38  ;;  %v18376_v30 = vpop.f32.mrb[75].mxu1 }
 0xe51   :  { %v14880_v46 = vadd.f32 %v14802_v51, %v14761_v43  ;;  %v14896_v42 = vmax.f32 %v14879_v34, 0.0  ;;  %v14852_v16 = vpop.permute.xlu0 %14851 }
 0xe53   :  { %v14897_v59 = vmax.f32 %v14880_v46, 0.0 }
 0xe54   :  { %v14579_v52 = vpop.f32.mrb[76].mxu1 }
 0xe55   :  { %v14913_v12 = vpack.c.bf16 %v14897_v59, %v14896_v42  ;;  %v14762_v61 = vmul.f32 %v14688_v17, %v14579_v52  ;;  %v18379_v1 = vpop.f32.mrb[77].mxu1 }
 0xe56   :  { %v14582_v32 = vpop.f32.mrb[78].mxu1 }
 0xe57   :  { %v14881_v53 = vadd.f32 %v14807_v39, %v14762_v61  ;;  %v14763_v49 = vmul.f32 %v14693_v24, %v14582_v32  ;;  %v18380_v2 = vpop.f32.mrb[79].mxu1  ;;  %18426 = vmatmul.mubr.bf16.vlgmr.msra.gmra.mrb[108].mxu1 %v14913_v12 }
 0xe58   :  { %18429 = vmatprep.mubr.msk.bf16.mxu1 %vm20862_vm9, %v20861_v19 }
 0xe59   :  { %v14882_v45 = vadd.f32 %v14812_v14, %v14763_v49  ;;  %v14898_v9 = vmax.f32 %v14881_v53, 0.0  ;;  %v14847_v14 = vpop.permute.xlu1 %14846 }
 0xe5b   :  { %v14899_v5 = vmax.f32 %v14882_v45, 0.0 }
 0xe5c   :  { %v14587_v7 = vpop.f32.mrb[80].mxu1 }
 0xe5d   :  { %v14764_v56 = vmul.f32 %v14698_v20, %v14587_v7  ;;  %v18383_v27 = vpop.f32.mrb[81].mxu1  ;;  %v14914_v10 = vpack.c.bf16 %v14899_v5, %v14898_v9  ;;  %v14738_v34 = vpop.permute.xlu1 %14737 }
 0xe5e   :  { %v14590_v18 = vpop.f32.mrb[82].mxu1 }
 0xe5f   :  { %v14883_v48 = vadd.f32 %v14817_v25, %v14764_v56  ;;  %v14765_v0 = vmul.f32 %v14703_v62, %v14590_v18  ;;  %v18384_v11 = vpop.f32.mrb[83].mxu1  ;;  %18430 = vmatmul.mubr.bf16.gmra.mrb[112].mxu1 %v14914_v10 }
 0xe60   :  { %18433 = vmatprep.mubr.msk.bf16.mxu1 %vm20862_vm9, %v20861_v19 }
 0xe61   :  { %v14884_v4 = vadd.f32 %v14822_v28, %v14765_v0  ;;  %v14900_v15 = vmax.f32 %v14883_v48, 0.0  ;;  %v14857_v1 = vpop.permute.xlu1 %14856 }
 0xe63   :  { %v14901_v21 = vmax.f32 %v14884_v4, 0.0 }
 0xe64   :  { %v14595_v33 = vpop.f32.mrb[84].mxu1 }
 0xe65   :  { %v14766_v60 = vmul.f32 %v14708_v29, %v14595_v33  ;;  %v18387_v26 = vpop.f32.mrb[85].mxu1  ;;  %v14915_v50 = vpack.c.bf16 %v14901_v21, %v14900_v15  ;;  %v14748_v56 = vpop.permute.xlu1 %14747 }
 0xe66   :  { %v14598_v57 = vpop.f32.mrb[86].mxu1 }
 0xe67   :  { %v14885_v40 = vadd.f32 %v14827_v44, %v14766_v60  ;;  %v14767_v63 = vmul.f32 %v14713_v8, %v14598_v57  ;;  %v18388_v6 = vpop.f32.mrb[87].mxu1  ;;  %18434 = vmatmul.mubr.bf16.gmra.mrb[116].mxu1 %v14915_v50  ;;  %v14743_v8 = vpop.permute.xlu0 %14742 }
 0xe68   :  { %18437 = vmatprep.mubr.msk.bf16.mxu1 %vm20862_vm9, %v20861_v19 }
 0xe69   :  { %v14886_v13 = vadd.f32 %v14832_v54, %v14767_v63  ;;  %v14902_v58 = vmax.f32 %v14885_v40, 0.0 }
 0xe6b   :  { %v14903_v23 = vmax.f32 %v14886_v13, 0.0  ;;  %v14862_v53 = vpop.permute.xlu0 %14861 }
 0xe6c   :  { %v14603_v51 = vpop.f32.mrb[88].mxu1 }
 0xe6d   :  { %v14768_v17 = vmul.f32 %v14718_v41, %v14603_v51  ;;  %v18391_v24 = vpop.f32.mrb[89].mxu1  ;;  %v14916_v39 = vpack.c.bf16 %v14903_v23, %v14902_v58 }
 0xe6e   :  { %v14606_v20 = vpop.f32.mrb[90].mxu1 }
 0xe6f   :  { %v14887_v62 = vadd.f32 %v14837_v31, %v14768_v17  ;;  %v14769_v25 = vmul.f32 %v14723_v47, %v14606_v20  ;;  %v18392_v28 = vpop.f32.mrb[91].mxu1  ;;  %18438 = vmatmul.mubr.bf16.gmra.mrb[120].mxu1 %v14916_v39  ;;  %v14753_v10 = vpop.permute.xlu0 %14752  ;;  %v20791_v39 = vld [vmem:[%s26555_s16 + $0x4] ss:$8 sps:$4 sm:$0xff]  }
 0xe70   :  { %18441 = vmatprep.mubr.msk.bf16.mxu1 %vm20862_vm9, %v20861_v19  ;;  %v14867_v31 = vpop.permute.xlu1 %14866  ;;  %17702 = vmatprep.mubr.msk.bf16.mxu0 %vm160_vm2, %v20791_v39 }
 0xe71   :  { %v14888_v36 = vadd.f32 %v14842_v22, %v14769_v25  ;;  %v14904_v37 = vmax.f32 %v14887_v62, 0.0 }
 0xe73   :  { %v14905_v38 = vmax.f32 %v14888_v36, 0.0  ;;  %v14872_v60 = vpop.permute.xlu0 %14871 }
 0xe74   :  { %v14611_v43 = vpop.f32.mrb[92].mxu1  ;;  %v14758_v40 = vpop.permute.xlu1 %14757 }
 0xe75   :  { %v14770_v30 = vmul.f32 %v14728_v35, %v14611_v43  ;;  %v18395_v29 = vpop.f32.mrb[93].mxu1  ;;  %v14917_v46 = vpack.c.bf16 %v14905_v38, %v14904_v37 }
 0xe76   :  { %v14614_v42 = vpop.f32.mrb[94].mxu1 }
 0xe77   :  { %v14889_v59 = vadd.f32 %v14847_v14, %v14770_v30  ;;  %v14771_v52 = vmul.f32 %v14733_v55, %v14614_v42  ;;  %v18396_v12 = vpop.f32.mrb[95].mxu1  ;;  %18442 = vmatmul.mubr.bf16.gmra.mrb[124].mxu1 %v14917_v46  ;;  %v14877_v55 = vpop.permute.xlu0 %14876 }
 0xe78   :  { %18445 = vmatprep.mubr.msk.bf16.mxu1 %vm20862_vm9, %v20861_v19 }
 0xe79   :  { %v14890_v61 = vadd.f32 %v14852_v16, %v14771_v52  ;;  %v14906_v44 = vmax.f32 %v14889_v59, 0.0 }
 0xe7b   :  { %v14907_v32 = vmax.f32 %v14890_v61, 0.0 }
 0xe7c   :  { %v14619_v49 = vpop.f32.mrb[96].mxu1 }
 0xe7d   :  { %v14772_v2 = vmul.f32 %v14738_v34, %v14619_v49  ;;  %v18399_v54 = vpop.f32.mrb[97].mxu1  ;;  %v14918_v45 = vpack.c.bf16 %v14907_v32, %v14906_v44 }
 0xe7e   :  { %v14622_v9 = vpop.f32.mrb[98].mxu1 }
 0xe7f   :  { %v14891_v5 = vadd.f32 %v14857_v1, %v14772_v2  ;;  %v14773_v41 = vmul.f32 %v14743_v8, %v14622_v9  ;;  %v18400_v7 = vpop.f32.mrb[99].mxu1  ;;  %18446 = vmatmul.mubr.bf16.gmra.mrb[128].mxu1 %v14918_v45 }
 0xe80   :  { %18449 = vmatprep.mubr.msk.bf16.mxu1 %vm20862_vm9, %v20861_v19 }
 0xe81   :  { %v14892_v27 = vadd.f32 %v14862_v53, %v14773_v41  ;;  %v14908_v47 = vmax.f32 %v14891_v5, 0.0 }
 0xe83   :  { %v14909_v18 = vmax.f32 %v14892_v27, 0.0 }
 0xe84   :  { %v14627_v48 = vpop.f32.mrb[100].mxu1 }
 0xe85   :  { %v14774_v0 = vmul.f32 %v14748_v56, %v14627_v48  ;;  %v18403_v11 = vpop.f32.mrb[101].mxu1  ;;  %v14919_v4 = vpack.c.bf16 %v14909_v18, %v14908_v47 }
 0xe86   :  { %v14630_v15 = vpop.f32.mrb[102].mxu1 }
 0xe87   :  { %v14893_v21 = vadd.f32 %v14867_v31, %v14774_v0  ;;  %v14775_v22 = vmul.f32 %v14753_v10, %v14630_v15  ;;  %v18404_v33 = vpop.f32.mrb[103].mxu1  ;;  %18450 = vmatmul.mubr.bf16.gmra.mrb[132].mxu1 %v14919_v4 }
 0xe88   :  { %18453 = vmatprep.mubr.msk.bf16.mxu1 %vm20862_vm9, %v20861_v19 }
 0xe89   :  { %v14894_v26 = vadd.f32 %v14872_v60, %v14775_v22  ;;  %v14910_v50 = vmax.f32 %v14893_v21, 0.0  ;;  %v20789_v60 = vld [vmem:[%s26555_s16] ss:$8 sps:$4 sm:$0xff]   ;;  %s20869_s16 = smov 122  }
 0xe8b   :  { %v14911_v57 = vmax.f32 %v14894_v26, 0.0  ;;  %v20792_v26 = vld [vmem:[%s26556_s18] ss:$16 sps:$4 sm:$0xff]  }
 0xe8c   :  { %v14635_v63 = vpop.f32.mrb[104].mxu1 }
 0xe8d   :  { %v14776_v6 = vmul.f32 %v14758_v40, %v14635_v63  ;;  %v18407_v35 = vpop.f32.mrb[105].mxu1  ;;  %v14920_v13 = vpack.c.bf16 %v14911_v57, %v14910_v50  ;;  %v20794_v50 = vld [vmem:[%s26556_s18 + $0x4] ss:$16 sps:$4 sm:$0xff]   ;;  %v20795_v57 = vld [vmem:[%s26556_s18 + $0x20] ss:$16 sps:$4 sm:$0xff]  }
 0xe8e   :  { %v14638_v58 = vpop.f32.mrb[106].mxu1  ;;  %v20797_v40 = vld [vmem:[%s26556_s18 + $0x24] ss:$16 sps:$4 sm:$0xff]   ;;  %v20798_v63 = vld [vmem:[%s26556_s18 + $0x40] ss:$16 sps:$4 sm:$0xff]   ;;  %v26170_v35 = vpop.permute.xlu1 %15105 }
 0xe8f   :  { %v14895_v23 = vadd.f32 %v14877_v55, %v14776_v6  ;;  %v18408_v51 = vpop.f32.mrb[107].mxu1  ;;  %18454 = vmatmul.mubr.bf16.gmra.mrb[136].mxu1 %v14920_v13  ;;  %v20800_v6 = vld [vmem:[%s26556_s18 + $0x44] ss:$16 sps:$4 sm:$0xff]   ;;  %v20803_v55 = vld [vmem:[%s26556_s18 + $0x60] ss:$16 sps:$4 sm:$0x7f]  }
 0xe90   :  { %18457 = vmatprep.mubr.msk.bf16.mxu1 %vm20862_vm9, %v20861_v19  ;;  %v20801_v13 = vld [vmem:[%s26556_s18 + $0x64] ss:$16 sps:$4 sm:$0x7f]   ;;  %v20806_v58 = vld [vmem:[%s26556_s18 + $0xc] ss:$16 sps:$4 sm:$0xff]  }
 0xe91   :  { %v14912_v17 = vmax.f32 %v14895_v23, 0.0  ;;  %v15270_v23 = vsel %vm15268_vm14, %v20803_v55, 0 }
 0xe93   :  { %v14921_v24 = vpack.c.bf16 %v14912_v17, %v14912_v17 }
 0xe97   :  { %18458 = vmatmul.mubr.bf16.gmra.mrb[140].mxu1 %v14921_v24 }
 0xf2a   :  { %v15020_v14 = vpop.f32.mrb[108].mxu1 }
 0xf2b   :  { %v18427_v20 = vpop.f32.mrb[109].mxu1 }
 0xf2c   :  { %v15023_v62 = vpop.f32.mrb[110].mxu1 }
 0xf2d   :  { %v26033_v25 = vpack.c.bf16 %v15023_v62, %v15020_v14  ;;  %v18428_v28 = vpop.f32.mrb[111].mxu1 }
 0xf2e   :  { %v16142_v28 = vld [vmem:[%s26557_s20 + $0x8] sm:$0x3] }
 0xf2f   :  { %15536 = vrot.lane.b32.xlu1 %v26033_v25, %s20849_s29  ;;  %15129 = vmatpush1.bf16.msra.mxu0 %v26033_v25 }
 0xf30   :  { %15130 = vmatprep.subr.bf16.mxu0 %v20847_v3 }
 0xf32   :  { %v15028_v16 = vpop.f32.mrb[112].mxu1 }
 0xf33   :  { %v18431_v36 = vpop.f32.mrb[113].mxu1 }
 0xf34   :  { %v15031_v37 = vpop.f32.mrb[114].mxu1 }
 0xf35   :  { %v26039_v38 = vpack.c.bf16 %v15031_v37, %v15028_v16  ;;  %v18432_v34 = vpop.f32.mrb[115].mxu1  ;;  %v16141_v16 = vld [vmem:[%s26557_s20] sm:$0xff] }
 0xf37   :  { %15538 = vrot.lane.b32.xlu0 %v26039_v38, %s20849_s29  ;;  %15131 = vmatpush1.bf16.msra.mxu0 %v26039_v38 }
 0xf38   :  { %15132 = vmatprep.subr.bf16.mxu0 %v20847_v3 }
 0xf3a   :  { %v15036_v43 = vpop.f32.mrb[116].mxu1 }
 0xf3b   :  { %v18435_v30 = vpop.f32.mrb[117].mxu1 }
 0xf3c   :  { %v15039_v29 = vpop.f32.mrb[118].mxu1 }
 0xf3d   :  { %v26045_v46 = vpack.c.bf16 %v15039_v29, %v15036_v43  ;;  %v18436_v8 = vpop.f32.mrb[119].mxu1 }
 0xf3f   :  { %15540 = vrot.lane.b32.xlu1 %v26045_v46, %s20849_s29  ;;  %15133 = vmatpush1.bf16.msra.mxu0 %v26045_v46 }
 0xf40   :  { %15134 = vmatprep.subr.bf16.mxu0 %v20847_v3 }
 0xf42   :  { %v15044_v42 = vpop.f32.mrb[120].mxu1 }
 0xf43   :  { %v18439_v59 = vpop.f32.mrb[121].mxu1 }
 0xf44   :  { %v15047_v52 = vpop.f32.mrb[122].mxu1 }
 0xf45   :  { %v26051_v12 = vpack.c.bf16 %v15047_v52, %v15044_v42  ;;  %v18440_v61 = vpop.f32.mrb[123].mxu1 }
 0xf47   :  { %15542 = vrot.lane.b32.xlu0 %v26051_v12, %s20849_s29  ;;  %15135 = vmatpush1.bf16.msra.mxu0 %v26051_v12 }
 0xf48   :  { %15136 = vmatprep.subr.bf16.mxu0 %v20847_v3 }
 0xf4a   :  { %v15052_v1 = vpop.f32.mrb[124].mxu1 }
 0xf4b   :  { %v18443_v44 = vpop.f32.mrb[125].mxu1 }
 0xf4c   :  { %v15055_v32 = vpop.f32.mrb[126].mxu1 }
 0xf4d   :  { %v26057_v53 = vpack.c.bf16 %v15055_v32, %v15052_v1  ;;  %v18444_v49 = vpop.f32.mrb[127].mxu1 }
 0xf4f   :  { %15544 = vrot.lane.b32.xlu1 %v26057_v53, %s20849_s29  ;;  %15137 = vmatpush1.bf16.msra.mxu0 %v26057_v53 }
 0xf50   :  { %15138 = vmatprep.subr.bf16.mxu0 %v20847_v3 }
 0xf52   :  { %v15060_v2 = vpop.f32.mrb[128].mxu1 }
 0xf53   :  { %v18447_v54 = vpop.f32.mrb[129].mxu1 }
 0xf54   :  { %v15063_v45 = vpop.f32.mrb[130].mxu1 }
 0xf55   :  { %v26063_v9 = vpack.c.bf16 %v15063_v45, %v15060_v2  ;;  %v18448_v5 = vpop.f32.mrb[131].mxu1 }
 0xf57   :  { %15546 = vrot.lane.b32.xlu0 %v26063_v9, %s20849_s29  ;;  %15139 = vmatpush1.bf16.msra.mxu0 %v26063_v9 }
 0xf58   :  { %15140 = vmatprep.subr.bf16.mxu0 %v20847_v3 }
 0xf5a   :  { %v15068_v41 = vpop.f32.mrb[132].mxu1 }
 0xf5b   :  { %v18451_v7 = vpop.f32.mrb[133].mxu1 }
 0xf5c   :  { %v15071_v56 = vpop.f32.mrb[134].mxu1 }
 0xf5d   :  { %v26069_v27 = vpack.c.bf16 %v15071_v56, %v15068_v41  ;;  %v18452_v10 = vpop.f32.mrb[135].mxu1 }
 0xf5f   :  { %15548 = vrot.lane.b32.xlu1 %v26069_v27, %s20849_s29  ;;  %15141 = vmatpush1.bf16.msra.mxu0 %v26069_v27 }
 0xf60   :  { %15142 = vmatprep.subr.bf16.mxu0 %v20847_v3 }
 0xf62   :  { %v15076_v47 = vpop.f32.mrb[136].mxu1 }
 0xf63   :  { %v18455_v18 = vpop.f32.mrb[137].mxu1 }
 0xf64   :  { %v15079_v48 = vpop.f32.mrb[138].mxu1 }
 0xf65   :  { %v26075_v0 = vpack.c.bf16 %v15079_v48, %v15076_v47  ;;  %v18456_v11 = vpop.f32.mrb[139].mxu1 }
 0xf66   :  { %v15111_v11 = vpop.permute.xlu0 %15110 }
 0xf67   :  { %15550 = vrot.lane.b32.xlu0 %v26075_v0, %s20849_s29  ;;  %15143 = vmatpush1.bf16.msra.mxu0 %v26075_v0 }
 0xf68   :  { %15144 = vmatprep.subr.bf16.mxu0 %v20847_v3 }
 0xf6a   :  { %v15084_v4 = vpop.f32.mrb[140].mxu1 }
 0xf6b   :  { %v26081_v31 = vpack.c.bf16 %v15084_v4, %v15084_v4  ;;  %15623 = vrot.lane.b32.xlu0 %v26033_v25, %s20868_s1  ;;  %v18459_v15 = vpop.f32.mrb[141].mxu1 }
 0xf6c   :  { %v15087_v21 = vpop.f32.mrb[142].mxu1 }
 0xf6d   :  { %15552 = vrot.lane.b32.xlu1 %v26081_v31, %s20849_s29  ;;  %v18460_v22 = vpop.f32.mrb[143].mxu1  ;;  %v26088_v33 = vsel %vm167_vm1, %v26081_v31, 0  ;;  %s20870_s29 = smov 121  }
 0xf6e   :  { %15145 = vmatpush1.bf16.msra.mxu0 %v26088_v33 }
 0xf6f   :  { %15627 = vrot.lane.b32.xlu0 %v26045_v46, %s20868_s1  ;;  %15281 = vmatprep.subr.bf16.mxu0 %v20794_v50 }
 0xf71   :  { %15625 = vrot.lane.b32.xlu1 %v26039_v38, %s20868_s1  ;;  %15161 = vmatmul.mubr.bf16.vlgmr.msra.gmra.mrb[76].mxu0 %v20789_v60 }
 0xf72   :  { %15313 = vmatprep.mubr.bf16.mxu0 %v20847_v3  ;;  %15282 = vmatpush1.bf16.msra.mxu0 %v20792_v26  ;;  %v20804_v26 = vld [vmem:[%s26556_s18 + $0x8] ss:$16 sps:$4 sm:$0xff]  }
 0xf73   :  { %15631 = vrot.lane.b32.xlu0 %v26057_v53, %s20868_s1  ;;  %15283 = vmatprep.subr.bf16.mxu0 %v20797_v40  ;;  %v20809_v40 = vld [vmem:[%s26556_s18 + $0x2c] ss:$16 sps:$4 sm:$0xff]  }
 0xf75   :  { %15629 = vrot.lane.b32.xlu1 %v26051_v12, %s20868_s1 }
 0xf76   :  { %15284 = vmatpush1.bf16.msra.mxu0 %v20795_v57 }
 0xf77   :  { %15635 = vrot.lane.b32.xlu0 %v26069_v27, %s20868_s1  ;;  %15285 = vmatprep.subr.bf16.mxu0 %v20800_v6 }
 0xf79   :  { %15633 = vrot.lane.b32.xlu1 %v26063_v9, %s20868_s1 }
 0xf7a   :  { %15286 = vmatpush1.bf16.msra.mxu0 %v20798_v63  ;;  %v20807_v63 = vld [vmem:[%s26556_s18 + $0x28] ss:$16 sps:$4 sm:$0xff]  }
 0xf7b   :  { %15639 = vrot.lane.b32.xlu0 %v26081_v31, %s20868_s1  ;;  %17719 = vmatprep.subr.msk.bf16.mxu0 %vm15268_vm14, %v20801_v13  ;;  %v20810_v13 = vld [vmem:[%s26556_s18 + $0x48] ss:$16 sps:$4 sm:$0xff]  }
 0xf7d   :  { %15637 = vrot.lane.b32.xlu1 %v26075_v0, %s20868_s1 }
 0xf7e   :  { %15288 = vmatpush1.bf16.msra.mxu0 %v15270_v23  ;;  %v20815_v23 = vld [vmem:[%s26556_s18 + $0x68] ss:$16 sps:$4 sm:$0x7f]  }
 0xf7f   :  { %15712 = vrot.lane.b32.xlu0 %v26039_v38, %s20869_s16  ;;  %15324 = vmatprep.subr.bf16.mxu0 %v20806_v58  ;;  %v20813_v58 = vld [vmem:[%s26556_s18 + $0x6c] ss:$16 sps:$4 sm:$0x7f]  }
 0xf81   :  { %15710 = vrot.lane.b32.xlu1 %v26033_v25, %s20869_s16 }
 0xf83   :  { %15716 = vrot.lane.b32.xlu0 %v26051_v12, %s20869_s16 }
 0xf85   :  { %15714 = vrot.lane.b32.xlu1 %v26045_v46, %s20869_s16 }
 0xf87   :  { %15720 = vrot.lane.b32.xlu0 %v26063_v9, %s20869_s16 }
 0xf89   :  { %15718 = vrot.lane.b32.xlu1 %v26057_v53, %s20869_s16 }
 0xf8b   :  { %15724 = vrot.lane.b32.xlu0 %v26075_v0, %s20869_s16 }
 0xf8d   :  { %15722 = vrot.lane.b32.xlu1 %v26069_v27, %s20869_s16 }
 0xf8f   :  { %15797 = vrot.lane.b32.xlu0 %v26033_v25, %s20870_s29 }
 0xf91   :  { %15726 = vrot.lane.b32.xlu1 %v26081_v31, %s20869_s16 }
 0xf93   :  { %15801 = vrot.lane.b32.xlu0 %v26045_v46, %s20870_s29 }
 0xf95   :  { %15799 = vrot.lane.b32.xlu1 %v26039_v38, %s20870_s29 }
 0xf97   :  { %15805 = vrot.lane.b32.xlu0 %v26057_v53, %s20870_s29 }
 0xf99   :  { %15803 = vrot.lane.b32.xlu1 %v26051_v12, %s20870_s29 }
 0xf9b   :  { %15809 = vrot.lane.b32.xlu0 %v26069_v27, %s20870_s29 }
 0xf9d   :  { %15807 = vrot.lane.b32.xlu1 %v26063_v9, %s20870_s29 }
 0xf9f   :  { %15813 = vrot.lane.b32.xlu0 %v26081_v31, %s20870_s29 }
 0xfa1   :  { %15811 = vrot.lane.b32.xlu1 %v26075_v0, %s20870_s29  ;;  %v26187_v51 = vpop.permute.xlu1 %15536 }
 0xfa3   :  { %15886 = vrot.lane.b32.xlu0 %v26039_v38, %s20865_s13 }
 0xfa5   :  { %15884 = vrot.lane.b32.xlu1 %v26033_v25, %s20865_s13 }
 0xfa7   :  { %15890 = vrot.lane.b32.xlu0 %v26051_v12, %s20865_s13 }
 0xfa9   :  { %15888 = vrot.lane.b32.xlu1 %v26045_v46, %s20865_s13 }
 0xfab   :  { %15894 = vrot.lane.b32.xlu0 %v26063_v9, %s20865_s13 }
 0xfad   :  { %15892 = vrot.lane.b32.xlu1 %v26057_v53, %s20865_s13 }
 0xfaf   :  { %15898 = vrot.lane.b32.xlu0 %v26075_v0, %s20865_s13 }
 0xfb1   :  { %15896 = vrot.lane.b32.xlu1 %v26069_v27, %s20865_s13  ;;  %v26193_v17 = vpop.permute.xlu1 %15540 }
 0xfb3   :  { %15971 = vrot.lane.b32.xlu0 %v26033_v25, %s20871_s7 }
 0xfb5   :  { %15900 = vrot.lane.b32.xlu1 %v26081_v31, %s20865_s13 }
 0xfb7   :  { %15975 = vrot.lane.b32.xlu0 %v26045_v46, %s20871_s7 }
 0xfb9   :  { %15973 = vrot.lane.b32.xlu1 %v26039_v38, %s20871_s7 }
 0xfbb   :  { %15979 = vrot.lane.b32.xlu0 %v26057_v53, %s20871_s7 }
 0xfbd   :  { %15977 = vrot.lane.b32.xlu1 %v26051_v12, %s20871_s7 }
 0xfbf   :  { %15983 = vrot.lane.b32.xlu0 %v26069_v27, %s20871_s7 }
 0xfc1   :  { %15981 = vrot.lane.b32.xlu1 %v26063_v9, %s20871_s7  ;;  %v26199_v24 = vpop.permute.xlu1 %15544 }
 0xfc3   :  { %15987 = vrot.lane.b32.xlu0 %v26081_v31, %s20871_s7 }
 0xfc5   :  { %15985 = vrot.lane.b32.xlu1 %v26075_v0, %s20871_s7 }
 0xfc7   :  { %16058 = vrot.lane.b32.xlu0 %v26033_v25, %s20872_s11 }
 0xfc9   :  { %15398 = vrot.lane.b32.xlu1 %v26033_v25, %s20848_s30 }
 0xfcb   :  { %16060 = vrot.lane.b32.xlu0 %v26039_v38, %s20872_s11 }
 0xfcd   :  { %15400 = vrot.lane.b32.xlu1 %v26039_v38, %s20848_s30 }
 0xfcf   :  { %16062 = vrot.lane.b32.xlu0 %v26045_v46, %s20872_s11 }
 0xfd1   :  { %15402 = vrot.lane.b32.xlu1 %v26045_v46, %s20848_s30  ;;  %v26205_v39 = vpop.permute.xlu1 %15548 }
 0xfd3   :  { %16064 = vrot.lane.b32.xlu0 %v26051_v12, %s20872_s11 }
 0xfd5   :  { %15404 = vrot.lane.b32.xlu1 %v26051_v12, %s20848_s30 }
 0xfd7   :  { %16066 = vrot.lane.b32.xlu0 %v26057_v53, %s20872_s11 }
 0xfd9   :  { %15406 = vrot.lane.b32.xlu1 %v26057_v53, %s20848_s30 }
 0xfdb   :  { %16068 = vrot.lane.b32.xlu0 %v26063_v9, %s20872_s11 }
 0xfdd   :  { %15408 = vrot.lane.b32.xlu1 %v26063_v9, %s20848_s30 }
 0xfdf   :  { %16070 = vrot.lane.b32.xlu0 %v26069_v27, %s20872_s11  ;;  %v26213_v14 = vpop.permute.xlu1 %15552 }
 0xfe1   :  { %15410 = vrot.lane.b32.xlu1 %v26069_v27, %s20848_s30 }
 0xfe3   :  { %16072 = vrot.lane.b32.xlu0 %v26075_v0, %s20872_s11  ;;  %v26219_v20 = vpop.permute.xlu1 %15625 }
 0xfe5   :  { %15412 = vrot.lane.b32.xlu1 %v26075_v0, %s20848_s30 }
 0xfe7   :  { %16074 = vrot.lane.b32.xlu0 %v26081_v31, %s20872_s11  ;;  %v26225_v62 = vpop.permute.xlu1 %15629 }
 0xfe9   :  { %15414 = vrot.lane.b32.xlu1 %v26081_v31, %s20848_s30 }
 0xfeb   :  { %16150 = vperm.xlu0 %19554, %v16142_v28   ;;  %v26235_v36 = vpop.permute.xlu1 %15633 }
 0xfed   :  { %16145 = vperm.xlu1 %19555, %v16141_v16   ;;  %v15276_v16 = vsel %vm15268_vm14, %v20815_v23, 0  ;;  %v20834_v23 = vld [vmem:[%s26558_s19 + $0x74] ss:$8 sps:$4 sm:$0x1f]  }
 0xfef   :  { %v26237_v37 = vpop.permute.xlu1 %15637 }
 0xff3   :  { %v26239_v34 = vpop.permute.xlu1 %15710 }
 0xff7   :  { %v26241_v43 = vpop.permute.xlu1 %15714 }
 0xffb   :  { %v26243_v30 = vpop.permute.xlu1 %15718 }
 0xfff   :  { %v26245_v29 = vpop.permute.xlu1 %15722 }
0x1003   :  { %v26247_v8 = vpop.permute.xlu1 %15726 }
0x1007   :  { %v26249_v42 = vpop.permute.xlu1 %15799 }
0x100b   :  { %v26251_v59 = vpop.permute.xlu1 %15803 }
0x100f   :  { %v26253_v52 = vpop.permute.xlu1 %15807 }
0x1013   :  { %v26255_v61 = vpop.permute.xlu1 %15811 }
0x1017   :  { %v26257_v1 = vpop.permute.xlu1 %15884 }
0x101b   :  { %v26259_v44 = vpop.permute.xlu1 %15888 }
0x101f   :  { %v26261_v32 = vpop.permute.xlu1 %15892 }
0x1023   :  { %v26263_v49 = vpop.permute.xlu1 %15896 }
0x1027   :  { %v26265_v2 = vpop.permute.xlu1 %15900 }
0x102b   :  { %v26267_v54 = vpop.permute.xlu1 %15973 }
0x102f   :  { %v26269_v45 = vpop.permute.xlu1 %15977 }
0x1033   :  { %v26271_v5 = vpop.permute.xlu1 %15981 }
0x1037   :  { %v26273_v41 = vpop.permute.xlu1 %15985 }
0x103b   :  { %v15399_v7 = vpop.permute.xlu1 %15398 }
0x103c   :  { %15431 = vmatpush1.bf16.msra.mxu1 %v15399_v7  ;;  %v20816_v7 = vld [vmem:[%s26558_s19 + $0x4] ss:$8 sps:$4 sm:$0x1f]  }
0x103d   :  { %15432 = vmatprep.subr.bf16.mxu1 %v20847_v3 }
0x103f   :  { %v15401_v56 = vpop.permute.xlu1 %15400 }
0x1040   :  { %15433 = vmatpush1.bf16.msra.mxu1 %v15401_v56 }
0x1041   :  { %15434 = vmatprep.subr.bf16.mxu1 %v20847_v3 }
0x1043   :  { %v15403_v10 = vpop.permute.xlu1 %15402 }
0x1044   :  { %v15162_v47 = vpop.f32.mrb[76].mxu0  ;;  %15435 = vmatpush1.bf16.msra.mxu1 %v15403_v10 }
0x1045   :  { %v15163_v18 = vadd.f32 %v15162_v47, %v26170_v35  ;;  %v15164_v48 = vpop.f32.mrb[77].mxu0  ;;  %15436 = vmatprep.subr.bf16.mxu1 %v20847_v3  ;;  %v20812_v35 = vld [vmem:[%s26556_s18 + $0x4c] ss:$16 sps:$4 sm:$0xff]  }
0x1046   :  { %v15165_v4 = vpop.f32.mrb[78].mxu0  ;;  %v20828_v48 = vld [vmem:[%s26558_s19 + $0x54] ss:$8 sps:$4 sm:$0x1f]  }
0x1047   :  { %v15166_v31 = vadd.f32 %v15165_v4, %v15111_v11  ;;  %v15405_v15 = vpop.permute.xlu1 %15404  ;;  %v15167_v21 = vpop.f32.mrb[79].mxu0  ;;  %v15169_v22 = vmax.f32 %v15163_v18, 0.0  ;;  %v20837_v11 = vld [vmem:[%s26558_s19 + $0x10] ss:$8 sps:$4 sm:$0x1f]  }
0x1048   :  { %15437 = vmatpush1.bf16.msra.mxu1 %v15405_v15  ;;  %v20839_v4 = vld [vmem:[%s26558_s19 + $0x14] ss:$8 sps:$4 sm:$0x1f]  }
0x1049   :  { %v15170_v60 = vmax.f32 %v15166_v31, 0.0  ;;  %15438 = vmatprep.subr.bf16.mxu1 %v20847_v3  ;;  %17727 = vmatprep.mubr.msk.bf16.mxu1 %vm160_vm2, %v20839_v4  ;;  %v20843_v31 = vld [vmem:[%s26559_s21] sm:$0xff]  }
0x104b   :  { %v15171_v50 = vpack.c.bf16 %v15170_v60, %v15169_v22  ;;  %v15407_v57 = vpop.permute.xlu1 %15406  ;;  %v20831_v60 = vld [vmem:[%s26558_s19 + $0x64] ss:$8 sps:$4 sm:$0x1f]  }
0x104c   :  { %15439 = vmatpush1.bf16.msra.mxu1 %v15407_v57 }
0x104d   :  { %17720 = vmatmul.mubr.msk.bf16.vlgmr.msra.gmra.mrb[80].mxu0 %vm15264_vm15, %v15171_v50  ;;  %15440 = vmatprep.subr.bf16.mxu1 %v20847_v3 }
0x104e   :  { %15325 = vmatpush1.bf16.msra.mxu0 %v20804_v26  ;;  %15356 = vmatprep.mubr.bf16.mxu0 %v20847_v3 }
0x104f   :  { %v15409_v6 = vpop.permute.xlu1 %15408  ;;  %15326 = vmatprep.subr.bf16.mxu0 %v20809_v40 }
0x1050   :  { %15441 = vmatpush1.bf16.msra.mxu1 %v15409_v6 }
0x1051   :  { %15442 = vmatprep.subr.bf16.mxu1 %v20847_v3 }
0x1052   :  { %15327 = vmatpush1.bf16.msra.mxu0 %v20807_v63 }
0x1053   :  { %v15411_v55 = vpop.permute.xlu1 %15410  ;;  %15328 = vmatprep.subr.bf16.mxu0 %v20812_v35 }
0x1054   :  { %15443 = vmatpush1.bf16.msra.mxu1 %v15411_v55 }
0x1055   :  { %15444 = vmatprep.subr.bf16.mxu1 %v20847_v3 }
0x1056   :  { %15329 = vmatpush1.bf16.msra.mxu0 %v20810_v13  ;;  %v15914_v13 = vsel %vm167_vm1, %v26265_v2, 0 }
0x1057   :  { %v15413_v28 = vpop.permute.xlu1 %15412  ;;  %17721 = vmatprep.subr.msk.bf16.mxu0 %vm15268_vm14, %v20813_v58  ;;  %v20833_v58 = vld [vmem:[%s26558_s19 + $0x60] ss:$8 sps:$4 sm:$0x1f]  }
0x1058   :  { %15445 = vmatpush1.bf16.msra.mxu1 %v15413_v28 }
0x1059   :  { %15446 = vmatprep.subr.bf16.mxu1 %v20847_v3 }
0x105a   :  { %15331 = vmatpush1.bf16.msra.mxu0 %v15276_v16 }
0x105b   :  { %v15415_v56 = vpop.permute.xlu1 %15414  ;;  %15483 = vmatprep.subr.bf16.mxu0 %v20847_v3 }
0x105c   :  { %v15428_v10 = vsel %vm167_vm1, %v15415_v56, 0 }
0x105d   :  { %17722 = vmatmul.mubr.msk.bf16.vlgmr.msra.gmra.mrb[84].mxu0 %vm15264_vm15, %v15171_v50  ;;  %15447 = vmatpush1.bf16.msra.mxu1 %v15428_v10 }
0x105e   :  { %15484 = vmatpush1.bf16.msra.mxu0 %v26033_v25  ;;  %17730 = vmatprep.mubr.msk.bf16.mxu0 %vm160_vm2, %v20816_v7  ;;  %v20818_v25 = vld [vmem:[%s26558_s19] ss:$8 sps:$4 sm:$0x1f]  }
0x105f   :  { %15485 = vmatprep.subr.bf16.mxu0 %v20847_v3  ;;  %18461 = vmatprep.subr.bf16.mxu1 %v20861_v19 }
0x1060   :  { %15463 = vmatmul.mubr.bf16.vlgmr.msra.gmra.mrb[144].mxu1 %v20837_v11 }
0x1061   :  { %18469 = vmatprep.mubr.msk.bf16.mxu1 %vm20862_vm9, %v20861_v19  ;;  %18462 = vmatpush3.bf16.msra.mxu1 %v20843_v31 }
0x1062   :  { %15486 = vmatpush1.bf16.msra.mxu0 %v26039_v38  ;;  %v20819_v38 = vld [vmem:[%s26558_s19 + $0x24] ss:$8 sps:$4 sm:$0x1f]   ;;  %18463 = vmatprep.subr.bf16.mxu1 %v20861_v19 }
0x1063   :  { %15487 = vmatprep.subr.bf16.mxu0 %v20847_v3 }
0x1066   :  { %15488 = vmatpush1.bf16.msra.mxu0 %v26045_v46  ;;  %v15539_v46 = vpop.permute.xlu0 %15538 }
0x1067   :  { %15489 = vmatprep.subr.bf16.mxu0 %v20847_v3 }
0x106a   :  { %15490 = vmatpush1.bf16.msra.mxu0 %v26051_v12  ;;  %v15543_v12 = vpop.permute.xlu0 %15542 }
0x106b   :  { %15491 = vmatprep.subr.bf16.mxu0 %v20847_v3 }
0x106e   :  { %15492 = vmatpush1.bf16.msra.mxu0 %v26057_v53  ;;  %v15547_v53 = vpop.permute.xlu0 %15546 }
0x106f   :  { %15493 = vmatprep.subr.bf16.mxu0 %v20847_v3 }
0x1072   :  { %15494 = vmatpush1.bf16.msra.mxu0 %v26063_v9  ;;  %v15551_v9 = vpop.permute.xlu0 %15550 }
0x1073   :  { %15495 = vmatprep.subr.bf16.mxu0 %v20847_v3 }
0x1076   :  { %15496 = vmatpush1.bf16.msra.mxu0 %v26069_v27  ;;  %v15566_v27 = vsel %vm167_vm1, %v26213_v14, 0 }
0x1077   :  { %15497 = vmatprep.subr.bf16.mxu0 %v20847_v3 }
0x107a   :  { %15498 = vmatpush1.bf16.msra.mxu0 %v26075_v0  ;;  %v20821_v0 = vld [vmem:[%s26558_s19 + $0x20] ss:$8 sps:$4 sm:$0x1f]  }
0x107b   :  { %15499 = vmatprep.subr.bf16.mxu0 %v20847_v3 }
0x107e   :  { %15500 = vmatpush1.bf16.msra.mxu0 %v26088_v33  ;;  %v20822_v33 = vld [vmem:[%s26558_s19 + $0x34] ss:$8 sps:$4 sm:$0x1f]  }
0x107f   :  { %15568 = vmatprep.subr.bf16.mxu0 %v20847_v3 }
0x1081   :  { %15516 = vmatmul.mubr.bf16.vlgmr.msra.gmra.mrb[88].mxu0 %v20818_v25  ;;  %v20836_v25 = vld [vmem:[%s26558_s19 + $0x70] ss:$8 sps:$4 sm:$0x1f]  }
0x1082   :  { %15569 = vmatpush1.bf16.msra.mxu0 %v26187_v51  ;;  %17735 = vmatprep.mubr.msk.bf16.mxu0 %vm160_vm2, %v20819_v38  ;;  %v15624_v51 = vpop.permute.xlu0 %15623 }
0x1083   :  { %15570 = vmatprep.subr.bf16.mxu0 %v20847_v3 }
0x1086   :  { %15571 = vmatpush1.bf16.msra.mxu0 %v15539_v46 }
0x1087   :  { %15572 = vmatprep.subr.bf16.mxu0 %v20847_v3 }
0x108a   :  { %15573 = vmatpush1.bf16.msra.mxu0 %v26193_v17  ;;  %v15628_v17 = vpop.permute.xlu0 %15627 }
0x108b   :  { %15574 = vmatprep.subr.bf16.mxu0 %v20847_v3 }
0x108e   :  { %15575 = vmatpush1.bf16.msra.mxu0 %v15543_v12 }
0x108f   :  { %15576 = vmatprep.subr.bf16.mxu0 %v20847_v3 }
0x1092   :  { %15577 = vmatpush1.bf16.msra.mxu0 %v26199_v24  ;;  %v15632_v24 = vpop.permute.xlu0 %15631 }
0x1093   :  { %15578 = vmatprep.subr.bf16.mxu0 %v20847_v3 }
0x1096   :  { %15579 = vmatpush1.bf16.msra.mxu0 %v15547_v53 }
0x1097   :  { %15580 = vmatprep.subr.bf16.mxu0 %v20847_v3 }
0x109a   :  { %15581 = vmatpush1.bf16.msra.mxu0 %v26205_v39  ;;  %v15636_v39 = vpop.permute.xlu0 %15635 }
0x109b   :  { %15582 = vmatprep.subr.bf16.mxu0 %v20847_v3 }
0x109e   :  { %15583 = vmatpush1.bf16.msra.mxu0 %v15551_v9  ;;  %v15640_v14 = vpop.permute.xlu0 %15639 }
0x109f   :  { %15584 = vmatprep.subr.bf16.mxu0 %v20847_v3 }
0x10a2   :  { %15585 = vmatpush1.bf16.msra.mxu0 %v15566_v27 }
0x10a3   :  { %15655 = vmatprep.subr.bf16.mxu0 %v20847_v3 }
0x10a5   :  { %15601 = vmatmul.mubr.bf16.vlgmr.msra.gmra.mrb[88].mxu0 %v20821_v0  ;;  %v20842_v0 = vld [vmem:[%s26558_s19 + $0x80] ss:$8 sps:$4 sm:$0x1f]  }
0x10a6   :  { %15656 = vmatpush1.bf16.msra.mxu0 %v15624_v51  ;;  %17740 = vmatprep.mubr.msk.bf16.mxu0 %vm160_vm2, %v20822_v33  ;;  %v20845_v51 = vld [vmem:[%s26559_s21 + $0x10] sm:$0xff]  }
0x10a7   :  { %15657 = vmatprep.subr.bf16.mxu0 %v20847_v3 }
0x10aa   :  { %15658 = vmatpush1.bf16.msra.mxu0 %v26219_v20  ;;  %v15653_v20 = vsel %vm167_vm1, %v15640_v14, 0 }
0x10ab   :  { %15659 = vmatprep.subr.bf16.mxu0 %v20847_v3 }
0x10ae   :  { %15660 = vmatpush1.bf16.msra.mxu0 %v15628_v17 }
0x10af   :  { %15661 = vmatprep.subr.bf16.mxu0 %v20847_v3 }
0x10b2   :  { %15662 = vmatpush1.bf16.msra.mxu0 %v26225_v62  ;;  %v20824_v62 = vld [vmem:[%s26558_s19 + $0x30] ss:$8 sps:$4 sm:$0x1f]  }
0x10b3   :  { %15663 = vmatprep.subr.bf16.mxu0 %v20847_v3 }
0x10b6   :  { %15664 = vmatpush1.bf16.msra.mxu0 %v15632_v24 }
0x10b7   :  { %15665 = vmatprep.subr.bf16.mxu0 %v20847_v3 }
0x10ba   :  { %15666 = vmatpush1.bf16.msra.mxu0 %v26235_v36  ;;  %v20825_v36 = vld [vmem:[%s26558_s19 + $0x44] ss:$8 sps:$4 sm:$0x1f]  }
0x10bb   :  { %15667 = vmatprep.subr.bf16.mxu0 %v20847_v3 }
0x10be   :  { %15668 = vmatpush1.bf16.msra.mxu0 %v15636_v39 }
0x10bf   :  { %15669 = vmatprep.subr.bf16.mxu0 %v20847_v3 }
0x10c2   :  { %15670 = vmatpush1.bf16.msra.mxu0 %v26237_v37  ;;  %v15713_v37 = vpop.permute.xlu0 %15712 }
0x10c3   :  { %15671 = vmatprep.subr.bf16.mxu0 %v20847_v3 }
0x10c6   :  { %15672 = vmatpush1.bf16.msra.mxu0 %v15653_v20  ;;  %v15717_v47 = vpop.permute.xlu0 %15716 }
0x10c7   :  { %15742 = vmatprep.subr.bf16.mxu0 %v20847_v3 }
0x10c9   :  { %15688 = vmatmul.mubr.bf16.vlgmr.msra.gmra.mrb[88].mxu0 %v20824_v62 }
0x10ca   :  { %15743 = vmatpush1.bf16.msra.mxu0 %v26239_v34  ;;  %17745 = vmatprep.mubr.msk.bf16.mxu0 %vm160_vm2, %v20825_v36  ;;  %v15721_v34 = vpop.permute.xlu0 %15720 }
0x10cb   :  { %15744 = vmatprep.subr.bf16.mxu0 %v20847_v3 }
0x10ce   :  { %15745 = vmatpush1.bf16.msra.mxu0 %v15713_v37  ;;  %v15725_v18 = vpop.permute.xlu0 %15724 }
0x10cf   :  { %15746 = vmatprep.subr.bf16.mxu0 %v20847_v3 }
0x10d2   :  { %15747 = vmatpush1.bf16.msra.mxu0 %v26241_v43  ;;  %v15740_v43 = vsel %vm167_vm1, %v26247_v8, 0 }
0x10d3   :  { %15748 = vmatprep.subr.bf16.mxu0 %v20847_v3 }
0x10d6   :  { %15749 = vmatpush1.bf16.msra.mxu0 %v15717_v47 }
0x10d7   :  { %15750 = vmatprep.subr.bf16.mxu0 %v20847_v3 }
0x10da   :  { %15751 = vmatpush1.bf16.msra.mxu0 %v26243_v30  ;;  %v20827_v30 = vld [vmem:[%s26558_s19 + $0x40] ss:$8 sps:$4 sm:$0x1f]  }
0x10db   :  { %15752 = vmatprep.subr.bf16.mxu0 %v20847_v3 }
0x10de   :  { %15753 = vmatpush1.bf16.msra.mxu0 %v15721_v34 }
0x10df   :  { %15754 = vmatprep.subr.bf16.mxu0 %v20847_v3 }
0x10e2   :  { %15755 = vmatpush1.bf16.msra.mxu0 %v26245_v29  ;;  %v15798_v29 = vpop.permute.xlu0 %15797 }
0x10e3   :  { %15756 = vmatprep.subr.bf16.mxu0 %v20847_v3 }
0x10e6   :  { %15757 = vmatpush1.bf16.msra.mxu0 %v15725_v18  ;;  %v15802_v8 = vpop.permute.xlu0 %15801 }
0x10e7   :  { %15758 = vmatprep.subr.bf16.mxu0 %v20847_v3 }
0x10ea   :  { %15759 = vmatpush1.bf16.msra.mxu0 %v15740_v43  ;;  %v16146_v43 = vpop.permute.xlu1 %16145 }
0x10eb   :  { %15829 = vmatprep.subr.bf16.mxu0 %v20847_v3 }
0x10ed   :  { %15775 = vmatmul.mubr.bf16.vlgmr.msra.gmra.mrb[88].mxu0 %v20827_v30 }
0x10ee   :  { %15830 = vmatpush1.bf16.msra.mxu0 %v15798_v29  ;;  %17750 = vmatprep.mubr.msk.bf16.mxu0 %vm160_vm2, %v20828_v48 }
0x10ef   :  { %15831 = vmatprep.subr.bf16.mxu0 %v20847_v3 }
0x10f2   :  { %15832 = vmatpush1.bf16.msra.mxu0 %v26249_v42  ;;  %v15806_v42 = vpop.permute.xlu0 %15805 }
0x10f3   :  { %15833 = vmatprep.subr.bf16.mxu0 %v20847_v3 }
0x10f6   :  { %15834 = vmatpush1.bf16.msra.mxu0 %v15802_v8  ;;  %v15810_v15 = vpop.permute.xlu0 %15809 }
0x10f7   :  { %15835 = vmatprep.subr.bf16.mxu0 %v20847_v3 }
0x10fa   :  { %15836 = vmatpush1.bf16.msra.mxu0 %v26251_v59  ;;  %v20844_v59 = vld [vmem:[%s26559_s21 + $0x8] sm:$0xff]   ;;  %v15814_v21 = vpop.permute.xlu0 %15813 }
0x10fb   :  { %15837 = vmatprep.subr.bf16.mxu0 %v20847_v3  ;;  %18464 = vmatpush3.bf16.msra.mxu1 %v20844_v59  ;;  %v15827_v22 = vsel %vm167_vm1, %v15814_v21, 0 }
0x10fc   :  { %18465 = vmatprep.subr.bf16.mxu1 %v20861_v19 }
0x10fe   :  { %15838 = vmatpush1.bf16.msra.mxu0 %v15806_v42  ;;  %v15887_v26 = vpop.permute.xlu0 %15886 }
0x10ff   :  { %15839 = vmatprep.subr.bf16.mxu0 %v20847_v3  ;;  %18466 = vmatpush3.bf16.msra.mxu1 %v20845_v51 }
0x1100   :  { %18467 = vmatprep.subr.bf16.mxu1 %v20861_v19 }
0x1102   :  { %15840 = vmatpush1.bf16.msra.mxu0 %v26253_v52  ;;  %v20830_v52 = vld [vmem:[%s26558_s19 + $0x50] ss:$8 sps:$4 sm:$0x1f]  }
0x1103   :  { %15841 = vmatprep.subr.bf16.mxu0 %v20847_v3 }
0x1106   :  { %15842 = vmatpush1.bf16.msra.mxu0 %v15810_v15 }
0x1107   :  { %15843 = vmatprep.subr.bf16.mxu0 %v20847_v3 }
0x110a   :  { %15844 = vmatpush1.bf16.msra.mxu0 %v26255_v61  ;;  %v15891_v61 = vpop.permute.xlu0 %15890 }
0x110b   :  { %15845 = vmatprep.subr.bf16.mxu0 %v20847_v3 }
0x110e   :  { %15846 = vmatpush1.bf16.msra.mxu0 %v15827_v22  ;;  %v15895_v50 = vpop.permute.xlu0 %15894 }
0x110f   :  { %15916 = vmatprep.subr.bf16.mxu0 %v20847_v3 }
0x1111   :  { %15862 = vmatmul.mubr.bf16.vlgmr.msra.gmra.mrb[88].mxu0 %v20830_v52 }
0x1112   :  { %15917 = vmatpush1.bf16.msra.mxu0 %v26257_v1  ;;  %17755 = vmatprep.mubr.msk.bf16.mxu0 %vm160_vm2, %v20831_v60  ;;  %v15899_v40 = vpop.permute.xlu0 %15898 }
0x1113   :  { %15918 = vmatprep.subr.bf16.mxu0 %v20847_v3 }
0x1116   :  { %15919 = vmatpush1.bf16.msra.mxu0 %v15887_v26  ;;  %v15972_v6 = vpop.permute.xlu0 %15971 }
0x1117   :  { %15920 = vmatprep.subr.bf16.mxu0 %v20847_v3 }
0x111a   :  { %15921 = vmatpush1.bf16.msra.mxu0 %v26259_v44 }
0x111b   :  { %15922 = vmatprep.subr.bf16.mxu0 %v20847_v3 }
0x111e   :  { %15923 = vmatpush1.bf16.msra.mxu0 %v15891_v61 }
0x111f   :  { %15924 = vmatprep.subr.bf16.mxu0 %v20847_v3 }
0x1120   :  { %v15315_v57 = vpop.f32.mrb[80].mxu0 }
0x1121   :  { %15367 = vst [vmem:[%s26560_s23] sm:$0xff] %v15315_v57  ;;  %v15317_v1 = vpop.f32.mrb[81].mxu0 }
0x1122   :  { %15368 = vst [vmem:[%s26560_s23 + $0x8] sm:$0xff] %v15317_v1  ;;  %15925 = vmatpush1.bf16.msra.mxu0 %v26261_v32  ;;  %v15319_v44 = vpop.f32.mrb[82].mxu0  ;;  %v15976_v32 = vpop.permute.xlu0 %15975 }
0x1123   :  { %15371 = vst [vmem:[%s26560_s23 + $0x20] sm:$0xff] %v15319_v44  ;;  %v15321_v63 = vpop.f32.mrb[83].mxu0  ;;  %15926 = vmatprep.subr.bf16.mxu0 %v20847_v3 }
0x1124   :  { %15372 = vst [vmem:[%s26560_s23 + $0x28] sm:$0xff] %v15321_v63 }
0x1126   :  { %15927 = vmatpush1.bf16.msra.mxu0 %v15895_v50  ;;  %v15980_v28 = vpop.permute.xlu0 %15979 }
0x1127   :  { %15928 = vmatprep.subr.bf16.mxu0 %v20847_v3 }
0x112a   :  { %15929 = vmatpush1.bf16.msra.mxu0 %v26263_v49  ;;  %v15984_v16 = vpop.permute.xlu0 %15983 }
0x112b   :  { %15930 = vmatprep.subr.bf16.mxu0 %v20847_v3 }
0x112e   :  { %15931 = vmatpush1.bf16.msra.mxu0 %v15899_v40  ;;  %v15988_v7 = vpop.permute.xlu0 %15987 }
0x112f   :  { %15932 = vmatprep.subr.bf16.mxu0 %v20847_v3 }
0x1130   :  { %v15358_v35 = vpop.f32.mrb[84].mxu0 }
0x1131   :  { %15369 = vst [vmem:[%s26560_s23 + $0x10] sm:$0xff] %v15358_v35  ;;  %v15360_v55 = vpop.f32.mrb[85].mxu0 }
0x1132   :  { %15370 = vst [vmem:[%s26560_s23 + $0x18] sm:$0xff] %v15360_v55  ;;  %v15362_v49 = vpop.f32.mrb[86].mxu0  ;;  %15933 = vmatpush1.bf16.msra.mxu0 %v15914_v13  ;;  %v16059_v56 = vpop.permute.xlu0 %16058 }
0x1133   :  { %15373 = vst [vmem:[%s26560_s23 + $0x30] sm:$0xff] %v15362_v49  ;;  %v15364_v2 = vpop.f32.mrb[87].mxu0  ;;  %16003 = vmatprep.subr.bf16.mxu0 %v20847_v3  ;;  %v15464_v33 = vpop.f32.mrb[144].mxu1 }
0x1134   :  { %15374 = vst [vmem:[%s26560_s23 + $0x38] sm:$0xff] %v15364_v2  ;;  %v15466_v17 = vpop.f32.mrb[145].mxu1 }
0x1135   :  { %15949 = vmatmul.mubr.bf16.vlgmr.msra.gmra.mrb[88].mxu0 %v20833_v58  ;;  %v15467_v24 = vpop.f32.mrb[146].mxu1 }
0x1136   :  { %16004 = vmatpush1.bf16.msra.mxu0 %v15972_v6  ;;  %17760 = vmatprep.mubr.msk.bf16.mxu0 %vm160_vm2, %v20834_v23  ;;  %v16061_v10 = vpop.permute.xlu0 %16060  ;;  %v15469_v39 = vpop.f32.mrb[147].mxu1 }
0x1137   :  { %16005 = vmatprep.subr.bf16.mxu0 %v20847_v3 }
0x113a   :  { %16006 = vmatpush1.bf16.msra.mxu0 %v26267_v54  ;;  %v16063_v54 = vpop.permute.xlu0 %16062 }
0x113b   :  { %16007 = vmatprep.subr.bf16.mxu0 %v20847_v3 }
0x113e   :  { %16008 = vmatpush1.bf16.msra.mxu0 %v15976_v32  ;;  %v16065_v38 = vpop.permute.xlu0 %16064 }
0x113f   :  { %16009 = vmatprep.subr.bf16.mxu0 %v20847_v3 }
0x1142   :  { %16010 = vmatpush1.bf16.msra.mxu0 %v26269_v45  ;;  %v16001_v45 = vsel %vm167_vm1, %v15988_v7, 0 }
0x1143   :  { %16011 = vmatprep.subr.bf16.mxu0 %v20847_v3 }
0x1146   :  { %16012 = vmatpush1.bf16.msra.mxu0 %v15980_v28 }
0x1147   :  { %16013 = vmatprep.subr.bf16.mxu0 %v20847_v3 }
0x114a   :  { %16014 = vmatpush1.bf16.msra.mxu0 %v26271_v5  ;;  %v20840_v5 = vld [vmem:[%s26558_s19 + $0x84] ss:$8 sps:$4 sm:$0x1f]  }
0x114b   :  { %16015 = vmatprep.subr.bf16.mxu0 %v20847_v3 }
0x114e   :  { %16016 = vmatpush1.bf16.msra.mxu0 %v15984_v16 }
0x114f   :  { %16017 = vmatprep.subr.bf16.mxu0 %v20847_v3 }
0x1152   :  { %16018 = vmatpush1.bf16.msra.mxu0 %v26273_v41  ;;  %v16067_v41 = vpop.permute.xlu0 %16066 }
0x1153   :  { %16019 = vmatprep.subr.bf16.mxu0 %v20847_v3 }
0x1156   :  { %16020 = vmatpush1.bf16.msra.mxu0 %v16001_v45  ;;  %v16069_v46 = vpop.permute.xlu0 %16068 }
0x1157   :  { %16090 = vmatprep.subr.bf16.mxu0 %v20847_v3 }
0x1159   :  { %16036 = vmatmul.mubr.bf16.vlgmr.msra.gmra.mrb[88].mxu0 %v20836_v25 }
0x115a   :  { %16091 = vmatpush1.bf16.msra.mxu0 %v16059_v56  ;;  %17765 = vmatprep.mubr.msk.bf16.mxu0 %vm160_vm2, %v20840_v5  ;;  %v16071_v12 = vpop.permute.xlu0 %16070  ;;  %vm16174_vm2 = vcmask 408576  }
0x115b   :  { %16092 = vmatprep.subr.bf16.mxu0 %v20847_v3 }
0x115e   :  { %16093 = vmatpush1.bf16.msra.mxu0 %v16061_v10  ;;  %v16073_v53 = vpop.permute.xlu0 %16072 }
0x115f   :  { %16094 = vmatprep.subr.bf16.mxu0 %v20847_v3 }
0x1162   :  { %16095 = vmatpush1.bf16.msra.mxu0 %v16063_v54  ;;  %v16075_v9 = vpop.permute.xlu0 %16074 }
0x1163   :  { %16096 = vmatprep.subr.bf16.mxu0 %v20847_v3  ;;  %v16088_v27 = vsel %vm167_vm1, %v16075_v9, 0  ;;  %vm16178_vm1 = vcmask 1040384  }
0x1166   :  { %16097 = vmatpush1.bf16.msra.mxu0 %v16065_v38  ;;  %v16151_v29 = vpop.permute.xlu0 %16150 }
0x1167   :  { %16098 = vmatprep.subr.bf16.mxu0 %v20847_v3 }
0x116a   :  { %16099 = vmatpush1.bf16.msra.mxu0 %v16067_v41 }
0x116b   :  { %16100 = vmatprep.subr.bf16.mxu0 %v20847_v3 }
0x116e   :  { %16101 = vmatpush1.bf16.msra.mxu0 %v16069_v46 }
0x116f   :  { %16102 = vmatprep.subr.bf16.mxu0 %v20847_v3 }
0x1172   :  { %16103 = vmatpush1.bf16.msra.mxu0 %v16071_v12 }
0x1173   :  { %16104 = vmatprep.subr.bf16.mxu0 %v20847_v3 }
0x1176   :  { %16105 = vmatpush1.bf16.msra.mxu0 %v16073_v53 }
0x1177   :  { %16106 = vmatprep.subr.bf16.mxu0 %v20847_v3  ;;  %v20846_v3 = vld [vmem:[%s26559_s21 + $0x18] ss:$0 sps:$4 sm:$0x11]  }
0x1178   :  { %v16180_v14 = vsel %vm16178_vm1, %v20846_v3, 0 }
0x1179   :  { %18468 = vmatpush3.bf16.msra.mxu1 %v16180_v14 }
0x117a   :  { %16107 = vmatpush1.bf16.msra.mxu0 %v16088_v27 }
0x117d   :  { %16123 = vmatmul.mubr.bf16.vlgmr.msra.gmra.mrb[88].mxu0 %v20842_v0 }
0x1250   :  { %v16124_v20 = vpop.f32.mrb[88].mxu0 }
0x1251   :  { %v18473_v62 = vadd.f32 %v16124_v20, %v15464_v33  ;;  %v16126_v36 = vpop.f32.mrb[89].mxu0 }
0x1252   :  { %v16127_v37 = vpop.f32.mrb[90].mxu0 }
0x1253   :  { %v18474_v47 = vadd.f32 %v16127_v37, %v15467_v24  ;;  %v16129_v34 = vpop.f32.mrb[91].mxu0 }
0x1255   :  { %v16133_v18 = vpack.c.bf16 %v18474_v47, %v18473_v62 }
0x1257   :  { %18470 = vmatmul.mubr.msk.bf16.vlgmr.msra.gmra.mrb[148].mxu1 %vm16174_vm2, %v16133_v18 }
0x132a   :  { %v16216_v30 = vpop.f32.mrb[148].mxu1 }
0x132b   :  { %v16217_v19 = vadd.f32 %v16216_v30, %v16146_v43  ;;  %v18471_v48 = vpop.f32.mrb[149].mxu1 }
0x132c   :  { %v16219_v8 = vpop.f32.mrb[150].mxu1 }
0x132d   :  { %16224 = vst.msk [vmem:[%s26561_s24] sm:$0xff] %vm16223_vm4, %v16217_v19  ;;  %v16220_v11 = vadd.f32 %v16219_v8, %v16151_v29  ;;  %v18472_v4 = vpop.f32.mrb[151].mxu1 }
0x132f   :  { %16226 = vst.msk [vmem:[%s26561_s24 + $0x8] sm:$0x3] %vm16225_vm5, %v16220_v11 }

</bundles_post_ra>
